<compile_context>
chip_gen: v7x
topology: tpu7x:2x2x1
jax: 0.10.0
libtpu: 0.0.40
codegen_flags: <defaults>
</compile_context>

<pallas_src>
import functools

import numpy as np
import jax
import jax.numpy as jnp
from jax.experimental import pallas as pl
from jax.experimental.pallas import tpu as pltpu


# -----------------------------------------------------------------------------
# Pallas kernel: one block of `wblk` windows per grid step.
# -----------------------------------------------------------------------------
def wmsa_kernel(x_ref, flags_ref, wqkv_ref, bqkv_ref, relb_ref, maskrc_ref,
                wout_ref, bout_ref, out_ref, *,
                n_heads, head_dim, n_tok, wblk, masked):
    C = n_heads * head_dim
    R = wblk * n_tok
    cout = out_ref.shape[-1]

    # ---- fused QKV projection over every token in the block (one MXU pass) --
    x = x_ref[...]                                              # bf16 [R, C]
    qkv = jnp.dot(x, wqkv_ref[...], preferred_element_type=jnp.float32)
    qkv = (qkv + bqkv_ref[...]).astype(jnp.bfloat16)            # ONE cast [R, 3C]

    # ---- shifted-window mask rebuilt in-kernel from resident ingredients ----
    # flags are VMEM-resident for the whole array; slice this block's rows.
    if masked:
        start = pl.multiple_of(pl.program_id(0) * wblk, wblk)
        f = flags_ref[pl.ds(start, wblk)]                       # [wblk, 1, 2]
        mrc = maskrc_ref[...]                                   # [2, NP, NP], pre-scaled by -1e9
        # NOTE: windows that are both last-row and last-col get -2e9 on the
        # overlapping entries; still ~0 after softmax, do not "fix".
        mask_bias = (f[:, :, 0:1] * mrc[0][None]
                     + f[:, :, 1:2] * mrc[1][None])             # f32 [wblk, NP, NP]

    # ---- attention: static unroll over heads, each batched over wblk windows
    # TODO(synk): replace with a single two-batch-dim einsum
    # ('bqhd,bkhd->bhqk' / 'bhqk,bkhd->bqhd') once multi-batch dot_general
    # lowering is verified on this Mosaic version; the per-head loop below uses
    # only single-batch einsums, which are known to lower.
    y = jnp.zeros((R, cout), jnp.float32)
    for h in range(n_heads):
        lo = h * head_dim
        qh = qkv[:, lo:lo + head_dim].reshape(wblk, n_tok, head_dim)
        kh = qkv[:, C + lo:C + lo + head_dim].reshape(wblk, n_tok, head_dim)
        vh = qkv[:, 2 * C + lo:2 * C + lo + head_dim].reshape(wblk, n_tok, head_dim)

        # scale already folded into the Q columns of Wqkv/bqkv in the wrapper
        sim = jnp.einsum('bqd,bkd->bqk', qh, kh,
                         preferred_element_type=jnp.float32)    # f32 [wblk, NP, NP]
        sim = sim + relb_ref[h]                                 # rel-pos bias (resident)
        if masked:
            sim = sim + mask_bias

        # softmax kept in f32; reciprocal rides the EUP slot
        m = jnp.max(sim, axis=-1, keepdims=True)
        e = jnp.exp(sim - m)
        denom = jnp.sum(e, axis=-1, keepdims=True)
        probs = (e * pl.reciprocal(denom, approx=True)).astype(jnp.bfloat16)

        o = jnp.einsum('bqk,bkd->bqd', probs, vh,
                       preferred_element_type=jnp.float32)      # f32 [wblk, NP, hd]
        # fold this head's slice of the output projection in immediately:
        # removes the 4-way lane concat and keeps per-head intermediates short-lived.
        o2 = o.reshape(R, head_dim).astype(jnp.bfloat16)
        y = y + jnp.dot(o2, wout_ref[h], preferred_element_type=jnp.float32)

    # TODO(synk): lane-dense (wblk, NP*Cout) output packing (reviewer's top
    # lever) needs an in-kernel sublane->lane reshape of the [R, Cout] result;
    # Mosaic reshape support for (R, 32) -> (wblk, 512) is not guaranteed, so
    # the sublane-clean 2-D [R, Cout] store is kept for now.
    out_ref[...] = (y + bout_ref[...]).astype(out_ref.dtype)


# -----------------------------------------------------------------------------
# Glue helpers (plain JAX / numpy, static shapes)
# -----------------------------------------------------------------------------
def _window_partition(x, p):
    B, H, W, C = x.shape
    hw, ww = H // p, W // p
    xw = x.reshape(B, hw, p, ww, p, C).transpose(0, 1, 3, 2, 4, 5)
    return xw.reshape(B, hw * ww, p * p, C), hw, ww


def _window_merge(y, hw, ww, p):
    B, nw, NP, C = y.shape
    y = y.reshape(B, hw, ww, p, p, C).transpose(0, 1, 3, 2, 4, 5)
    return y.reshape(B, hw * p, ww * p, C)


def _relative_embedding(rel_pos_params, p):
    # rel_pos_params: [n_heads, 2p-1, 2p-1]  ->  [n_heads, p*p, p*p]
    coords = np.array([[i, j] for i in range(p) for j in range(p)])
    rel = coords[:, None, :] - coords[None, :, :] + p - 1
    return rel_pos_params[:, rel[..., 0], rel[..., 1]]


# -----------------------------------------------------------------------------
# Pallas-backed forward
# -----------------------------------------------------------------------------
def wmsa_forward(x, params, *, window_size, head_dim, wmsa_type,
                 wblk=None, out_dtype=None):
    B, H, W, C = x.shape
    p = window_size
    n_heads = C // head_dim
    Cout = params['wout'].shape[1]
    shift = p // 2
    scale = head_dim ** (-0.5)
    masked = (wmsa_type != 'W')
    # Optionally emit bf16 to halve HBM writeback; default keeps caller dtype.
    out_dtype = x.dtype if out_dtype is None else out_dtype

    if masked:
        x = jnp.roll(x, shift=(-shift, -shift), axis=(1, 2))

    xw, hw, ww = _window_partition(x, p)              # [B, nw, NP, C]
    nw, NP = hw * ww, p * p
    nwin = B * nw

    # --- windows per grid step: target ~512 projection rows per block --------
    # (~0.35 us fixed cost per grid step; 512-1024-row blocks sit near the HBM
    # roofline in measured sweeps).  Keep >= 2 blocks so v7x's second
    # TensorCore gets work on the "parallel" axis.
    if wblk is None:
        wblk = max(1, min(nwin, max(1, 512 // NP)))
        while wblk > 1 and -(-nwin // wblk) < 2:
            wblk = -(-wblk // 2)
    nwin_pad = -(-nwin // wblk) * wblk
    nblocks = nwin_pad // wblk

    xw = xw.reshape(nwin, NP, C)
    if nwin_pad != nwin:
        xw = jnp.concatenate(
            [xw, jnp.zeros((nwin_pad - nwin, NP, C), xw.dtype)], axis=0)
    # Flat 2-D token slab: sublane dim is a clean multiple of 8, no in-kernel
    # 3-D -> 2-D reshape.
    # TODO(synk): a lane-dense (nwin_pad, NP*C) slab would avoid 32/128-lane
    # input tiles but needs an in-kernel lane->sublane reshape; measure first.
    x2d = xw.reshape(nwin_pad * NP, C)

    # fold the attention scale into the Q columns of the qkv projection
    wqkv = params['wqkv'].astype(jnp.float32).at[:, :C].multiply(scale)
    bqkv = params['bqkv'].astype(jnp.float32).at[:C].multiply(scale)

    relb = _relative_embedding(params['rel_pos'], p).astype(jnp.float32)

    # tiny static shifted-window mask ingredients (numpy, built once);
    # -1e9 is folded in host-side so the kernel does no extra scalar multiply.
    s = p - shift
    tok = np.arange(NP)
    row_side = (tok // p) < s
    col_side = (tok % p) < s
    maskrc = (-1e9) * np.stack(
        [(row_side[:, None] != row_side[None, :]).astype(np.float32),
         (col_side[:, None] != col_side[None, :]).astype(np.float32)], axis=0)

    win = np.arange(nw)
    flags_img = np.stack([(win // ww == hw - 1).astype(np.float32),
                          (win % ww == ww - 1).astype(np.float32)], axis=-1)
    flags = np.tile(flags_img, (B, 1))
    if not masked:
        flags = np.zeros_like(flags)
    if nwin_pad != nwin:
        flags = np.concatenate(
            [flags, np.zeros((nwin_pad - nwin, 2), np.float32)], axis=0)
    flags = jnp.asarray(flags.reshape(nwin_pad, 1, 2))
    maskrc = jnp.asarray(maskrc)

    # bf16 MXU operands (accumulation stays f32 inside the kernel)
    mm_dtype = jnp.bfloat16
    x_in = x2d.astype(mm_dtype)
    wqkv_in = wqkv.astype(mm_dtype)
    # per-head output-projection weights: [n_heads, head_dim, Cout]
    wout_in = params['wout'].astype(mm_dtype).reshape(n_heads, head_dim, Cout)
    bqkv_in = bqkv[None, :]
    bout_in = params['bout'].astype(jnp.float32)[None, :]

    kernel = functools.partial(
        wmsa_kernel, n_heads=n_heads, head_dim=head_dim, n_tok=NP,
        wblk=wblk, masked=masked)

    rows_blk = wblk * NP
    # VMEM budget (guardrail for v7x's 64 MiB): 2 x-blocks (bf16) + 2 out-blocks
    # + resident weights/bias/flags -- well under the 32 MiB request below.
    out = pl.pallas_call(
        kernel,
        out_shape=jax.ShapeDtypeStruct((nwin_pad * NP, Cout), out_dtype),
        grid=(nblocks,),
        in_specs=[
            pl.BlockSpec((rows_blk, C), lambda i: (i, 0)),            # x tokens (streamed)
            pl.BlockSpec((nwin_pad, 1, 2), lambda i: (0, 0, 0)),      # SW flags (resident)
            pl.BlockSpec((C, 3 * C), lambda i: (0, 0)),               # Wqkv (resident)
            pl.BlockSpec((1, 3 * C), lambda i: (0, 0)),               # bqkv (resident)
            pl.BlockSpec((n_heads, NP, NP), lambda i: (0, 0, 0)),     # rel-pos bias (resident)
            pl.BlockSpec((2, NP, NP), lambda i: (0, 0, 0)),           # mask row/col patterns
            pl.BlockSpec((n_heads, head_dim, Cout), lambda i: (0, 0, 0)),  # Wout per head
            pl.BlockSpec((1, Cout), lambda i: (0, 0)),                # bout (resident)
        ],
        out_specs=pl.BlockSpec((rows_blk, Cout), lambda i: (i, 0)),
        compiler_params=pltpu.CompilerParams(
            dimension_semantics=("parallel",),
            vmem_limit_bytes=32 * 1024 * 1024),
    )(x_in, flags, wqkv_in, bqkv_in, relb, maskrc, wout_in, bout_in)

    out = out[:nwin * NP].reshape(B, nw, NP, Cout)
    y = _window_merge(out, hw, ww, p)                 # [B, H, W, Cout]
    if masked:
        y = jnp.roll(y, shift=(shift, shift), axis=(1, 2))
    return y


# -----------------------------------------------------------------------------
# Pure-JAX reference (mirrors the PyTorch forward) for verification
# -----------------------------------------------------------------------------
def wmsa_reference(x, params, *, window_size, head_dim, wmsa_type):
    B, H, W, C = x.shape
    p = window_size
    n_heads = C // head_dim
    shift = p // 2
    scale = head_dim ** (-0.5)

    if wmsa_type != 'W':
        x = jnp.roll(x, shift=(-shift, -shift), axis=(1, 2))
    xw, hw, ww = _window_partition(x, p)
    nw, NP = hw * ww, p * p

    qkv = jnp.einsum('bwpc,cd->bwpd', xw, params['wqkv']) + params['bqkv']
    q, k, v = qkv[..., :C], qkv[..., C:2 * C], qkv[..., 2 * C:]

    def split_heads(t):
        return t.reshape(B, nw, NP, n_heads, head_dim).transpose(3, 0, 1, 2, 4)

    q, k, v = split_heads(q), split_heads(k), split_heads(v)
    sim = jnp.einsum('hbwpc,hbwqc->hbwpq', q, k) * scale
    rel = _relative_embedding(params['rel_pos'], p)
    sim = sim + rel[:, None, None, :, :]
    if wmsa_type != 'W':
        s = p - shift
        m = np.zeros((hw, ww, p, p, p, p), dtype=bool)
        m[-1, :, :s, :, s:, :] = True
        m[-1, :, s:, :, :s, :] = True
        m[:, -1, :, :s, :, s:] = True
        m[:, -1, :, s:, :, :s] = True
        mask = jnp.asarray(m.reshape(nw, NP, NP))
        sim = jnp.where(mask[None, None], -jnp.inf, sim)
    probs = jax.nn.softmax(sim, axis=-1)
    o = jnp.einsum('hbwij,hbwjc->hbwic', probs, v)
    o = o.transpose(1, 2, 3, 0, 4).reshape(B, nw, NP, C)
    y = jnp.einsum('bwpc,cd->bwpd', o, params['wout']) + params['bout']
    y = _window_merge(y, hw, ww, p)
    if wmsa_type != 'W':
        y = jnp.roll(y, shift=(shift, shift), axis=(1, 2))
    return y


# -----------------------------------------------------------------------------
if __name__ == "__main__":
    # Small shapes consistent with the module.
    B = 2
    input_dim = 32
    output_dim = 32
    head_dim = 8
    window_size = 4
    H = W = 16                      # 4x4 windows of 4x4 tokens -> 32 windows
    n_heads = input_dim // head_dim

    key = jax.random.PRNGKey(0)
    k1, k2, k3, k4, k5, k6 = jax.random.split(key, 6)
    params = {
        'wqkv': (jax.random.normal(k1, (input_dim, 3 * input_dim), jnp.float32) * 0.02),
        'bqkv': (jax.random.normal(k2, (3 * input_dim,), jnp.float32) * 0.02),
        # relative_position_params as stored after __init__: [n_heads, 2p-1, 2p-1]
        'rel_pos': (jax.random.truncated_normal(
            k3, -2.0, 2.0, (n_heads, 2 * window_size - 1, 2 * window_size - 1),
            jnp.float32) * 0.02),
        'wout': (jax.random.normal(k4, (input_dim, output_dim), jnp.float32) * 0.02),
        'bout': (jax.random.normal(k5, (output_dim,), jnp.float32) * 0.02),
    }
    x = jax.random.normal(k6, (B, H, W, input_dim), jnp.float32)

    for wmsa_type in ('W', 'SW'):   # 'W' = plain window MSA, 'SW' = shifted-window MSA
        y = wmsa_forward(x, params, window_size=window_size, head_dim=head_dim,
                         wmsa_type=wmsa_type)
        y = jax.block_until_ready(y)
        y_ref = wmsa_reference(x, params, window_size=window_size,
                               head_dim=head_dim, wmsa_type=wmsa_type)
        np.testing.assert_allclose(np.asarray(y), np.asarray(y_ref),
                                   atol=2e-3, rtol=2e-3)

    print("KERNEL_OK")
</pallas_src>

<mosaic_0001>
module attributes {stable_mosaic.version = 11 : i64} {
  func.func @wmsa_kernel(%arg0: i32, %arg1: memref<256x32xbf16, #tpu.memory_space<vmem>>, %arg2: memref<32x1x2xf32, #tpu.memory_space<vmem>>, %arg3: memref<32x96xbf16, #tpu.memory_space<vmem>>, %arg4: memref<1x96xf32, #tpu.memory_space<vmem>>, %arg5: memref<4x16x16xf32, #tpu.memory_space<vmem>>, %arg6: memref<2x16x16xf32, #tpu.memory_space<vmem>>, %arg7: memref<4x8x32xbf16, #tpu.memory_space<vmem>>, %arg8: memref<1x32xf32, #tpu.memory_space<vmem>>, %arg9: memref<256x32xf32, #tpu.memory_space<vmem>>) attributes {dimension_semantics = [#tpu.dimension_semantics<parallel>], iteration_bounds = array<i64: 2>, scalar_prefetch = 0 : i64, scratch_operands = 0 : i64, tpu.core_type = #tpu.core_type<tc>, window_params = [{transform_indices = @transform_0, window_bounds = array<i64: 256, 32>}, {pipeline_mode = #tpu.pipeline_mode<synchronous>, transform_indices = @transform_1, window_bounds = array<i64: 32, 1, 2>}, {pipeline_mode = #tpu.pipeline_mode<synchronous>, transform_indices = @transform_2, window_bounds = array<i64: 32, 96>}, {pipeline_mode = #tpu.pipeline_mode<synchronous>, transform_indices = @transform_3, window_bounds = array<i64: 1, 96>}, {pipeline_mode = #tpu.pipeline_mode<synchronous>, transform_indices = @transform_4, window_bounds = array<i64: 4, 16, 16>}, {pipeline_mode = #tpu.pipeline_mode<synchronous>, transform_indices = @transform_5, window_bounds = array<i64: 2, 16, 16>}, {pipeline_mode = #tpu.pipeline_mode<synchronous>, transform_indices = @transform_6, window_bounds = array<i64: 4, 8, 32>}, {pipeline_mode = #tpu.pipeline_mode<synchronous>, transform_indices = @transform_7, window_bounds = array<i64: 1, 32>}, {transform_indices = @transform_8, window_bounds = array<i64: 256, 32>}]} {
    %c0 = arith.constant 0 : index
    %c0_0 = arith.constant 0 : index
    %0 = vector.load %arg1[%c0, %c0_0] : memref<256x32xbf16, #tpu.memory_space<vmem>>, vector<256x32xbf16>
    %c0_1 = arith.constant 0 : index
    %c0_2 = arith.constant 0 : index
    %1 = vector.load %arg3[%c0_1, %c0_2] : memref<32x96xbf16, #tpu.memory_space<vmem>>, vector<32x96xbf16>
    %cst = arith.constant dense<0.000000e+00> : vector<256x96xf32>
    %2 = tpu.matmul %0, %1, %cst {dimension_numbers = #tpu.dot_dimension_numbers<[1], [0], [0], [1], [0, 0, 1, 1], [], []>} : vector<256x32xbf16>, vector<32x96xbf16>, vector<256x96xf32> -> vector<256x96xf32>
    %c0_3 = arith.constant 0 : index
    %c0_4 = arith.constant 0 : index
    %3 = vector.load %arg4[%c0_3, %c0_4] : memref<1x96xf32, #tpu.memory_space<vmem>>, vector<1x96xf32>
    %4 = vector.broadcast %3 : vector<1x96xf32> to vector<256x96xf32>
    %5 = arith.addf %2, %4 : vector<256x96xf32>
    %6 = arith.truncf %5 : vector<256x96xf32> to vector<256x96xbf16>
    %cst_5 = arith.constant 0.000000e+00 : f32
    %7 = vector.broadcast %cst_5 : f32 to vector<256x32xf32>
    %8 = vector.extract_strided_slice %6 {offsets = [0, 0], sizes = [256, 8], strides = [1, 1]} : vector<256x96xbf16> to vector<256x8xbf16>
    %9 = vector.shape_cast %8 : vector<256x8xbf16> to vector<16x16x8xbf16>
    %10 = vector.extract_strided_slice %6 {offsets = [0, 32], sizes = [256, 8], strides = [1, 1]} : vector<256x96xbf16> to vector<256x8xbf16>
    %11 = vector.shape_cast %10 : vector<256x8xbf16> to vector<16x16x8xbf16>
    %12 = vector.extract_strided_slice %6 {offsets = [0, 64], sizes = [256, 8], strides = [1, 1]} : vector<256x96xbf16> to vector<256x8xbf16>
    %13 = vector.shape_cast %12 : vector<256x8xbf16> to vector<16x16x8xbf16>
    "tpu.trace_start"() <{level = 10 : i32, message = "bqd,bkd->bqk"}> : () -> ()
    %cst_6 = arith.constant dense<0.000000e+00> : vector<16x16x16xf32>
    %14 = tpu.matmul %9, %11, %cst_6 {dimension_numbers = #tpu.dot_dimension_numbers<[2], [2], [1], [1], [0, 0, 0, 1, 1, 1], [0], [0]>} : vector<16x16x8xbf16>, vector<16x16x8xbf16>, vector<16x16x16xf32> -> vector<16x16x16xf32>
    "tpu.trace_stop"() : () -> ()
    %c0_7 = arith.constant 0 : index
    %c0_8 = arith.constant 0 : index
    %c0_9 = arith.constant 0 : index
    %15 = vector.load %arg5[%c0_7, %c0_8, %c0_9] : memref<4x16x16xf32, #tpu.memory_space<vmem>>, vector<1x16x16xf32>
    %16 = vector.shape_cast %15 : vector<1x16x16xf32> to vector<16x16xf32>
    %17 = vector.shape_cast %16 : vector<16x16xf32> to vector<1x16x16xf32>
    %18 = vector.broadcast %17 : vector<1x16x16xf32> to vector<16x16x16xf32>
    %19 = arith.addf %14, %18 : vector<16x16x16xf32>
    %cst_10 = arith.constant dense<0xFF800000> : vector<16x16xf32>
    %20 = vector.multi_reduction <maximumf>, %19, %cst_10 [2] : vector<16x16x16xf32> to vector<16x16xf32>
    %21 = vector.shape_cast %20 : vector<16x16xf32> to vector<16x16x1xf32>
    %22 = vector.broadcast %21 : vector<16x16x1xf32> to vector<16x16x16xf32>
    %23 = arith.subf %19, %22 : vector<16x16x16xf32>
    %24 = math.exp %23 : vector<16x16x16xf32>
    %cst_11 = arith.constant dense<0.000000e+00> : vector<16x16xf32>
    %25 = vector.multi_reduction <add>, %24, %cst_11 [2] : vector<16x16x16xf32> to vector<16x16xf32>
    %26 = vector.shape_cast %25 : vector<16x16xf32> to vector<16x16x1xf32>
    %27 = tpu.reciprocal %26 {approx = true} : vector<16x16x1xf32> -> vector<16x16x1xf32>
    %28 = vector.broadcast %27 : vector<16x16x1xf32> to vector<16x16x16xf32>
    %29 = arith.mulf %24, %28 : vector<16x16x16xf32>
    %30 = arith.truncf %29 : vector<16x16x16xf32> to vector<16x16x16xbf16>
    "tpu.trace_start"() <{level = 10 : i32, message = "bqk,bkd->bqd"}> : () -> ()
    %cst_12 = arith.constant dense<0.000000e+00> : vector<16x16x8xf32>
    %31 = tpu.matmul %30, %13, %cst_12 {dimension_numbers = #tpu.dot_dimension_numbers<[2], [1], [1], [2], [0, 0, 0, 1, 1, 2], [0], [0]>} : vector<16x16x16xbf16>, vector<16x16x8xbf16>, vector<16x16x8xf32> -> vector<16x16x8xf32>
    "tpu.trace_stop"() : () -> ()
    %32 = vector.shape_cast %31 : vector<16x16x8xf32> to vector<256x8xf32>
    %33 = arith.truncf %32 : vector<256x8xf32> to vector<256x8xbf16>
    %c0_13 = arith.constant 0 : index
    %c0_14 = arith.constant 0 : index
    %c0_15 = arith.constant 0 : index
    %34 = vector.load %arg7[%c0_13, %c0_14, %c0_15] : memref<4x8x32xbf16, #tpu.memory_space<vmem>>, vector<1x8x32xbf16>
    %35 = vector.shape_cast %34 : vector<1x8x32xbf16> to vector<8x32xbf16>
    %cst_16 = arith.constant dense<0.000000e+00> : vector<256x32xf32>
    %36 = tpu.matmul %33, %35, %cst_16 {dimension_numbers = #tpu.dot_dimension_numbers<[1], [0], [0], [1], [0, 0, 1, 1], [], []>} : vector<256x8xbf16>, vector<8x32xbf16>, vector<256x32xf32> -> vector<256x32xf32>
    %37 = arith.addf %7, %36 : vector<256x32xf32>
    %38 = vector.extract_strided_slice %6 {offsets = [0, 8], sizes = [256, 8], strides = [1, 1]} : vector<256x96xbf16> to vector<256x8xbf16>
    %39 = vector.shape_cast %38 : vector<256x8xbf16> to vector<16x16x8xbf16>
    %40 = vector.extract_strided_slice %6 {offsets = [0, 40], sizes = [256, 8], strides = [1, 1]} : vector<256x96xbf16> to vector<256x8xbf16>
    %41 = vector.shape_cast %40 : vector<256x8xbf16> to vector<16x16x8xbf16>
    %42 = vector.extract_strided_slice %6 {offsets = [0, 72], sizes = [256, 8], strides = [1, 1]} : vector<256x96xbf16> to vector<256x8xbf16>
    %43 = vector.shape_cast %42 : vector<256x8xbf16> to vector<16x16x8xbf16>
    "tpu.trace_start"() <{level = 10 : i32, message = "bqd,bkd->bqk"}> : () -> ()
    %cst_17 = arith.constant dense<0.000000e+00> : vector<16x16x16xf32>
    %44 = tpu.matmul %39, %41, %cst_17 {dimension_numbers = #tpu.dot_dimension_numbers<[2], [2], [1], [1], [0, 0, 0, 1, 1, 1], [0], [0]>} : vector<16x16x8xbf16>, vector<16x16x8xbf16>, vector<16x16x16xf32> -> vector<16x16x16xf32>
    "tpu.trace_stop"() : () -> ()
    %c1 = arith.constant 1 : index
    %c0_18 = arith.constant 0 : index
    %c0_19 = arith.constant 0 : index
    %45 = vector.load %arg5[%c1, %c0_18, %c0_19] : memref<4x16x16xf32, #tpu.memory_space<vmem>>, vector<1x16x16xf32>
    %46 = vector.shape_cast %45 : vector<1x16x16xf32> to vector<16x16xf32>
    %47 = vector.shape_cast %46 : vector<16x16xf32> to vector<1x16x16xf32>
    %48 = vector.broadcast %47 : vector<1x16x16xf32> to vector<16x16x16xf32>
    %49 = arith.addf %44, %48 : vector<16x16x16xf32>
    %cst_20 = arith.constant dense<0xFF800000> : vector<16x16xf32>
    %50 = vector.multi_reduction <maximumf>, %49, %cst_20 [2] : vector<16x16x16xf32> to vector<16x16xf32>
    %51 = vector.shape_cast %50 : vector<16x16xf32> to vector<16x16x1xf32>
    %52 = vector.broadcast %51 : vector<16x16x1xf32> to vector<16x16x16xf32>
    %53 = arith.subf %49, %52 : vector<16x16x16xf32>
    %54 = math.exp %53 : vector<16x16x16xf32>
    %cst_21 = arith.constant dense<0.000000e+00> : vector<16x16xf32>
    %55 = vector.multi_reduction <add>, %54, %cst_21 [2] : vector<16x16x16xf32> to vector<16x16xf32>
    %56 = vector.shape_cast %55 : vector<16x16xf32> to vector<16x16x1xf32>
    %57 = tpu.reciprocal %56 {approx = true} : vector<16x16x1xf32> -> vector<16x16x1xf32>
    %58 = vector.broadcast %57 : vector<16x16x1xf32> to vector<16x16x16xf32>
    %59 = arith.mulf %54, %58 : vector<16x16x16xf32>
    %60 = arith.truncf %59 : vector<16x16x16xf32> to vector<16x16x16xbf16>
    "tpu.trace_start"() <{level = 10 : i32, message = "bqk,bkd->bqd"}> : () -> ()
    %cst_22 = arith.constant dense<0.000000e+00> : vector<16x16x8xf32>
    %61 = tpu.matmul %60, %43, %cst_22 {dimension_numbers = #tpu.dot_dimension_numbers<[2], [1], [1], [2], [0, 0, 0, 1, 1, 2], [0], [0]>} : vector<16x16x16xbf16>, vector<16x16x8xbf16>, vector<16x16x8xf32> -> vector<16x16x8xf32>
    "tpu.trace_stop"() : () -> ()
    %62 = vector.shape_cast %61 : vector<16x16x8xf32> to vector<256x8xf32>
    %63 = arith.truncf %62 : vector<256x8xf32> to vector<256x8xbf16>
    %c1_23 = arith.constant 1 : index
    %c0_24 = arith.constant 0 : index
    %c0_25 = arith.constant 0 : index
    %64 = vector.load %arg7[%c1_23, %c0_24, %c0_25] : memref<4x8x32xbf16, #tpu.memory_space<vmem>>, vector<1x8x32xbf16>
    %65 = vector.shape_cast %64 : vector<1x8x32xbf16> to vector<8x32xbf16>
    %cst_26 = arith.constant dense<0.000000e+00> : vector<256x32xf32>
    %66 = tpu.matmul %63, %65, %cst_26 {dimension_numbers = #tpu.dot_dimension_numbers<[1], [0], [0], [1], [0, 0, 1, 1], [], []>} : vector<256x8xbf16>, vector<8x32xbf16>, vector<256x32xf32> -> vector<256x32xf32>
    %67 = arith.addf %37, %66 : vector<256x32xf32>
    %68 = vector.extract_strided_slice %6 {offsets = [0, 16], sizes = [256, 8], strides = [1, 1]} : vector<256x96xbf16> to vector<256x8xbf16>
    %69 = vector.shape_cast %68 : vector<256x8xbf16> to vector<16x16x8xbf16>
    %70 = vector.extract_strided_slice %6 {offsets = [0, 48], sizes = [256, 8], strides = [1, 1]} : vector<256x96xbf16> to vector<256x8xbf16>
    %71 = vector.shape_cast %70 : vector<256x8xbf16> to vector<16x16x8xbf16>
    %72 = vector.extract_strided_slice %6 {offsets = [0, 80], sizes = [256, 8], strides = [1, 1]} : vector<256x96xbf16> to vector<256x8xbf16>
    %73 = vector.shape_cast %72 : vector<256x8xbf16> to vector<16x16x8xbf16>
    "tpu.trace_start"() <{level = 10 : i32, message = "bqd,bkd->bqk"}> : () -> ()
    %cst_27 = arith.constant dense<0.000000e+00> : vector<16x16x16xf32>
    %74 = tpu.matmul %69, %71, %cst_27 {dimension_numbers = #tpu.dot_dimension_numbers<[2], [2], [1], [1], [0, 0, 0, 1, 1, 1], [0], [0]>} : vector<16x16x8xbf16>, vector<16x16x8xbf16>, vector<16x16x16xf32> -> vector<16x16x16xf32>
    "tpu.trace_stop"() : () -> ()
    %c2 = arith.constant 2 : index
    %c0_28 = arith.constant 0 : index
    %c0_29 = arith.constant 0 : index
    %75 = vector.load %arg5[%c2, %c0_28, %c0_29] : memref<4x16x16xf32, #tpu.memory_space<vmem>>, vector<1x16x16xf32>
    %76 = vector.shape_cast %75 : vector<1x16x16xf32> to vector<16x16xf32>
    %77 = vector.shape_cast %76 : vector<16x16xf32> to vector<1x16x16xf32>
    %78 = vector.broadcast %77 : vector<1x16x16xf32> to vector<16x16x16xf32>
    %79 = arith.addf %74, %78 : vector<16x16x16xf32>
    %cst_30 = arith.constant dense<0xFF800000> : vector<16x16xf32>
    %80 = vector.multi_reduction <maximumf>, %79, %cst_30 [2] : vector<16x16x16xf32> to vector<16x16xf32>
    %81 = vector.shape_cast %80 : vector<16x16xf32> to vector<16x16x1xf32>
    %82 = vector.broadcast %81 : vector<16x16x1xf32> to vector<16x16x16xf32>
    %83 = arith.subf %79, %82 : vector<16x16x16xf32>
    %84 = math.exp %83 : vector<16x16x16xf32>
    %cst_31 = arith.constant dense<0.000000e+00> : vector<16x16xf32>
    %85 = vector.multi_reduction <add>, %84, %cst_31 [2] : vector<16x16x16xf32> to vector<16x16xf32>
    %86 = vector.shape_cast %85 : vector<16x16xf32> to vector<16x16x1xf32>
    %87 = tpu.reciprocal %86 {approx = true} : vector<16x16x1xf32> -> vector<16x16x1xf32>
    %88 = vector.broadcast %87 : vector<16x16x1xf32> to vector<16x16x16xf32>
    %89 = arith.mulf %84, %88 : vector<16x16x16xf32>
    %90 = arith.truncf %89 : vector<16x16x16xf32> to vector<16x16x16xbf16>
    "tpu.trace_start"() <{level = 10 : i32, message = "bqk,bkd->bqd"}> : () -> ()
    %cst_32 = arith.constant dense<0.000000e+00> : vector<16x16x8xf32>
    %91 = tpu.matmul %90, %73, %cst_32 {dimension_numbers = #tpu.dot_dimension_numbers<[2], [1], [1], [2], [0, 0, 0, 1, 1, 2], [0], [0]>} : vector<16x16x16xbf16>, vector<16x16x8xbf16>, vector<16x16x8xf32> -> vector<16x16x8xf32>
    "tpu.trace_stop"() : () -> ()
    %92 = vector.shape_cast %91 : vector<16x16x8xf32> to vector<256x8xf32>
    %93 = arith.truncf %92 : vector<256x8xf32> to vector<256x8xbf16>
    %c2_33 = arith.constant 2 : index
    %c0_34 = arith.constant 0 : index
    %c0_35 = arith.constant 0 : index
    %94 = vector.load %arg7[%c2_33, %c0_34, %c0_35] : memref<4x8x32xbf16, #tpu.memory_space<vmem>>, vector<1x8x32xbf16>
    %95 = vector.shape_cast %94 : vector<1x8x32xbf16> to vector<8x32xbf16>
    %cst_36 = arith.constant dense<0.000000e+00> : vector<256x32xf32>
    %96 = tpu.matmul %93, %95, %cst_36 {dimension_numbers = #tpu.dot_dimension_numbers<[1], [0], [0], [1], [0, 0, 1, 1], [], []>} : vector<256x8xbf16>, vector<8x32xbf16>, vector<256x32xf32> -> vector<256x32xf32>
    %97 = arith.addf %67, %96 : vector<256x32xf32>
    %98 = vector.extract_strided_slice %6 {offsets = [0, 24], sizes = [256, 8], strides = [1, 1]} : vector<256x96xbf16> to vector<256x8xbf16>
    %99 = vector.shape_cast %98 : vector<256x8xbf16> to vector<16x16x8xbf16>
    %100 = vector.extract_strided_slice %6 {offsets = [0, 56], sizes = [256, 8], strides = [1, 1]} : vector<256x96xbf16> to vector<256x8xbf16>
    %101 = vector.shape_cast %100 : vector<256x8xbf16> to vector<16x16x8xbf16>
    %102 = vector.extract_strided_slice %6 {offsets = [0, 88], sizes = [256, 8], strides = [1, 1]} : vector<256x96xbf16> to vector<256x8xbf16>
    %103 = vector.shape_cast %102 : vector<256x8xbf16> to vector<16x16x8xbf16>
    "tpu.trace_start"() <{level = 10 : i32, message = "bqd,bkd->bqk"}> : () -> ()
    %cst_37 = arith.constant dense<0.000000e+00> : vector<16x16x16xf32>
    %104 = tpu.matmul %99, %101, %cst_37 {dimension_numbers = #tpu.dot_dimension_numbers<[2], [2], [1], [1], [0, 0, 0, 1, 1, 1], [0], [0]>} : vector<16x16x8xbf16>, vector<16x16x8xbf16>, vector<16x16x16xf32> -> vector<16x16x16xf32>
    "tpu.trace_stop"() : () -> ()
    %c3 = arith.constant 3 : index
    %c0_38 = arith.constant 0 : index
    %c0_39 = arith.constant 0 : index
    %105 = vector.load %arg5[%c3, %c0_38, %c0_39] : memref<4x16x16xf32, #tpu.memory_space<vmem>>, vector<1x16x16xf32>
    %106 = vector.shape_cast %105 : vector<1x16x16xf32> to vector<16x16xf32>
    %107 = vector.shape_cast %106 : vector<16x16xf32> to vector<1x16x16xf32>
    %108 = vector.broadcast %107 : vector<1x16x16xf32> to vector<16x16x16xf32>
    %109 = arith.addf %104, %108 : vector<16x16x16xf32>
    %cst_40 = arith.constant dense<0xFF800000> : vector<16x16xf32>
    %110 = vector.multi_reduction <maximumf>, %109, %cst_40 [2] : vector<16x16x16xf32> to vector<16x16xf32>
    %111 = vector.shape_cast %110 : vector<16x16xf32> to vector<16x16x1xf32>
    %112 = vector.broadcast %111 : vector<16x16x1xf32> to vector<16x16x16xf32>
    %113 = arith.subf %109, %112 : vector<16x16x16xf32>
    %114 = math.exp %113 : vector<16x16x16xf32>
    %cst_41 = arith.constant dense<0.000000e+00> : vector<16x16xf32>
    %115 = vector.multi_reduction <add>, %114, %cst_41 [2] : vector<16x16x16xf32> to vector<16x16xf32>
    %116 = vector.shape_cast %115 : vector<16x16xf32> to vector<16x16x1xf32>
    %117 = tpu.reciprocal %116 {approx = true} : vector<16x16x1xf32> -> vector<16x16x1xf32>
    %118 = vector.broadcast %117 : vector<16x16x1xf32> to vector<16x16x16xf32>
    %119 = arith.mulf %114, %118 : vector<16x16x16xf32>
    %120 = arith.truncf %119 : vector<16x16x16xf32> to vector<16x16x16xbf16>
    "tpu.trace_start"() <{level = 10 : i32, message = "bqk,bkd->bqd"}> : () -> ()
    %cst_42 = arith.constant dense<0.000000e+00> : vector<16x16x8xf32>
    %121 = tpu.matmul %120, %103, %cst_42 {dimension_numbers = #tpu.dot_dimension_numbers<[2], [1], [1], [2], [0, 0, 0, 1, 1, 2], [0], [0]>} : vector<16x16x16xbf16>, vector<16x16x8xbf16>, vector<16x16x8xf32> -> vector<16x16x8xf32>
    "tpu.trace_stop"() : () -> ()
    %122 = vector.shape_cast %121 : vector<16x16x8xf32> to vector<256x8xf32>
    %123 = arith.truncf %122 : vector<256x8xf32> to vector<256x8xbf16>
    %c3_43 = arith.constant 3 : index
    %c0_44 = arith.constant 0 : index
    %c0_45 = arith.constant 0 : index
    %124 = vector.load %arg7[%c3_43, %c0_44, %c0_45] : memref<4x8x32xbf16, #tpu.memory_space<vmem>>, vector<1x8x32xbf16>
    %125 = vector.shape_cast %124 : vector<1x8x32xbf16> to vector<8x32xbf16>
    %cst_46 = arith.constant dense<0.000000e+00> : vector<256x32xf32>
    %126 = tpu.matmul %123, %125, %cst_46 {dimension_numbers = #tpu.dot_dimension_numbers<[1], [0], [0], [1], [0, 0, 1, 1], [], []>} : vector<256x8xbf16>, vector<8x32xbf16>, vector<256x32xf32> -> vector<256x32xf32>
    %127 = arith.addf %97, %126 : vector<256x32xf32>
    %c0_47 = arith.constant 0 : index
    %c0_48 = arith.constant 0 : index
    %128 = vector.load %arg8[%c0_47, %c0_48] : memref<1x32xf32, #tpu.memory_space<vmem>>, vector<1x32xf32>
    %129 = vector.broadcast %128 : vector<1x32xf32> to vector<256x32xf32>
    %130 = arith.addf %127, %129 : vector<256x32xf32>
    %c0_49 = arith.constant 0 : index
    %c0_50 = arith.constant 0 : index
    %131 = vector.load %arg9[%c0_49, %c0_50] : memref<256x32xf32, #tpu.memory_space<vmem>>, vector<256x32xf32>
    tpu.vector_store %arg9[%c0_49, %c0_50], %130 {strides = array<i32>} : memref<256x32xf32, #tpu.memory_space<vmem>>, vector<256x32xf32>,
    return
  }
  func.func @transform_0(%arg0: i32) -> (i32, i32) {
    %c0_i32 = arith.constant 0 : i32
    %c0_i32_0 = arith.constant 0 : i32
    return %arg0, %c0_i32 : i32, i32
  }
  func.func @transform_1(%arg0: i32) -> (i32, i32, i32) {
    %c0_i32 = arith.constant 0 : i32
    %c0_i32_0 = arith.constant 0 : i32
    %c0_i32_1 = arith.constant 0 : i32
    %c0_i32_2 = arith.constant 0 : i32
    return %c0_i32, %c0_i32_0, %c0_i32_1 : i32, i32, i32
  }
  func.func @transform_2(%arg0: i32) -> (i32, i32) {
    %c0_i32 = arith.constant 0 : i32
    %c0_i32_0 = arith.constant 0 : i32
    %c0_i32_1 = arith.constant 0 : i32
    return %c0_i32, %c0_i32_0 : i32, i32
  }
  func.func @transform_3(%arg0: i32) -> (i32, i32) {
    %c0_i32 = arith.constant 0 : i32
    %c0_i32_0 = arith.constant 0 : i32
    %c0_i32_1 = arith.constant 0 : i32
    return %c0_i32, %c0_i32_0 : i32, i32
  }
  func.func @transform_4(%arg0: i32) -> (i32, i32, i32) {
    %c0_i32 = arith.constant 0 : i32
    %c0_i32_0 = arith.constant 0 : i32
    %c0_i32_1 = arith.constant 0 : i32
    %c0_i32_2 = arith.constant 0 : i32
    return %c0_i32, %c0_i32_0, %c0_i32_1 : i32, i32, i32
  }
  func.func @transform_5(%arg0: i32) -> (i32, i32, i32) {
    %c0_i32 = arith.constant 0 : i32
    %c0_i32_0 = arith.constant 0 : i32
    %c0_i32_1 = arith.constant 0 : i32
    %c0_i32_2 = arith.constant 0 : i32
    return %c0_i32, %c0_i32_0, %c0_i32_1 : i32, i32, i32
  }
  func.func @transform_6(%arg0: i32) -> (i32, i32, i32) {
    %c0_i32 = arith.constant 0 : i32
    %c0_i32_0 = arith.constant 0 : i32
    %c0_i32_1 = arith.constant 0 : i32
    %c0_i32_2 = arith.constant 0 : i32
    return %c0_i32, %c0_i32_0, %c0_i32_1 : i32, i32, i32
  }
  func.func @transform_7(%arg0: i32) -> (i32, i32) {
    %c0_i32 = arith.constant 0 : i32
    %c0_i32_0 = arith.constant 0 : i32
    %c0_i32_1 = arith.constant 0 : i32
    return %c0_i32, %c0_i32_0 : i32, i32
  }
  func.func @transform_8(%arg0: i32) -> (i32, i32) {
    %c0_i32 = arith.constant 0 : i32
    %c0_i32_0 = arith.constant 0 : i32
    return %arg0, %c0_i32 : i32, i32
  }
}

</mosaic_0001>

<bundles_post_ra>
// kernel: tpu_custom_call.1
= control target key start
LH: loop header
LB: loop body
LE: loop exit
PB: predicated region body
PF: predicated region fallthrough
CT: control target
= control target key end

     0   :  { %s11774_s26 = smov 0   ;;  %s15245_s0 = inlined_call_operand.vmem [shape: bf16[512,32], index: 0, kind: input, shape index: {}]   ;;  %s15246_s1 = inlined_call_operand.vmem [shape: f32[32,1,2], index: 1, kind: input, shape index: {}]   ;;  %s15247_s2 = inlined_call_operand.vmem [shape: bf16[32,96], index: 2, kind: input, shape index: {}]   ;;  %s15248_s3 = inlined_call_operand.vmem [shape: f32[1,96], index: 3, kind: input, shape index: {}]   ;;  %s15249_s4 = inlined_call_operand.vmem [shape: f32[4,16,16], index: 4, kind: input, shape index: {}]   ;;  %s15250_s5 = inlined_call_operand.vmem [shape: f32[2,16,16], index: 5, kind: input, shape index: {}]   ;;  %s15251_s6 = inlined_call_operand.vmem [shape: bf16[4,8,32], index: 6, kind: input, shape index: {}]   ;;  %s15252_s7 = inlined_call_operand.vmem [shape: f32[1,32], index: 7, kind: input, shape index: {}]   ;;  %s15253_s8 = inlined_call_operand.vmem [shape: f32[512,32], index: 8, kind: output, shape index: {}]  }
   0x1 LB: > { %s9523_s5 = sadd.s32 4294967295, %s11714_s26   ;;  %p9527_p0 = scmp.ge.s32.totalorder %s11714_s26, 1  ;;  %s11714_s26 = sphi %s11774_s26, %s18_s26  }
   0x2   : > { %p263_p1 = scmp.lt.s32.totalorder %s11714_s26, 3 }
   0x4   : > { %p264_p2 = pnand %p9527_p0, %p263_p1 }
   0x6   : > { %267 = sbr.rel (%p264_p2) target bundleno = 3756 (0xeac), region = 52 }
   0xd   : > { %v11178_v0 = vld [vmem:[%s15247_s2] sm:$0xff]   ;;  %s9528_s29 = sshll.u32 %s9523_s5, 5  ;;  %v11179_v1 = vld [vmem:[%s15247_s2 + $0x8] sm:$0xff]   ;;  %vm445_vm0 = vcmask 261120   ;;  %v15254_v18 = vmov 0.0   ;;  %vm11717_vm1 = vmmov 0  }
   0xe   : > { %p298_p3 = scmp.lt.s32.totalorder %s9528_s29, 63  ;;  %10113 = vmatprep.subr.bf16.mxu0 %v11178_v0  ;;  %11053 = vmatprep.subr.bf16.mxu1 %v11178_v0  ;;  %v11833_v20 = vld [vmem:[%s15248_s3] ss:$0 sm:$0xff]  ;;  %s11718_s16 = smov 96   ;;  %vm676_vm2 = vcmask 64512   ;;  %vm1474_vm3 = vcmask 130048  }
   0xf   : > { %10114 = vmatpush3.bf16.msra.mxu0 %v11178_v0  ;;  %11055 = vmatpush3.bf16.msra.mxu1 %v11178_v0  ;;  %s11719_s17 = smov 64   ;;  %s11720_s18 = smov 120   ;;  %vm4617_vm4 = vcmask 1043456  }
  0x10   : > { %s15572_s29 = smov (!%p298_p3, %s9528_s29), 63  ;;  %10115 = vmatprep.subr.bf16.mxu0 %v11179_v1  ;;  %11054 = vmatprep.subr.bf16.mxu1 %v11179_v1  ;;  %s11721_s19 = smov 88  }
  0x11   : > { %s9529_s10 = sshll.u32 %s15572_s29, 2  ;;  %s11722_s24 = smov 56  }
  0x12   : > { %s11794_s13 = scalar_lea.vmem %s15245_s0, %s9529_s10  ;;  %s11723_s25 = smov 80  }
  0x13   : > { %10116 = vmatpush3.bf16.msra.mxu0 %v11179_v1  ;;  %v11180_v2 = vld [vmem:[%s11794_s13] sm:$0xff]   ;;  %11056 = vmatpush3.bf16.msra.mxu1 %v11179_v1  ;;  %v11181_v3 = vld [vmem:[%s11794_s13 + $0x8] sm:$0xff]   ;;  %v11182_v4 = vld [vmem:[%s11794_s13 + $0x10] sm:$0xff]   ;;  %s11724_s1 = smov 112   ;;  %s11725_s9 = smov 48  }
  0x14   : > { %10117 = vmatprep.mubr.msk.bf16.mxu0 %vm445_vm0, %v11180_v2  ;;  %v11183_v5 = vld [vmem:[%s11794_s13 + $0x40] sm:$0xff]   ;;  %v11185_v6 = vld [vmem:[%s11794_s13 + $0x48] sm:$0xff]   ;;  %v11184_v7 = vld [vmem:[%s11794_s13 + $0x18] sm:$0xff]   ;;  %10149 = vmatprep.subr.bf16.mxu1 %v15254_v18  ;;  %s11728_s20 = smov 40   ;;  %s9531_s28 = sshll.u32 %s15572_s29, 3 }
  0x15   : > { %10133 = vmatprep.mubr.msk.bf16.mxu1 %vm445_vm0, %v11183_v5  ;;  %v11187_v8 = vld [vmem:[%s11794_s13 + $0x50] sm:$0xff]   ;;  %v11186_v9 = vld [vmem:[%s11794_s13 + $0x20] sm:$0xff]   ;;  %v11189_v10 = vld [vmem:[%s11794_s13 + $0x58] sm:$0xff]   ;;  %10197 = vmatprep.subr.bf16.mxu0 %v15254_v18  ;;  %s15144_s12 = scalar_lea.vmem %s15253_s8, %s9531_s28 }
  0x16   : > { %10118 = vmatmul.mubr.msk.bf16.vlgmr.msra.gmra.mrb[0].mxu0 %vm445_vm0, %v11181_v3  ;;  %10134 = vmatmul.mubr.msk.bf16.vlgmr.msra.gmra.mrb[0].mxu1 %vm445_vm0, %v11185_v6  ;;  %v11191_v11 = vld [vmem:[%s11794_s13 + $0x60] sm:$0xff]   ;;  %v11188_v12 = vld [vmem:[%s11794_s13 + $0x28] sm:$0xff]   ;;  %v11190_v13 = vld [vmem:[%s11794_s13 + $0x30] sm:$0xff]  }
  0x17   : > { %10121 = vmatprep.mubr.msk.bf16.mxu0 %vm445_vm0, %v11182_v4  ;;  %10137 = vmatprep.mubr.msk.bf16.mxu1 %vm445_vm0, %v11187_v8  ;;  %v11193_v14 = vld [vmem:[%s11794_s13 + $0x68] sm:$0xff]   ;;  %v11194_v15 = vld [vmem:[%s11794_s13 + $0x70] sm:$0xff]   ;;  %v11192_v16 = vld [vmem:[%s11794_s13 + $0x38] sm:$0xff]  }
  0x18   : > { %v11195_v17 = vld [vmem:[%s11794_s13 + $0x78] sm:$0xff]  }
  0x1e   : > { %10122 = vmatmul.mubr.msk.bf16.gmra.mrb[4].mxu0 %vm445_vm0, %v11184_v7  ;;  %10138 = vmatmul.mubr.msk.bf16.gmra.mrb[4].mxu1 %vm445_vm0, %v11189_v10 }
  0x1f   : > { %10125 = vmatprep.mubr.msk.bf16.mxu0 %vm445_vm0, %v11186_v9  ;;  %10141 = vmatprep.mubr.msk.bf16.mxu1 %vm445_vm0, %v11191_v11 }
  0x26   : > { %10126 = vmatmul.mubr.msk.bf16.gmra.mrb[8].mxu0 %vm445_vm0, %v11188_v12  ;;  %10142 = vmatmul.mubr.msk.bf16.gmra.mrb[8].mxu1 %vm445_vm0, %v11193_v14 }
  0x27   : > { %10129 = vmatprep.mubr.msk.bf16.mxu0 %vm445_vm0, %v11190_v13  ;;  %10145 = vmatprep.mubr.msk.bf16.mxu1 %vm445_vm0, %v11194_v15 }
  0x2e   : > { %10130 = vmatmul.mubr.msk.bf16.gmra.mrb[12].mxu0 %vm445_vm0, %v11192_v16  ;;  %10146 = vmatmul.mubr.msk.bf16.gmra.mrb[12].mxu1 %vm445_vm0, %v11195_v17 }
  0x2f   : > { %10151 = vmatprep.mubr.msk.bf16.mxu1 %vm11717_vm1, %v15254_v18  ;;  %10199 = vmatprep.mubr.msk.bf16.mxu0 %vm11717_vm1, %v15254_v18 }
  0xe9   : > { %v10119_v19 = vpop.f32.mrb[0].mxu0  ;;  %v10135_v28 = vpop.f32.mrb[0].mxu1 }
  0xea   : > { %v528_v21 = vpop.f32.mrb[1].mxu0  ;;  %v537_v23 = vadd.f32 %v10119_v19, %v11833_v20  ;;  %v601_v30 = vadd.f32 %v10135_v28, %v11833_v20  ;;  %v592_v31 = vpop.f32.mrb[1].mxu1 }
  0xeb   : > { %v10120_v22 = vpop.f32.mrb[2].mxu0  ;;  %v529_v26 = vadd.f32 %v11833_v20, %v528_v21  ;;  %v593_v33 = vadd.f32 %v11833_v20, %v592_v31  ;;  %v10136_v34 = vpop.f32.mrb[2].mxu1 }
  0xec   : > { %v540_v24 = vadd.f32 %v10120_v22, %v11833_v20  ;;  %v531_v25 = vpop.f32.mrb[3].mxu0  ;;  %v604_v35 = vadd.f32 %v10136_v34, %v11833_v20  ;;  %v595_v36 = vpop.f32.mrb[3].mxu1 }
  0xed   : > { %v532_v27 = vadd.f32 %v11833_v20, %v531_v25  ;;  %v596_v38 = vadd.f32 %v11833_v20, %v595_v36 }
  0xee   : > { %v11843_v29 = vpack.c.bf16 %v540_v24, %v537_v23  ;;  %v11853_v40 = vpack.c.bf16 %v604_v35, %v601_v30 }
  0xef   : > { %v11846_v32 = vpack.c.bf16 %v532_v27, %v529_v26  ;;  %v11855_v42 = vpack.c.bf16 %v596_v38, %v593_v33 }
  0xf0   : > { %15332 = vst [vmem:[#allocation2_spill] sm:$0xff] %v11843_v29  ;;  %15333 = vst [vmem:[#allocation3_spill] sm:$0xff] %v11853_v40 }
  0xf1   : > { %v10123_v37 = vpop.f32.mrb[4].mxu0  ;;  %674 = vrot.lane.b32.xlu0 %v11846_v32, %s11718_s16  ;;  %15334 = vst [vmem:[#allocation4_spill] sm:$0xff] %v11855_v42  ;;  %v10139_v48 = vpop.f32.mrb[4].mxu1 }
  0xf2   : > { %v544_v39 = vpop.f32.mrb[5].mxu0  ;;  %v553_v43 = vadd.f32 %v10123_v37, %v11833_v20  ;;  %v617_v50 = vadd.f32 %v10139_v48, %v11833_v20  ;;  %v608_v51 = vpop.f32.mrb[5].mxu1 }
  0xf3   : > { %v10124_v41 = vpop.f32.mrb[6].mxu0  ;;  %v545_v46 = vadd.f32 %v11833_v20, %v544_v39  ;;  %v609_v53 = vadd.f32 %v11833_v20, %v608_v51  ;;  %v10140_v54 = vpop.f32.mrb[6].mxu1 }
  0xf4   : > { %v556_v44 = vadd.f32 %v10124_v41, %v11833_v20  ;;  %v547_v45 = vpop.f32.mrb[7].mxu0  ;;  %v620_v55 = vadd.f32 %v10140_v54, %v11833_v20  ;;  %v611_v56 = vpop.f32.mrb[7].mxu1 }
  0xf5   : > { %v548_v47 = vadd.f32 %v11833_v20, %v547_v45  ;;  %725 = vrot.lane.b32.xlu0 %v11843_v29, %s11718_s16  ;;  %v612_v58 = vadd.f32 %v11833_v20, %v611_v56 }
  0xf6   : > { %v11863_v49 = vpack.c.bf16 %v556_v44, %v553_v43  ;;  %v11873_v60 = vpack.c.bf16 %v620_v55, %v617_v50 }
  0xf7   : > { %v11866_v52 = vpack.c.bf16 %v548_v47, %v545_v46  ;;  %v11875_v62 = vpack.c.bf16 %v612_v58, %v609_v53 }
  0xf8   : > { %15335 = vst [vmem:[#allocation5_spill] sm:$0xff] %v11863_v49  ;;  %15336 = vst [vmem:[#allocation6_spill] sm:$0xff] %v11873_v60 }
  0xf9   : > { %v10127_v57 = vpop.f32.mrb[8].mxu0  ;;  %775 = vrot.lane.b32.xlu1 %v11866_v52, %s11718_s16  ;;  %15337 = vst [vmem:[#allocation7_spill] sm:$0xff] %v11875_v62  ;;  %v10143_v4 = vpop.f32.mrb[8].mxu1 }
  0xfa   : > { %v560_v59 = vpop.f32.mrb[9].mxu0  ;;  %v569_v63 = vadd.f32 %v10127_v57, %v11833_v20  ;;  %v633_v6 = vadd.f32 %v10143_v4, %v11833_v20  ;;  %v624_v7 = vpop.f32.mrb[9].mxu1 }
  0xfb   : > { %v10128_v61 = vpop.f32.mrb[10].mxu0  ;;  %v561_v2 = vadd.f32 %v11833_v20, %v560_v59  ;;  %v625_v9 = vadd.f32 %v11833_v20, %v624_v7  ;;  %v10144_v10 = vpop.f32.mrb[10].mxu1 }
  0xfc   : > { %v572_v0 = vadd.f32 %v10128_v61, %v11833_v20  ;;  %v563_v1 = vpop.f32.mrb[11].mxu0  ;;  %v636_v11 = vadd.f32 %v10144_v10, %v11833_v20  ;;  %v627_v12 = vpop.f32.mrb[11].mxu1 }
  0xfd   : > { %v564_v3 = vadd.f32 %v11833_v20, %v563_v1  ;;  %825 = vrot.lane.b32.xlu1 %v11863_v49, %s11718_s16  ;;  %v628_v14 = vadd.f32 %v11833_v20, %v627_v12 }
  0xfe   : > { %v11883_v5 = vpack.c.bf16 %v572_v0, %v569_v63  ;;  %v11895_v16 = vpack.c.bf16 %v636_v11, %v633_v6 }
  0xff   : > { %v11886_v8 = vpack.c.bf16 %v564_v3, %v561_v2  ;;  %v11897_v19 = vpack.c.bf16 %v628_v14, %v625_v9 }
 0x100   : > { %15338 = vst [vmem:[#allocation8_spill] sm:$0xff] %v11883_v5  ;;  %15340 = vst [vmem:[#allocation10_spill] sm:$0xff] %v11895_v16 }
 0x101   : > { %15339 = vst [vmem:[#allocation9_spill] sm:$0xff] %v11886_v8  ;;  %v10131_v13 = vpop.f32.mrb[12].mxu0  ;;  %925 = vrot.lane.b32.xlu1 %v11883_v5, %s11718_s16  ;;  %875 = vrot.lane.b32.xlu0 %v11886_v8, %s11718_s16  ;;  %15341 = vst [vmem:[#allocation11_spill] sm:$0xff] %v11897_v19  ;;  %v10147_v26 = vpop.f32.mrb[12].mxu1 }
 0x102   : > { %v576_v15 = vpop.f32.mrb[13].mxu0  ;;  %v585_v21 = vadd.f32 %v10131_v13, %v11833_v20  ;;  %v649_v28 = vadd.f32 %v10147_v26, %v11833_v20  ;;  %v640_v30 = vpop.f32.mrb[13].mxu1 }
 0x103   : > { %v10132_v17 = vpop.f32.mrb[14].mxu0  ;;  %v577_v24 = vadd.f32 %v11833_v20, %v576_v15  ;;  %v641_v33 = vadd.f32 %v11833_v20, %v640_v30  ;;  %v10148_v34 = vpop.f32.mrb[14].mxu1  ;;  %v12101_v30 = vld [vmem:[%s15249_s4] sm:$0xff] }
 0x104   : > { %v588_v22 = vadd.f32 %v10132_v17, %v11833_v20  ;;  %v579_v23 = vpop.f32.mrb[15].mxu0  ;;  %v652_v35 = vadd.f32 %v10148_v34, %v11833_v20  ;;  %v643_v36 = vpop.f32.mrb[15].mxu1  ;;  %v12106_v34 = vld [vmem:[%s15249_s4 + $0x8] sm:$0xff] }
 0x105   : > { %v580_v25 = vadd.f32 %v11833_v20, %v579_v23  ;;  %v644_v37 = vadd.f32 %v11833_v20, %v643_v36 }
 0x106   : > { %v11903_v27 = vpack.c.bf16 %v588_v22, %v585_v21  ;;  %v11915_v38 = vpack.c.bf16 %v652_v35, %v649_v28 }
 0x107   : > { %v11906_v31 = vpack.c.bf16 %v580_v25, %v577_v24  ;;  %v11917_v39 = vpack.c.bf16 %v644_v37, %v641_v33 }
 0x108   : > { %15342 = vst [vmem:[#allocation12_spill] sm:$0xff] %v11903_v27  ;;  %1025 = vrot.lane.b32.xlu1 %v11903_v27, %s11718_s16 }
 0x109   : > { %15343 = vst [vmem:[#allocation13_spill] sm:$0xff] %v11906_v31  ;;  %975 = vrot.lane.b32.xlu0 %v11906_v31, %s11718_s16  ;;  %15344 = vst [vmem:[#allocation14_spill] sm:$0xff] %v11917_v39 }
 0x10c   : > { %1225 = vrot.lane.b32.xlu1 %v11873_v60, %s11718_s16 }
 0x10d   : > { %1125 = vrot.lane.b32.xlu0 %v11853_v40, %s11718_s16 }
 0x110   : > { %1425 = vrot.lane.b32.xlu1 %v11915_v38, %s11718_s16 }
 0x111   : > { %1325 = vrot.lane.b32.xlu0 %v11895_v16, %s11718_s16 }
 0x114   : > { %1175 = vrot.lane.b32.xlu1 %v11875_v62, %s11718_s16 }
 0x115   : > { %1075 = vrot.lane.b32.xlu0 %v11855_v42, %s11718_s16 }
 0x118   : > { %1890 = vrot.lane.b32.xlu1 %v11843_v29, %s11719_s17 }
 0x119   : > { %1275 = vrot.lane.b32.xlu0 %v11897_v19, %s11718_s16 }
 0x11c   : > { %2078 = vrot.lane.b32.xlu1 %v11883_v5, %s11719_s17 }
 0x11d   : > { %1984 = vrot.lane.b32.xlu0 %v11863_v49, %s11719_s17 }
 0x120   : > { %2172 = vrot.lane.b32.xlu1 %v11903_v27, %s11719_s17 }
 0x121   : > { %2266 = vrot.lane.b32.xlu0 %v11853_v40, %s11719_s17 }
 0x124   : > { %2666 = vrot.lane.b32.xlu1 %v11843_v29, %s11720_s18 }
 0x125   : > { %2360 = vrot.lane.b32.xlu0 %v11873_v60, %s11719_s17 }
 0x128   : > { %2770 = vrot.lane.b32.xlu1 %v11863_v49, %s11721_s19 }
 0x129   : > { %2454 = vrot.lane.b32.xlu0 %v11895_v16, %s11719_s17 }
 0x12c   : > { %2870 = vrot.lane.b32.xlu1 %v11883_v5, %s11720_s18 }
 0x12d   : > { %2548 = vrot.lane.b32.xlu0 %v11915_v38, %s11719_s17 }
 0x130   : > { %2974 = vrot.lane.b32.xlu1 %v11903_v27, %s11721_s19 }
 0x131   : > { %2668 = vrot.lane.b32.xlu0 %v11843_v29, %s11721_s19 }
 0x134   : > { %3074 = vrot.lane.b32.xlu1 %v11853_v40, %s11720_s18 }
 0x135   : > { %2768 = vrot.lane.b32.xlu0 %v11863_v49, %s11720_s18 }
 0x138   : > { %3178 = vrot.lane.b32.xlu1 %v11873_v60, %s11721_s19 }
 0x139   : > { %2872 = vrot.lane.b32.xlu0 %v11883_v5, %s11721_s19 }
 0x13c   : > { %1375 = vrot.lane.b32.xlu1 %v11917_v39, %s11718_s16 }
 0x13d   : > { %2972 = vrot.lane.b32.xlu0 %v11903_v27, %s11720_s18 }
 0x140   : > { %3278 = vrot.lane.b32.xlu1 %v11895_v16, %s11720_s18 }
 0x141   : > { %3076 = vrot.lane.b32.xlu0 %v11853_v40, %s11721_s19 }
 0x145   : > { %3176 = vrot.lane.b32.xlu0 %v11873_v60, %s11720_s18 }
 0x149   : > { %3280 = vrot.lane.b32.xlu0 %v11895_v16, %s11721_s19 }
 0x163   : > { %v675_v20 = vpop.permute.xlu0 %674 }
 0x164   : > { %v681_v41 = vsel %vm676_vm2, %v675_v20, 0 }
 0x165   : > { %10150 = vmatpush3.bf16.xpose.msra.mxu1 %v681_v41 }
 0x166   : > { %10155 = vmatprep.subr.bf16.mxu1 %v15254_v18 }
 0x167   : > { %v726_v43 = vpop.permute.xlu0 %725 }
 0x168   : > { %v731_v45 = vsel %vm676_vm2, %v726_v43, 0 }
 0x16b   : > { %v776_v44 = vpop.permute.xlu1 %775 }
 0x16c   : > { %10152 = vmatmul.mubr.msk.bf16.vlgmr.msra.gmra.mrb[16].mxu1 %vm676_vm2, %v11846_v32  ;;  %v781_v47 = vsel %vm676_vm2, %v776_v44, 0 }
 0x16d   : > { %10156 = vmatpush3.bf16.xpose.msra.mxu1 %v731_v45  ;;  %10157 = vmatprep.mubr.msk.bf16.mxu1 %vm11717_vm1, %v15254_v18 }
 0x16e   : > { %10161 = vmatprep.subr.bf16.mxu1 %v15254_v18 }
 0x16f   : > { %v826_v46 = vpop.permute.xlu1 %825 }
 0x170   : > { %v831_v54 = vsel %vm676_vm2, %v826_v46, 0 }
 0x173   : > { %v926_v48 = vpop.permute.xlu1 %925  ;;  %v876_v50 = vpop.permute.xlu0 %875 }
 0x174   : > { %10158 = vmatmul.mubr.msk.bf16.vlgmr.msra.gmra.mrb[20].mxu1 %vm676_vm2, %v11843_v29  ;;  %v881_v59 = vsel %vm676_vm2, %v876_v50, 0  ;;  %v931_v2 = vsel %vm676_vm2, %v926_v48, 0 }
 0x175   : > { %10162 = vmatpush3.bf16.xpose.msra.mxu1 %v781_v47  ;;  %10163 = vmatprep.mubr.msk.bf16.mxu1 %vm11717_vm1, %v15254_v18 }
 0x176   : > { %10167 = vmatprep.subr.bf16.mxu1 %v15254_v18 }
 0x17a   : > { %v1026_v51 = vpop.permute.xlu1 %1025 }
 0x17b   : > { %v976_v53 = vpop.permute.xlu0 %975  ;;  %v1031_v13 = vsel %vm676_vm2, %v1026_v51, 0 }
 0x17c   : > { %10164 = vmatmul.mubr.msk.bf16.vlgmr.msra.gmra.mrb[24].mxu1 %vm676_vm2, %v11866_v52  ;;  %v981_v7 = vsel %vm676_vm2, %v976_v53, 0 }
 0x17d   : > { %10168 = vmatpush3.bf16.xpose.msra.mxu1 %v831_v54  ;;  %10169 = vmatprep.mubr.msk.bf16.mxu1 %vm11717_vm1, %v15254_v18 }
 0x17e   : > { %v1226_v55 = vpop.permute.xlu1 %1225  ;;  %10173 = vmatprep.subr.bf16.mxu1 %v15254_v18 }
 0x17f   : > { %v1126_v56 = vpop.permute.xlu0 %1125  ;;  %v1231_v23 = vsel %vm676_vm2, %v1226_v55, 0 }
 0x180   : > { %v1131_v17 = vsel %vm676_vm2, %v1126_v56, 0 }
 0x182   : > { %v11999_v57 = vpop.permute.xlu1 %1425 }
 0x183   : > { %v1326_v58 = vpop.permute.xlu0 %1325  ;;  %v1431_v28 = vsel %vm676_vm2, %v11999_v57, 0 }
 0x184   : > { %10170 = vmatmul.mubr.msk.bf16.vlgmr.msra.gmra.mrb[28].mxu1 %vm676_vm2, %v11863_v49  ;;  %v1331_v26 = vsel %vm676_vm2, %v1326_v58, 0 }
 0x185   : > { %10174 = vmatpush3.bf16.xpose.msra.mxu1 %v881_v59  ;;  %10175 = vmatprep.mubr.msk.bf16.mxu1 %vm11717_vm1, %v15254_v18 }
 0x186   : > { %v1176_v61 = vpop.permute.xlu1 %1175  ;;  %10179 = vmatprep.subr.bf16.mxu1 %v15254_v18 }
 0x187   : > { %v1076_v63 = vpop.permute.xlu0 %1075  ;;  %v1181_v4 = vsel %vm676_vm2, %v1176_v61, 0 }
 0x188   : > { %v1081_v0 = vsel %vm676_vm2, %v1076_v63, 0 }
 0x189   : > { %10198 = vmatpush3.bf16.xpose.msra.mxu0 %v1081_v0 }
 0x18a   : > { %v12008_v1 = vpop.permute.xlu1 %1890  ;;  %10209 = vmatprep.subr.bf16.mxu0 %v15254_v18 }
 0x18b   : > { %v1276_v9 = vpop.permute.xlu0 %1275 }
 0x18c   : > { %10176 = vmatmul.mubr.msk.bf16.vlgmr.msra.gmra.mrb[32].mxu1 %vm676_vm2, %v11886_v8  ;;  %v1281_v11 = vsel %vm676_vm2, %v1276_v9, 0 }
 0x18d   : > { %10180 = vmatpush3.bf16.xpose.msra.mxu1 %v931_v2  ;;  %10181 = vmatprep.mubr.msk.bf16.mxu1 %vm11717_vm1, %v15254_v18 }
 0x18e   : > { %v12016_v3 = vpop.permute.xlu1 %2078  ;;  %10185 = vmatprep.subr.bf16.mxu1 %v15254_v18 }
 0x190   : > { %10200 = vmatmul.mubr.msk.bf16.vlgmr.msra.gmra.mrb[16].mxu0 %vm676_vm2, %v11855_v42 }
 0x191   : > { %10210 = vmatpush3.bf16.xpose.msra.mxu0 %v1181_v4  ;;  %10211 = vmatprep.mubr.msk.bf16.mxu0 %vm11717_vm1, %v15254_v18 }
 0x192   : > { %v12024_v6 = vpop.permute.xlu1 %2172  ;;  %10221 = vmatprep.subr.bf16.mxu0 %v15254_v18 }
 0x193   : > { %15345 = vst [vmem:[#allocation15_spill] sm:$0xff] %v12024_v6 }
 0x194   : > { %10182 = vmatmul.mubr.msk.bf16.vlgmr.msra.gmra.mrb[36].mxu1 %vm676_vm2, %v11883_v5 }
 0x195   : > { %10186 = vmatpush3.bf16.xpose.msra.mxu1 %v981_v7  ;;  %10187 = vmatprep.mubr.msk.bf16.mxu1 %vm11717_vm1, %v15254_v18 }
 0x196   : > { %v12032_v10 = vpop.permute.xlu1 %2666  ;;  %10191 = vmatprep.subr.bf16.mxu1 %v15254_v18 }
 0x197   : > { %15346 = vst [vmem:[#allocation16_spill] sm:$0xff] %v12032_v10 }
 0x198   : > { %10212 = vmatmul.mubr.msk.bf16.vlgmr.msra.gmra.mrb[20].mxu0 %vm676_vm2, %v11875_v62 }
 0x199   : > { %10222 = vmatpush3.bf16.xpose.msra.mxu0 %v1281_v11  ;;  %10223 = vmatprep.mubr.msk.bf16.mxu0 %vm11717_vm1, %v15254_v18 }
 0x19a   : > { %v12040_v12 = vpop.permute.xlu1 %2770  ;;  %10233 = vmatprep.subr.bf16.mxu0 %v15254_v18 }
 0x19b   : > { %15347 = vst [vmem:[#allocation17_spill] sm:$0xff] %v12040_v12 }
 0x19c   : > { %10188 = vmatmul.mubr.msk.bf16.vlgmr.msra.gmra.mrb[40].mxu1 %vm676_vm2, %v11906_v31 }
 0x19d   : > { %10192 = vmatpush3.bf16.xpose.msra.mxu1 %v1031_v13  ;;  %10193 = vmatprep.mubr.msk.bf16.mxu1 %vm11717_vm1, %v15254_v18 }
 0x19e   : > { %v12048_v14 = vpop.permute.xlu1 %2870  ;;  %10203 = vmatprep.subr.bf16.mxu1 %v15254_v18 }
 0x19f   : > { %15348 = vst [vmem:[#allocation18_spill] sm:$0xff] %v12048_v14 }
 0x1a0   : > { %10224 = vmatmul.mubr.msk.bf16.vlgmr.msra.gmra.mrb[24].mxu0 %vm676_vm2, %v11897_v19 }
 0x1a1   : > { %10235 = vmatprep.mubr.msk.bf16.mxu0 %vm11717_vm1, %v15254_v18 }
 0x1a2   : > { %v12055_v15 = vpop.permute.xlu1 %2974 }
 0x1a3   : > { %15349 = vst [vmem:[#allocation19_spill] sm:$0xff] %v12055_v15 }
 0x1a4   : > { %10194 = vmatmul.mubr.msk.bf16.vlgmr.msra.gmra.mrb[44].mxu1 %vm676_vm2, %v11903_v27 }
 0x1a5   : > { %10204 = vmatpush3.bf16.xpose.msra.mxu1 %v1131_v17  ;;  %10205 = vmatprep.mubr.msk.bf16.mxu1 %vm11717_vm1, %v15254_v18 }
 0x1a6   : > { %v12062_v21 = vpop.permute.xlu1 %3074  ;;  %10215 = vmatprep.subr.bf16.mxu1 %v15254_v18 }
 0x1a7   : > { %15350 = vst [vmem:[#allocation20_spill] sm:$0xff] %v12062_v21 }
 0x1aa   : > { %v12065_v22 = vpop.permute.xlu1 %3178 }
 0x1ab   : > { %15351 = vst [vmem:[#allocation21_spill] sm:$0xff] %v12065_v22 }
 0x1ac   : > { %10206 = vmatmul.mubr.msk.bf16.vlgmr.msra.gmra.mrb[48].mxu1 %vm676_vm2, %v11853_v40 }
 0x1ad   : > { %10216 = vmatpush3.bf16.xpose.msra.mxu1 %v1231_v23  ;;  %10217 = vmatprep.mubr.msk.bf16.mxu1 %vm11717_vm1, %v15254_v18 }
 0x1ae   : > { %v1376_v24 = vpop.permute.xlu1 %1375  ;;  %10227 = vmatprep.subr.bf16.mxu1 %v15254_v18 }
 0x1af   : > { %v1381_v25 = vsel %vm676_vm2, %v1376_v24, 0 }
 0x1b0   : > { %10234 = vmatpush3.bf16.xpose.msra.mxu0 %v1381_v25 }
 0x1b1   : > { %10245 = vmatprep.subr.bf16.mxu0 %v15254_v18 }
 0x1b4   : > { %10218 = vmatmul.mubr.msk.bf16.vlgmr.msra.gmra.mrb[52].mxu1 %vm676_vm2, %v11873_v60 }
 0x1b5   : > { %10228 = vmatpush3.bf16.xpose.msra.mxu1 %v1331_v26  ;;  %10229 = vmatprep.mubr.msk.bf16.mxu1 %vm11717_vm1, %v15254_v18 }
 0x1b6   : > { %10239 = vmatprep.subr.bf16.mxu1 %v15254_v18 }
 0x1b7   : > { %10236 = vmatmul.mubr.msk.bf16.vlgmr.msra.gmra.mrb[28].mxu0 %vm676_vm2, %v11917_v39 }
 0x1b8   : > { %10247 = vmatprep.mubr.msk.bf16.mxu0 %vm11717_vm1, %v15254_v18 }
 0x1bc   : > { %10230 = vmatmul.mubr.msk.bf16.vlgmr.msra.gmra.mrb[56].mxu1 %vm676_vm2, %v11895_v16 }
 0x1bd   : > { %10240 = vmatpush3.bf16.xpose.msra.mxu1 %v1431_v28  ;;  %10241 = vmatprep.mubr.msk.bf16.mxu1 %vm11717_vm1, %v15254_v18 }
 0x1be   : > { %10251 = vmatprep.subr.bf16.mxu1 %v15254_v18 }
 0x1c4   : > { %10242 = vmatmul.mubr.msk.bf16.vlgmr.msra.gmra.mrb[60].mxu1 %vm676_vm2, %v11915_v38 }
 0x1c5   : > { %10252 = vmatpush3.bf16.msra.mxu1 %v12008_v1  ;;  %10253 = vmatprep.mubr.msk.bf16.mxu1 %vm11717_vm1, %v15254_v18 }
 0x1c6   : > { %10263 = vmatprep.subr.bf16.mxu1 %v15254_v18 }
 0x23f   : > { %v717_v33 = vpop.f32.mrb[16].mxu1 }
 0x240   : > { %v10153_v35 = vpop.f32.mrb[17].mxu1  ;;  %v12109_v36 = vadd.f32 %v717_v33, %v12101_v30 }
 0x241   : > { %v720_v37 = vpop.f32.mrb[18].mxu1 }
 0x242   : > { %v10154_v20 = vpop.f32.mrb[19].mxu1  ;;  %v1475_v41 = vsel %vm1474_vm3, %v12109_v36, -inf  ;;  %v12114_v43 = vadd.f32 %v720_v37, %v12106_v34 }
 0x243   : > { %1476 = vmax.xlane.f32.xlu1 %v1475_v41 }
 0x244   : > { %v1478_v44 = vsel %vm1474_vm3, %v12114_v43, -inf }
 0x245   : > { %1479 = vmax.xlane.f32.xlu0 %v1478_v44 }
 0x247   : > { %v767_v45 = vpop.f32.mrb[20].mxu1 }
 0x248   : > { %v10159_v46 = vpop.f32.mrb[21].mxu1  ;;  %v12133_v25 = vadd.f32 %v767_v45, %v12101_v30 }
 0x249   : > { %v770_v47 = vpop.f32.mrb[22].mxu1 }
 0x24a   : > { %v10160_v48 = vpop.f32.mrb[23].mxu1  ;;  %v1481_v20 = vsel %vm1474_vm3, %v12133_v25, -inf }
 0x24b   : > { %v12146_v48 = vadd.f32 %v770_v47, %v12106_v34 }
 0x24f   : > { %v817_v50 = vpop.f32.mrb[24].mxu1 }
 0x250   : > { %v10165_v51 = vpop.f32.mrb[25].mxu1 }
 0x251   : > { %v820_v53 = vpop.f32.mrb[26].mxu1 }
 0x252   : > { %v10166_v54 = vpop.f32.mrb[27].mxu1 }
 0x257   : > { %v867_v55 = vpop.f32.mrb[28].mxu1 }
 0x258   : > { %v10171_v56 = vpop.f32.mrb[29].mxu1 }
 0x259   : > { %v12118_v57 = vpop.f32.mrb[30].mxu1 }
 0x25a   : > { %v10172_v58 = vpop.f32.mrb[31].mxu1 }
 0x25b   : > { %v12151_v58 = vadd.f32 %v820_v53, %v12106_v34 }
 0x25f   : > { %v917_v59 = vpop.f32.mrb[32].mxu1 }
 0x260   : > { %v10177_v61 = vpop.f32.mrb[33].mxu1 }
 0x261   : > { %v12120_v63 = vpop.f32.mrb[34].mxu1 }
 0x262   : > { %v10178_v0 = vpop.f32.mrb[35].mxu1 }
 0x263   : > { %v1117_v1 = vpop.f32.mrb[16].mxu0 }
 0x264   : > { %v12123_v2 = vadd.f32 %v1117_v1, %v12101_v30  ;;  %v10201_v4 = vpop.f32.mrb[17].mxu0  ;;  %v1484_v1 = vsel %vm1474_vm3, %v12146_v48, -inf }
 0x265   : > { %v1120_v7 = vpop.f32.mrb[18].mxu0  ;;  %v12156_v4 = vadd.f32 %v817_v50, %v12101_v30 }
 0x266   : > { %v12126_v9 = vadd.f32 %v1120_v7, %v12106_v34  ;;  %v10202_v11 = vpop.f32.mrb[19].mxu0  ;;  %v1523_v13 = vsel %vm1474_vm3, %v12123_v2, -inf }
 0x267   : > { %v967_v17 = vpop.f32.mrb[36].mxu1  ;;  %1524 = vmax.xlane.f32.xlu1 %v1523_v13  ;;  %v1490_v11 = vsel %vm1474_vm3, %v12151_v58, -inf }
 0x268   : > { %v10183_v23 = vpop.f32.mrb[37].mxu1  ;;  %v1526_v24 = vsel %vm1474_vm3, %v12126_v9, -inf }
 0x269   : > { %v970_v26 = vpop.f32.mrb[38].mxu1  ;;  %1527 = vmax.xlane.f32.xlu0 %v1526_v24 }
 0x26a   : > { %v10184_v28 = vpop.f32.mrb[39].mxu1 }
 0x26b   : > { %v1217_v33 = vpop.f32.mrb[20].mxu0  ;;  %v1487_v28 = vsel %vm1474_vm3, %v12156_v4, -inf }
 0x26c   : > { %v12136_v35 = vadd.f32 %v1217_v33, %v12101_v30  ;;  %v10213_v37 = vpop.f32.mrb[21].mxu0 }
 0x26d   : > { %1482 = vmax.xlane.f32.xlu0 %v1481_v20  ;;  %v1220_v41 = vpop.f32.mrb[22].mxu0  ;;  %v12171_v20 = vadd.f32 %v867_v55, %v12101_v30 }
 0x26e   : > { %v12141_v44 = vadd.f32 %v1220_v41, %v12106_v34  ;;  %v10214_v46 = vpop.f32.mrb[23].mxu0  ;;  %v1535_v45 = vsel %vm1474_vm3, %v12136_v35, -inf }
 0x26f   : > { %v1017_v51 = vpop.f32.mrb[40].mxu1  ;;  %1536 = vmax.xlane.f32.xlu1 %v1535_v45 }
 0x270   : > { %v10189_v54 = vpop.f32.mrb[41].mxu1  ;;  %v1538_v56 = vsel %vm1474_vm3, %v12141_v44, -inf }
 0x271   : > { %v1020_v61 = vpop.f32.mrb[42].mxu1  ;;  %1539 = vmax.xlane.f32.xlu0 %v1538_v56  ;;  %v12176_v54 = vadd.f32 %v917_v59, %v12101_v30  ;;  %v1493_v56 = vsel %vm1474_vm3, %v12171_v20, -inf }
 0x272   : > { %v10190_v0 = vpop.f32.mrb[43].mxu1 }
 0x273   : > { %1485 = vmax.xlane.f32.xlu1 %v1484_v1  ;;  %v1317_v47 = vpop.f32.mrb[24].mxu0  ;;  %v12182_v0 = vadd.f32 %v12118_v57, %v12106_v34  ;;  %v1499_v55 = vsel %vm1474_vm3, %v12176_v54, -inf  ;;  %v12187_v1 = vadd.f32 %v967_v17, %v12101_v30 }
 0x274   : > { %v10225_v7 = vpop.f32.mrb[25].mxu0  ;;  %v12161_v53 = vadd.f32 %v1317_v47, %v12101_v30 }
 0x275   : > { %1491 = vmax.xlane.f32.xlu0 %v1490_v11  ;;  %v1320_v13 = vpop.f32.mrb[26].mxu0  ;;  %v1496_v59 = vsel %vm1474_vm3, %v12182_v0, -inf  ;;  %v12193_v11 = vadd.f32 %v12120_v63, %v12106_v34 }
 0x276   : > { %v12164_v23 = vadd.f32 %v1320_v13, %v12106_v34  ;;  %v10226_v24 = vpop.f32.mrb[27].mxu0  ;;  %v1547_v45 = vsel %vm1474_vm3, %v12161_v53, -inf }
 0x277   : > { %v1067_v50 = vpop.f32.mrb[44].mxu1  ;;  %1488 = vmax.xlane.f32.xlu1 %v1487_v28  ;;  %v1505_v24 = vsel %vm1474_vm3, %v12187_v1, -inf  ;;  %v12198_v28 = vadd.f32 %v1017_v51, %v12101_v30  ;;  %v1502_v17 = vsel %vm1474_vm3, %v12193_v11, -inf }
 0x278   : > { %v10195_v33 = vpop.f32.mrb[45].mxu1  ;;  %v1550_v37 = vsel %vm1474_vm3, %v12164_v23, -inf }
 0x279   : > { %v1070_v41 = vpop.f32.mrb[46].mxu1  ;;  %1551 = vmax.xlane.f32.xlu0 %v1550_v37  ;;  %v12203_v33 = vadd.f32 %v970_v26, %v12106_v34  ;;  %v1511_v63 = vsel %vm1474_vm3, %v12198_v28, -inf  ;;  %v12208_v37 = vadd.f32 %v1067_v50, %v12101_v30 }
 0x27a   : > { %v10196_v46 = vpop.f32.mrb[47].mxu1 }
 0x27b   : > { %1548 = vmax.xlane.f32.xlu1 %v1547_v45  ;;  %v1508_v51 = vsel %vm1474_vm3, %v12203_v33, -inf }
 0x27d   : > { %1494 = vmax.xlane.f32.xlu0 %v1493_v56  ;;  %v12213_v56 = vadd.f32 %v1020_v61, %v12106_v34 }
 0x27f   : > { %v1167_v47 = vpop.f32.mrb[48].mxu1  ;;  %1500 = vmax.xlane.f32.xlu1 %v1499_v55 }
 0x280   : > { %v10207_v7 = vpop.f32.mrb[49].mxu1 }
 0x281   : > { %v1170_v13 = vpop.f32.mrb[50].mxu1  ;;  %1497 = vmax.xlane.f32.xlu0 %v1496_v59  ;;  %v1517_v59 = vsel %vm1474_vm3, %v12208_v37, -inf }
 0x282   : > { %v10208_v57 = vpop.f32.mrb[51].mxu1 }
 0x283   : > { %1506 = vmax.xlane.f32.xlu1 %v1505_v24  ;;  %v12218_v57 = vadd.f32 %v1167_v47, %v12101_v30 }
 0x285   : > { %1503 = vmax.xlane.f32.xlu0 %v1502_v17  ;;  %v1514_v17 = vsel %vm1474_vm3, %v12213_v56, -inf }
 0x287   : > { %v1267_v46 = vpop.f32.mrb[52].mxu1  ;;  %1512 = vmax.xlane.f32.xlu1 %v1511_v63  ;;  %v12223_v63 = vadd.f32 %v1070_v41, %v12106_v34 }
 0x288   : > { %v10219_v45 = vpop.f32.mrb[53].mxu1 }
 0x289   : > { %v1270_v55 = vpop.f32.mrb[54].mxu1  ;;  %1509 = vmax.xlane.f32.xlu0 %v1508_v51  ;;  %v1529_v45 = vsel %vm1474_vm3, %v12218_v57, -inf  ;;  %v12228_v51 = vadd.f32 %v1267_v46, %v12101_v30 }
 0x28a   : > { %v10220_v26 = vpop.f32.mrb[55].mxu1  ;;  %v1417_v7 = vpop.f32.mrb[28].mxu0 }
 0x28b   : > { %1518 = vmax.xlane.f32.xlu1 %v1517_v59  ;;  %v10237_v50 = vpop.f32.mrb[29].mxu0  ;;  %v1520_v59 = vsel %vm1474_vm3, %v12223_v63, -inf }
 0x28c   : > { %v1420_v24 = vpop.f32.mrb[30].mxu0  ;;  %v12233_v50 = vadd.f32 %v1170_v13, %v12106_v34 }
 0x28d   : > { %1515 = vmax.xlane.f32.xlu0 %v1514_v17  ;;  %v10238_v61 = vpop.f32.mrb[31].mxu0  ;;  %v1541_v17 = vsel %vm1474_vm3, %v12228_v51, -inf  ;;  %v12258_v22 = vadd.f32 %v1420_v24, %v12106_v34 }
 0x28e   : > { %v1532_v46 = vsel %vm1474_vm3, %v12233_v50, -inf }
 0x28f   : > { %v1367_v26 = vpop.f32.mrb[56].mxu1  ;;  %1530 = vmax.xlane.f32.xlu1 %v1529_v45  ;;  %v12243_v45 = vadd.f32 %v1270_v55, %v12106_v34 }
 0x290   : > { %v10231_v47 = vpop.f32.mrb[57].mxu1  ;;  %v12238_v61 = vadd.f32 %v1367_v26, %v12101_v30 }
 0x291   : > { %v1370_v18 = vpop.f32.mrb[58].mxu1  ;;  %1521 = vmax.xlane.f32.xlu0 %v1520_v59 }
 0x292   : > { %v10232_v41 = vpop.f32.mrb[59].mxu1  ;;  %v1553_v13 = vsel %vm1474_vm3, %v12238_v61, -inf }
 0x293   : > { %1542 = vmax.xlane.f32.xlu1 %v1541_v17  ;;  %v1544_v41 = vsel %vm1474_vm3, %v12243_v45, -inf  ;;  %v12253_v17 = vadd.f32 %v1370_v18, %v12106_v34 }
 0x295   : > { %1533 = vmax.xlane.f32.xlu0 %v1532_v46 }
 0x297   : > { %v1467_v47 = vpop.f32.mrb[60].mxu1  ;;  %1554 = vmax.xlane.f32.xlu1 %v1553_v13  ;;  %v1556_v13 = vsel %vm1474_vm3, %v12253_v17, -inf }
 0x298   : > { %v10243_v59 = vpop.f32.mrb[61].mxu1  ;;  %v12250_v26 = vadd.f32 %v1467_v47, %v12101_v30  ;;  %v1562_v47 = vsel %vm1474_vm3, %v12258_v22, -inf }
 0x299   : > { %v1470_v21 = vpop.f32.mrb[62].mxu1  ;;  %1545 = vmax.xlane.f32.xlu0 %v1544_v41  ;;  %v12269_v41 = vpop.permute.xlu0 %1984 }
 0x29a   : > { %v10244_v55 = vpop.f32.mrb[63].mxu1  ;;  %v1565_v46 = vsel %vm1474_vm3, %v12250_v26, -inf  ;;  %v12265_v18 = vadd.f32 %v1470_v21, %v12106_v34  ;;  %v12284_v34 = vadd.f32 %v1417_v7, %v12101_v30 }
 0x29b   : > { %1566 = vmax.xlane.f32.xlu1 %v1565_v46 }
 0x29c   : > { %v1568_v59 = vsel %vm1474_vm3, %v12265_v18, -inf }
 0x29d   : > { %1557 = vmax.xlane.f32.xlu0 %v1556_v13  ;;  %v12273_v24 = vpop.permute.xlu0 %2266 }
 0x29e   : > { %15352 = vst [vmem:[#allocation22_spill] sm:$0xff] %v12273_v24 }
 0x2a1   : > { %1563 = vmax.xlane.f32.xlu0 %v1562_v47  ;;  %v12275_v55 = vpop.permute.xlu0 %2360  ;;  %v1559_v47 = vsel %vm1474_vm3, %v12284_v34, -inf }
 0x2a2   : > { %15353 = vst [vmem:[#allocation23_spill] sm:$0xff] %v12275_v55 }
 0x2a5   : > { %1569 = vmax.xlane.f32.xlu0 %v1568_v59  ;;  %v12277_v46 = vpop.permute.xlu0 %2454 }
 0x2a6   : > { %15354 = vst [vmem:[#allocation24_spill] sm:$0xff] %v12277_v46 }
 0x2a9   : > { %v12279_v13 = vpop.permute.xlu0 %2548 }
 0x2aa   : > { %15355 = vst [vmem:[#allocation25_spill] sm:$0xff] %v12279_v13 }
 0x2ac   : > { %3382 = vrot.lane.b32.xlu1 %v11915_v38, %s11721_s19 }
 0x2ad   : > { %v12281_v21 = vpop.permute.xlu0 %2668 }
 0x2ae   : > { %15356 = vst [vmem:[#allocation26_spill] sm:$0xff] %v12281_v21  ;;  %v12300_v21 = vpop.permute.xlu1 %3278 }
 0x2af   : > { %15363 = vst [vmem:[#allocation33_spill] sm:$0xff] %v12300_v21 }
 0x2b1   : > { %v12288_v59 = vpop.permute.xlu0 %2768 }
 0x2b2   : > { %15357 = vst [vmem:[#allocation27_spill] sm:$0xff] %v12288_v59 }
 0x2b5   : > { %v12290_v14 = vpop.permute.xlu0 %2872 }
 0x2b6   : > { %15358 = vst [vmem:[#allocation28_spill] sm:$0xff] %v12290_v14 }
 0x2b9   : > { %v12292_v15 = vpop.permute.xlu0 %2972 }
 0x2ba   : > { %15359 = vst [vmem:[#allocation29_spill] sm:$0xff] %v12292_v15 }
 0x2bd   : > { %v12294_v10 = vpop.permute.xlu0 %3076 }
 0x2be   : > { %15360 = vst [vmem:[#allocation30_spill] sm:$0xff] %v12294_v10 }
 0x2c1   : > { %v12296_v12 = vpop.permute.xlu0 %3176 }
 0x2c2   : > { %15361 = vst [vmem:[#allocation31_spill] sm:$0xff] %v12296_v12 }
 0x2c5   : > { %v12298_v16 = vpop.permute.xlu0 %3280 }
 0x2c6   : > { %15362 = vst [vmem:[#allocation32_spill] sm:$0xff] %v12298_v16 }
 0x2d0   : > { %1560 = vmax.xlane.f32.xlu1 %v1559_v47  ;;  %v12302_v7 = vpop.xlane.xlu1 %1476 }
 0x2d2   : > { %v1480_v30 = vpop.xlane.xlu0 %1479 }
 0x2f4   : > { %v12306_v40 = vpop.xlane.xlu1 %1524 }
 0x2f6   : > { %v12304_v13 = vpop.xlane.xlu0 %1527 }
 0x2fa   : > { %v1483_v47 = vpop.xlane.xlu0 %1482 }
 0x2fb   : > { %v1573_v59 = vsub.f32 %v12133_v25, %v1483_v47 }
 0x2fc   : > { %v12309_v14 = vpop.xlane.xlu1 %1536 }
 0x2fd   : > { %v1607_v15 = vmul.f32 1.442695, %v1573_v59 }
 0x2fe   : > { %v12311_v10 = vpop.xlane.xlu0 %1539 }
 0x2ff   : > { %11196 = vpow2.f32 %v1607_v15 }
 0x300   : > { %v1486_v12 = vpop.xlane.xlu1 %1485 }
 0x301   : > { %v1574_v16 = vsub.f32 %v12146_v48, %v1486_v12 }
 0x302   : > { %v1492_v21 = vpop.xlane.xlu0 %1491 }
 0x303   : > { %v1609_v46 = vmul.f32 1.442695, %v1574_v16  ;;  %v1572_v16 = vsub.f32 %v12114_v43, %v1480_v30 }
 0x304   : > { %v1489_v55 = vpop.xlane.xlu1 %1488 }
 0x305   : > { %11198 = vpow2.f32 %v1609_v46 }
 0x306   : > { %v12314_v5 = vpop.xlane.xlu0 %1551 }
 0x308   : > { %v12316_v24 = vpop.xlane.xlu1 %1548 }
 0x309   : > { %v12318_v6 = vpop.eup %11196 }
 0x30a   : > { %v1495_v25 = vpop.xlane.xlu0 %1494  ;;  %v1673_v59 = vsel %vm1474_vm3, %v12318_v6, 0.0 }
 0x30b   : > { %v1577_v47 = vsub.f32 %v12171_v20, %v1495_v25  ;;  %1674 = vadd.xlane.f32.xlu1 %v1673_v59  ;;  %v1605_v25 = vmul.f32 1.442695, %v1572_v16  ;;  %v1575_v59 = vsub.f32 %v12156_v4, %v1489_v55 }
 0x30c   : > { %v1501_v15 = vpop.xlane.xlu1 %1500 }
 0x30d   : > { %v1615_v29 = vmul.f32 1.442695, %v1577_v47  ;;  %v1611_v43 = vmul.f32 1.442695, %v1575_v59  ;;  %v1579_v4 = vsub.f32 %v12176_v54, %v1501_v15 }
 0x30e   : > { %v1498_v12 = vpop.xlane.xlu0 %1497 }
 0x30f   : > { %v12323_v48 = vpop.eup %11198  ;;  %11200 = vpow2.f32 %v1615_v29  ;;  %v1578_v46 = vsub.f32 %v12182_v0, %v1498_v12  ;;  %v1576_v29 = vsub.f32 %v12151_v58, %v1492_v21  ;;  %v1619_v55 = vmul.f32 1.442695, %v1579_v4 }
 0x310   : > { %v1507_v60 = vpop.xlane.xlu1 %1506  ;;  %v1676_v27 = vsel %vm1474_vm3, %v12323_v48, 0.0 }
 0x311   : > { %v1617_v49 = vmul.f32 1.442695, %v1578_v46  ;;  %v1581_v39 = vsub.f32 %v12187_v1, %v1507_v60  ;;  %1677 = vadd.xlane.f32.xlu0 %v1676_v27  ;;  %v1613_v27 = vmul.f32 1.442695, %v1576_v29 }
 0x312   : > { %v1504_v20 = vpop.xlane.xlu0 %1503 }
 0x313   : > { %11202 = vpow2.f32 %v1617_v49  ;;  %v1623_v47 = vmul.f32 1.442695, %v1581_v39  ;;  %v1580_v21 = vsub.f32 %v12193_v11, %v1504_v20 }
 0x314   : > { %v1513_v30 = vpop.xlane.xlu1 %1512 }
 0x315   : > { %11204 = vpow2.f32 %v1623_v47  ;;  %v1583_v59 = vsub.f32 %v12198_v28, %v1513_v30 }
 0x316   : > { %v12331_v19 = vpop.xlane.xlu0 %1509  ;;  %11206 = vpow2.f32 %v1605_v25  ;;  %v1621_v25 = vmul.f32 1.442695, %v1580_v21 }
 0x317   : > { %11208 = vpow2.f32 %v1611_v43  ;;  %v1627_v43 = vmul.f32 1.442695, %v1583_v59 }
 0x318   : > { %11210 = vpow2.f32 %v1613_v27  ;;  %v1519_v16 = vpop.xlane.xlu1 %1518 }
 0x319   : > { %v12334_v0 = vpop.eup %11200  ;;  %11212 = vpow2.f32 %v1619_v55 }
 0x31a   : > { %v1516_v12 = vpop.xlane.xlu0 %1515  ;;  %v1685_v60 = vsel %vm1474_vm3, %v12334_v0, 0.0  ;;  %11214 = vpow2.f32 %v1621_v25 }
 0x31b   : > { %1686 = vadd.xlane.f32.xlu1 %v1685_v60  ;;  %v1585_v60 = vsub.f32 %v12208_v37, %v1519_v16  ;;  %11216 = vpow2.f32 %v1627_v43 }
 0x31c   : > { %v1531_v11 = vpop.xlane.xlu1 %1530 }
 0x31d   : > { %v12339_v49 = vpop.eup %11202  ;;  %v1631_v30 = vmul.f32 1.442695, %v1585_v60 }
 0x31e   : > { %v12341_v39 = vpop.xlane.xlu0 %1521  ;;  %v1688_v58 = vsel %vm1474_vm3, %v12339_v49, 0.0 }
 0x31f   : > { %v12345_v1 = vpop.eup %11204  ;;  %1689 = vadd.xlane.f32.xlu0 %v1688_v58  ;;  %v1584_v58 = vsub.f32 %v12213_v56, %v1516_v12  ;;  %11218 = vpow2.f32 %v1631_v30 }
 0x320   : > { %v1697_v46 = vsel %vm1474_vm3, %v12345_v1, 0.0  ;;  %v12350_v54 = vpop.eup %11206  ;;  %v1543_v55 = vpop.xlane.xlu1 %1542 }
 0x321   : > { %1698 = vadd.xlane.f32.xlu1 %v1697_v46  ;;  %v1670_v47 = vsel %vm1474_vm3, %v12350_v54, 0.0  ;;  %v12357_v29 = vpop.eup %11208  ;;  %v1629_v16 = vmul.f32 1.442695, %v1584_v58  ;;  %v1593_v25 = vsub.f32 %v12228_v51, %v1543_v55 }
 0x322   : > { %v12352_v15 = vpop.xlane.xlu0 %1533  ;;  %v1679_v27 = vsel %vm1474_vm3, %v12357_v29, 0.0  ;;  %v12364_v4 = vpop.eup %11210 }
 0x323   : > { %v1682_v21 = vsel %vm1474_vm3, %v12364_v4, 0.0  ;;  %v12371_v46 = vpop.eup %11212  ;;  %11220 = vpow2.f32 %v1629_v16  ;;  %v1647_v12 = vmul.f32 1.442695, %v1593_v25 }
 0x324   : > { %v1691_v59 = vsel %vm1474_vm3, %v12371_v46, 0.0 }
 0x325   : > { %1671 = vadd.xlane.f32.xlu1 %v1670_v47  ;;  %v12378_v47 = vpop.eup %11214  ;;  %11222 = vpow2.f32 %v1647_v12 }
 0x326   : > { %v12359_v20 = vpop.xlane.xlu0 %1545  ;;  %v1694_v60 = vsel %vm1474_vm3, %v12378_v47, 0.0 }
 0x329   : > { %1680 = vadd.xlane.f32.xlu1 %v1679_v27  ;;  %v12383_v27 = vpop.eup %11216 }
 0x32a   : > { %v12366_v28 = vpop.xlane.xlu0 %1557  ;;  %v1703_v30 = vsel %vm1474_vm3, %v12383_v27, 0.0  ;;  %v12389_v58 = vpop.eup %11218 }
 0x32d   : > { %1683 = vadd.xlane.f32.xlu1 %v1682_v21  ;;  %v12393_v55 = vpop.eup %11220  ;;  %v1582_v21 = vsub.f32 %v12203_v33, %v12331_v19  ;;  %v1586_v19 = vsub.f32 %v12223_v63, %v12341_v39  ;;  %v1594_v63 = vsub.f32 %v12243_v45, %v12359_v20  ;;  %v1555_v39 = vpop.xlane.xlu1 %1554  ;;  %v1598_v45 = vsub.f32 %v12253_v17, %v12366_v28 }
 0x32e   : > { %v12373_v37 = vpop.xlane.xlu0 %1563  ;;  %v1706_v16 = vsel %vm1474_vm3, %v12393_v55, 0.0  ;;  %v1587_v17 = vsub.f32 %v12123_v2, %v12306_v40  ;;  %v1591_v40 = vsub.f32 %v12136_v35, %v12309_v14 }
 0x32f   : > { %v12399_v25 = vpop.eup %11222 }
 0x330   : > { %v1733_v12 = vsel %vm1474_vm3, %v12399_v25, 0.0 }
 0x331   : > { %1692 = vadd.xlane.f32.xlu1 %v1691_v59  ;;  %v1571_v59 = vsub.f32 %v12109_v36, %v12302_v7  ;;  %v1633_v36 = vmul.f32 1.442695, %v1586_v19  ;;  %v1567_v20 = vpop.xlane.xlu1 %1566  ;;  %v1657_v19 = vmul.f32 1.442695, %v1598_v45 }
 0x332   : > { %v1570_v56 = vpop.xlane.xlu0 %1569 }
 0x333   : > { %v1602_v43 = vsub.f32 %v12265_v18, %v1570_v56  ;;  %v1709_v18 = vsel %vm1474_vm3, %v12389_v58, 0.0  ;;  %v1625_v56 = vmul.f32 1.442695, %v1582_v21 }
 0x335   : > { %3380 = vrot.lane.b32.xlu0 %v11915_v38, %s11720_s18  ;;  %1695 = vadd.xlane.f32.xlu1 %v1694_v60  ;;  %v1665_v51 = vmul.f32 1.442695, %v1602_v43  ;;  %v1603_v60 = vmul.f32 1.442695, %v1571_v59 }
 0x337   : > { %11224 = vpow2.f32 %v1665_v51  ;;  %v1589_v51 = vsub.f32 %v12218_v57, %v1531_v11  ;;  %v1597_v57 = vsub.f32 %v12238_v61, %v1555_v39  ;;  %v1649_v11 = vmul.f32 1.442695, %v1594_v63 }
 0x338   : > { %11226 = vpow2.f32 %v1625_v56 }
 0x339   : > { %1704 = vadd.xlane.f32.xlu1 %v1703_v30  ;;  %11228 = vpow2.f32 %v1603_v60  ;;  %v1639_v7 = vmul.f32 1.442695, %v1589_v51  ;;  %v1590_v30 = vsub.f32 %v12233_v50, %v12352_v15  ;;  %v1655_v56 = vmul.f32 1.442695, %v1597_v57 }
 0x33a   : > { %11230 = vpow2.f32 %v1633_v36  ;;  %v1601_v60 = vsub.f32 %v12250_v26, %v1567_v20  ;;  %v1588_v26 = vsub.f32 %v12126_v9, %v12304_v13  ;;  %v1643_v57 = vmul.f32 1.442695, %v1591_v40 }
 0x33b   : > { %11232 = vpow2.f32 %v1639_v7  ;;  %v1641_v21 = vmul.f32 1.442695, %v1590_v30  ;;  %v1635_v30 = vmul.f32 1.442695, %v1587_v17 }
 0x33c   : > { %v1663_v28 = vmul.f32 1.442695, %v1601_v60  ;;  %v1637_v2 = vmul.f32 1.442695, %v1588_v26  ;;  %v1596_v26 = vsub.f32 %v12164_v23, %v12314_v5 }
 0x33d   : > { %1710 = vadd.xlane.f32.xlu1 %v1709_v18  ;;  %11234 = vpow2.f32 %v1641_v21 }
 0x33e   : > { %11236 = vpow2.f32 %v1649_v11 }
 0x33f   : > { %11238 = vpow2.f32 %v1655_v56 }
 0x340   : > { %11240 = vpow2.f32 %v1657_v19 }
 0x341   : > { %1707 = vadd.xlane.f32.xlu1 %v1706_v16  ;;  %v12405_v43 = vpop.eup %11224  ;;  %11242 = vpow2.f32 %v1663_v28 }
 0x342   : > { %v1760_v33 = vsel %vm1474_vm3, %v12405_v43, 0.0  ;;  %v12414_v18 = vpop.eup %11226  ;;  %11244 = vpow2.f32 %v1635_v30  ;;  %v1600_v30 = vsub.f32 %v12258_v22, %v12373_v37 }
 0x343   : > { %v1700_v16 = vsel %vm1474_vm3, %v12414_v18, 0.0  ;;  %v12420_v59 = vpop.eup %11228  ;;  %11246 = vpow2.f32 %v1637_v2  ;;  %v1653_v2 = vmul.f32 1.442695, %v1596_v26 }
 0x344   : > { %v1667_v50 = vsel %vm1474_vm3, %v12420_v59, 0.0  ;;  %v12425_v15 = vpop.eup %11230  ;;  %11248 = vpow2.f32 %v1643_v57  ;;  %v1661_v40 = vmul.f32 1.442695, %v1600_v30 }
 0x345   : > { %1734 = vadd.xlane.f32.xlu1 %v1733_v12  ;;  %v1712_v12 = vsel %vm1474_vm3, %v12425_v15, 0.0  ;;  %v12433_v61 = vpop.eup %11232 }
 0x347   : > { %v12438_v51 = vpop.eup %11234 }
 0x348   : > { %v1724_v36 = vsel %vm1474_vm3, %v12438_v51, 0.0  ;;  %v12444_v7 = vpop.eup %11236 }
 0x349   : > { %1761 = vadd.xlane.f32.xlu1 %v1760_v33  ;;  %v1721_v33 = vsel %vm1474_vm3, %v12433_v61, 0.0  ;;  %v1736_v21 = vsel %vm1474_vm3, %v12444_v7, 0.0  ;;  %v12450_v63 = vpop.eup %11238 }
 0x34a   : > { %v1745_v39 = vsel %vm1474_vm3, %v12450_v63, 0.0 }
 0x354   : > { %1701 = vadd.xlane.f32.xlu0 %v1700_v16  ;;  %v12456_v16 = vpop.eup %11240 }
 0x355   : > { %v1748_v9 = vsel %vm1474_vm3, %v12456_v16, 0.0  ;;  %v12460_v13 = vpop.eup %11242 }
 0x356   : > { %v1757_v14 = vsel %vm1474_vm3, %v12460_v13, 0.0  ;;  %v12464_v35 = vpop.eup %11244 }
 0x357   : > { %v1715_v11 = vsel %vm1474_vm3, %v12464_v35, 0.0 }
 0x358   : > { %1668 = vadd.xlane.f32.xlu0 %v1667_v50  ;;  %v12468_v50 = vpop.eup %11246 }
 0x359   : > { %v12470_v56 = vpop.eup %11248  ;;  %v1718_v45 = vsel %vm1474_vm3, %v12468_v50, 0.0 }
 0x35a   : > { %1843 = vrot.lane.b32.xlu1 %v11846_v32, %s11719_s17  ;;  %v1727_v20 = vsel %vm1474_vm3, %v12470_v56, 0.0 }
 0x35c   : > { %1713 = vadd.xlane.f32.xlu0 %v1712_v12  ;;  %v12478_v12 = vpop.permute.xlu1 %3382 }
 0x360   : > { %1722 = vadd.xlane.f32.xlu0 %v1721_v33  ;;  %v1561_v60 = vpop.xlane.xlu1 %1560  ;;  %v1592_v33 = vsub.f32 %v12141_v44, %v12311_v10 }
 0x361   : > { %v1599_v10 = vsub.f32 %v12284_v34, %v1561_v60  ;;  %v15364_v34 = vmov 0.0  }
 0x362   : > { %v1645_v28 = vmul.f32 1.442695, %v1592_v33 }
 0x363   : > { %v1659_v22 = vmul.f32 1.442695, %v1599_v10 }
 0x364   : > { %1725 = vadd.xlane.f32.xlu0 %v1724_v36  ;;  %v1595_v36 = vsub.f32 %v12161_v53, %v12316_v24 }
 0x368   : > { %1737 = vadd.xlane.f32.xlu0 %v1736_v21  ;;  %v1651_v21 = vmul.f32 1.442695, %v1595_v36 }
 0x36c   : > { %1746 = vadd.xlane.f32.xlu0 %v1745_v39 }
 0x370   : > { %1749 = vadd.xlane.f32.xlu0 %v1748_v9 }
 0x374   : > { %1758 = vadd.xlane.f32.xlu0 %v1757_v14 }
 0x378   : > { %1716 = vadd.xlane.f32.xlu0 %v1715_v11 }
 0x37c   : > { %1719 = vadd.xlane.f32.xlu0 %v1718_v45 }
 0x37e   : > { %1728 = vadd.xlane.f32.xlu1 %v1727_v20 }
 0x38f   : > { %2031 = vrot.lane.b32.xlu1 %v11886_v8, %s11719_s17 }
 0x392   : > { %1937 = vrot.lane.b32.xlu0 %v11866_v52, %s11719_s17 }
 0x393   : > { %2125 = vrot.lane.b32.xlu1 %v11906_v31, %s11719_s17 }
 0x398   : > { %v1675_v19 = vpop.xlane.xlu1 %1674 }
 0x399   : > { %11250 = vrcp.f32 %v1675_v19 }
 0x39e   : > { %v1678_v17 = vpop.xlane.xlu0 %1677 }
 0x39f   : > { %11252 = vrcp.f32 %v1678_v17 }
 0x3a0   : > { %11254 = vpow2.f32 %v1645_v28 }
 0x3a1   : > { %11256 = vpow2.f32 %v1651_v21 }
 0x3a2   : > { %11258 = vpow2.f32 %v1661_v40 }
 0x3a3   : > { %v11251_v39 = vpop.eup %11250  ;;  %11260 = vpow2.f32 %v1653_v2 }
 0x3a4   : > { %v1797_v53 = vmul.f32 %v11251_v39, %v12318_v6 }
 0x3a8   : > { %v1687_v44 = vpop.xlane.xlu1 %1686 }
 0x3a9   : > { %v11253_v57 = vpop.eup %11252  ;;  %11262 = vrcp.f32 %v1687_v44 }
 0x3aa   : > { %v1798_v24 = vmul.f32 %v11253_v57, %v12323_v48  ;;  %v12495_v23 = vpop.eup %11254  ;;  %v15365_v57 = vld [vmem:[#allocation11_spill] sm:$0xff] }
 0x3ab   : > { %v1730_v6 = vsel %vm1474_vm3, %v12495_v23, 0.0  ;;  %v12504_v48 = vpop.eup %11256 }
 0x3ac   : > { %v1690_v37 = vpop.xlane.xlu0 %1689  ;;  %v1828_v5 = vpack.c.bf16 %v1798_v24, %v1797_v53  ;;  %v12506_v11 = vpop.eup %11258  ;;  %v1739_v20 = vsel %vm1474_vm3, %v12504_v48, 0.0  ;;  %v15366_v24 = vld [vmem:[#allocation14_spill] sm:$0xff] }
 0x3ad   : > { %11264 = vrcp.f32 %v1690_v37  ;;  %v12508_v45 = vpop.eup %11260  ;;  %v1754_v19 = vsel %vm1474_vm3, %v12506_v11, 0.0  ;;  %v15367_v37 = vld [vmem:[#allocation5_spill] sm:$0xff] }
 0x3ae   : > { %v1699_v9 = vpop.xlane.xlu1 %1698  ;;  %10254 = vmatmul.mubr.msk.bf16.vlgmr.msra.gmra.mrb[64].mxu1 %vm1474_vm3, %v1828_v5  ;;  %11266 = vpow2.f32 %v1659_v22  ;;  %v1742_v36 = vsel %vm1474_vm3, %v12508_v45, 0.0 }
 0x3af   : > { %10264 = vmatpush3.bf16.msra.mxu1 %v12269_v41  ;;  %10265 = vmatprep.mubr.msk.bf16.mxu1 %vm11717_vm1, %v15364_v34  ;;  %11268 = vrcp.f32 %v1699_v9  ;;  %v15369_v9 = vld [vmem:[#allocation6_spill] sm:$0xff] }
 0x3b0   : > { %10275 = vmatprep.subr.bf16.mxu1 %v15364_v34  ;;  %v12562_v22 = vpop.permute.xlu0 %3380 }
 0x3b1   : > { %1731 = vadd.xlane.f32.xlu0 %v1730_v6  ;;  %v15368_v6 = vld [vmem:[#allocation12_spill] sm:$0xff] }
 0x3b2   : > { %v1672_v14 = vpop.xlane.xlu1 %1671 }
 0x3b3   : > { %v11263_v41 = vpop.eup %11262 }
 0x3b4   : > { %v1801_v17 = vmul.f32 %v11263_v41, %v12334_v0 }
 0x3b5   : > { %1740 = vadd.xlane.f32.xlu0 %v1739_v20 }
 0x3b6   : > { %v12512_v60 = vpop.xlane.xlu1 %1680 }
 0x3b7   : > { %v11265_v33 = vpop.eup %11264  ;;  %1755 = vadd.xlane.f32.xlu1 %v1754_v19 }
 0x3b8   : > { %v1802_v28 = vmul.f32 %v11265_v33, %v12339_v49  ;;  %v12520_v30 = vpop.eup %11266 }
 0x3b9   : > { %1743 = vadd.xlane.f32.xlu0 %v1742_v36  ;;  %v1751_v40 = vsel %vm1474_vm3, %v12520_v30, 0.0  ;;  %v11269_v19 = vpop.eup %11268 }
 0x3ba   : > { %v12522_v26 = vpop.xlane.xlu1 %1683  ;;  %v1830_v21 = vpack.c.bf16 %v1802_v28, %v1801_v17  ;;  %v1805_v17 = vmul.f32 %v11269_v19, %v12345_v1 }
 0x3bc   : > { %10266 = vmatmul.mubr.msk.bf16.vlgmr.msra.gmra.mrb[68].mxu1 %vm1474_vm3, %v1830_v21 }
 0x3bd   : > { %10276 = vmatpush3.bf16.msra.mxu1 %v12016_v3  ;;  %1752 = vadd.xlane.f32.xlu0 %v1751_v40 }
 0x3be   : > { %v12528_v0 = vpop.xlane.xlu1 %1692  ;;  %10277 = vmatprep.mubr.msk.bf16.mxu1 %vm11717_vm1, %v15364_v34  ;;  %10287 = vmatprep.subr.bf16.mxu1 %v15364_v34 }
 0x3c2   : > { %v12533_v49 = vpop.xlane.xlu1 %1695 }
 0x3c6   : > { %v12535_v2 = vpop.xlane.xlu1 %1704 }
 0x3c8   : > { %2615 = vrot.lane.b32.xlu1 %v11846_v32, %s11720_s18 }
 0x3ca   : > { %v1711_v39 = vpop.xlane.xlu1 %1710 }
 0x3cc   : > { %2923 = vrot.lane.b32.xlu1 %v11906_v31, %s11721_s19 }
 0x3ce   : > { %v12541_v3 = vpop.xlane.xlu1 %1707 }
 0x3d0   : > { %3025 = vrot.lane.b32.xlu1 %v11855_v42, %s11721_s19 }
 0x3d2   : > { %v12545_v10 = vpop.xlane.xlu1 %1734 }
 0x3d3   : > { %2219 = vrot.lane.b32.xlu0 %v11855_v42, %s11719_s17 }
 0x3d4   : > { %3127 = vrot.lane.b32.xlu1 %v11875_v62, %s11721_s19 }
 0x3d6   : > { %v12551_v44 = vpop.xlane.xlu1 %1761 }
 0x3d7   : > { %2313 = vrot.lane.b32.xlu0 %v11875_v62, %s11719_s17 }
 0x3d8   : > { %3229 = vrot.lane.b32.xlu1 %v15365_v57, %s11721_s19 }
 0x3da   : > { %v1844_v53 = vpop.permute.xlu1 %1843 }
 0x3db   : > { %2407 = vrot.lane.b32.xlu0 %v15365_v57, %s11719_s17  ;;  %10246 = vmatpush3.bf16.msra.mxu0 %v1844_v53 }
 0x3dc   : > { %3331 = vrot.lane.b32.xlu1 %v15366_v24, %s11721_s19  ;;  %10257 = vmatprep.subr.bf16.mxu0 %v15364_v34 }
 0x3df   : > { %2501 = vrot.lane.b32.xlu0 %v15366_v24, %s11719_s17 }
 0x3e0   : > { %3940 = vrot.lane.b32.xlu1 %v15367_v37, %s11722_s24 }
 0x3e1   : > { %v1702_v5 = vpop.xlane.xlu0 %1701 }
 0x3e2   : > { %11270 = vrcp.f32 %v1702_v5 }
 0x3e3   : > { %2617 = vrot.lane.b32.xlu0 %v11846_v32, %s11721_s19  ;;  %11272 = vrcp.f32 %v1672_v14  ;;  %v15370_v14 = vld [vmem:[#allocation2_spill] sm:$0xff] }
 0x3e4   : > { %4128 = vrot.lane.b32.xlu1 %v15368_v6, %s11722_s24 }
 0x3e5   : > { %v1669_v20 = vpop.xlane.xlu0 %1668 }
 0x3e6   : > { %11274 = vrcp.f32 %v1669_v20 }
 0x3e7   : > { %2719 = vrot.lane.b32.xlu0 %v11866_v52, %s11721_s19  ;;  %11276 = vrcp.f32 %v1711_v39 }
 0x3e8   : > { %4316 = vrot.lane.b32.xlu1 %v15369_v9, %s11722_s24 }
 0x3e9   : > { %v1714_v41 = vpop.xlane.xlu0 %1713 }
 0x3ea   : > { %11278 = vrcp.f32 %v1714_v41 }
 0x3eb   : > { %2717 = vrot.lane.b32.xlu0 %v11866_v52, %s11720_s18 }
 0x3ec   : > { %v11271_v33 = vpop.eup %11270  ;;  %5050 = vrot.lane.b32.xlu1 %v15370_v14, %s11723_s25 }
 0x3ed   : > { %v1806_v28 = vmul.f32 %v11271_v33, %v12414_v18  ;;  %v1723_v36 = vpop.xlane.xlu0 %1722  ;;  %v11273_v21 = vpop.eup %11272  ;;  %v15371_v18 = vld [vmem:[#allocation15_spill] sm:$0xff] }
 0x3ee   : > { %11280 = vrcp.f32 %v1723_v36  ;;  %v1796_v53 = vmul.f32 %v11273_v21, %v12350_v54 }
 0x3ef   : > { %2821 = vrot.lane.b32.xlu0 %v11886_v8, %s11721_s19  ;;  %v1832_v40 = vpack.c.bf16 %v1806_v28, %v1805_v17  ;;  %v15372_v28 = vld [vmem:[#allocation22_spill] sm:$0xff]  ;;  %s11727_s19 = smov 104  }
 0x3f0   : > { %v11275_v39 = vpop.eup %11274  ;;  %5101 = vrot.lane.b32.xlu1 %v11866_v52, %s11723_s25 }
 0x3f1   : > { %v1795_v5 = vmul.f32 %v11275_v39, %v12420_v59  ;;  %10278 = vmatmul.mubr.msk.bf16.vlgmr.msra.gmra.mrb[72].mxu1 %vm1474_vm3, %v1832_v40  ;;  %v1726_v1 = vpop.xlane.xlu0 %1725  ;;  %v11277_v20 = vpop.eup %11276 }
 0x3f2   : > { %10288 = vmatpush3.bf16.msra.mxu1 %v15371_v18  ;;  %11282 = vrcp.f32 %v1726_v1  ;;  %10289 = vmatprep.mubr.msk.bf16.mxu1 %vm11717_vm1, %v15364_v34  ;;  %v1809_v54 = vmul.f32 %v11277_v20, %v12389_v58 }
 0x3f3   : > { %2819 = vrot.lane.b32.xlu0 %v11886_v8, %s11720_s18  ;;  %v1827_v41 = vpack.c.bf16 %v1796_v53, %v1795_v5  ;;  %10299 = vmatprep.subr.bf16.mxu1 %v15364_v34 }
 0x3f4   : > { %v11279_v19 = vpop.eup %11278  ;;  %5152 = vrot.lane.b32.xlu1 %v15367_v37, %s11723_s25 }
 0x3f5   : > { %v1810_v59 = vmul.f32 %v11279_v19, %v12425_v15  ;;  %10248 = vmatmul.mubr.msk.bf16.vlgmr.msra.gmra.mrb[32].mxu0 %vm1474_vm3, %v1827_v41  ;;  %v1738_v33 = vpop.xlane.xlu0 %1737 }
 0x3f6   : > { %11284 = vrcp.f32 %v1738_v33  ;;  %10259 = vmatprep.mubr.msk.bf16.mxu0 %vm11717_vm1, %v15364_v34  ;;  %v15376_v33 = vld [vmem:[#allocation3_spill] sm:$0xff] }
 0x3f7   : > { %2921 = vrot.lane.b32.xlu0 %v11906_v31, %s11720_s18  ;;  %v1834_v17 = vpack.c.bf16 %v1810_v59, %v1809_v54  ;;  %11286 = vrcp.f32 %v12545_v10  ;;  %v15373_v10 = vld [vmem:[#allocation8_spill] sm:$0xff] }
 0x3f8   : > { %5203 = vrot.lane.b32.xlu1 %v11886_v8, %s11723_s25  ;;  %v11281_v15 = vpop.eup %11280  ;;  %11288 = vrcp.f32 %v12522_v26  ;;  %v15375_v54 = vld [vmem:[#allocation24_spill] sm:$0xff] }
 0x3f9   : > { %10290 = vmatmul.mubr.msk.bf16.vlgmr.msra.gmra.mrb[76].mxu1 %vm1474_vm3, %v1834_v17  ;;  %v1747_v58 = vpop.xlane.xlu0 %1746  ;;  %v1813_v21 = vmul.f32 %v11281_v15, %v12433_v61  ;;  %v15374_v61 = vld [vmem:[#allocation23_spill] sm:$0xff] }
 0x3fa   : > { %10300 = vmatpush3.bf16.msra.mxu1 %v15372_v28  ;;  %10301 = vmatprep.mubr.msk.bf16.mxu1 %vm11717_vm1, %v15364_v34 }
 0x3fb   : > { %3023 = vrot.lane.b32.xlu0 %v11855_v42, %s11720_s18  ;;  %10311 = vmatprep.subr.bf16.mxu1 %v15364_v34 }
 0x3fc   : > { %v11283_v36 = vpop.eup %11282  ;;  %5254 = vrot.lane.b32.xlu1 %v15373_v10, %s11723_s25 }
 0x3fd   : > { %v1814_v40 = vmul.f32 %v11283_v36, %v12438_v51  ;;  %v1750_v39 = vpop.xlane.xlu0 %1749 }
 0x3fe   : > { %11290 = vrcp.f32 %v1750_v39 }
 0x3ff   : > { %11292 = vrcp.f32 %v12512_v60  ;;  %3125 = vrot.lane.b32.xlu0 %v11875_v62, %s11720_s18  ;;  %v1836_v53 = vpack.c.bf16 %v1814_v40, %v1813_v21  ;;  %v15377_v21 = vld [vmem:[#allocation25_spill] sm:$0xff] }
 0x400   : > { %v11285_v5 = vpop.eup %11284  ;;  %11294 = vrcp.f32 %v1747_v58  ;;  %5305 = vrot.lane.b32.xlu1 %v11906_v31, %s11723_s25 }
 0x401   : > { %10302 = vmatmul.mubr.msk.bf16.vlgmr.msra.gmra.mrb[80].mxu1 %vm1474_vm3, %v1836_v53  ;;  %v1759_v26 = vpop.xlane.xlu0 %1758  ;;  %v11287_v1 = vpop.eup %11286  ;;  %v1818_v51 = vmul.f32 %v11285_v5, %v12444_v7  ;;  %11296 = vrcp.f32 %v12533_v49 }
 0x402   : > { %10312 = vmatpush3.bf16.msra.mxu1 %v15374_v61  ;;  %10313 = vmatprep.mubr.msk.bf16.mxu1 %vm11717_vm1, %v15364_v34  ;;  %v1817_v60 = vmul.f32 %v11287_v1, %v12399_v25  ;;  %11298 = vrcp.f32 %v1759_v26  ;;  %v11289_v18 = vpop.eup %11288 }
 0x403   : > { %3227 = vrot.lane.b32.xlu0 %v15365_v57, %s11720_s18  ;;  %10323 = vmatprep.subr.bf16.mxu1 %v15364_v34  ;;  %11300 = vrcp.f32 %v12528_v0  ;;  %v1800_v0 = vmul.f32 %v11289_v18, %v12364_v4 }
 0x404   : > { %5356 = vrot.lane.b32.xlu1 %v15368_v6, %s11723_s25  ;;  %v1838_v7 = vpack.c.bf16 %v1818_v51, %v1817_v60  ;;  %11302 = vrcp.f32 %v12551_v44 }
 0x405   : > { %v12636_v20 = vpop.xlane.xlu0 %1716  ;;  %11304 = vrcp.f32 %v12541_v3 }
 0x406   : > { %11306 = vrcp.f32 %v12535_v2 }
 0x407   : > { %3329 = vrot.lane.b32.xlu0 %v15366_v24, %s11720_s18  ;;  %s11726_s18 = smov 72  }
 0x408   : > { %v11291_v41 = vpop.eup %11290  ;;  %5407 = vrot.lane.b32.xlu1 %v11855_v42, %s11723_s25 }
 0x409   : > { %v11293_v19 = vpop.eup %11292  ;;  %10314 = vmatmul.mubr.msk.bf16.vlgmr.msra.gmra.mrb[84].mxu1 %vm1474_vm3, %v1838_v7  ;;  %v12645_v25 = vpop.xlane.xlu0 %1719  ;;  %v1822_v59 = vmul.f32 %v11291_v41, %v12456_v16  ;;  %v15381_v41 = vld [vmem:[#allocation16_spill] sm:$0xff] }
 0x40a   : > { %v11295_v49 = vpop.eup %11294  ;;  %10324 = vmatpush3.bf16.msra.mxu1 %v15375_v54  ;;  %10325 = vmatprep.mubr.msk.bf16.mxu1 %vm11717_vm1, %v15364_v34  ;;  %v1799_v17 = vmul.f32 %v11293_v19, %v12357_v29  ;;  %v15384_v54 = vld [vmem:[#allocation19_spill] sm:$0xff]  ;;  %11308 = vrcp.f32 %v12645_v25 }
 0x40b   : > { %3846 = vrot.lane.b32.xlu0 %v15370_v14, %s11722_s24  ;;  %v12654_v44 = vpop.xlane.xlu1 %1728  ;;  %10335 = vmatprep.subr.bf16.mxu1 %v15364_v34  ;;  %v1821_v58 = vmul.f32 %v11295_v49, %v12450_v63  ;;  %v11297_v4 = vpop.eup %11296  ;;  %v15383_v49 = vld [vmem:[#allocation27_spill] sm:$0xff]  ;;  %11310 = vrcp.f32 %v12636_v20 }
 0x40c   : > { %5458 = vrot.lane.b32.xlu1 %v15376_v33, %s11723_s25  ;;  %v1829_v16 = vpack.c.bf16 %v1800_v0, %v1799_v17  ;;  %v11299_v36 = vpop.eup %11298  ;;  %v1804_v40 = vmul.f32 %v11297_v4, %v12378_v47  ;;  %v15378_v47 = vld [vmem:[#allocation10_spill] sm:$0xff]  ;;  %v2980_v0 = vsel %vm676_vm2, %v15384_v54, 0 }
 0x40d   : > { %v1938_v15 = vpop.permute.xlu0 %1937  ;;  %v1840_v28 = vpack.c.bf16 %v1822_v59, %v1821_v58  ;;  %v11301_v29 = vpop.eup %11300  ;;  %v1825_v39 = vmul.f32 %v11299_v36, %v12460_v13  ;;  %v15385_v59 = vld [vmem:[#allocation18_spill] sm:$0xff]  ;;  %v15389_v36 = vld [vmem:[#allocation20_spill] sm:$0xff] }
 0x40e   : > { %10258 = vmatpush3.bf16.msra.mxu0 %v1938_v15  ;;  %v11303_v3 = vpop.eup %11302  ;;  %v1803_v2 = vmul.f32 %v11301_v29, %v12371_v46  ;;  %v15386_v17 = vld [vmem:[#allocation30_spill] sm:$0xff]  ;;  %v15387_v15 = vld [vmem:[#allocation29_spill] sm:$0xff] }
 0x40f   : > { %4034 = vrot.lane.b32.xlu0 %v15373_v10, %s11722_s24  ;;  %10269 = vmatprep.subr.bf16.mxu0 %v15364_v34  ;;  %v2032_v63 = vpop.permute.xlu1 %2031  ;;  %v1826_v53 = vmul.f32 %v11303_v3, %v12405_v43  ;;  %v11305_v26 = vpop.eup %11304  ;;  %v15379_v43 = vld [vmem:[#allocation26_spill] sm:$0xff]  ;;  %v3082_v58 = vsel %vm676_vm2, %v15386_v17, 0 }
 0x410   : > { %5509 = vrot.lane.b32.xlu1 %v11875_v62, %s11723_s25  ;;  %v1831_v13 = vpack.c.bf16 %v1804_v40, %v1803_v2  ;;  %v11307_v46 = vpop.eup %11306  ;;  %v2674_v61 = vsel %vm676_vm2, %v15379_v43, 0  ;;  %v1808_v51 = vmul.f32 %v11305_v26, %v12393_v55  ;;  %v15380_v55 = vld [vmem:[#allocation17_spill] sm:$0xff] }
 0x411   : > { %10260 = vmatmul.mubr.msk.bf16.vlgmr.msra.gmra.mrb[36].mxu0 %vm1474_vm3, %v1829_v16  ;;  %10326 = vmatmul.mubr.msk.bf16.vlgmr.msra.gmra.mrb[88].mxu1 %vm1474_vm3, %v1840_v28  ;;  %v1842_v5 = vpack.c.bf16 %v1826_v53, %v1825_v39  ;;  %v1807_v60 = vmul.f32 %v11307_v46, %v12383_v27  ;;  %v2776_v7 = vsel %vm676_vm2, %v15380_v55, 0  ;;  %v15382_v27 = vld [vmem:[#allocation28_spill] sm:$0xff]  ;;  %v15388_v16 = vld [vmem:[#allocation21_spill] sm:$0xff] }
 0x412   : > { %10336 = vmatpush3.bf16.msra.mxu1 %v15377_v21  ;;  %10270 = vmatpush3.bf16.msra.mxu0 %v2032_v63  ;;  %v2878_v19 = vsel %vm676_vm2, %v15382_v27, 0  ;;  %v3184_v28 = vsel %vm676_vm2, %v15388_v16, 0  ;;  %v15390_v63 = vld [vmem:[#allocation32_spill] sm:$0xff]  ;;  %v15391_v21 = vld [vmem:[#allocation31_spill] sm:$0xff]  ;;  %v15392_v26 = vld [vmem:[#allocation33_spill] sm:$0xff] }
 0x413   : > { %4222 = vrot.lane.b32.xlu0 %v15376_v33, %s11722_s24  ;;  %10271 = vmatprep.mubr.msk.bf16.mxu0 %vm11717_vm1, %v15364_v34  ;;  %v2126_v1 = vpop.permute.xlu1 %2125  ;;  %v1833_v18 = vpack.c.bf16 %v1808_v51, %v1807_v60  ;;  %v3286_v3 = vsel %vm676_vm2, %v15390_v63, 0 }
 0x414   : > { %5560 = vrot.lane.b32.xlu1 %v15369_v9, %s11723_s25  ;;  %10281 = vmatprep.subr.bf16.mxu0 %v15364_v34  ;;  %v11309_v20 = vpop.eup %11308 }
 0x415   : > { %10337 = vmatprep.mubr.msk.bf16.mxu1 %vm11717_vm1, %v15364_v34  ;;  %10347 = vmatprep.subr.bf16.mxu1 %v15364_v34  ;;  %v11311_v39 = vpop.eup %11310  ;;  %v1812_v2 = vmul.f32 %v11309_v20, %v12468_v50  ;;  %v3388_v50 = vsel %vm676_vm2, %v12478_v12, 0 }
 0x417   : > { %4410 = vrot.lane.b32.xlu0 %v15378_v47, %s11722_s24 }
 0x418   : > { %5611 = vrot.lane.b32.xlu1 %v15365_v57, %s11723_s25 }
 0x419   : > { %10272 = vmatmul.mubr.msk.bf16.vlgmr.msra.gmra.mrb[40].mxu0 %vm1474_vm3, %v1831_v13  ;;  %10338 = vmatmul.mubr.msk.bf16.vlgmr.msra.gmra.mrb[92].mxu1 %vm1474_vm3, %v1842_v5 }
 0x41a   : > { %10282 = vmatpush3.bf16.msra.mxu0 %v2126_v1  ;;  %10283 = vmatprep.mubr.msk.bf16.mxu0 %vm11717_vm1, %v15364_v34 }
 0x41b   : > { %10348 = vmatpush3.bf16.xpose.msra.mxu1 %v2674_v61  ;;  %4504 = vrot.lane.b32.xlu0 %v11915_v38, %s11722_s24 }
 0x41c   : > { %10349 = vmatprep.mubr.msk.bf16.mxu1 %vm11717_vm1, %v15364_v34  ;;  %10359 = vmatprep.subr.bf16.mxu1 %v15364_v34 }
 0x41d   : > { %10293 = vmatprep.subr.bf16.mxu0 %v15364_v34 }
 0x41f   : > { %4999 = vrot.lane.b32.xlu0 %v11846_v32, %s11723_s25 }
 0x421   : > { %10284 = vmatmul.mubr.msk.bf16.vlgmr.msra.gmra.mrb[44].mxu0 %vm1474_vm3, %v1833_v18 }
 0x422   : > { %10350 = vmatmul.mubr.msk.bf16.vlgmr.msra.gmra.mrb[96].mxu1 %vm676_vm2, %v15381_v41  ;;  %10295 = vmatprep.mubr.msk.bf16.mxu0 %vm11717_vm1, %v15364_v34 }
 0x423   : > { %10360 = vmatpush3.bf16.xpose.msra.mxu1 %v2776_v7  ;;  %4997 = vrot.lane.b32.xlu0 %v11846_v32, %s11724_s1 }
 0x424   : > { %10361 = vmatprep.mubr.msk.bf16.mxu1 %vm11717_vm1, %v15364_v34  ;;  %10371 = vmatprep.subr.bf16.mxu1 %v15364_v34 }
 0x427   : > { %5048 = vrot.lane.b32.xlu0 %v15370_v14, %s11724_s1 }
 0x42a   : > { %10362 = vmatmul.mubr.msk.bf16.vlgmr.msra.gmra.mrb[100].mxu1 %vm676_vm2, %v15383_v49 }
 0x42b   : > { %10372 = vmatpush3.bf16.xpose.msra.mxu1 %v2878_v19  ;;  %5099 = vrot.lane.b32.xlu0 %v11866_v52, %s11724_s1 }
 0x42c   : > { %10373 = vmatprep.mubr.msk.bf16.mxu1 %vm11717_vm1, %v15364_v34  ;;  %10383 = vmatprep.subr.bf16.mxu1 %v15364_v34 }
 0x42f   : > { %5150 = vrot.lane.b32.xlu0 %v15367_v37, %s11724_s1 }
 0x432   : > { %10374 = vmatmul.mubr.msk.bf16.vlgmr.msra.gmra.mrb[104].mxu1 %vm676_vm2, %v15385_v59 }
 0x433   : > { %10384 = vmatpush3.bf16.xpose.msra.mxu1 %v2980_v0  ;;  %5201 = vrot.lane.b32.xlu0 %v11886_v8, %s11724_s1 }
 0x434   : > { %10385 = vmatprep.mubr.msk.bf16.mxu1 %vm11717_vm1, %v15364_v34  ;;  %10395 = vmatprep.subr.bf16.mxu1 %v15364_v34 }
 0x437   : > { %5252 = vrot.lane.b32.xlu0 %v15373_v10, %s11724_s1 }
 0x43a   : > { %10386 = vmatmul.mubr.msk.bf16.vlgmr.msra.gmra.mrb[108].mxu1 %vm676_vm2, %v15387_v15 }
 0x43b   : > { %10396 = vmatpush3.bf16.xpose.msra.mxu1 %v3082_v58  ;;  %5303 = vrot.lane.b32.xlu0 %v11906_v31, %s11724_s1 }
 0x43c   : > { %10397 = vmatprep.mubr.msk.bf16.mxu1 %vm11717_vm1, %v15364_v34  ;;  %10407 = vmatprep.subr.bf16.mxu1 %v15364_v34 }
 0x43e   : > { %v1732_v4 = vpop.xlane.xlu0 %1731 }
 0x43f   : > { %5354 = vrot.lane.b32.xlu0 %v15368_v6, %s11724_s1  ;;  %11312 = vrcp.f32 %v1732_v4 }
 0x440   : > { %11314 = vrcp.f32 %v12654_v44  ;;  %v1811_v44 = vmul.f32 %v11311_v39, %v12464_v35 }
 0x442   : > { %10398 = vmatmul.mubr.msk.bf16.vlgmr.msra.gmra.mrb[112].mxu1 %vm676_vm2, %v15389_v36  ;;  %v1741_v29 = vpop.xlane.xlu0 %1740  ;;  %v1835_v13 = vpack.c.bf16 %v1812_v2, %v1811_v44 }
 0x443   : > { %10408 = vmatpush3.bf16.xpose.msra.mxu1 %v3184_v28  ;;  %5405 = vrot.lane.b32.xlu0 %v11855_v42, %s11724_s1 }
 0x444   : > { %10409 = vmatprep.mubr.msk.bf16.mxu1 %vm11717_vm1, %v15364_v34  ;;  %10419 = vmatprep.subr.bf16.mxu1 %v15364_v34  ;;  %v1756_v43 = vpop.xlane.xlu1 %1755 }
 0x446   : > { %v1744_v25 = vpop.xlane.xlu0 %1743 }
 0x447   : > { %5456 = vrot.lane.b32.xlu0 %v15376_v33, %s11724_s1  ;;  %11316 = vrcp.f32 %v1744_v25 }
 0x448   : > { %11318 = vrcp.f32 %v1741_v29  ;;  %v2616_v58 = vpop.permute.xlu1 %2615 }
 0x449   : > { %v11313_v5 = vpop.eup %11312 }
 0x44a   : > { %10410 = vmatmul.mubr.msk.bf16.vlgmr.msra.gmra.mrb[116].mxu1 %vm676_vm2, %v15391_v21  ;;  %v1753_v40 = vpop.xlane.xlu0 %1752  ;;  %v11315_v1 = vpop.eup %11314  ;;  %v1816_v46 = vmul.f32 %v11313_v5, %v12495_v23 }
 0x44b   : > { %10420 = vmatpush3.bf16.xpose.msra.mxu1 %v3286_v3  ;;  %5507 = vrot.lane.b32.xlu0 %v11875_v62, %s11724_s1  ;;  %v1815_v12 = vmul.f32 %v11315_v1, %v12470_v56  ;;  %11320 = vrcp.f32 %v1753_v40 }
 0x44c   : > { %10421 = vmatprep.mubr.msk.bf16.mxu1 %vm11717_vm1, %v15364_v34  ;;  %10431 = vmatprep.subr.bf16.mxu1 %v15364_v34  ;;  %11322 = vrcp.f32 %v1756_v43  ;;  %v2924_v36 = vpop.permute.xlu1 %2923 }
 0x44d   : > { %v1837_v51 = vpack.c.bf16 %v1816_v46, %v1815_v12  ;;  %v2929_v63 = vsel %vm676_vm2, %v2924_v36, 0 }
 0x44e   : > { %v2220_v53 = vpop.permute.xlu0 %2219 }
 0x44f   : > { %5558 = vrot.lane.b32.xlu0 %v15369_v9, %s11724_s1  ;;  %10294 = vmatpush3.bf16.msra.mxu0 %v2220_v53 }
 0x450   : > { %10305 = vmatprep.subr.bf16.mxu0 %v15364_v34  ;;  %v3026_v2 = vpop.permute.xlu1 %3025 }
 0x451   : > { %v11317_v60 = vpop.eup %11316  ;;  %v3031_v44 = vsel %vm676_vm2, %v3026_v2, 0 }
 0x452   : > { %10422 = vmatmul.mubr.msk.bf16.vlgmr.msra.gmra.mrb[120].mxu1 %vm676_vm2, %v15392_v26  ;;  %10296 = vmatmul.mubr.msk.bf16.vlgmr.msra.gmra.mrb[48].mxu0 %vm1474_vm3, %v1835_v13  ;;  %v2314_v35 = vpop.permute.xlu0 %2313  ;;  %v11319_v18 = vpop.eup %11318  ;;  %v1820_v55 = vmul.f32 %v11317_v60, %v12508_v45 }
 0x453   : > { %10432 = vmatpush3.bf16.xpose.msra.mxu1 %v3388_v50  ;;  %10306 = vmatpush3.bf16.msra.mxu0 %v2314_v35  ;;  %v1819_v56 = vmul.f32 %v11319_v18, %v12504_v48 }
 0x454   : > { %10433 = vmatprep.mubr.msk.bf16.mxu1 %vm11717_vm1, %v15364_v34  ;;  %10307 = vmatprep.mubr.msk.bf16.mxu0 %vm11717_vm1, %v15364_v34  ;;  %v3128_v13 = vpop.permute.xlu1 %3127 }
 0x455   : > { %10317 = vmatprep.subr.bf16.mxu0 %v15364_v34  ;;  %10443 = vmatprep.subr.bf16.mxu1 %v15364_v34  ;;  %v1839_v41 = vpack.c.bf16 %v1820_v55, %v1819_v56  ;;  %v3133_v1 = vsel %vm676_vm2, %v3128_v13, 0 }
 0x456   : > { %v2408_v61 = vpop.permute.xlu0 %2407 }
 0x458   : > { %v3230_v46 = vpop.permute.xlu1 %3229 }
 0x459   : > { %v3235_v12 = vsel %vm676_vm2, %v3230_v46, 0 }
 0x45a   : > { %10434 = vmatmul.mubr.msk.bf16.vlgmr.msra.gmra.mrb[124].mxu1 %vm676_vm2, %v12562_v22  ;;  %10308 = vmatmul.mubr.msk.bf16.vlgmr.msra.gmra.mrb[52].mxu0 %vm1474_vm3, %v1837_v51  ;;  %v2502_v23 = vpop.permute.xlu0 %2501  ;;  %v11321_v22 = vpop.eup %11320 }
 0x45b   : > { %10318 = vmatpush3.bf16.msra.mxu0 %v2408_v61  ;;  %10319 = vmatprep.mubr.msk.bf16.mxu0 %vm11717_vm1, %v15364_v34  ;;  %v11323_v19 = vpop.eup %11322  ;;  %v1823_v45 = vmul.f32 %v11321_v22, %v12520_v30 }
 0x45c   : > { %10329 = vmatprep.subr.bf16.mxu0 %v15364_v34  ;;  %10445 = vmatprep.mubr.msk.bf16.mxu1 %vm11717_vm1, %v15364_v34  ;;  %v1824_v49 = vmul.f32 %v11323_v19, %v12506_v11  ;;  %v3332_v43 = vpop.permute.xlu1 %3331 }
 0x45d   : > { %v3337_v61 = vsel %vm676_vm2, %v3332_v43, 0 }
 0x45e   : > { %v2618_v7 = vpop.permute.xlu0 %2617  ;;  %v1841_v0 = vpack.c.bf16 %v1824_v49, %v1823_v45 }
 0x45f   : > { %v2623_v59 = vsel %vm676_vm2, %v2618_v7, 0 }
 0x462   : > { %10320 = vmatmul.mubr.msk.bf16.vlgmr.msra.gmra.mrb[56].mxu0 %vm1474_vm3, %v1839_v41  ;;  %v2720_v27 = vpop.permute.xlu0 %2719 }
 0x463   : > { %10330 = vmatpush3.bf16.msra.mxu0 %v2502_v23  ;;  %10331 = vmatprep.mubr.msk.bf16.mxu0 %vm11717_vm1, %v15364_v34  ;;  %v2725_v15 = vsel %vm676_vm2, %v2720_v27, 0 }
 0x464   : > { %10341 = vmatprep.subr.bf16.mxu0 %v15364_v34 }
 0x466   : > { %v2718_v54 = vpop.permute.xlu0 %2717 }
 0x46a   : > { %10332 = vmatmul.mubr.msk.bf16.vlgmr.msra.gmra.mrb[60].mxu0 %vm1474_vm3, %v1841_v0  ;;  %v2822_v48 = vpop.permute.xlu0 %2821 }
 0x46b   : > { %10343 = vmatprep.mubr.msk.bf16.mxu0 %vm11717_vm1, %v15364_v34  ;;  %v2827_v16 = vsel %vm676_vm2, %v2822_v48, 0 }
 0x46c   : > { %10342 = vmatpush3.bf16.xpose.msra.mxu0 %v2623_v59 }
 0x46d   : > { %10353 = vmatprep.subr.bf16.mxu0 %v15364_v34 }
 0x46e   : > { %v2820_v17 = vpop.permute.xlu0 %2819 }
 0x472   : > { %v2922_v30 = vpop.permute.xlu0 %2921 }
 0x473   : > { %10344 = vmatmul.mubr.msk.bf16.vlgmr.msra.gmra.mrb[64].mxu0 %vm676_vm2, %v2616_v58 }
 0x474   : > { %10354 = vmatpush3.bf16.xpose.msra.mxu0 %v2725_v15  ;;  %10355 = vmatprep.mubr.msk.bf16.mxu0 %vm11717_vm1, %v15364_v34 }
 0x475   : > { %10365 = vmatprep.subr.bf16.mxu0 %v15364_v34 }
 0x476   : > { %v3024_v11 = vpop.permute.xlu0 %3023 }
 0x47a   : > { %v3126_v4 = vpop.permute.xlu0 %3125 }
 0x47b   : > { %10356 = vmatmul.mubr.msk.bf16.vlgmr.msra.gmra.mrb[68].mxu0 %vm676_vm2, %v2718_v54 }
 0x47c   : > { %10366 = vmatpush3.bf16.xpose.msra.mxu0 %v2827_v16  ;;  %10367 = vmatprep.mubr.msk.bf16.mxu0 %vm11717_vm1, %v15364_v34 }
 0x47d   : > { %10377 = vmatprep.subr.bf16.mxu0 %v15364_v34 }
 0x47e   : > { %v3228_v28 = vpop.permute.xlu0 %3227 }
 0x481   : > { %v12824_v29 = vpop.f32.mrb[64].mxu1 }
 0x482   : > { %15393 = vst [vmem:[#allocation14_spill] sm:$0xff] %v12824_v29  ;;  %v10255_v25 = vpop.f32.mrb[65].mxu1  ;;  %v3330_v20 = vpop.permute.xlu0 %3329 }
 0x483   : > { %10368 = vmatmul.mubr.msk.bf16.vlgmr.msra.gmra.mrb[72].mxu0 %vm676_vm2, %v2820_v17  ;;  %v12828_v3 = vpop.f32.mrb[66].mxu1 }
 0x484   : > { %15394 = vst [vmem:[#allocation15_spill] sm:$0xff] %v12828_v3  ;;  %10378 = vmatpush3.bf16.xpose.msra.mxu0 %v2929_v63  ;;  %v10256_v40 = vpop.f32.mrb[67].mxu1  ;;  %10379 = vmatprep.mubr.msk.bf16.mxu0 %vm11717_vm1, %v15364_v34 }
 0x485   : > { %10389 = vmatprep.subr.bf16.mxu0 %v15364_v34 }
 0x486   : > { %v3847_v39 = vpop.permute.xlu0 %3846 }
 0x487   : > { %10444 = vmatpush3.bf16.msra.mxu1 %v3847_v39 }
 0x488   : > { %10455 = vmatprep.subr.bf16.mxu1 %v15364_v34 }
 0x48b   : > { %10380 = vmatmul.mubr.msk.bf16.vlgmr.msra.gmra.mrb[76].mxu0 %vm676_vm2, %v2922_v30 }
 0x48c   : > { %10390 = vmatpush3.bf16.xpose.msra.mxu0 %v3031_v44  ;;  %10391 = vmatprep.mubr.msk.bf16.mxu0 %vm11717_vm1, %v15364_v34 }
 0x48d   : > { %10401 = vmatprep.subr.bf16.mxu0 %v15364_v34 }
 0x48f   : > { %v12841_v53 = vpop.f32.mrb[68].mxu1 }
 0x490   : > { %15395 = vst [vmem:[#allocation22_spill] sm:$0xff] %v12841_v53  ;;  %v10267_v5 = vpop.f32.mrb[69].mxu1 }
 0x491   : > { %v12843_v50 = vpop.f32.mrb[70].mxu1 }
 0x492   : > { %15396 = vst [vmem:[#allocation23_spill] sm:$0xff] %v12843_v50  ;;  %v10268_v35 = vpop.f32.mrb[71].mxu1 }
 0x493   : > { %10392 = vmatmul.mubr.msk.bf16.vlgmr.msra.gmra.mrb[80].mxu0 %vm676_vm2, %v3024_v11 }
 0x494   : > { %10402 = vmatpush3.bf16.xpose.msra.mxu0 %v3133_v1  ;;  %10403 = vmatprep.mubr.msk.bf16.mxu0 %vm11717_vm1, %v15364_v34 }
 0x495   : > { %10413 = vmatprep.subr.bf16.mxu0 %v15364_v34 }
 0x49b   : > { %10404 = vmatmul.mubr.msk.bf16.vlgmr.msra.gmra.mrb[84].mxu0 %vm676_vm2, %v3126_v4 }
 0x49c   : > { %10414 = vmatpush3.bf16.xpose.msra.mxu0 %v3235_v12  ;;  %10415 = vmatprep.mubr.msk.bf16.mxu0 %vm11717_vm1, %v15364_v34 }
 0x49d   : > { %10425 = vmatprep.subr.bf16.mxu0 %v15364_v34 }
 0x4a3   : > { %10416 = vmatmul.mubr.msk.bf16.vlgmr.msra.gmra.mrb[88].mxu0 %vm676_vm2, %v3228_v28 }
 0x4a4   : > { %10426 = vmatpush3.bf16.xpose.msra.mxu0 %v3337_v61  ;;  %10427 = vmatprep.mubr.msk.bf16.mxu0 %vm11717_vm1, %v15364_v34 }
 0x4a5   : > { %10437 = vmatprep.subr.bf16.mxu0 %v15364_v34 }
 0x4ab   : > { %10428 = vmatmul.mubr.msk.bf16.vlgmr.msra.gmra.mrb[92].mxu0 %vm676_vm2, %v3330_v20 }
 0x4ac   : > { %10439 = vmatprep.mubr.msk.bf16.mxu0 %vm11717_vm1, %v15364_v34 }
 0x4c4   : > { %v12865_v51 = vpop.f32.mrb[72].mxu1 }
 0x4c5   : > { %15397 = vst [vmem:[#allocation24_spill] sm:$0xff] %v12865_v51  ;;  %v10279_v60 = vpop.f32.mrb[73].mxu1 }
 0x4c6   : > { %v12867_v23 = vpop.f32.mrb[74].mxu1 }
 0x4c7   : > { %15398 = vst [vmem:[#allocation25_spill] sm:$0xff] %v12867_v23  ;;  %v10280_v55 = vpop.f32.mrb[75].mxu1 }
 0x4c8   : > { %v12871_v56 = vpop.f32.mrb[32].mxu0 }
 0x4c9   : > { %15399 = vst [vmem:[#allocation26_spill] sm:$0xff] %v12871_v56  ;;  %v10249_v7 = vpop.f32.mrb[33].mxu0 }
 0x4ca   : > { %v12873_v41 = vpop.f32.mrb[34].mxu0 }
 0x4cb   : > { %15400 = vst [vmem:[#allocation17_spill] sm:$0xff] %v12873_v41  ;;  %v10250_v27 = vpop.f32.mrb[35].mxu0 }
 0x4cc   : > { %v12877_v19 = vpop.f32.mrb[76].mxu1 }
 0x4cd   : > { %15401 = vst [vmem:[#allocation16_spill] sm:$0xff] %v12877_v19  ;;  %v10291_v45 = vpop.f32.mrb[77].mxu1 }
 0x4ce   : > { %v12879_v49 = vpop.f32.mrb[78].mxu1 }
 0x4cf   : > { %15402 = vst [vmem:[#allocation28_spill] sm:$0xff] %v12879_v49  ;;  %v10292_v0 = vpop.f32.mrb[79].mxu1 }
 0x4d4   : > { %v12883_v48 = vpop.f32.mrb[80].mxu1 }
 0x4d5   : > { %15403 = vst [vmem:[#allocation27_spill] sm:$0xff] %v12883_v48  ;;  %v10303_v59 = vpop.f32.mrb[81].mxu1 }
 0x4d6   : > { %v12885_v17 = vpop.f32.mrb[82].mxu1 }
 0x4d7   : > { %15404 = vst [vmem:[#allocation19_spill] sm:$0xff] %v12885_v17  ;;  %v10304_v30 = vpop.f32.mrb[83].mxu1 }
 0x4dc   : > { %v12889_v15 = vpop.f32.mrb[84].mxu1 }
 0x4dd   : > { %15405 = vst [vmem:[#allocation18_spill] sm:$0xff] %v12889_v15  ;;  %v10315_v11 = vpop.f32.mrb[85].mxu1 }
 0x4de   : > { %v12891_v4 = vpop.f32.mrb[86].mxu1 }
 0x4df   : > { %15406 = vst [vmem:[#allocation30_spill] sm:$0xff] %v12891_v4  ;;  %v10316_v28 = vpop.f32.mrb[87].mxu1 }
 0x4e4   : > { %v12895_v36 = vpop.f32.mrb[36].mxu0  ;;  %v12897_v25 = vpop.f32.mrb[88].mxu1 }
 0x4e5   : > { %15407 = vst [vmem:[#allocation29_spill] sm:$0xff] %v12895_v36  ;;  %15408 = vst [vmem:[#allocation21_spill] sm:$0xff] %v12897_v25  ;;  %v10261_v20 = vpop.f32.mrb[37].mxu0  ;;  %v10327_v63 = vpop.f32.mrb[89].mxu1 }
 0x4e6   : > { %v12899_v40 = vpop.f32.mrb[38].mxu0  ;;  %v12901_v39 = vpop.f32.mrb[90].mxu1 }
 0x4e7   : > { %15409 = vst [vmem:[#allocation20_spill] sm:$0xff] %v12899_v40  ;;  %15410 = vst [vmem:[#allocation32_spill] sm:$0xff] %v12901_v39  ;;  %v10262_v13 = vpop.f32.mrb[39].mxu0  ;;  %v10328_v5 = vpop.f32.mrb[91].mxu1 }
 0x4e8   : > { %v13150_v40 = vpop.permute.xlu1 %3940 }
 0x4ec   : > { %v12907_v35 = vpop.f32.mrb[40].mxu0  ;;  %v12909_v1 = vpop.f32.mrb[92].mxu1 }
 0x4ed   : > { %15411 = vst [vmem:[#allocation31_spill] sm:$0xff] %v12907_v35  ;;  %15412 = vst [vmem:[#allocation33_spill] sm:$0xff] %v12909_v1  ;;  %v10273_v46 = vpop.f32.mrb[41].mxu0  ;;  %v10339_v12 = vpop.f32.mrb[93].mxu1 }
 0x4ee   : > { %v12911_v43 = vpop.f32.mrb[42].mxu0  ;;  %v12913_v61 = vpop.f32.mrb[94].mxu1 }
 0x4ef   : > { %15413 = vst [vmem:[#allocation34_spill] sm:$0xff] %v12911_v43  ;;  %15414 = vst [vmem:[#allocation35_spill] sm:$0xff] %v12913_v61  ;;  %v10274_v7 = vpop.f32.mrb[43].mxu0  ;;  %v10340_v27 = vpop.f32.mrb[95].mxu1 }
 0x4f0   : > { %v13108_v35 = vpop.permute.xlu0 %4034 }
 0x4f4   : > { %v12919_v45 = vpop.f32.mrb[44].mxu0  ;;  %v13124_v43 = vpop.permute.xlu0 %4222 }
 0x4f5   : > { %15415 = vst [vmem:[#allocation36_spill] sm:$0xff] %v12919_v45  ;;  %v12921_v0 = vpop.f32.mrb[96].mxu1  ;;  %v10285_v59 = vpop.f32.mrb[45].mxu0 }
 0x4f6   : > { %v10351_v30 = vpop.f32.mrb[97].mxu1  ;;  %v12923_v11 = vpop.f32.mrb[46].mxu0 }
 0x4f7   : > { %15416 = vst [vmem:[#allocation37_spill] sm:$0xff] %v12923_v11  ;;  %v12927_v20 = vpop.f32.mrb[98].mxu1  ;;  %v10286_v63 = vpop.f32.mrb[47].mxu0 }
 0x4f8   : > { %v10352_v13 = vpop.f32.mrb[99].mxu1 }
 0x4fd   : > { %v12929_v5 = vpop.f32.mrb[100].mxu1 }
 0x4fe   : > { %v10363_v46 = vpop.f32.mrb[101].mxu1 }
 0x4ff   : > { %v12931_v12 = vpop.f32.mrb[102].mxu1 }
 0x500   : > { %v10364_v7 = vpop.f32.mrb[103].mxu1 }
 0x505   : > { %v12933_v27 = vpop.f32.mrb[104].mxu1 }
 0x506   : > { %v10375_v55 = vpop.f32.mrb[105].mxu1 }
 0x507   : > { %v12935_v59 = vpop.f32.mrb[106].mxu1 }
 0x508   : > { %v10376_v30 = vpop.f32.mrb[107].mxu1 }
 0x50d   : > { %v12937_v44 = vpop.f32.mrb[108].mxu1 }
 0x50e   : > { %v10387_v16 = vpop.f32.mrb[109].mxu1 }
 0x50f   : > { %v12939_v58 = vpop.f32.mrb[110].mxu1 }
 0x510   : > { %v10388_v54 = vpop.f32.mrb[111].mxu1 }
 0x515   : > { %v12941_v63 = vpop.f32.mrb[112].mxu1 }
 0x516   : > { %v10399_v13 = vpop.f32.mrb[113].mxu1 }
 0x517   : > { %v12943_v28 = vpop.f32.mrb[114].mxu1 }
 0x518   : > { %v10400_v46 = vpop.f32.mrb[115].mxu1 }
 0x51d   : > { %v12945_v18 = vpop.f32.mrb[116].mxu1 }
 0x51e   : > { %v10411_v7 = vpop.f32.mrb[117].mxu1 }
 0x51f   : > { %v12947_v60 = vpop.f32.mrb[118].mxu1  ;;  %v12962_v7 = vld [vmem:[%s15249_s4 + $0x10] sm:$0xff] }
 0x520   : > { %v10412_v55 = vpop.f32.mrb[119].mxu1 }
 0x525   : > { %v12949_v26 = vpop.f32.mrb[120].mxu1  ;;  %v12951_v30 = vpop.f32.mrb[48].mxu0 }
 0x526   : > { %15417 = vst [vmem:[#allocation38_spill] sm:$0xff] %v12951_v30  ;;  %v10423_v16 = vpop.f32.mrb[121].mxu1  ;;  %v10297_v2 = vpop.f32.mrb[49].mxu0 }
 0x527   : > { %v12953_v21 = vpop.f32.mrb[122].mxu1  ;;  %v12955_v54 = vpop.f32.mrb[50].mxu0 }
 0x528   : > { %15418 = vst [vmem:[#allocation39_spill] sm:$0xff] %v12955_v54  ;;  %v10424_v46 = vpop.f32.mrb[123].mxu1  ;;  %v10298_v22 = vpop.f32.mrb[51].mxu0 }
 0x52d   : > { %v3424_v55 = vpop.f32.mrb[124].mxu1  ;;  %v12964_v1 = vpop.f32.mrb[52].mxu0 }
 0x52e   : > { %15419 = vst [vmem:[#allocation40_spill] sm:$0xff] %v12964_v1  ;;  %v12967_v16 = vadd.f32 %v12962_v7, %v3424_v55  ;;  %v10435_v2 = vpop.f32.mrb[125].mxu1  ;;  %v10309_v61 = vpop.f32.mrb[53].mxu0  ;;  %v12993_v1 = vld [vmem:[%s15249_s4 + $0x18] sm:$0xff] }
 0x52f   : > { %v12969_v25 = vpop.f32.mrb[126].mxu1  ;;  %v12971_v39 = vpop.f32.mrb[54].mxu0 }
 0x530   : > { %15420 = vst [vmem:[#allocation41_spill] sm:$0xff] %v12971_v39  ;;  %v10436_v46 = vpop.f32.mrb[127].mxu1  ;;  %v10310_v13 = vpop.f32.mrb[55].mxu0  ;;  %v13204_v62 = vadd.f32 %v12993_v1, %v12969_v25 }
 0x535   : > { %v12975_v15 = vpop.f32.mrb[56].mxu0 }
 0x536   : > { %15421 = vst [vmem:[#allocation42_spill] sm:$0xff] %v12975_v15  ;;  %v10321_v4 = vpop.f32.mrb[57].mxu0 }
 0x537   : > { %v12977_v48 = vpop.f32.mrb[58].mxu0 }
 0x538   : > { %15422 = vst [vmem:[#allocation43_spill] sm:$0xff] %v12977_v48  ;;  %v10322_v17 = vpop.f32.mrb[59].mxu0 }
 0x53d   : > { %v12981_v2 = vpop.f32.mrb[60].mxu0 }
 0x53e   : > { %15423 = vst [vmem:[#allocation44_spill] sm:$0xff] %v12981_v2  ;;  %v10333_v61 = vpop.f32.mrb[61].mxu0 }
 0x53f   : > { %v12983_v30 = vpop.f32.mrb[62].mxu0 }
 0x540   : > { %15424 = vst [vmem:[#allocation45_spill] sm:$0xff] %v12983_v30  ;;  %v10334_v22 = vpop.f32.mrb[63].mxu0 }
 0x541   : > { %v13002_v22 = vadd.f32 %v12962_v7, %v12921_v0 }
 0x546   : > { %v2659_v46 = vpop.f32.mrb[64].mxu0 }
 0x547   : > { %v12988_v13 = vadd.f32 %v12962_v7, %v2659_v46  ;;  %v10345_v4 = vpop.f32.mrb[65].mxu0 }
 0x548   : > { %v2662_v17 = vpop.f32.mrb[66].mxu0 }
 0x549   : > { %v12996_v55 = vadd.f32 %v12993_v1, %v2662_v17  ;;  %v10346_v61 = vpop.f32.mrb[67].mxu0  ;;  %v3431_v15 = vsel %vm1474_vm3, %v12988_v13, -inf  ;;  %v3437_v17 = vsel %vm1474_vm3, %v13002_v22, -inf }
 0x54a   : > { %3432 = vmax.xlane.f32.xlu0 %v3431_v15  ;;  %v13013_v15 = vadd.f32 %v12993_v1, %v12927_v20  ;;  %v13028_v20 = vadd.f32 %v12962_v7, %v12929_v5 }
 0x54b   : > { %v3434_v46 = vsel %vm1474_vm3, %v12996_v55, -inf }
 0x54c   : > { %3435 = vmax.xlane.f32.xlu1 %v3434_v46  ;;  %v3449_v5 = vsel %vm1474_vm3, %v13028_v20, -inf }
 0x54e   : > { %v2761_v4 = vpop.f32.mrb[68].mxu0 }
 0x54f   : > { %v13007_v54 = vadd.f32 %v12962_v7, %v2761_v4  ;;  %v10357_v2 = vpop.f32.mrb[69].mxu0 }
 0x550   : > { %3438 = vmax.xlane.f32.xlu1 %v3437_v17  ;;  %v2764_v61 = vpop.f32.mrb[70].mxu0  ;;  %v13022_v2 = vadd.f32 %v12993_v1, %v12931_v12  ;;  %v3440_v17 = vsel %vm1474_vm3, %v13013_v15, -inf }
 0x551   : > { %v13016_v0 = vadd.f32 %v12993_v1, %v2764_v61  ;;  %v10358_v30 = vpop.f32.mrb[71].mxu0  ;;  %v3443_v46 = vsel %vm1474_vm3, %v13007_v54, -inf }
 0x552   : > { %3444 = vmax.xlane.f32.xlu0 %v3443_v46  ;;  %v3452_v46 = vsel %vm1474_vm3, %v13022_v2, -inf }
 0x553   : > { %v3446_v4 = vsel %vm1474_vm3, %v13016_v0, -inf }
 0x554   : > { %3447 = vmax.xlane.f32.xlu1 %v3446_v4 }
 0x556   : > { %3441 = vmax.xlane.f32.xlu0 %v3440_v17  ;;  %v2863_v30 = vpop.f32.mrb[72].mxu0  ;;  %v13044_v17 = vadd.f32 %v12993_v1, %v12935_v59 }
 0x557   : > { %v10369_v61 = vpop.f32.mrb[73].mxu0  ;;  %v13035_v48 = vadd.f32 %v12962_v7, %v2863_v30  ;;  %v13050_v30 = vadd.f32 %v12962_v7, %v12933_v27 }
 0x558   : > { %3453 = vmax.xlane.f32.xlu1 %v3452_v46  ;;  %v2866_v12 = vpop.f32.mrb[74].mxu0 }
 0x559   : > { %v13038_v4 = vadd.f32 %v12993_v1, %v2866_v12  ;;  %v10370_v39 = vpop.f32.mrb[75].mxu0  ;;  %v3455_v46 = vsel %vm1474_vm3, %v13035_v48, -inf  ;;  %v3461_v27 = vsel %vm1474_vm3, %v13050_v30, -inf }
 0x55a   : > { %3450 = vmax.xlane.f32.xlu0 %v3449_v5  ;;  %v3464_v5 = vsel %vm1474_vm3, %v13044_v17, -inf }
 0x55b   : > { %v3458_v61 = vsel %vm1474_vm3, %v13038_v4, -inf }
 0x55c   : > { %3459 = vmax.xlane.f32.xlu1 %v3458_v61 }
 0x55e   : > { %3456 = vmax.xlane.f32.xlu0 %v3455_v46  ;;  %v2965_v39 = vpop.f32.mrb[76].mxu0  ;;  %v13066_v46 = vadd.f32 %v12993_v1, %v12939_v58 }
 0x55f   : > { %v10381_v12 = vpop.f32.mrb[77].mxu0  ;;  %v13057_v19 = vadd.f32 %v12962_v7, %v2965_v39  ;;  %v13072_v39 = vadd.f32 %v12962_v7, %v12937_v44 }
 0x560   : > { %3465 = vmax.xlane.f32.xlu1 %v3464_v5  ;;  %v2968_v59 = vpop.f32.mrb[78].mxu0 }
 0x561   : > { %v13060_v61 = vadd.f32 %v12993_v1, %v2968_v59  ;;  %v10382_v49 = vpop.f32.mrb[79].mxu0  ;;  %v3467_v5 = vsel %vm1474_vm3, %v13057_v19, -inf  ;;  %v3473_v44 = vsel %vm1474_vm3, %v13072_v39, -inf }
 0x562   : > { %3462 = vmax.xlane.f32.xlu0 %v3461_v27  ;;  %v3476_v27 = vsel %vm1474_vm3, %v13066_v46, -inf }
 0x563   : > { %v3470_v12 = vsel %vm1474_vm3, %v13060_v61, -inf }
 0x564   : > { %3471 = vmax.xlane.f32.xlu1 %v3470_v12 }
 0x566   : > { %3468 = vmax.xlane.f32.xlu0 %v3467_v5  ;;  %v3067_v49 = vpop.f32.mrb[80].mxu0  ;;  %v13088_v5 = vadd.f32 %v12993_v1, %v12943_v28 }
 0x567   : > { %v10393_v59 = vpop.f32.mrb[81].mxu0  ;;  %v13079_v45 = vadd.f32 %v12962_v7, %v3067_v49  ;;  %v13094_v49 = vadd.f32 %v12962_v7, %v12941_v63 }
 0x568   : > { %3477 = vmax.xlane.f32.xlu1 %v3476_v27  ;;  %v3070_v58 = vpop.f32.mrb[82].mxu0 }
 0x569   : > { %v13082_v12 = vadd.f32 %v12993_v1, %v3070_v58  ;;  %v10394_v11 = vpop.f32.mrb[83].mxu0  ;;  %v3479_v27 = vsel %vm1474_vm3, %v13079_v45, -inf  ;;  %v3485_v63 = vsel %vm1474_vm3, %v13094_v49, -inf }
 0x56a   : > { %3474 = vmax.xlane.f32.xlu0 %v3473_v44  ;;  %v3488_v44 = vsel %vm1474_vm3, %v13088_v5, -inf }
 0x56b   : > { %v3482_v59 = vsel %vm1474_vm3, %v13082_v12, -inf }
 0x56c   : > { %3483 = vmax.xlane.f32.xlu1 %v3482_v59 }
 0x56e   : > { %3480 = vmax.xlane.f32.xlu0 %v3479_v27  ;;  %v3169_v11 = vpop.f32.mrb[84].mxu0  ;;  %v13112_v27 = vadd.f32 %v12993_v1, %v12947_v60 }
 0x56f   : > { %v10405_v58 = vpop.f32.mrb[85].mxu0  ;;  %v13101_v51 = vadd.f32 %v12962_v7, %v3169_v11  ;;  %v13118_v11 = vadd.f32 %v12962_v7, %v12945_v18 }
 0x570   : > { %3489 = vmax.xlane.f32.xlu1 %v3488_v44  ;;  %v3172_v28 = vpop.f32.mrb[86].mxu0 }
 0x571   : > { %v13104_v59 = vadd.f32 %v12993_v1, %v3172_v28  ;;  %v10406_v23 = vpop.f32.mrb[87].mxu0  ;;  %v3497_v50 = vsel %vm1474_vm3, %v13118_v11, -inf }
 0x572   : > { %3486 = vmax.xlane.f32.xlu0 %v3485_v63  ;;  %v3491_v23 = vsel %vm1474_vm3, %v13101_v51, -inf  ;;  %v3500_v63 = vsel %vm1474_vm3, %v13112_v27, -inf }
 0x573   : > { %v3494_v58 = vsel %vm1474_vm3, %v13104_v59, -inf }
 0x574   : > { %3495 = vmax.xlane.f32.xlu1 %v3494_v58 }
 0x576   : > { %3492 = vmax.xlane.f32.xlu0 %v3491_v23  ;;  %v3271_v44 = vpop.f32.mrb[88].mxu0  ;;  %v13136_v23 = vadd.f32 %v12993_v1, %v12953_v21 }
 0x577   : > { %v10417_v28 = vpop.f32.mrb[89].mxu0  ;;  %v13127_v53 = vadd.f32 %v12962_v7, %v3271_v44  ;;  %v13142_v44 = vadd.f32 %v12962_v7, %v12949_v26 }
 0x578   : > { %3501 = vmax.xlane.f32.xlu1 %v3500_v63  ;;  %v3274_v60 = vpop.f32.mrb[90].mxu0  ;;  %v3512_v21 = vsel %vm1474_vm3, %v13136_v23, -inf }
 0x579   : > { %v13130_v58 = vadd.f32 %v12993_v1, %v3274_v60  ;;  %v10418_v18 = vpop.f32.mrb[91].mxu0  ;;  %v3503_v63 = vsel %vm1474_vm3, %v13127_v53, -inf }
 0x57a   : > { %3498 = vmax.xlane.f32.xlu0 %v3497_v50  ;;  %v13146_v18 = vpop.permute.xlu0 %4410 }
 0x57b   : > { %v3506_v28 = vsel %vm1474_vm3, %v13130_v58, -inf }
 0x57c   : > { %3507 = vmax.xlane.f32.xlu1 %v3506_v28 }
 0x57e   : > { %3504 = vmax.xlane.f32.xlu0 %v3503_v63  ;;  %v3373_v60 = vpop.f32.mrb[92].mxu0  ;;  %v3509_v63 = vsel %vm1474_vm3, %v13142_v44, -inf  ;;  %v13162_v3 = vpop.permute.xlu0 %4504 }
 0x57f   : > { %v10429_v50 = vpop.f32.mrb[93].mxu0  ;;  %v13153_v28 = vadd.f32 %v12962_v7, %v3373_v60  ;;  %v13166_v7 = vpop.permute.xlu1 %4128 }
 0x580   : > { %3513 = vmax.xlane.f32.xlu1 %v3512_v21  ;;  %v3376_v36 = vpop.f32.mrb[94].mxu0 }
 0x581   : > { %v13156_v26 = vadd.f32 %v12993_v1, %v3376_v36  ;;  %v10430_v29 = vpop.f32.mrb[95].mxu0  ;;  %v3515_v21 = vsel %vm1474_vm3, %v13153_v28, -inf  ;;  %v3521_v36 = vsel %vm1474_vm3, %v12967_v16, -inf }
 0x582   : > { %3510 = vmax.xlane.f32.xlu0 %v3509_v63  ;;  %v13170_v29 = vpop.permute.xlu0 %4999 }
 0x583   : > { %15425 = vst [vmem:[#allocation46_spill] sm:$0xff] %v13156_v26  ;;  %v3518_v50 = vsel %vm1474_vm3, %v13156_v26, -inf  ;;  %v13172_v60 = vpop.permute.xlu1 %4316 }
 0x584   : > { %3519 = vmax.xlane.f32.xlu1 %v3518_v50 }
 0x586   : > { %3516 = vmax.xlane.f32.xlu0 %v3515_v21  ;;  %v13174_v63 = vpop.permute.xlu0 %4997 }
 0x587   : > { %15426 = vst [vmem:[#allocation47_spill] sm:$0xff] %v13174_v63  ;;  %v13176_v56 = vpop.permute.xlu1 %5050 }
 0x58a   : > { %3522 = vmax.xlane.f32.xlu0 %v3521_v36  ;;  %v13180_v50 = vpop.permute.xlu0 %5048 }
 0x58b   : > { %15427 = vst [vmem:[#allocation48_spill] sm:$0xff] %v13180_v50  ;;  %v13182_v21 = vpop.permute.xlu1 %5101 }
 0x58c   : > { %15428 = vst [vmem:[#allocation49_spill] sm:$0xff] %v13182_v21 }
 0x58e   : > { %v13184_v41 = vpop.permute.xlu0 %5099 }
 0x58f   : > { %15429 = vst [vmem:[#allocation50_spill] sm:$0xff] %v13184_v41  ;;  %v13186_v9 = vpop.permute.xlu1 %5152 }
 0x590   : > { %15430 = vst [vmem:[#allocation51_spill] sm:$0xff] %v13186_v9 }
 0x592   : > { %v13190_v36 = vpop.permute.xlu0 %5150 }
 0x593   : > { %15431 = vst [vmem:[#allocation52_spill] sm:$0xff] %v13190_v36  ;;  %v13192_v33 = vpop.permute.xlu1 %5203 }
 0x594   : > { %15432 = vst [vmem:[#allocation53_spill] sm:$0xff] %v13192_v33 }
 0x595   : > { %5662 = vrot.lane.b32.xlu1 %v15378_v47, %s11723_s25 }
 0x596   : > { %v13194_v6 = vpop.permute.xlu0 %5201 }
 0x597   : > { %15433 = vst [vmem:[#allocation54_spill] sm:$0xff] %v13194_v6  ;;  %v13196_v10 = vpop.permute.xlu1 %5254 }
 0x598   : > { %15434 = vst [vmem:[#allocation55_spill] sm:$0xff] %v13196_v10 }
 0x59a   : > { %v13198_v37 = vpop.permute.xlu0 %5252 }
 0x59b   : > { %15435 = vst [vmem:[#allocation56_spill] sm:$0xff] %v13198_v37  ;;  %v13200_v14 = vpop.permute.xlu1 %5305 }
 0x59c   : > { %15436 = vst [vmem:[#allocation57_spill] sm:$0xff] %v13200_v14 }
 0x59e   : > { %v13206_v26 = vpop.permute.xlu0 %5303 }
 0x59f   : > { %15437 = vst [vmem:[#allocation58_spill] sm:$0xff] %v13206_v26  ;;  %v13208_v42 = vpop.permute.xlu1 %5356 }
 0x5a0   : > { %5609 = vrot.lane.b32.xlu0 %v15365_v57, %s11724_s1  ;;  %15438 = vst [vmem:[#allocation59_spill] sm:$0xff] %v13208_v42  ;;  %v3524_v57 = vsel %vm1474_vm3, %v13204_v62, -inf }
 0x5a2   : > { %v13212_v36 = vpop.permute.xlu0 %5354 }
 0x5a3   : > { %15439 = vst [vmem:[#allocation60_spill] sm:$0xff] %v13212_v36  ;;  %v13214_v6 = vpop.permute.xlu1 %5407 }
 0x5a4   : > { %15440 = vst [vmem:[#allocation61_spill] sm:$0xff] %v13214_v6 }
 0x5a6   : > { %v13216_v10 = vpop.permute.xlu0 %5405 }
 0x5a7   : > { %15441 = vst [vmem:[#allocation62_spill] sm:$0xff] %v13216_v10  ;;  %v13218_v37 = vpop.permute.xlu1 %5458 }
 0x5a8   : > { %15442 = vst [vmem:[#allocation63_spill] sm:$0xff] %v13218_v37 }
 0x5aa   : > { %v13220_v14 = vpop.permute.xlu0 %5456 }
 0x5ab   : > { %15443 = vst [vmem:[#allocation64_spill] sm:$0xff] %v13220_v14  ;;  %v13222_v25 = vpop.permute.xlu1 %5509 }
 0x5ac   : > { %15444 = vst [vmem:[#allocation65_spill] sm:$0xff] %v13222_v25 }
 0x5ae   : > { %v13224_v1 = vpop.permute.xlu0 %5507 }
 0x5af   : > { %15445 = vst [vmem:[#allocation66_spill] sm:$0xff] %v13224_v1  ;;  %v13226_v26 = vpop.permute.xlu1 %5560 }
 0x5b0   : > { %15446 = vst [vmem:[#allocation67_spill] sm:$0xff] %v13226_v26 }
 0x5b2   : > { %v13228_v42 = vpop.permute.xlu0 %5558 }
 0x5b3   : > { %15447 = vst [vmem:[#allocation68_spill] sm:$0xff] %v13228_v42  ;;  %v13230_v33 = vpop.permute.xlu1 %5611 }
 0x5b4   : > { %15448 = vst [vmem:[#allocation69_spill] sm:$0xff] %v13230_v33 }
 0x5b9   : > { %3525 = vmax.xlane.f32.xlu1 %v3524_v57 }
 0x5d7   : > { %v3433_v57 = vpop.xlane.xlu0 %3432 }
 0x5d8   : > { %v3527_v36 = vsub.f32 %v12988_v13, %v3433_v57 }
 0x5d9   : > { %v3436_v6 = vpop.xlane.xlu1 %3435 }
 0x5da   : > { %v3559_v31 = vmul.f32 1.442695, %v3527_v36  ;;  %v3528_v10 = vsub.f32 %v12996_v55, %v3436_v6 }
 0x5dc   : > { %11324 = vpow2.f32 %v3559_v31  ;;  %v3561_v37 = vmul.f32 1.442695, %v3528_v10 }
 0x5dd   : > { %v3439_v14 = vpop.xlane.xlu1 %3438 }
 0x5de   : > { %11326 = vpow2.f32 %v3561_v37  ;;  %v3529_v25 = vsub.f32 %v13002_v22, %v3439_v14 }
 0x5df   : > { %v3445_v1 = vpop.xlane.xlu0 %3444 }
 0x5e0   : > { %v3563_v41 = vmul.f32 1.442695, %v3529_v25  ;;  %v3531_v26 = vsub.f32 %v13007_v54, %v3445_v1 }
 0x5e1   : > { %v3448_v42 = vpop.xlane.xlu1 %3447 }
 0x5e2   : > { %11328 = vpow2.f32 %v3563_v41  ;;  %v3567_v33 = vmul.f32 1.442695, %v3531_v26  ;;  %v3532_v9 = vsub.f32 %v13016_v0, %v3448_v42 }
 0x5e3   : > { %v3442_v13 = vpop.xlane.xlu0 %3441 }
 0x5e4   : > { %11330 = vpow2.f32 %v3567_v33  ;;  %v3530_v36 = vsub.f32 %v13013_v15, %v3442_v13  ;;  %v3569_v10 = vmul.f32 1.442695, %v3532_v9 }
 0x5e5   : > { %v3454_v6 = vpop.xlane.xlu1 %3453 }
 0x5e6   : > { %v13238_v31 = vpop.eup %11324  ;;  %v3565_v37 = vmul.f32 1.442695, %v3530_v36  ;;  %v3534_v14 = vsub.f32 %v13022_v2, %v3454_v6 }
 0x5e7   : > { %v3451_v55 = vpop.xlane.xlu0 %3450  ;;  %v3623_v54 = vsel %vm1474_vm3, %v13238_v31, 0.0 }
 0x5e8   : > { %v13243_v22 = vpop.eup %11326  ;;  %11332 = vpow2.f32 %v3565_v37  ;;  %v3533_v42 = vsub.f32 %v13028_v20, %v3451_v55  ;;  %3624 = vadd.xlane.f32.xlu0 %v3623_v54  ;;  %v3573_v9 = vmul.f32 1.442695, %v3534_v14 }
 0x5e9   : > { %v13246_v33 = vpop.xlane.xlu1 %3459  ;;  %v3626_v41 = vsel %vm1474_vm3, %v13243_v22, 0.0  ;;  %11334 = vpow2.f32 %v3569_v10 }
 0x5ea   : > { %v3571_v15 = vmul.f32 1.442695, %v3533_v42  ;;  %3627 = vadd.xlane.f32.xlu1 %v3626_v41 }
 0x5eb   : > { %v13250_v0 = vpop.xlane.xlu0 %3456 }
 0x5ec   : > { %v13252_v2 = vpop.eup %11328  ;;  %11336 = vpow2.f32 %v3571_v15 }
 0x5ed   : > { %v3466_v26 = vpop.xlane.xlu1 %3465  ;;  %v3629_v25 = vsel %vm1474_vm3, %v13252_v2, 0.0  ;;  %11338 = vpow2.f32 %v3573_v9 }
 0x5ee   : > { %v13256_v20 = vpop.eup %11330  ;;  %v3538_v1 = vsub.f32 %v13044_v17, %v3466_v26  ;;  %3630 = vadd.xlane.f32.xlu0 %v3629_v25 }
 0x5ef   : > { %15449 = vst [vmem:[#allocation70_spill] sm:$0xff] %v13256_v20  ;;  %v3463_v57 = vpop.xlane.xlu0 %3462  ;;  %v3635_v10 = vsel %vm1474_vm3, %v13256_v20, 0.0 }
 0x5f0   : > { %v3581_v13 = vmul.f32 1.442695, %v3538_v1  ;;  %v3537_v36 = vsub.f32 %v13050_v30, %v3463_v57 }
 0x5f1   : > { %v13260_v6 = vpop.xlane.xlu1 %3471 }
 0x5f2   : > { %v13264_v37 = vpop.eup %11332  ;;  %11340 = vpow2.f32 %v3581_v13  ;;  %v3579_v14 = vmul.f32 1.442695, %v3537_v36  ;;  %3636 = vadd.xlane.f32.xlu0 %v3635_v10 }
 0x5f3   : > { %v13266_v55 = vpop.xlane.xlu0 %3468  ;;  %v3632_v17 = vsel %vm1474_vm3, %v13264_v37, 0.0  ;;  %v13270_v54 = vpop.eup %11334 }
 0x5f4   : > { %15450 = vst [vmem:[#allocation71_spill] sm:$0xff] %v13270_v54  ;;  %11342 = vpow2.f32 %v3579_v14  ;;  %3633 = vadd.xlane.f32.xlu1 %v3632_v17  ;;  %v3638_v15 = vsel %vm1474_vm3, %v13270_v54, 0.0 }
 0x5f5   : > { %v3478_v30 = vpop.xlane.xlu1 %3477 }
 0x5f6   : > { %v13272_v42 = vpop.eup %11336  ;;  %v3542_v41 = vsub.f32 %v13066_v46, %v3478_v30 }
 0x5f7   : > { %v3475_v9 = vpop.xlane.xlu0 %3474  ;;  %v3641_v26 = vsel %vm1474_vm3, %v13272_v42, 0.0  ;;  %v13279_v25 = vpop.eup %11338 }
 0x5f8   : > { %v3589_v1 = vmul.f32 1.442695, %v3542_v41  ;;  %v3541_v57 = vsub.f32 %v13072_v39, %v3475_v9  ;;  %3639 = vadd.xlane.f32.xlu1 %v3638_v15  ;;  %3642 = vadd.xlane.f32.xlu0 %v3641_v26  ;;  %v3644_v46 = vsel %vm1474_vm3, %v13279_v25, 0.0 }
 0x5f9   : > { %v13282_v13 = vpop.xlane.xlu1 %3483 }
 0x5fa   : > { %11344 = vpow2.f32 %v3589_v1  ;;  %v3587_v36 = vmul.f32 1.442695, %v3541_v57 }
 0x5fb   : > { %v13284_v10 = vpop.xlane.xlu0 %3480 }
 0x5fc   : > { %v13288_v14 = vpop.eup %11340  ;;  %11346 = vpow2.f32 %v3587_v36  ;;  %3645 = vadd.xlane.f32.xlu1 %v3644_v46 }
 0x5fd   : > { %v3490_v17 = vpop.xlane.xlu1 %3489  ;;  %v3656_v9 = vsel %vm1474_vm3, %v13288_v14, 0.0 }
 0x5fe   : > { %v13290_v30 = vpop.eup %11342  ;;  %v3546_v39 = vsub.f32 %v13088_v5, %v3490_v17 }
 0x5ff   : > { %v3487_v41 = vpop.xlane.xlu0 %3486  ;;  %v3653_v15 = vsel %vm1474_vm3, %v13290_v30, 0.0 }
 0x600   : > { %v3545_v26 = vsub.f32 %v13094_v49, %v3487_v41  ;;  %3657 = vadd.xlane.f32.xlu1 %v3656_v9  ;;  %3654 = vadd.xlane.f32.xlu0 %v3653_v15  ;;  %v3597_v57 = vmul.f32 1.442695, %v3546_v39 }
 0x601   : > { %v13298_v1 = vpop.xlane.xlu1 %3495 }
 0x602   : > { %v3595_v36 = vmul.f32 1.442695, %v3545_v26 }
 0x603   : > { %v13300_v46 = vpop.xlane.xlu0 %3492 }
 0x604   : > { %v13302_v20 = vpop.eup %11344  ;;  %11348 = vpow2.f32 %v3595_v36 }
 0x605   : > { %v3502_v5 = vpop.xlane.xlu1 %3501  ;;  %v3668_v17 = vsel %vm1474_vm3, %v13302_v20, 0.0  ;;  %11350 = vpow2.f32 %v3597_v57 }
 0x606   : > { %v13306_v54 = vpop.eup %11346  ;;  %v3550_v49 = vsub.f32 %v13112_v27, %v3502_v5  ;;  %3669 = vadd.xlane.f32.xlu1 %v3668_v17 }
 0x607   : > { %v3499_v41 = vpop.xlane.xlu0 %3498  ;;  %v3665_v39 = vsel %vm1474_vm3, %v13306_v54, 0.0 }
 0x608   : > { %v3605_v9 = vmul.f32 1.442695, %v3550_v49  ;;  %v3549_v15 = vsub.f32 %v13118_v11, %v3499_v41  ;;  %3666 = vadd.xlane.f32.xlu0 %v3665_v39 }
 0x609   : > { %v13312_v26 = vpop.xlane.xlu1 %3507 }
 0x60a   : > { %11352 = vpow2.f32 %v3605_v9  ;;  %v3603_v36 = vmul.f32 1.442695, %v3549_v15 }
 0x60b   : > { %v13314_v50 = vpop.xlane.xlu0 %3504 }
 0x60c   : > { %11354 = vpow2.f32 %v3603_v36 }
 0x60d   : > { %v3514_v21 = vpop.xlane.xlu1 %3513 }
 0x60e   : > { %v13316_v57 = vpop.eup %11348  ;;  %v3554_v27 = vsub.f32 %v13136_v23, %v3514_v21  ;;  %v3535_v21 = vsub.f32 %v13035_v48, %v13250_v0 }
 0x60f   : > { %v3511_v5 = vpop.xlane.xlu0 %3510  ;;  %v3677_v17 = vsel %vm1474_vm3, %v13316_v57, 0.0  ;;  %v13321_v49 = vpop.eup %11350 }
 0x610   : > { %v3553_v11 = vsub.f32 %v13142_v44, %v3511_v5  ;;  %3678 = vadd.xlane.f32.xlu1 %v3677_v17  ;;  %v3613_v41 = vmul.f32 1.442695, %v3554_v27  ;;  %v3680_v15 = vsel %vm1474_vm3, %v13321_v49, 0.0  ;;  %v3575_v17 = vmul.f32 1.442695, %v3535_v21 }
 0x612   : > { %v3611_v39 = vmul.f32 1.442695, %v3553_v11 }
 0x613   : > { %v13324_v9 = vpop.xlane.xlu0 %3516 }
 0x614   : > { %v13328_v36 = vpop.eup %11352  ;;  %11356 = vpow2.f32 %v3611_v39  ;;  %3681 = vadd.xlane.f32.xlu1 %v3680_v15 }
 0x615   : > { %11358 = vpow2.f32 %v3613_v41  ;;  %v3692_v44 = vsel %vm1474_vm3, %v13328_v36, 0.0 }
 0x616   : > { %v13330_v23 = vpop.eup %11354 }
 0x617   : > { %v3523_v63 = vpop.xlane.xlu0 %3522  ;;  %v3689_v27 = vsel %vm1474_vm3, %v13330_v23, 0.0 }
 0x618   : > { %v3557_v5 = vsub.f32 %v12967_v16, %v3523_v63  ;;  %3693 = vadd.xlane.f32.xlu1 %v3692_v44  ;;  %3690 = vadd.xlane.f32.xlu0 %v3689_v27  ;;  %v13355_v44 = vpop.xlane.xlu1 %3519 }
 0x61a   : > { %v3619_v11 = vmul.f32 1.442695, %v3557_v5  ;;  %v3536_v5 = vsub.f32 %v13038_v4, %v13246_v33 }
 0x61b   : > { %v13380_v33 = vpop.permute.xlu0 %5609 }
 0x61c   : > { %11360 = vpow2.f32 %v3619_v11  ;;  %v13357_v27 = vpop.permute.xlu1 %5662 }
 0x61d   : > { %11362 = vpow2.f32 %v3575_v17  ;;  %15452 = vst [vmem:[#allocation73_spill] sm:$0xff] %v13357_v27 }
 0x61e   : > { %v13339_v39 = vpop.eup %11356 }
 0x61f   : > { %v3701_v48 = vsel %vm1474_vm3, %v13339_v39, 0.0  ;;  %v13343_v0 = vpop.eup %11358 }
 0x620   : > { %3702 = vadd.xlane.f32.xlu1 %v3701_v48  ;;  %v3704_v41 = vsel %vm1474_vm3, %v13343_v0, 0.0  ;;  %v3577_v48 = vmul.f32 1.442695, %v3536_v5 }
 0x624   : > { %3705 = vadd.xlane.f32.xlu1 %v3704_v41 }
 0x626   : > { %v13347_v15 = vpop.eup %11360 }
 0x627   : > { %v3713_v16 = vsel %vm1474_vm3, %v13347_v15, 0.0  ;;  %v13351_v63 = vpop.eup %11362 }
 0x628   : > { %15451 = vst [vmem:[#allocation72_spill] sm:$0xff] %v13351_v63  ;;  %3714 = vadd.xlane.f32.xlu0 %v3713_v16  ;;  %v3647_v21 = vsel %vm1474_vm3, %v13351_v63, 0.0  ;;  %v3539_v16 = vsub.f32 %v13057_v19, %v13266_v55 }
 0x62c   : > { %3648 = vadd.xlane.f32.xlu0 %v3647_v21  ;;  %v3583_v21 = vmul.f32 1.442695, %v3539_v16  ;;  %v3544_v16 = vsub.f32 %v13082_v12, %v13282_v13 }
 0x642   : > { %5660 = vrot.lane.b32.xlu0 %v15378_v47, %s11724_s1 }
 0x646   : > { %v3526_v17 = vpop.xlane.xlu1 %3525 }
 0x647   : > { %v3558_v11 = vsub.f32 %v13204_v62, %v3526_v17 }
 0x649   : > { %v3621_v41 = vmul.f32 1.442695, %v3558_v11 }
 0x64b   : > { %11364 = vpow2.f32 %v3621_v41 }
 0x64c   : > { %11366 = vpow2.f32 %v3577_v48 }
 0x64d   : > { %11368 = vpow2.f32 %v3583_v21 }
 0x655   : > { %v13366_v63 = vpop.eup %11364 }
 0x656   : > { %v3716_v47 = vsel %vm1474_vm3, %v13366_v63, 0.0  ;;  %v13370_v27 = vpop.eup %11366 }
 0x657   : > { %15453 = vst [vmem:[#allocation74_spill] sm:$0xff] %v13370_v27  ;;  %3717 = vadd.xlane.f32.xlu1 %v3716_v47  ;;  %v3650_v62 = vsel %vm1474_vm3, %v13370_v27, 0.0  ;;  %v13374_v4 = vpop.eup %11368  ;;  %v3540_v47 = vsub.f32 %v13060_v61, %v13260_v6  ;;  %v3593_v61 = vmul.f32 1.442695, %v3544_v16 }
 0x658   : > { %15454 = vst [vmem:[#allocation75_spill] sm:$0xff] %v13374_v4  ;;  %v3659_v19 = vsel %vm1474_vm3, %v13374_v4, 0.0 }
 0x659   : > { %v3585_v17 = vmul.f32 1.442695, %v3540_v47 }
 0x65b   : > { %3651 = vadd.xlane.f32.xlu1 %v3650_v62 }
 0x661   : > { %3660 = vadd.xlane.f32.xlu0 %v3659_v19 }
 0x66c   : > { %5713 = vrot.lane.b32.xlu1 %v15366_v24, %s11723_s25 }
 0x675   : > { %v13382_v55 = vpop.xlane.xlu0 %3624 }
 0x677   : > { %3799 = vrot.lane.b32.xlu0 %v11846_v32, %s11722_s24  ;;  %v13390_v11 = vpop.xlane.xlu1 %3627 }
 0x67b   : > { %5764 = vrot.lane.b32.xlu0 %v11915_v38, %s11723_s25  ;;  %v3631_v5 = vpop.xlane.xlu0 %3630 }
 0x67c   : > { %11370 = vrcp.f32 %v3631_v5 }
 0x67d   : > { %11372 = vpow2.f32 %v3585_v17 }
 0x67f   : > { %v13392_v48 = vpop.xlane.xlu0 %3636 }
 0x681   : > { %v3634_v41 = vpop.xlane.xlu1 %3633 }
 0x682   : > { %11374 = vrcp.f32 %v3634_v41 }
 0x685   : > { %v13396_v21 = vpop.xlane.xlu1 %3639  ;;  %v3643_v62 = vpop.xlane.xlu0 %3642 }
 0x686   : > { %11376 = vrcp.f32 %v3643_v62  ;;  %v11371_v19 = vpop.eup %11370 }
 0x687   : > { %v13398_v47 = vpop.eup %11372  ;;  %v3753_v5 = vmul.f32 %v11371_v19, %v13252_v2 }
 0x688   : > { %v3662_v12 = vsel %vm1474_vm3, %v13398_v47, 0.0 }
 0x689   : > { %v3646_v6 = vpop.xlane.xlu1 %3645 }
 0x68a   : > { %11378 = vrcp.f32 %v3646_v6 }
 0x68b   : > { %11380 = vpow2.f32 %v3593_v61 }
 0x68c   : > { %v11375_v4 = vpop.eup %11374 }
 0x68d   : > { %v3754_v17 = vmul.f32 %v11375_v4, %v13264_v37  ;;  %v3658_v41 = vpop.xlane.xlu1 %3657  ;;  %v3655_v27 = vpop.xlane.xlu0 %3654 }
 0x68e   : > { %11382 = vrcp.f32 %v3658_v41 }
 0x68f   : > { %11384 = vrcp.f32 %v3655_v27  ;;  %v3784_v13 = vpack.c.bf16 %v3754_v17, %v3753_v5 }
 0x690   : > { %3663 = vadd.xlane.f32.xlu1 %v3662_v12  ;;  %v11377_v16 = vpop.eup %11376 }
 0x691   : > { %10446 = vmatmul.mubr.msk.bf16.vlgmr.msra.gmra.mrb[128].mxu1 %vm1474_vm3, %v3784_v13  ;;  %v3757_v37 = vmul.f32 %v11377_v16, %v13272_v42 }
 0x692   : > { %10456 = vmatpush3.bf16.msra.mxu1 %v13150_v40  ;;  %10457 = vmatprep.mubr.msk.bf16.mxu1 %vm11717_vm1, %v15364_v34 }
 0x693   : > { %10467 = vmatprep.subr.bf16.mxu1 %v15364_v34  ;;  %v3670_v4 = vpop.xlane.xlu1 %3669 }
 0x694   : > { %v11379_v2 = vpop.eup %11378 }
 0x695   : > { %v3758_v27 = vmul.f32 %v11379_v2, %v13279_v25  ;;  %v3667_v62 = vpop.xlane.xlu0 %3666  ;;  %v13411_v61 = vpop.eup %11380 }
 0x696   : > { %11386 = vrcp.f32 %v3667_v62  ;;  %v3674_v40 = vsel %vm1474_vm3, %v13411_v61, 0.0  ;;  %v3543_v62 = vsub.f32 %v13079_v45, %v13284_v10 }
 0x697   : > { %v3786_v6 = vpack.c.bf16 %v3758_v27, %v3757_v37  ;;  %11388 = vrcp.f32 %v3670_v4 }
 0x698   : > { %v11383_v19 = vpop.eup %11382 }
 0x699   : > { %v11385_v5 = vpop.eup %11384  ;;  %10458 = vmatmul.mubr.msk.bf16.vlgmr.msra.gmra.mrb[132].mxu1 %vm1474_vm3, %v3786_v6  ;;  %v3762_v42 = vmul.f32 %v11383_v19, %v13288_v14 }
 0x69a   : > { %10468 = vmatpush3.bf16.msra.mxu1 %v13108_v35  ;;  %3675 = vadd.xlane.f32.xlu0 %v3674_v40  ;;  %v3761_v25 = vmul.f32 %v11385_v5, %v13290_v30  ;;  %v3548_v40 = vsub.f32 %v13104_v59, %v13298_v1 }
 0x69b   : > { %10469 = vmatprep.mubr.msk.bf16.mxu1 %vm11717_vm1, %v15364_v34  ;;  %10479 = vmatprep.subr.bf16.mxu1 %v15364_v34 }
 0x69c   : > { %v3788_v41 = vpack.c.bf16 %v3762_v42, %v3761_v25 }
 0x69d   : > { %v3679_v17 = vpop.xlane.xlu1 %3678 }
 0x69e   : > { %11390 = vrcp.f32 %v3679_v17 }
 0x6a0   : > { %v11387_v12 = vpop.eup %11386 }
 0x6a1   : > { %v3682_v13 = vpop.xlane.xlu1 %3681  ;;  %5711 = vrot.lane.b32.xlu1 %v15366_v24, %s11724_s1  ;;  %10470 = vmatmul.mubr.msk.bf16.vlgmr.msra.gmra.mrb[136].mxu1 %vm1474_vm3, %v3788_v41  ;;  %v11389_v35 = vpop.eup %11388  ;;  %v3765_v14 = vmul.f32 %v11387_v12, %v13306_v54 }
 0x6a2   : > { %11392 = vrcp.f32 %v3682_v13  ;;  %10480 = vmatpush3.bf16.msra.mxu1 %v13166_v7  ;;  %10481 = vmatprep.mubr.msk.bf16.mxu1 %vm11717_vm1, %v15364_v34  ;;  %v3766_v30 = vmul.f32 %v11389_v35, %v13302_v20  ;;  %v3551_v35 = vsub.f32 %v13127_v53, %v13314_v50 }
 0x6a3   : > { %10491 = vmatprep.subr.bf16.mxu1 %v15364_v34 }
 0x6a4   : > { %v3790_v37 = vpack.c.bf16 %v3766_v30, %v3765_v14 }
 0x6a5   : > { %v3694_v16 = vpop.xlane.xlu1 %3693  ;;  %v3691_v2 = vpop.xlane.xlu0 %3690 }
 0x6a6   : > { %11394 = vrcp.f32 %v3694_v16  ;;  %v3555_v16 = vsub.f32 %v13153_v28, %v13324_v9  ;;  %v5005_v28 = vsel %vm676_vm2, %v13170_v29, 0 }
 0x6a7   : > { %11396 = vrcp.f32 %v3691_v2 }
 0x6a8   : > { %v11391_v27 = vpop.eup %11390 }
 0x6a9   : > { %10482 = vmatmul.mubr.msk.bf16.vlgmr.msra.gmra.mrb[140].mxu1 %vm1474_vm3, %v3790_v37  ;;  %v3769_v54 = vmul.f32 %v11391_v27, %v13316_v57  ;;  %v3591_v57 = vmul.f32 1.442695, %v3543_v62 }
 0x6aa   : > { %10492 = vmatpush3.bf16.msra.mxu1 %v13124_v43  ;;  %10493 = vmatprep.mubr.msk.bf16.mxu1 %vm11717_vm1, %v15364_v34 }
 0x6ab   : > { %10503 = vmatprep.subr.bf16.mxu1 %v15364_v34 }
 0x6ac   : > { %v11393_v7 = vpop.eup %11392 }
 0x6ad   : > { %v3770_v20 = vmul.f32 %v11393_v7, %v13321_v49  ;;  %v3703_v4 = vpop.xlane.xlu1 %3702 }
 0x6ae   : > { %11398 = vrcp.f32 %v3703_v4 }
 0x6af   : > { %v3792_v6 = vpack.c.bf16 %v3770_v20, %v3769_v54 }
 0x6b0   : > { %v11395_v19 = vpop.eup %11394  ;;  %3893 = vrot.lane.b32.xlu0 %v11866_v52, %s11722_s24 }
 0x6b1   : > { %v11397_v43 = vpop.eup %11396  ;;  %v3706_v5 = vpop.xlane.xlu1 %3705  ;;  %10494 = vmatmul.mubr.msk.bf16.vlgmr.msra.gmra.mrb[144].mxu1 %vm1474_vm3, %v3792_v6  ;;  %v3774_v49 = vmul.f32 %v11395_v19, %v13328_v36  ;;  %v3601_v36 = vmul.f32 1.442695, %v3548_v40  ;;  %v15460_v40 = vld [vmem:[#allocation13_spill] sm:$0xff] }
 0x6b2   : > { %11400 = vrcp.f32 %v3706_v5  ;;  %10504 = vmatpush3.bf16.msra.mxu1 %v13172_v60  ;;  %10505 = vmatprep.mubr.msk.bf16.mxu1 %vm11717_vm1, %v15364_v34  ;;  %v3773_v45 = vmul.f32 %v11397_v43, %v13330_v23  ;;  %v15456_v43 = vld [vmem:[#allocation49_spill] sm:$0xff] }
 0x6b3   : > { %10515 = vmatprep.subr.bf16.mxu1 %v15364_v34  ;;  %11402 = vpow2.f32 %v3591_v57  ;;  %v5107_v5 = vsel %vm676_vm2, %v15456_v43, 0  ;;  %v15457_v57 = vld [vmem:[#allocation48_spill] sm:$0xff]  ;;  %v15481_v43 = vld [vmem:[#allocation67_spill] sm:$0xff] }
 0x6b4   : > { %v3794_v10 = vpack.c.bf16 %v3774_v49, %v3773_v45  ;;  %11404 = vpow2.f32 %v3601_v36  ;;  %v15458_v49 = vld [vmem:[#allocation51_spill] sm:$0xff]  ;;  %v15462_v36 = vld [vmem:[#allocation52_spill] sm:$0xff] }
 0x6b5   : > { %11406 = vrcp.f32 %v13390_v11  ;;  %v3552_v11 = vsub.f32 %v13130_v58, %v13312_v26  ;;  %v3615_v58 = vmul.f32 1.442695, %v3555_v16  ;;  %v5158_v45 = vsel %vm676_vm2, %v15458_v49, 0  ;;  %v15483_v49 = vld [vmem:[#allocation66_spill] sm:$0xff] }
 0x6b7   : > { %v3609_v27 = vmul.f32 1.442695, %v3552_v11 }
 0x6b8   : > { %v11399_v42 = vpop.eup %11398 }
 0x6b9   : > { %10506 = vmatmul.mubr.msk.bf16.vlgmr.msra.gmra.mrb[148].mxu1 %vm1474_vm3, %v3794_v10  ;;  %v3777_v23 = vmul.f32 %v11399_v42, %v13339_v39  ;;  %v3715_v39 = vpop.xlane.xlu0 %3714  ;;  %v15459_v10 = vld [vmem:[#allocation50_spill] sm:$0xff]  ;;  %v15461_v42 = vld [vmem:[#allocation53_spill] sm:$0xff] }
 0x6ba   : > { %10516 = vmatpush3.bf16.msra.mxu1 %v13146_v18  ;;  %10517 = vmatprep.mubr.msk.bf16.mxu1 %vm11717_vm1, %v15364_v34  ;;  %11408 = vrcp.f32 %v3715_v39  ;;  %v15467_v39 = vld [vmem:[#allocation46_spill] sm:$0xff] }
 0x6bb   : > { %10527 = vmatprep.subr.bf16.mxu1 %v15364_v34  ;;  %11410 = vrcp.f32 %v13382_v55 }
 0x6bc   : > { %v11401_v60 = vpop.eup %11400 }
 0x6bd   : > { %v3778_v25 = vmul.f32 %v11401_v60, %v13343_v0  ;;  %v13458_v41 = vpop.eup %11402  ;;  %v13477_v0 = vpop.xlane.xlu0 %3648  ;;  %v5209_v60 = vsel %vm676_vm2, %v15461_v42, 0  ;;  %v15485_v42 = vld [vmem:[#allocation69_spill] sm:$0xff] }
 0x6be   : > { %v3671_v59 = vsel %vm1474_vm3, %v13458_v41, 0.0  ;;  %v13467_v18 = vpop.eup %11404 }
 0x6bf   : > { %v3796_v17 = vpack.c.bf16 %v3778_v25, %v3777_v23  ;;  %v3686_v1 = vsel %vm1474_vm3, %v13467_v18, 0.0  ;;  %v11407_v30 = vpop.eup %11406  ;;  %v15463_v23 = vld [vmem:[#allocation4_spill] sm:$0xff]  ;;  %v15464_v25 = vld [vmem:[#allocation55_spill] sm:$0xff] }
 0x6c0   : > { %v3752_v53 = vmul.f32 %v11407_v30, %v13243_v22 }
 0x6c1   : > { %10518 = vmatmul.mubr.msk.bf16.vlgmr.msra.gmra.mrb[152].mxu1 %vm1474_vm3, %v3796_v17  ;;  %v13483_v14 = vpop.permute.xlu0 %5660  ;;  %v5260_v17 = vsel %vm676_vm2, %v15464_v25, 0  ;;  %v15487_v25 = vld [vmem:[#allocation68_spill] sm:$0xff] }
 0x6c2   : > { %10528 = vmatpush3.bf16.msra.mxu1 %v13162_v3  ;;  %10529 = vmatprep.mubr.msk.bf16.mxu1 %vm11717_vm1, %v15364_v34  ;;  %v3547_v3 = vsub.f32 %v13101_v51, %v13300_v46  ;;  %v3607_v51 = vmul.f32 1.442695, %v3551_v35  ;;  %v15469_v35 = vld [vmem:[#allocation56_spill] sm:$0xff] }
 0x6c3   : > { %10601 = vmatprep.subr.bf16.mxu1 %v15364_v34 }
 0x6c4   : > { %v3599_v13 = vmul.f32 1.442695, %v3547_v3  ;;  %v11409_v46 = vpop.eup %11408  ;;  %v3556_v3 = vsub.f32 %v15467_v39, %v13355_v44 }
 0x6c5   : > { %3672 = vadd.xlane.f32.xlu1 %v3671_v59  ;;  %v11411_v55 = vpop.eup %11410  ;;  %v3781_v50 = vmul.f32 %v11409_v46, %v13347_v15  ;;  %v5056_v15 = vsel %vm676_vm2, %v13176_v56, 0  ;;  %v15465_v59 = vld [vmem:[#allocation54_spill] sm:$0xff] }
 0x6c6   : > { %v3751_v26 = vmul.f32 %v11411_v55, %v13238_v31  ;;  %v15471_v55 = vld [vmem:[#allocation70_spill] sm:$0xff] }
 0x6c8   : > { %v3783_v9 = vpack.c.bf16 %v3752_v53, %v3751_v26  ;;  %v15474_v26 = vld [vmem:[#allocation61_spill] sm:$0xff] }
 0x6cf   : > { %3687 = vadd.xlane.f32.xlu0 %v3686_v1  ;;  %v15466_v1 = vld [vmem:[#allocation11_spill] sm:$0xff] }
 0x6d6   : > { %5762 = vrot.lane.b32.xlu1 %v11915_v38, %s11724_s1 }
 0x6e4   : > { %v3718_v12 = vpop.xlane.xlu1 %3717 }
 0x6e5   : > { %11412 = vrcp.f32 %v3718_v12  ;;  %3987 = vrot.lane.b32.xlu0 %v11886_v8, %s11722_s24  ;;  %v15468_v12 = vld [vmem:[#allocation57_spill] sm:$0xff] }
 0x6e6   : > { %11414 = vpow2.f32 %v3599_v13  ;;  %v5311_v13 = vsel %vm676_vm2, %v15468_v12, 0 }
 0x6e7   : > { %11416 = vpow2.f32 %v3607_v51  ;;  %v15470_v51 = vld [vmem:[#allocation71_spill] sm:$0xff] }
 0x6e8   : > { %11418 = vpow2.f32 %v3609_v27  ;;  %v15472_v27 = vld [vmem:[#allocation59_spill] sm:$0xff] }
 0x6e9   : > { %11420 = vpow2.f32 %v3615_v58  ;;  %v5362_v53 = vsel %vm676_vm2, %v15472_v27, 0 }
 0x6ea   : > { %11422 = vrcp.f32 %v13396_v21 }
 0x6eb   : > { %11424 = vrcp.f32 %v13392_v48  ;;  %v3617_v48 = vmul.f32 1.442695, %v3556_v3 }
 0x6ed   : > { %11426 = vpow2.f32 %v3617_v48 }
 0x6ee   : > { %v13489_v2 = vpop.xlane.xlu0 %3660 }
 0x6ef   : > { %v11413_v37 = vpop.eup %11412 }
 0x6f0   : > { %v3782_v7 = vmul.f32 %v11413_v37, %v13366_v63  ;;  %v13501_v22 = vpop.eup %11414  ;;  %v15455_v63 = vld [vmem:[#allocation47_spill] sm:$0xff] }
 0x6f1   : > { %v3683_v29 = vsel %vm1474_vm3, %v13501_v22, 0.0  ;;  %v13509_v31 = vpop.eup %11416 }
 0x6f2   : > { %v3800_v54 = vpop.permute.xlu0 %3799  ;;  %v3798_v20 = vpack.c.bf16 %v3782_v7, %v3781_v50  ;;  %v3695_v4 = vsel %vm1474_vm3, %v13509_v31, 0.0  ;;  %v13519_v62 = vpop.eup %11418  ;;  %v15473_v50 = vld [vmem:[#allocation58_spill] sm:$0xff] }
 0x6f3   : > { %10438 = vmatpush3.bf16.msra.mxu0 %v3800_v54  ;;  %v13522_v6 = vpop.eup %11420  ;;  %v3698_v56 = vsel %vm1474_vm3, %v13519_v62, 0.0  ;;  %v5413_v54 = vsel %vm676_vm2, %v15474_v26, 0 }
 0x6f4   : > { %10530 = vmatmul.mubr.msk.bf16.vlgmr.msra.gmra.mrb[156].mxu1 %vm1474_vm3, %v3798_v20  ;;  %10449 = vmatprep.subr.bf16.mxu0 %v15364_v34  ;;  %v3707_v19 = vsel %vm1474_vm3, %v13522_v6, 0.0  ;;  %v11423_v11 = vpop.eup %11422  ;;  %v15475_v20 = vld [vmem:[#allocation60_spill] sm:$0xff] }
 0x6f5   : > { %10602 = vmatpush3.bf16.xpose.msra.mxu1 %v5005_v28  ;;  %10603 = vmatprep.mubr.msk.bf16.mxu1 %vm11717_vm1, %v15364_v34  ;;  %v11425_v30 = vpop.eup %11424  ;;  %v3756_v46 = vmul.f32 %v11423_v11, %v15470_v51  ;;  %v15491_v11 = vld [vmem:[#allocation72_spill] sm:$0xff] }
 0x6f6   : > { %10440 = vmatmul.mubr.msk.bf16.vlgmr.msra.gmra.mrb[96].mxu0 %vm1474_vm3, %v3783_v9  ;;  %10607 = vmatprep.subr.bf16.mxu1 %v15364_v34  ;;  %v13568_v21 = vpop.permute.xlu0 %5764  ;;  %v3755_v16 = vmul.f32 %v11425_v30, %v15471_v55  ;;  %v15476_v9 = vld [vmem:[#allocation63_spill] sm:$0xff] }
 0x6f7   : > { %10451 = vmatprep.mubr.msk.bf16.mxu0 %vm11717_vm1, %v15364_v34  ;;  %v13600_v58 = vpop.eup %11426 }
 0x6f8   : > { %v3785_v7 = vpack.c.bf16 %v3756_v46, %v3755_v16  ;;  %v3710_v28 = vsel %vm1474_vm3, %v13600_v58, 0.0 }
 0x6fa   : > { %3684 = vadd.xlane.f32.xlu1 %v3683_v29  ;;  %v5464_v29 = vsel %vm676_vm2, %v15476_v9, 0 }
 0x6fc   : > { %10604 = vmatmul.mubr.msk.bf16.vlgmr.msra.gmra.mrb[160].mxu1 %vm676_vm2, %v15455_v63  ;;  %v15478_v63 = vld [vmem:[#allocation65_spill] sm:$0xff] }
 0x6fd   : > { %10608 = vmatpush3.bf16.xpose.msra.mxu1 %v5056_v15  ;;  %10609 = vmatprep.mubr.msk.bf16.mxu1 %vm11717_vm1, %v15364_v34  ;;  %v15477_v15 = vld [vmem:[#allocation62_spill] sm:$0xff] }
 0x6fe   : > { %3696 = vadd.xlane.f32.xlu1 %v3695_v4  ;;  %10613 = vmatprep.subr.bf16.mxu1 %v15364_v34  ;;  %v5515_v4 = vsel %vm676_vm2, %v15478_v63, 0 }
 0x702   : > { %3699 = vadd.xlane.f32.xlu1 %v3698_v56  ;;  %v15479_v56 = vld [vmem:[#allocation64_spill] sm:$0xff] }
 0x704   : > { %3708 = vadd.xlane.f32.xlu0 %v3707_v19  ;;  %10610 = vmatmul.mubr.msk.bf16.vlgmr.msra.gmra.mrb[164].mxu1 %vm676_vm2, %v15457_v57  ;;  %v15480_v19 = vld [vmem:[#allocation7_spill] sm:$0xff]  ;;  %v15482_v57 = vld [vmem:[#allocation2_spill] sm:$0xff] }
 0x705   : > { %10614 = vmatpush3.bf16.xpose.msra.mxu1 %v5107_v5  ;;  %10615 = vmatprep.mubr.msk.bf16.mxu1 %vm11717_vm1, %v15364_v34  ;;  %v5566_v5 = vsel %vm676_vm2, %v15481_v43, 0 }
 0x706   : > { %10619 = vmatprep.subr.bf16.mxu1 %v15364_v34 }
 0x70c   : > { %10616 = vmatmul.mubr.msk.bf16.vlgmr.msra.gmra.mrb[168].mxu1 %vm676_vm2, %v15459_v10  ;;  %v15484_v10 = vld [vmem:[#allocation5_spill] sm:$0xff] }
 0x70d   : > { %10620 = vmatpush3.bf16.xpose.msra.mxu1 %v5158_v45  ;;  %10621 = vmatprep.mubr.msk.bf16.mxu1 %vm11717_vm1, %v15364_v34  ;;  %v3652_v45 = vpop.xlane.xlu1 %3651 }
 0x70e   : > { %10625 = vmatprep.subr.bf16.mxu1 %v15364_v34  ;;  %11428 = vrcp.f32 %v3652_v45 }
 0x70f   : > { %11430 = vrcp.f32 %v13477_v0  ;;  %v15489_v0 = vld [vmem:[#allocation73_spill] sm:$0xff] }
 0x710   : > { %v5668_v39 = vsel %vm676_vm2, %v15489_v0, 0 }
 0x711   : > { %v5714_v48 = vpop.permute.xlu1 %5713 }
 0x712   : > { %v5719_v55 = vsel %vm676_vm2, %v5714_v48, 0 }
 0x713   : > { %4081 = vrot.lane.b32.xlu1 %v15460_v40, %s11722_s24 }
 0x714   : > { %10622 = vmatmul.mubr.msk.bf16.vlgmr.msra.gmra.mrb[172].mxu1 %vm676_vm2, %v15462_v36  ;;  %v15486_v36 = vld [vmem:[#allocation8_spill] sm:$0xff] }
 0x715   : > { %10626 = vmatpush3.bf16.xpose.msra.mxu1 %v5209_v60  ;;  %10627 = vmatprep.mubr.msk.bf16.mxu1 %vm11717_vm1, %v15364_v34  ;;  %v5617_v60 = vsel %vm676_vm2, %v15485_v42, 0 }
 0x716   : > { %10631 = vmatprep.subr.bf16.mxu1 %v15364_v34 }
 0x71a   : > { %4175 = vrot.lane.b32.xlu0 %v15463_v23, %s11722_s24 }
 0x71c   : > { %10628 = vmatmul.mubr.msk.bf16.vlgmr.msra.gmra.mrb[176].mxu1 %vm676_vm2, %v15465_v59  ;;  %v11429_v59 = vpop.eup %11428 }
 0x71d   : > { %10632 = vmatpush3.bf16.xpose.msra.mxu1 %v5260_v17  ;;  %10633 = vmatprep.mubr.msk.bf16.mxu1 %vm11717_vm1, %v15364_v34  ;;  %v15488_v17 = vld [vmem:[#allocation12_spill] sm:$0xff]  ;;  %v11431_v12 = vpop.eup %11430 }
 0x71e   : > { %4363 = vrot.lane.b32.xlu0 %v15466_v1, %s11722_s24  ;;  %10637 = vmatprep.subr.bf16.mxu1 %v15364_v34  ;;  %v3759_v30 = vmul.f32 %v11431_v12, %v15491_v11 }
 0x722   : > { %4457 = vrot.lane.b32.xlu0 %v15366_v24, %s11722_s24 }
 0x724   : > { %10634 = vmatmul.mubr.msk.bf16.vlgmr.msra.gmra.mrb[180].mxu1 %vm676_vm2, %v15469_v35 }
 0x725   : > { %10638 = vmatpush3.bf16.xpose.msra.mxu1 %v5311_v13  ;;  %10639 = vmatprep.mubr.msk.bf16.mxu1 %vm11717_vm1, %v15364_v34  ;;  %v15490_v13 = vld [vmem:[#allocation74_spill] sm:$0xff] }
 0x726   : > { %6181 = vrot.lane.b32.xlu0 %v11846_v32, %s11725_s9  ;;  %10643 = vmatprep.subr.bf16.mxu1 %v15364_v34  ;;  %v3760_v35 = vmul.f32 %v11429_v59, %v15490_v13 }
 0x727   : > { %v13579_v44 = vpop.xlane.xlu0 %3675 }
 0x728   : > { %v3787_v46 = vpack.c.bf16 %v3760_v35, %v3759_v30 }
 0x72a   : > { %6275 = vrot.lane.b32.xlu0 %v11866_v52, %s11725_s9 }
 0x72b   : > { %v3894_v37 = vpop.permute.xlu0 %3893 }
 0x72c   : > { %10450 = vmatpush3.bf16.msra.mxu0 %v3894_v37  ;;  %10640 = vmatmul.mubr.msk.bf16.vlgmr.msra.gmra.mrb[184].mxu1 %vm676_vm2, %v15473_v50 }
 0x72d   : > { %10644 = vmatpush3.bf16.xpose.msra.mxu1 %v5362_v53  ;;  %10645 = vmatprep.mubr.msk.bf16.mxu1 %vm11717_vm1, %v15364_v34 }
 0x72e   : > { %6369 = vrot.lane.b32.xlu0 %v11886_v8, %s11725_s9  ;;  %10649 = vmatprep.subr.bf16.mxu1 %v15364_v34 }
 0x72f   : > { %10452 = vmatmul.mubr.msk.bf16.vlgmr.msra.gmra.mrb[100].mxu0 %vm1474_vm3, %v3785_v7  ;;  %10461 = vmatprep.subr.bf16.mxu0 %v15364_v34 }
 0x730   : > { %10463 = vmatprep.mubr.msk.bf16.mxu0 %vm11717_vm1, %v15364_v34 }
 0x732   : > { %6463 = vrot.lane.b32.xlu0 %v15460_v40, %s11725_s9 }
 0x734   : > { %10646 = vmatmul.mubr.msk.bf16.vlgmr.msra.gmra.mrb[188].mxu1 %vm676_vm2, %v15475_v20 }
 0x735   : > { %10650 = vmatpush3.bf16.xpose.msra.mxu1 %v5413_v54  ;;  %10651 = vmatprep.mubr.msk.bf16.mxu1 %vm11717_vm1, %v15364_v34 }
 0x736   : > { %10655 = vmatprep.subr.bf16.mxu1 %v15364_v34 }
 0x737   : > { %3711 = vadd.xlane.f32.xlu1 %v3710_v28 }
 0x73c   : > { %10652 = vmatmul.mubr.msk.bf16.vlgmr.msra.gmra.mrb[192].mxu1 %vm676_vm2, %v15477_v15 }
 0x73d   : > { %10656 = vmatpush3.bf16.xpose.msra.mxu1 %v5464_v29  ;;  %10657 = vmatprep.mubr.msk.bf16.mxu1 %vm11717_vm1, %v15364_v34 }
 0x73e   : > { %10661 = vmatprep.subr.bf16.mxu1 %v15364_v34 }
 0x744   : > { %10658 = vmatmul.mubr.msk.bf16.vlgmr.msra.gmra.mrb[196].mxu1 %vm676_vm2, %v15479_v56 }
 0x745   : > { %10662 = vmatpush3.bf16.xpose.msra.mxu1 %v5515_v4  ;;  %10663 = vmatprep.mubr.msk.bf16.mxu1 %vm11717_vm1, %v15364_v34 }
 0x746   : > { %10667 = vmatprep.subr.bf16.mxu1 %v15364_v34 }
 0x748   : > { %4269 = vrot.lane.b32.xlu1 %v15480_v19, %s11722_s24 }
 0x74c   : > { %6228 = vrot.lane.b32.xlu1 %v15482_v57, %s11725_s9  ;;  %10664 = vmatmul.mubr.msk.bf16.vlgmr.msra.gmra.mrb[200].mxu1 %vm676_vm2, %v15483_v49 }
 0x74d   : > { %10668 = vmatpush3.bf16.xpose.msra.mxu1 %v5566_v5  ;;  %10669 = vmatprep.mubr.msk.bf16.mxu1 %vm11717_vm1, %v15364_v34 }
 0x74e   : > { %10673 = vmatprep.subr.bf16.mxu1 %v15364_v34 }
 0x750   : > { %6322 = vrot.lane.b32.xlu1 %v15484_v10, %s11725_s9 }
 0x754   : > { %6416 = vrot.lane.b32.xlu1 %v15486_v36, %s11725_s9  ;;  %10670 = vmatmul.mubr.msk.bf16.vlgmr.msra.gmra.mrb[204].mxu1 %vm676_vm2, %v15487_v25 }
 0x755   : > { %10674 = vmatpush3.bf16.xpose.msra.mxu1 %v5617_v60  ;;  %10675 = vmatprep.mubr.msk.bf16.mxu1 %vm11717_vm1, %v15364_v34 }
 0x756   : > { %10679 = vmatprep.subr.bf16.mxu1 %v15364_v34 }
 0x758   : > { %6510 = vrot.lane.b32.xlu1 %v15488_v17, %s11725_s9 }
 0x75c   : > { %10676 = vmatmul.mubr.msk.bf16.vlgmr.msra.gmra.mrb[208].mxu1 %vm676_vm2, %v13380_v33  ;;  %v13654_v3 = vpop.xlane.xlu0 %3687  ;;  %v3664_v33 = vpop.xlane.xlu1 %3663 }
 0x75d   : > { %10680 = vmatpush3.bf16.xpose.msra.mxu1 %v5668_v39  ;;  %10681 = vmatprep.mubr.msk.bf16.mxu1 %vm11717_vm1, %v15364_v34  ;;  %11432 = vrcp.f32 %v3664_v33 }
 0x75e   : > { %10685 = vmatprep.subr.bf16.mxu1 %v15364_v34  ;;  %11434 = vrcp.f32 %v13489_v2 }
 0x760   : > { %v3988_v51 = vpop.permute.xlu0 %3987  ;;  %v5712_v7 = vpop.permute.xlu1 %5711 }
 0x761   : > { %10462 = vmatpush3.bf16.msra.mxu0 %v3988_v51 }
 0x762   : > { %10473 = vmatprep.subr.bf16.mxu0 %v15364_v34 }
 0x764   : > { %v13663_v16 = vpop.f32.mrb[128].mxu1  ;;  %10464 = vmatmul.mubr.msk.bf16.vlgmr.msra.gmra.mrb[104].mxu0 %vm1474_vm3, %v3787_v46  ;;  %10682 = vmatmul.mubr.msk.bf16.vlgmr.msra.gmra.mrb[212].mxu1 %vm676_vm2, %v13483_v14  ;;  %v5770_v14 = vsel %vm676_vm2, %v13568_v21, 0  ;;  %v3673_v54 = vpop.xlane.xlu1 %3672 }
 0x765   : > { %10686 = vmatpush3.bf16.xpose.msra.mxu1 %v5719_v55  ;;  %v10447_v37 = vpop.f32.mrb[129].mxu1  ;;  %10687 = vmatprep.mubr.msk.bf16.mxu1 %vm11717_vm1, %v15364_v34  ;;  %11436 = vrcp.f32 %v3673_v54 }
 0x766   : > { %v13670_v27 = vpop.f32.mrb[130].mxu1  ;;  %10691 = vmatprep.subr.bf16.mxu1 %v15364_v34  ;;  %10475 = vmatprep.mubr.msk.bf16.mxu0 %vm11717_vm1, %v15364_v34  ;;  %11438 = vrcp.f32 %v13579_v44 }
 0x767   : > { %v4552_v53 = vpack.c.bf16 %v13670_v27, %v13663_v16  ;;  %v10448_v50 = vpop.f32.mrb[131].mxu1  ;;  %v11433_v30 = vpop.eup %11432 }
 0x768   : > { %v5763_v15 = vpop.permute.xlu1 %5762  ;;  %v11435_v55 = vpop.eup %11434  ;;  %v3764_v37 = vmul.f32 %v11433_v30, %v13398_v47 }
 0x76c   : > { %v13679_v26 = vpop.f32.mrb[132].mxu1  ;;  %10688 = vmatmul.mubr.msk.bf16.vlgmr.msra.gmra.mrb[216].mxu1 %vm676_vm2, %v5712_v7  ;;  %v15492_v7 = vld [vmem:[#allocation75_spill] sm:$0xff] }
 0x76d   : > { %10692 = vmatpush3.bf16.xpose.msra.mxu1 %v5770_v14  ;;  %v10459_v20 = vpop.f32.mrb[133].mxu1  ;;  %10693 = vmatprep.mubr.msk.bf16.mxu1 %vm11717_vm1, %v15364_v34  ;;  %v3763_v14 = vmul.f32 %v11435_v55, %v15492_v7 }
 0x76e   : > { %v13684_v28 = vpop.f32.mrb[134].mxu1  ;;  %10703 = vmatprep.subr.bf16.mxu1 %v15364_v34 }
 0x76f   : > { %v4554_v9 = vpack.c.bf16 %v13684_v28, %v13679_v26  ;;  %v10460_v29 = vpop.f32.mrb[135].mxu1  ;;  %v11437_v44 = vpop.eup %11436 }
 0x774   : > { %v13689_v21 = vpop.f32.mrb[136].mxu1  ;;  %10694 = vmatmul.mubr.msk.bf16.vlgmr.msra.gmra.mrb[220].mxu1 %vm676_vm2, %v5763_v15  ;;  %v3789_v15 = vpack.c.bf16 %v3764_v37, %v3763_v14 }
 0x775   : > { %v10471_v63 = vpop.f32.mrb[137].mxu1  ;;  %10705 = vmatprep.mubr.msk.bf16.mxu1 %vm11717_vm1, %v15364_v34 }
 0x776   : > { %v13694_v4 = vpop.f32.mrb[138].mxu1 }
 0x777   : > { %v10472_v43 = vpop.f32.mrb[139].mxu1 }
 0x77c   : > { %v13698_v5 = vpop.f32.mrb[140].mxu1 }
 0x77d   : > { %v10483_v49 = vpop.f32.mrb[141].mxu1 }
 0x77e   : > { %v13700_v45 = vpop.f32.mrb[142].mxu1 }
 0x77f   : > { %v10484_v60 = vpop.f32.mrb[143].mxu1 }
 0x780   : > { %v11439_v60 = vpop.eup %11438 }
 0x784   : > { %v13704_v25 = vpop.f32.mrb[144].mxu1 }
 0x785   : > { %v10495_v59 = vpop.f32.mrb[145].mxu1 }
 0x786   : > { %v13707_v0 = vpop.f32.mrb[146].mxu1  ;;  %v3767_v59 = vmul.f32 %v11437_v44, %v13458_v41 }
 0x787   : > { %v3685_v12 = vpop.xlane.xlu1 %3684  ;;  %v10496_v13 = vpop.f32.mrb[147].mxu1 }
 0x788   : > { %v3768_v13 = vmul.f32 %v11439_v60, %v13411_v61  ;;  %11440 = vrcp.f32 %v3685_v12 }
 0x789   : > { %11442 = vrcp.f32 %v13654_v3 }
 0x78b   : > { %v3697_v35 = vpop.xlane.xlu1 %3696 }
 0x78c   : > { %v13711_v48 = vpop.f32.mrb[148].mxu1 }
 0x78d   : > { %v10507_v11 = vpop.f32.mrb[149].mxu1 }
 0x78e   : > { %v13714_v51 = vpop.f32.mrb[150].mxu1  ;;  %v3791_v11 = vpack.c.bf16 %v3768_v13, %v3767_v59  ;;  %v13750_v59 = vld [vmem:[%s15249_s4 + $0x20] sm:$0xff] }
 0x78f   : > { %v3700_v46 = vpop.xlane.xlu1 %3699  ;;  %v10508_v33 = vpop.f32.mrb[151].mxu1 }
 0x790   : > { %11444 = vrcp.f32 %v3700_v46 }
 0x791   : > { %v3709_v50 = vpop.xlane.xlu0 %3708  ;;  %11446 = vrcp.f32 %v3697_v35 }
 0x792   : > { %v11441_v30 = vpop.eup %11440 }
 0x793   : > { %v4082_v54 = vpop.permute.xlu1 %4081  ;;  %v11443_v55 = vpop.eup %11442  ;;  %v3771_v41 = vmul.f32 %v11441_v30, %v13501_v22 }
 0x794   : > { %10474 = vmatpush3.bf16.msra.mxu0 %v4082_v54  ;;  %v13720_v20 = vpop.f32.mrb[152].mxu1  ;;  %v3772_v61 = vmul.f32 %v11443_v55, %v13467_v18 }
 0x795   : > { %v10519_v29 = vpop.f32.mrb[153].mxu1  ;;  %10485 = vmatprep.subr.bf16.mxu0 %v15364_v34  ;;  %v4176_v43 = vpop.permute.xlu0 %4175 }
 0x796   : > { %v13723_v63 = vpop.f32.mrb[154].mxu1  ;;  %v3793_v46 = vpack.c.bf16 %v3772_v61, %v3771_v41 }
 0x797   : > { %10476 = vmatmul.mubr.msk.bf16.vlgmr.msra.gmra.mrb[108].mxu0 %vm1474_vm3, %v3789_v15  ;;  %v10520_v47 = vpop.f32.mrb[155].mxu1 }
 0x798   : > { %10486 = vmatpush3.bf16.msra.mxu0 %v4176_v43  ;;  %10487 = vmatprep.mubr.msk.bf16.mxu0 %vm11717_vm1, %v15364_v34 }
 0x799   : > { %10497 = vmatprep.subr.bf16.mxu0 %v15364_v34  ;;  %v4364_v15 = vpop.permute.xlu0 %4363 }
 0x79a   : > { %v11445_v22 = vpop.eup %11444 }
 0x79b   : > { %v11447_v60 = vpop.eup %11446  ;;  %v3776_v13 = vmul.f32 %v11445_v22, %v13519_v62 }
 0x79c   : > { %v3775_v30 = vmul.f32 %v11447_v60, %v13509_v31 }
 0x79d   : > { %v4458_v31 = vpop.permute.xlu0 %4457 }
 0x79f   : > { %10488 = vmatmul.mubr.msk.bf16.vlgmr.msra.gmra.mrb[112].mxu0 %vm1474_vm3, %v3791_v11  ;;  %v13759_v11 = vld [vmem:[%s15249_s4 + $0x28] sm:$0xff] }
 0x7a0   : > { %10499 = vmatprep.mubr.msk.bf16.mxu0 %vm11717_vm1, %v15364_v34 }
 0x7c4   : > { %v3712_v33 = vpop.xlane.xlu1 %3711 }
 0x7c5   : > { %11448 = vrcp.f32 %v3712_v33 }
 0x7c6   : > { %11450 = vrcp.f32 %v3709_v50 }
 0x7c7   : > { %v13738_v37 = vpop.f32.mrb[156].mxu1 }
 0x7c8   : > { %v4270_v7 = vpop.permute.xlu1 %4269  ;;  %v10531_v14 = vpop.f32.mrb[157].mxu1 }
 0x7c9   : > { %v3839_v54 = vpop.f32.mrb[96].mxu0  ;;  %10498 = vmatpush3.bf16.msra.mxu0 %v4270_v7  ;;  %v13741_v29 = vpop.f32.mrb[158].mxu1  ;;  %v3795_v14 = vpack.c.bf16 %v3776_v13, %v3775_v30 }
 0x7ca   : > { %v10441_v12 = vpop.f32.mrb[97].mxu0  ;;  %v10532_v35 = vpop.f32.mrb[159].mxu1  ;;  %10509 = vmatprep.subr.bf16.mxu0 %v15364_v34 }
 0x7cb   : > { %v3842_v44 = vpop.f32.mrb[98].mxu0  ;;  %v9633_v12 = vld [vmem:[%s15251_s6 + $0x4] sm:$0xf] }
 0x7cc   : > { %v4551_v18 = vpack.c.bf16 %v3842_v44, %v3839_v54  ;;  %v6229_v43 = vpop.permute.xlu1 %6228  ;;  %v10442_v47 = vpop.f32.mrb[99].mxu0  ;;  %10500 = vmatmul.mubr.msk.bf16.vlgmr.msra.gmra.mrb[116].mxu0 %vm1474_vm3, %v3793_v46 }
 0x7cd   : > { %10510 = vmatpush3.bf16.msra.mxu0 %v4364_v15  ;;  %10704 = vmatpush3.bf16.msra.mxu1 %v6229_v43 }
 0x7ce   : > { %10511 = vmatprep.mubr.msk.bf16.mxu0 %vm11717_vm1, %v15364_v34  ;;  %10521 = vmatprep.subr.bf16.mxu0 %v15364_v34 }
 0x7cf   : > { %v5041_v50 = vpop.f32.mrb[160].mxu1  ;;  %10715 = vmatprep.subr.bf16.mxu1 %v15364_v34  ;;  %v11449_v54 = vpop.eup %11448 }
 0x7d0   : > { %v13764_v33 = vadd.f32 %v13750_v59, %v5041_v50  ;;  %v10605_v55 = vpop.f32.mrb[161].mxu1  ;;  %v11451_v46 = vpop.eup %11450  ;;  %v3780_v22 = vmul.f32 %v11449_v54, %v13600_v58 }
 0x7d1   : > { %v5044_v62 = vpop.f32.mrb[162].mxu1  ;;  %v3779_v44 = vmul.f32 %v11451_v46, %v13522_v6  ;;  %v4619_v55 = vsel %vm4617_vm4, %v9633_v12, 0 }
 0x7d2   : > { %v13767_v41 = vadd.f32 %v13759_v11, %v5044_v62  ;;  %v10606_v61 = vpop.f32.mrb[163].mxu1  ;;  %v5813_v7 = vsel %vm1474_vm3, %v13764_v33, -inf }
 0x7d3   : > { %5814 = vmax.xlane.f32.xlu1 %v5813_v7  ;;  %v3797_v30 = vpack.c.bf16 %v3780_v22, %v3779_v44 }
 0x7d4   : > { %10512 = vmatmul.mubr.msk.bf16.vlgmr.msra.gmra.mrb[120].mxu0 %vm1474_vm3, %v3795_v14  ;;  %v5816_v35 = vsel %vm1474_vm3, %v13767_v41, -inf }
 0x7d5   : > { %10522 = vmatpush3.bf16.msra.mxu0 %v4458_v31  ;;  %5817 = vmax.xlane.f32.xlu0 %v5816_v35 }
 0x7d6   : > { %10523 = vmatprep.mubr.msk.bf16.mxu0 %vm11717_vm1, %v15364_v34  ;;  %11153 = vmatprep.subr.msk.bf16.mxu0 %vm4617_vm4, %v9633_v12 }
 0x7d7   : > { %v5092_v15 = vpop.f32.mrb[164].mxu1 }
 0x7d8   : > { %v13783_v43 = vadd.f32 %v13750_v59, %v5092_v15  ;;  %v10611_v47 = vpop.f32.mrb[165].mxu1 }
 0x7d9   : > { %v5095_v60 = vpop.f32.mrb[166].mxu1 }
 0x7da   : > { %v13786_v13 = vadd.f32 %v13759_v11, %v5095_v60  ;;  %v10612_v50 = vpop.f32.mrb[167].mxu1  ;;  %v5819_v58 = vsel %vm1474_vm3, %v13783_v43, -inf }
 0x7db   : > { %5820 = vmax.xlane.f32.xlu0 %v5819_v58 }
 0x7dc   : > { %10524 = vmatmul.mubr.msk.bf16.vlgmr.msra.gmra.mrb[124].mxu0 %vm1474_vm3, %v3797_v30  ;;  %v5822_v6 = vsel %vm1474_vm3, %v13786_v13, -inf }
 0x7dd   : > { %5823 = vmax.xlane.f32.xlu1 %v5822_v6  ;;  %10535 = vmatprep.mubr.msk.bf16.mxu0 %vm676_vm2, %v4551_v18 }
 0x7de   : > { %10534 = vmatpush3.bf16.msra.mxu0 %v4619_v55 }
 0x7df   : > { %v5143_v62 = vpop.f32.mrb[168].mxu1 }
 0x7e0   : > { %v13796_v61 = vadd.f32 %v13750_v59, %v5143_v62  ;;  %v10617_v7 = vpop.f32.mrb[169].mxu1 }
 0x7e1   : > { %v5146_v14 = vpop.f32.mrb[170].mxu1 }
 0x7e2   : > { %v13799_v54 = vadd.f32 %v13759_v11, %v5146_v14  ;;  %v10618_v31 = vpop.f32.mrb[171].mxu1  ;;  %v5825_v12 = vsel %vm1474_vm3, %v13796_v61, -inf }
 0x7e3   : > { %5826 = vmax.xlane.f32.xlu0 %v5825_v12  ;;  %v15493_v31 = vld [vmem:[#allocation3_spill] sm:$0xff] }
 0x7e4   : > { %10536 = vmatmul.mubr.msk.bf16.vlgmr.msra.gmra.mrb[128].mxu0 %vm676_vm2, %v4552_v53  ;;  %v5828_v18 = vsel %vm1474_vm3, %v13799_v54, -inf }
 0x7e5   : > { %5829 = vmax.xlane.f32.xlu1 %v5828_v18 }
 0x7e7   : > { %v5194_v35 = vpop.f32.mrb[172].mxu1 }
 0x7e8   : > { %v13810_v46 = vadd.f32 %v13750_v59, %v5194_v35  ;;  %v10623_v22 = vpop.f32.mrb[173].mxu1 }
 0x7e9   : > { %v5197_v15 = vpop.f32.mrb[174].mxu1 }
 0x7ea   : > { %v13813_v44 = vadd.f32 %v13759_v11, %v5197_v15  ;;  %v10624_v47 = vpop.f32.mrb[175].mxu1  ;;  %v5831_v60 = vsel %vm1474_vm3, %v13810_v46, -inf }
 0x7eb   : > { %5832 = vmax.xlane.f32.xlu0 %v5831_v60 }
 0x7ec   : > { %v5834_v16 = vsel %vm1474_vm3, %v13813_v44, -inf }
 0x7ed   : > { %5835 = vmax.xlane.f32.xlu1 %v5834_v16 }
 0x7ef   : > { %v5245_v27 = vpop.f32.mrb[176].mxu1 }
 0x7f0   : > { %v13820_v53 = vadd.f32 %v13750_v59, %v5245_v27  ;;  %v10629_v50 = vpop.f32.mrb[177].mxu1 }
 0x7f1   : > { %v5248_v58 = vpop.f32.mrb[178].mxu1 }
 0x7f2   : > { %v10630_v30 = vpop.f32.mrb[179].mxu1  ;;  %v5837_v55 = vsel %vm1474_vm3, %v13820_v53, -inf  ;;  %v13846_v28 = vadd.f32 %v13759_v11, %v5248_v58 }
 0x7f3   : > { %5838 = vmax.xlane.f32.xlu0 %v5837_v55 }
 0x7f7   : > { %v5296_v6 = vpop.f32.mrb[180].mxu1 }
 0x7f8   : > { %v10635_v62 = vpop.f32.mrb[181].mxu1 }
 0x7f9   : > { %v5299_v7 = vpop.f32.mrb[182].mxu1 }
 0x7fa   : > { %v10636_v14 = vpop.f32.mrb[183].mxu1 }
 0x7fe   : > { %6604 = vrot.lane.b32.xlu1 %v15493_v31, %s11725_s9 }
 0x7ff   : > { %v13826_v12 = vpop.f32.mrb[184].mxu1 }
 0x800   : > { %v10641_v18 = vpop.f32.mrb[185].mxu1 }
 0x801   : > { %v5350_v35 = vpop.f32.mrb[186].mxu1 }
 0x802   : > { %6651 = vrot.lane.b32.xlu1 %v15480_v19, %s11725_s9  ;;  %v3933_v22 = vpop.f32.mrb[100].mxu0  ;;  %v10642_v15 = vpop.f32.mrb[187].mxu1 }
 0x803   : > { %v10453_v47 = vpop.f32.mrb[101].mxu0 }
 0x804   : > { %v3936_v60 = vpop.f32.mrb[102].mxu0 }
 0x805   : > { %v4553_v16 = vpack.c.bf16 %v3936_v60, %v3933_v22  ;;  %v10454_v27 = vpop.f32.mrb[103].mxu0 }
 0x807   : > { %10539 = vmatprep.mubr.msk.bf16.mxu0 %vm676_vm2, %v4553_v16  ;;  %v13831_v50 = vpop.f32.mrb[188].mxu1 }
 0x808   : > { %10540 = vmatmul.mubr.msk.bf16.gmra.mrb[132].mxu0 %vm676_vm2, %v4554_v9  ;;  %v10647_v30 = vpop.f32.mrb[189].mxu1 }
 0x809   : > { %6557 = vrot.lane.b32.xlu0 %v15463_v23, %s11725_s9  ;;  %v5401_v55 = vpop.f32.mrb[190].mxu1  ;;  %v15494_v23 = vpack.c.bf16 %v13694_v4, %v13689_v21 }
 0x80a   : > { %v10648_v62 = vpop.f32.mrb[191].mxu1  ;;  %v13866_v49 = vadd.f32 %v13759_v11, %v5401_v55 }
 0x80b   : > { %v13849_v62 = vadd.f32 %v13750_v59, %v5296_v6 }
 0x80c   : > { %v5858_v39 = vsel %vm1474_vm3, %v13866_v49, -inf }
 0x80f   : > { %v13839_v14 = vpop.f32.mrb[192].mxu1 }
 0x810   : > { %v10653_v18 = vpop.f32.mrb[193].mxu1 }
 0x811   : > { %v5452_v22 = vpop.f32.mrb[194].mxu1  ;;  %v13852_v18 = vadd.f32 %v13759_v11, %v5299_v7 }
 0x812   : > { %v10654_v15 = vpop.f32.mrb[195].mxu1 }
 0x813   : > { %v5840_v15 = vsel %vm1474_vm3, %v13846_v28, -inf  ;;  %v5846_v6 = vsel %vm1474_vm3, %v13852_v18, -inf }
 0x817   : > { %v13841_v47 = vpop.f32.mrb[196].mxu1 }
 0x818   : > { %v10659_v60 = vpop.f32.mrb[197].mxu1 }
 0x819   : > { %v5503_v16 = vpop.f32.mrb[198].mxu1 }
 0x81a   : > { %v10660_v27 = vpop.f32.mrb[199].mxu1 }
 0x81b   : > { %v5843_v27 = vsel %vm1474_vm3, %v13849_v62, -inf }
 0x81f   : > { %v13843_v3 = vpop.f32.mrb[200].mxu1 }
 0x820   : > { %v10665_v26 = vpop.f32.mrb[201].mxu1 }
 0x821   : > { %v5554_v9 = vpop.f32.mrb[202].mxu1  ;;  %v13861_v26 = vadd.f32 %v13759_v11, %v5350_v35 }
 0x822   : > { %v10666_v30 = vpop.f32.mrb[203].mxu1  ;;  %v13888_v19 = vadd.f32 %v13759_v11, %v5554_v9 }
 0x826   : > { %5841 = vmax.xlane.f32.xlu1 %v5840_v15  ;;  %v5852_v15 = vsel %vm1474_vm3, %v13861_v26, -inf }
 0x827   : > { %v13856_v60 = vpop.f32.mrb[204].mxu1 }
 0x828   : > { %5844 = vmax.xlane.f32.xlu0 %v5843_v27  ;;  %v10671_v58 = vpop.f32.mrb[205].mxu1 }
 0x829   : > { %v5605_v30 = vpop.f32.mrb[206].mxu1  ;;  %v13873_v58 = vadd.f32 %v13759_v11, %v5452_v22  ;;  %v2611_v22 = vld [vmem:[%s15251_s6] sm:$0xf] }
 0x82a   : > { %5847 = vmax.xlane.f32.xlu1 %v5846_v6  ;;  %v10672_v7 = vpop.f32.mrb[207].mxu1  ;;  %11154 = vmatprep.subr.msk.bf16.mxu0 %vm4617_vm4, %v2611_v22  ;;  %v13897_v9 = vadd.f32 %v13759_v11, %v5605_v30 }
 0x82b   : > { %v13878_v7 = vadd.f32 %v13759_v11, %v5503_v16  ;;  %v5864_v55 = vsel %vm1474_vm3, %v13873_v58, -inf }
 0x82d   : > { %v5870_v16 = vsel %vm1474_vm3, %v13878_v7, -inf }
 0x82e   : > { %5853 = vmax.xlane.f32.xlu1 %v5852_v15 }
 0x82f   : > { %v13870_v2 = vpop.f32.mrb[208].mxu1 }
 0x830   : > { %v10677_v27 = vpop.f32.mrb[209].mxu1 }
 0x831   : > { %v5656_v35 = vpop.f32.mrb[210].mxu1 }
 0x832   : > { %5859 = vmax.xlane.f32.xlu1 %v5858_v39  ;;  %v10678_v6 = vpop.f32.mrb[211].mxu1 }
 0x836   : > { %5865 = vmax.xlane.f32.xlu1 %v5864_v55  ;;  %v4831_v55 = vsel %vm4617_vm4, %v2611_v22, 0  ;;  %v5876_v22 = vsel %vm1474_vm3, %v13888_v19, -inf }
 0x837   : > { %v4027_v15 = vpop.f32.mrb[104].mxu0  ;;  %v13882_v42 = vpop.f32.mrb[212].mxu1  ;;  %10568 = vmatpush3.bf16.msra.mxu0 %v4831_v55  ;;  %v5882_v55 = vsel %vm1474_vm3, %v13897_v9, -inf }
 0x838   : > { %v10465_v27 = vpop.f32.mrb[105].mxu0  ;;  %v10683_v56 = vpop.f32.mrb[213].mxu1  ;;  %10697 = vmatprep.subr.bf16.mxu0 %v15364_v34 }
 0x839   : > { %v4030_v39 = vpop.f32.mrb[106].mxu0  ;;  %v5707_v6 = vpop.f32.mrb[214].mxu1 }
 0x83a   : > { %v4555_v31 = vpack.c.bf16 %v4030_v39, %v4027_v15  ;;  %5871 = vmax.xlane.f32.xlu1 %v5870_v16  ;;  %v10466_v27 = vpop.f32.mrb[107].mxu0  ;;  %v10684_v56 = vpop.f32.mrb[215].mxu1  ;;  %v15495_v15 = vld [vmem:[#allocation6_spill] sm:$0xff] }
 0x83c   : > { %10543 = vmatprep.mubr.msk.bf16.mxu0 %vm676_vm2, %v4555_v31  ;;  %v13910_v31 = vadd.f32 %v13759_v11, %v5656_v35 }
 0x83d   : > { %10544 = vmatmul.mubr.msk.bf16.gmra.mrb[136].mxu0 %vm676_vm2, %v15494_v23  ;;  %v13915_v23 = vadd.f32 %v13759_v11, %v5707_v6 }
 0x83e   : > { %6698 = vrot.lane.b32.xlu0 %v15495_v15, %s11725_s9  ;;  %5877 = vmax.xlane.f32.xlu1 %v5876_v22  ;;  %v5888_v4 = vsel %vm1474_vm3, %v13910_v31, -inf }
 0x83f   : > { %v13907_v39 = vpop.f32.mrb[216].mxu1 }
 0x840   : > { %v10689_v16 = vpop.f32.mrb[217].mxu1 }
 0x841   : > { %v5758_v30 = vpop.f32.mrb[218].mxu1  ;;  %v5894_v16 = vsel %vm1474_vm3, %v13915_v23, -inf }
 0x842   : > { %5883 = vmax.xlane.f32.xlu1 %v5882_v55  ;;  %v10690_v21 = vpop.f32.mrb[219].mxu1  ;;  %v13922_v22 = vadd.f32 %v13759_v11, %v5758_v30  ;;  %v13937_v30 = vadd.f32 %v13750_v59, %v13826_v12 }
 0x844   : > { %v5900_v6 = vsel %vm1474_vm3, %v13922_v22, -inf }
 0x846   : > { %5889 = vmax.xlane.f32.xlu1 %v5888_v4 }
 0x847   : > { %v13919_v27 = vpop.f32.mrb[220].mxu1 }
 0x848   : > { %v10695_v56 = vpop.f32.mrb[221].mxu1 }
 0x849   : > { %v5809_v35 = vpop.f32.mrb[222].mxu1  ;;  %v13933_v56 = vpop.permute.xlu0 %6181 }
 0x84a   : > { %5895 = vmax.xlane.f32.xlu1 %v5894_v16  ;;  %v10696_v55 = vpop.f32.mrb[223].mxu1  ;;  %v13927_v21 = vadd.f32 %v13759_v11, %v5809_v35  ;;  %v13941_v16 = vadd.f32 %v13750_v59, %v13831_v50  ;;  %v5849_v11 = vsel %vm1474_vm3, %v13937_v30, -inf }
 0x84b   : > { %v13947_v55 = vpop.permute.xlu1 %6322 }
 0x84c   : > { %v5906_v4 = vsel %vm1474_vm3, %v13927_v21, -inf  ;;  %15497 = vst [vmem:[#allocation49_spill] sm:$0xff] %v13947_v55  ;;  %v5855_v12 = vsel %vm1474_vm3, %v13941_v16, -inf }
 0x84d   : > { %v13945_v35 = vpop.permute.xlu0 %6275 }
 0x84e   : > { %5901 = vmax.xlane.f32.xlu1 %v5900_v6  ;;  %15496 = vst [vmem:[#allocation47_spill] sm:$0xff] %v13945_v35  ;;  %v13951_v6 = vadd.f32 %v13750_v59, %v13839_v14  ;;  %v13969_v14 = vadd.f32 %v13750_v59, %v13843_v3 }
 0x84f   : > { %v13959_v50 = vpop.permute.xlu1 %6416 }
 0x850   : > { %15499 = vst [vmem:[#allocation51_spill] sm:$0xff] %v13959_v50  ;;  %v5861_v15 = vsel %vm1474_vm3, %v13951_v6, -inf }
 0x852   : > { %5907 = vmax.xlane.f32.xlu1 %v5906_v4  ;;  %v13955_v4 = vpop.permute.xlu0 %6369 }
 0x853   : > { %15498 = vst [vmem:[#allocation48_spill] sm:$0xff] %v13955_v4 }
 0x856   : > { %v13973_v4 = vpop.permute.xlu0 %6463 }
 0x857   : > { %15500 = vst [vmem:[#allocation50_spill] sm:$0xff] %v13973_v4 }
 0x85d   : > { %5850 = vmax.xlane.f32.xlu0 %v5849_v11  ;;  %v13963_v11 = vadd.f32 %v13750_v59, %v13841_v47  ;;  %v13979_v47 = vadd.f32 %v13750_v59, %v13856_v60 }
 0x85f   : > { %v5879_v60 = vsel %vm1474_vm3, %v13979_v47, -inf }
 0x861   : > { %5856 = vmax.xlane.f32.xlu0 %v5855_v12  ;;  %v5867_v12 = vsel %vm1474_vm3, %v13963_v11, -inf }
 0x862   : > { %v5818_v36 = vpop.xlane.xlu0 %5817 }
 0x863   : > { %6745 = vrot.lane.b32.xlu1 %v15466_v1, %s11725_s9  ;;  %v13975_v1 = vpop.permute.xlu1 %6510 }
 0x864   : > { %15501 = vst [vmem:[#allocation53_spill] sm:$0xff] %v13975_v1 }
 0x865   : > { %5862 = vmax.xlane.f32.xlu0 %v5861_v15  ;;  %v5873_v15 = vsel %vm1474_vm3, %v13969_v14, -inf }
 0x867   : > { %v5815_v40 = vpop.xlane.xlu1 %5814 }
 0x869   : > { %5868 = vmax.xlane.f32.xlu0 %v5867_v12  ;;  %v13986_v12 = vadd.f32 %v13750_v59, %v13870_v2 }
 0x86a   : > { %v4121_v50 = vpop.f32.mrb[108].mxu0 }
 0x86b   : > { %v10477_v55 = vpop.f32.mrb[109].mxu0  ;;  %v5885_v1 = vsel %vm1474_vm3, %v13986_v12, -inf }
 0x86c   : > { %v4124_v35 = vpop.f32.mrb[110].mxu0  ;;  %v15502_v55 = vpack.c.bf16 %v13700_v45, %v13698_v5 }
 0x86d   : > { %v4557_v3 = vpack.c.bf16 %v4124_v35, %v4121_v50  ;;  %5874 = vmax.xlane.f32.xlu0 %v5873_v15  ;;  %v10478_v17 = vpop.f32.mrb[111].mxu0  ;;  %v5910_v35 = vsub.f32 %v13767_v41, %v5818_v36  ;;  %v14005_v36 = vadd.f32 %v13750_v59, %v13907_v39 }
 0x86e   : > { %v5824_v17 = vpop.xlane.xlu1 %5823 }
 0x86f   : > { %10547 = vmatprep.mubr.msk.bf16.mxu0 %vm676_vm2, %v4557_v3  ;;  %v13997_v3 = vadd.f32 %v13750_v59, %v13882_v42  ;;  %v5943_v5 = vmul.f32 1.442695, %v5910_v35  ;;  %v5912_v45 = vsub.f32 %v13786_v13, %v5824_v17  ;;  %v15503_v42 = vpack.c.bf16 %v13707_v0, %v13704_v25 }
 0x870   : > { %10548 = vmatmul.mubr.msk.bf16.gmra.mrb[140].mxu0 %vm676_vm2, %v15502_v55  ;;  %v5897_v39 = vsel %vm1474_vm3, %v14005_v36, -inf }
 0x871   : > { %5880 = vmax.xlane.f32.xlu0 %v5879_v60  ;;  %v5891_v41 = vsel %vm1474_vm3, %v13997_v3, -inf  ;;  %11452 = vpow2.f32 %v5943_v5  ;;  %v5947_v13 = vmul.f32 1.442695, %v5912_v45  ;;  %v14016_v60 = vadd.f32 %v13750_v59, %v13919_v27  ;;  %v15504_v5 = vld [vmem:[#allocation10_spill] sm:$0xff]  ;;  %v5821_v45 = vpop.xlane.xlu0 %5820 }
 0x872   : > { %v4215_v50 = vpop.f32.mrb[112].mxu0  ;;  %v5830_v8 = vpop.xlane.xlu1 %5829 }
 0x873   : > { %v10489_v15 = vpop.f32.mrb[113].mxu0  ;;  %11454 = vpow2.f32 %v5947_v13  ;;  %v5903_v35 = vsel %vm1474_vm3, %v14016_v60, -inf }
 0x874   : > { %v4218_v2 = vpop.f32.mrb[114].mxu0 }
 0x875   : > { %v4559_v55 = vpack.c.bf16 %v4218_v2, %v4215_v50  ;;  %5886 = vmax.xlane.f32.xlu0 %v5885_v1  ;;  %v10490_v4 = vpop.f32.mrb[115].mxu0  ;;  %v5914_v1 = vsub.f32 %v13799_v54, %v5830_v8 }
 0x877   : > { %10551 = vmatprep.mubr.msk.bf16.mxu0 %vm676_vm2, %v4559_v55  ;;  %v5951_v25 = vmul.f32 1.442695, %v5914_v1 }
 0x878   : > { %10552 = vmatmul.mubr.msk.bf16.gmra.mrb[144].mxu0 %vm676_vm2, %v15503_v42  ;;  %v5909_v42 = vsub.f32 %v13764_v33, %v5815_v40 }
 0x879   : > { %5892 = vmax.xlane.f32.xlu0 %v5891_v41  ;;  %11456 = vpow2.f32 %v5951_v25 }
 0x87a   : > { %v5836_v4 = vpop.xlane.xlu1 %5835  ;;  %v5941_v25 = vmul.f32 1.442695, %v5909_v42 }
 0x87b   : > { %v5916_v0 = vsub.f32 %v13813_v44, %v5836_v4  ;;  %v14023_v8 = vpop.eup %11452 }
 0x87c   : > { %v6008_v59 = vsel %vm1474_vm3, %v14023_v8, 0.0 }
 0x87d   : > { %5898 = vmax.xlane.f32.xlu0 %v5897_v39  ;;  %v5955_v17 = vmul.f32 1.442695, %v5916_v0  ;;  %v14027_v54 = vpop.eup %11454  ;;  %v5827_v39 = vpop.xlane.xlu0 %5826  ;;  %v5911_v0 = vsub.f32 %v13783_v43, %v5821_v45 }
 0x87e   : > { %v6014_v27 = vsel %vm1474_vm3, %v14027_v54, 0.0  ;;  %v5913_v33 = vsub.f32 %v13796_v61, %v5827_v39 }
 0x87f   : > { %11458 = vpow2.f32 %v5955_v17 }
 0x880   : > { %11460 = vpow2.f32 %v5941_v25  ;;  %v5949_v45 = vmul.f32 1.442695, %v5913_v33 }
 0x881   : > { %5904 = vmax.xlane.f32.xlu0 %v5903_v35  ;;  %v15505_v35 = vpack.c.bf16 %v13714_v51, %v13711_v48  ;;  %v5833_v17 = vpop.xlane.xlu0 %5832  ;;  %v15506_v51 = vpack.c.bf16 %v13723_v63, %v13720_v20 }
 0x882   : > { %v5915_v48 = vsub.f32 %v13810_v46, %v5833_v17 }
 0x883   : > { %v14031_v44 = vpop.eup %11456 }
 0x884   : > { %v6020_v50 = vsel %vm1474_vm3, %v14031_v44, 0.0 }
 0x885   : > { %v5839_v43 = vpop.xlane.xlu0 %5838 }
 0x887   : > { %6009 = vadd.xlane.f32.xlu1 %v6008_v59 }
 0x889   : > { %v14035_v15 = vpop.eup %11458  ;;  %v14060_v39 = vpop.permute.xlu0 %6557 }
 0x88a   : > { %v6026_v2 = vsel %vm1474_vm3, %v14035_v15, 0.0 }
 0x88b   : > { %6015 = vadd.xlane.f32.xlu1 %v6014_v27  ;;  %v5945_v27 = vmul.f32 1.442695, %v5911_v0  ;;  %v14062_v0 = vpop.eup %11460 }
 0x88d   : > { %11462 = vpow2.f32 %v5945_v27  ;;  %v6005_v27 = vsel %vm1474_vm3, %v14062_v0, 0.0 }
 0x88e   : > { %11464 = vpow2.f32 %v5949_v45 }
 0x88f   : > { %6021 = vadd.xlane.f32.xlu1 %v6020_v50  ;;  %v14049_v50 = vpop.permute.xlu1 %6604 }
 0x893   : > { %6027 = vadd.xlane.f32.xlu1 %v6026_v2 }
 0x897   : > { %6792 = vrot.lane.b32.xlu0 %v15504_v5, %s11725_s9 }
 0x89f   : > { %v4309_v55 = vpop.f32.mrb[116].mxu0 }
 0x8a0   : > { %v10501_v41 = vpop.f32.mrb[117].mxu0 }
 0x8a1   : > { %v4312_v13 = vpop.f32.mrb[118].mxu0  ;;  %v14057_v41 = vpop.permute.xlu1 %6651 }
 0x8a2   : > { %v4561_v1 = vpack.c.bf16 %v4312_v13, %v4309_v55  ;;  %v10502_v4 = vpop.f32.mrb[119].mxu0 }
 0x8a3   : > { %v5917_v4 = vsub.f32 %v13820_v53, %v5839_v43 }
 0x8a4   : > { %10555 = vmatprep.mubr.msk.bf16.mxu0 %vm676_vm2, %v4561_v1  ;;  %v5953_v1 = vmul.f32 1.442695, %v5915_v48 }
 0x8a5   : > { %10556 = vmatmul.mubr.msk.bf16.gmra.mrb[148].mxu0 %vm676_vm2, %v15505_v35  ;;  %v5957_v63 = vmul.f32 1.442695, %v5917_v4 }
 0x8a6   : > { %11466 = vpow2.f32 %v5953_v1  ;;  %v15512_v1 = vld [vmem:[#allocation14_spill] sm:$0xff] }
 0x8a7   : > { %v4403_v59 = vpop.f32.mrb[120].mxu0 }
 0x8a8   : > { %v10513_v40 = vpop.f32.mrb[121].mxu0 }
 0x8a9   : > { %v4406_v2 = vpop.f32.mrb[122].mxu0  ;;  %v14072_v40 = vpop.eup %11462 }
 0x8aa   : > { %v4563_v55 = vpack.c.bf16 %v4406_v2, %v4403_v59  ;;  %v10514_v42 = vpop.f32.mrb[123].mxu0  ;;  %v15507_v59 = vpack.c.bf16 %v13741_v29, %v13738_v37  ;;  %v6011_v45 = vsel %vm1474_vm3, %v14072_v40, 0.0 }
 0x8ac   : > { %10559 = vmatprep.mubr.msk.bf16.mxu0 %vm676_vm2, %v4563_v55  ;;  %v15509_v55 = vld [vmem:[#allocation26_spill] sm:$0xff] }
 0x8ad   : > { %10560 = vmatmul.mubr.msk.bf16.gmra.mrb[152].mxu0 %vm676_vm2, %v15506_v51  ;;  %v14082_v51 = vpop.eup %11464 }
 0x8af   : > { %v4497_v61 = vpop.f32.mrb[124].mxu0 }
 0x8b0   : > { %v10525_v13 = vpop.f32.mrb[125].mxu0 }
 0x8b1   : > { %v4500_v25 = vpop.f32.mrb[126].mxu0  ;;  %v15511_v13 = vld [vmem:[#allocation15_spill] sm:$0xff] }
 0x8b2   : > { %v4565_v35 = vpack.c.bf16 %v4500_v25, %v4497_v61  ;;  %v10526_v46 = vpop.f32.mrb[127].mxu0  ;;  %v15513_v4 = vpack.c.bf16 %v15511_v13, %v15512_v1  ;;  %v15514_v25 = vld [vmem:[#allocation20_spill] sm:$0xff]  ;;  %v15523_v1 = vld [vmem:[#allocation25_spill] sm:$0xff] }
 0x8b3   : > { %v5842_v17 = vpop.xlane.xlu1 %5841 }
 0x8b4   : > { %v5918_v20 = vsub.f32 %v13846_v28, %v5842_v17  ;;  %10563 = vmatprep.mubr.msk.bf16.mxu0 %vm676_vm2, %v4565_v35  ;;  %v15508_v28 = vld [vmem:[#allocation17_spill] sm:$0xff]  ;;  %v6017_v17 = vsel %vm1474_vm3, %v14082_v51, 0.0 }
 0x8b5   : > { %10564 = vmatmul.mubr.msk.bf16.gmra.mrb[156].mxu0 %vm676_vm2, %v15507_v59  ;;  %v5845_v53 = vpop.xlane.xlu0 %5844  ;;  %v15510_v42 = vpack.c.bf16 %v15508_v28, %v15509_v55  ;;  %v15515_v35 = vld [vmem:[#allocation29_spill] sm:$0xff]  ;;  %v15518_v28 = vld [vmem:[#allocation22_spill] sm:$0xff] }
 0x8b6   : > { %v5959_v33 = vmul.f32 1.442695, %v5918_v20  ;;  %v5919_v2 = vsub.f32 %v13849_v62, %v5845_v53  ;;  %6006 = vadd.xlane.f32.xlu0 %v6005_v27  ;;  %v15516_v46 = vpack.c.bf16 %v15514_v25, %v15515_v35  ;;  %v14096_v20 = vpop.eup %11466  ;;  %v15526_v35 = vld [vmem:[#allocation37_spill] sm:$0xff] }
 0x8b7   : > { %10569 = vmatprep.mubr.msk.bf16.mxu0 %vm676_vm2, %v15510_v42  ;;  %v5848_v43 = vpop.xlane.xlu1 %5847  ;;  %v6023_v53 = vsel %vm1474_vm3, %v14096_v20, 0.0  ;;  %v15520_v42 = vld [vmem:[#allocation34_spill] sm:$0xff] }
 0x8b8   : > { %11468 = vpow2.f32 %v5959_v33  ;;  %v5920_v37 = vsub.f32 %v13852_v18, %v5848_v43  ;;  %v5961_v29 = vmul.f32 1.442695, %v5919_v2  ;;  %v15517_v2 = vld [vmem:[#allocation23_spill] sm:$0xff] }
 0x8b9   : > { %11470 = vpow2.f32 %v5957_v63  ;;  %v15519_v55 = vpack.c.bf16 %v15517_v2, %v15518_v28  ;;  %v15521_v43 = vld [vmem:[#allocation31_spill] sm:$0xff]  ;;  %v15533_v2 = vld [vmem:[#allocation38_spill] sm:$0xff] }
 0x8ba   : > { %v5963_v48 = vmul.f32 1.442695, %v5920_v37  ;;  %6012 = vadd.xlane.f32.xlu0 %v6011_v45  ;;  %v15522_v37 = vpack.c.bf16 %v15520_v42, %v15521_v43  ;;  %v15535_v42 = vld [vmem:[#allocation19_spill] sm:$0xff] }
 0x8bb   : > { %v5854_v62 = vpop.xlane.xlu1 %5853  ;;  %v15536_v43 = vld [vmem:[#allocation27_spill] sm:$0xff] }
 0x8bc   : > { %11472 = vpow2.f32 %v5963_v48  ;;  %v5922_v61 = vsub.f32 %v13861_v26, %v5854_v62 }
 0x8bd   : > { %11474 = vpow2.f32 %v5961_v29  ;;  %10570 = vmatmul.mubr.msk.bf16.vlgmr.msra.gmra.mrb[128].mxu0 %vm676_vm2, %v15513_v4  ;;  %v15524_v4 = vld [vmem:[#allocation24_spill] sm:$0xff] }
 0x8be   : > { %v5967_v18 = vmul.f32 1.442695, %v5922_v61  ;;  %10698 = vmatpush3.bf16.msra.mxu0 %v13933_v56  ;;  %10573 = vmatprep.mubr.msk.bf16.mxu0 %vm676_vm2, %v15516_v46  ;;  %v15527_v46 = vld [vmem:[#allocation36_spill] sm:$0xff] }
 0x8bf   : > { %6018 = vadd.xlane.f32.xlu0 %v6017_v17  ;;  %v5860_v26 = vpop.xlane.xlu1 %5859  ;;  %10709 = vmatprep.subr.bf16.mxu0 %v15364_v34  ;;  %v15528_v17 = vpack.c.bf16 %v15526_v35, %v15527_v46  ;;  %v14162_v35 = vpop.permute.xlu0 %6698  ;;  %v15544_v46 = vld [vmem:[#allocation43_spill] sm:$0xff] }
 0x8c0   : > { %11476 = vpow2.f32 %v5967_v18  ;;  %v5924_v63 = vsub.f32 %v13866_v49, %v5860_v26  ;;  %v15525_v18 = vpack.c.bf16 %v15523_v1, %v15524_v4  ;;  %v15541_v1 = vld [vmem:[#allocation30_spill] sm:$0xff] }
 0x8c1   : > { %v15542_v4 = vld [vmem:[#allocation18_spill] sm:$0xff] }
 0x8c2   : > { %v14100_v59 = vpop.eup %11468  ;;  %v5971_v56 = vmul.f32 1.442695, %v5924_v63  ;;  %v15529_v63 = vld [vmem:[#allocation28_spill] sm:$0xff] }
 0x8c3   : > { %v14104_v27 = vpop.eup %11470  ;;  %6024 = vadd.xlane.f32.xlu0 %v6023_v53  ;;  %v6032_v33 = vsel %vm1474_vm3, %v14100_v59, 0.0 }
 0x8c4   : > { %11478 = vpow2.f32 %v5971_v56  ;;  %6033 = vadd.xlane.f32.xlu1 %v6032_v33  ;;  %v6029_v29 = vsel %vm1474_vm3, %v14104_v27, 0.0  ;;  %v15530_v56 = vld [vmem:[#allocation16_spill] sm:$0xff]  ;;  %v15532_v33 = vld [vmem:[#allocation39_spill] sm:$0xff] }
 0x8c5   : > { %10574 = vmatmul.mubr.msk.bf16.gmra.mrb[132].mxu0 %vm676_vm2, %v15519_v55  ;;  %v15531_v53 = vpack.c.bf16 %v15529_v63, %v15530_v56  ;;  %v15534_v28 = vpack.c.bf16 %v15532_v33, %v15533_v2  ;;  %v5866_v55 = vpop.xlane.xlu1 %5865 }
 0x8c6   : > { %v14112_v49 = vpop.eup %11472  ;;  %10577 = vmatprep.mubr.msk.bf16.mxu0 %vm676_vm2, %v15522_v37  ;;  %v15537_v37 = vpack.c.bf16 %v15535_v42, %v15536_v43  ;;  %v5926_v33 = vsub.f32 %v13873_v58, %v5866_v55  ;;  %v15548_v42 = vld [vmem:[#allocation21_spill] sm:$0xff] }
 0x8c7   : > { %v14120_v45 = vpop.eup %11474  ;;  %6030 = vadd.xlane.f32.xlu0 %v6029_v29  ;;  %v6038_v48 = vsel %vm1474_vm3, %v14112_v49, 0.0  ;;  %v15538_v29 = vld [vmem:[#allocation41_spill] sm:$0xff] }
 0x8c8   : > { %6039 = vadd.xlane.f32.xlu1 %v6038_v48  ;;  %v6035_v61 = vsel %vm1474_vm3, %v14120_v45, 0.0  ;;  %v15539_v48 = vld [vmem:[#allocation40_spill] sm:$0xff] }
 0x8ca   : > { %v14124_v62 = vpop.eup %11476 }
 0x8cb   : > { %6036 = vadd.xlane.f32.xlu0 %v6035_v61  ;;  %v6044_v13 = vsel %vm1474_vm3, %v14124_v62, 0.0  ;;  %v15540_v61 = vpack.c.bf16 %v15538_v29, %v15539_v48  ;;  %v15550_v29 = vld [vmem:[#allocation45_spill] sm:$0xff]  ;;  %v15551_v48 = vld [vmem:[#allocation44_spill] sm:$0xff] }
 0x8cc   : > { %6045 = vadd.xlane.f32.xlu1 %v6044_v13  ;;  %v5872_v13 = vpop.xlane.xlu1 %5871 }
 0x8cd   : > { %10578 = vmatmul.mubr.msk.bf16.gmra.mrb[136].mxu0 %vm676_vm2, %v15525_v18  ;;  %v15543_v18 = vpack.c.bf16 %v15541_v1, %v15542_v4 }
 0x8ce   : > { %v14134_v25 = vpop.eup %11478  ;;  %10581 = vmatprep.mubr.msk.bf16.mxu0 %vm676_vm2, %v15528_v17  ;;  %v15545_v17 = vld [vmem:[#allocation42_spill] sm:$0xff] }
 0x8cf   : > { %v6050_v26 = vsel %vm1474_vm3, %v14134_v25, 0.0 }
 0x8d0   : > { %6051 = vadd.xlane.f32.xlu1 %v6050_v26  ;;  %v15546_v26 = vpack.c.bf16 %v15544_v46, %v15545_v17  ;;  %v5878_v63 = vpop.xlane.xlu1 %5877 }
 0x8d5   : > { %10582 = vmatmul.mubr.msk.bf16.gmra.mrb[140].mxu0 %vm676_vm2, %v15531_v53 }
 0x8d6   : > { %10585 = vmatprep.mubr.msk.bf16.mxu0 %vm676_vm2, %v15534_v28  ;;  %v15547_v28 = vld [vmem:[#allocation32_spill] sm:$0xff] }
 0x8d7   : > { %v15549_v43 = vpack.c.bf16 %v15547_v28, %v15548_v42  ;;  %v15553_v28 = vld [vmem:[#allocation35_spill] sm:$0xff]  ;;  %v15554_v42 = vld [vmem:[#allocation33_spill] sm:$0xff] }
 0x8dd   : > { %10586 = vmatmul.mubr.msk.bf16.gmra.mrb[144].mxu0 %vm676_vm2, %v15537_v37  ;;  %v5884_v37 = vpop.xlane.xlu1 %5883 }
 0x8de   : > { %10589 = vmatprep.mubr.msk.bf16.mxu0 %vm676_vm2, %v15540_v61  ;;  %v15552_v61 = vpack.c.bf16 %v15550_v29, %v15551_v48 }
 0x8e1   : > { %v5890_v17 = vpop.xlane.xlu1 %5889 }
 0x8e5   : > { %10590 = vmatmul.mubr.msk.bf16.gmra.mrb[148].mxu0 %vm676_vm2, %v15543_v18  ;;  %v5975_v18 = vmul.f32 1.442695, %v5926_v33  ;;  %v5932_v33 = vsub.f32 %v13897_v9, %v5884_v37 }
 0x8e6   : > { %10593 = vmatprep.mubr.msk.bf16.mxu0 %vm676_vm2, %v15546_v26 }
 0x8ea   : > { %v5851_v56 = vpop.xlane.xlu0 %5850 }
 0x8eb   : > { %v5921_v53 = vsub.f32 %v13937_v30, %v5851_v56  ;;  %v5928_v30 = vsub.f32 %v13878_v7, %v5872_v13  ;;  %v5930_v56 = vsub.f32 %v13888_v19, %v5878_v63  ;;  %v5896_v63 = vpop.xlane.xlu1 %5895 }
 0x8ed   : > { %v5965_v2 = vmul.f32 1.442695, %v5921_v53  ;;  %10594 = vmatmul.mubr.msk.bf16.gmra.mrb[152].mxu0 %vm676_vm2, %v15549_v43  ;;  %v5979_v26 = vmul.f32 1.442695, %v5928_v30  ;;  %v15555_v43 = vpack.c.bf16 %v15553_v28, %v15554_v42 }
 0x8ee   : > { %10597 = vmatprep.mubr.msk.bf16.mxu0 %vm676_vm2, %v15552_v61  ;;  %v5857_v1 = vpop.xlane.xlu0 %5856 }
 0x8ef   : > { %11480 = vpow2.f32 %v5965_v2  ;;  %v5923_v4 = vsub.f32 %v13941_v16, %v5857_v1  ;;  %v5934_v1 = vsub.f32 %v13910_v31, %v5890_v17 }
 0x8f1   : > { %v5969_v58 = vmul.f32 1.442695, %v5923_v4 }
 0x8f2   : > { %v5863_v55 = vpop.xlane.xlu0 %5862 }
 0x8f3   : > { %11482 = vpow2.f32 %v5969_v58  ;;  %v5925_v46 = vsub.f32 %v13951_v6, %v5863_v55  ;;  %v5983_v6 = vmul.f32 1.442695, %v5930_v56  ;;  %v5902_v58 = vpop.xlane.xlu1 %5901  ;;  %v5991_v55 = vmul.f32 1.442695, %v5934_v1 }
 0x8f4   : > { %11484 = vpow2.f32 %v5975_v18 }
 0x8f5   : > { %v5973_v53 = vmul.f32 1.442695, %v5925_v46  ;;  %10598 = vmatmul.mubr.msk.bf16.gmra.mrb[156].mxu0 %vm676_vm2, %v15555_v43  ;;  %v5936_v46 = vsub.f32 %v13915_v23, %v5896_v63  ;;  %v5938_v23 = vsub.f32 %v13922_v22, %v5902_v58 }
 0x8f6   : > { %v5869_v16 = vpop.xlane.xlu0 %5868  ;;  %10699 = vmatprep.mubr.msk.bf16.mxu0 %vm11717_vm1, %v15364_v34 }
 0x8f7   : > { %11486 = vpow2.f32 %v5973_v53  ;;  %v5927_v7 = vsub.f32 %v13963_v11, %v5869_v16  ;;  %v5987_v11 = vmul.f32 1.442695, %v5932_v33  ;;  %v5995_v42 = vmul.f32 1.442695, %v5936_v46  ;;  %v5908_v16 = vpop.xlane.xlu1 %5907 }
 0x8f8   : > { %11488 = vpow2.f32 %v5979_v26  ;;  %v5999_v22 = vmul.f32 1.442695, %v5938_v23 }
 0x8f9   : > { %v14189_v13 = vpop.eup %11480  ;;  %v5977_v19 = vmul.f32 1.442695, %v5927_v7 }
 0x8fa   : > { %v5875_v2 = vpop.xlane.xlu0 %5874  ;;  %v6041_v29 = vsel %vm1474_vm3, %v14189_v13, 0.0 }
 0x8fb   : > { %11490 = vpow2.f32 %v5977_v19  ;;  %v5929_v48 = vsub.f32 %v13969_v14, %v5875_v2  ;;  %6042 = vadd.xlane.f32.xlu0 %v6041_v29  ;;  %v5940_v2 = vsub.f32 %v13927_v21, %v5908_v16 }
 0x8fc   : > { %11492 = vpow2.f32 %v5983_v6 }
 0x8fd   : > { %v14195_v61 = vpop.eup %11482  ;;  %v5981_v4 = vmul.f32 1.442695, %v5929_v48 }
 0x8fe   : > { %v5881_v18 = vpop.xlane.xlu0 %5880  ;;  %v6047_v9 = vsel %vm1474_vm3, %v14195_v61, 0.0  ;;  %v14200_v37 = vpop.eup %11484 }
 0x8ff   : > { %11494 = vpow2.f32 %v5981_v4  ;;  %v5931_v30 = vsub.f32 %v13979_v47, %v5881_v18  ;;  %6048 = vadd.xlane.f32.xlu0 %v6047_v9  ;;  %v6056_v17 = vsel %vm1474_vm3, %v14200_v37, 0.0  ;;  %v6003_v9 = vmul.f32 1.442695, %v5940_v2 }
 0x900   : > { %11496 = vpow2.f32 %v5987_v11 }
 0x901   : > { %v14203_v14 = vpop.eup %11486  ;;  %v5985_v26 = vmul.f32 1.442695, %v5931_v30 }
 0x902   : > { %v5887_v31 = vpop.xlane.xlu0 %5886  ;;  %v6053_v56 = vsel %vm1474_vm3, %v14203_v14, 0.0  ;;  %v14210_v53 = vpop.eup %11488 }
 0x903   : > { %11498 = vpow2.f32 %v5985_v26  ;;  %v5933_v47 = vsub.f32 %v13986_v12, %v5887_v31  ;;  %6057 = vadd.xlane.f32.xlu0 %v6056_v17  ;;  %6054 = vadd.xlane.f32.xlu1 %v6053_v56  ;;  %v6062_v6 = vsel %vm1474_vm3, %v14210_v53, 0.0 }
 0x904   : > { %11500 = vpow2.f32 %v5991_v55 }
 0x905   : > { %v14213_v28 = vpop.eup %11490  ;;  %v5989_v43 = vmul.f32 1.442695, %v5933_v47 }
 0x906   : > { %v5893_v7 = vpop.xlane.xlu0 %5892  ;;  %v6059_v33 = vsel %vm1474_vm3, %v14213_v28, 0.0  ;;  %v14220_v19 = vpop.eup %11492 }
 0x907   : > { %11502 = vpow2.f32 %v5989_v43  ;;  %v5935_v12 = vsub.f32 %v13997_v3, %v5893_v7  ;;  %6063 = vadd.xlane.f32.xlu1 %v6062_v6  ;;  %6060 = vadd.xlane.f32.xlu0 %v6059_v33  ;;  %v6068_v11 = vsel %vm1474_vm3, %v14220_v19, 0.0 }
 0x908   : > { %11504 = vpow2.f32 %v5995_v42 }
 0x909   : > { %v14223_v63 = vpop.eup %11494  ;;  %v5993_v29 = vmul.f32 1.442695, %v5935_v12 }
 0x90a   : > { %v5899_v48 = vpop.xlane.xlu0 %5898  ;;  %v6065_v1 = vsel %vm1474_vm3, %v14223_v63, 0.0  ;;  %v14230_v4 = vpop.eup %11496 }
 0x90b   : > { %11506 = vpow2.f32 %v5993_v29  ;;  %v5937_v3 = vsub.f32 %v14005_v36, %v5899_v48  ;;  %6069 = vadd.xlane.f32.xlu0 %v6068_v11  ;;  %6066 = vadd.xlane.f32.xlu1 %v6065_v1  ;;  %v6074_v58 = vsel %vm1474_vm3, %v14230_v4, 0.0  ;;  %v14278_v29 = vpop.permute.xlu1 %6745 }
 0x90c   : > { %11508 = vpow2.f32 %v5999_v22 }
 0x90d   : > { %v14233_v18 = vpop.eup %11498  ;;  %v5997_v21 = vmul.f32 1.442695, %v5937_v3 }
 0x90e   : > { %v5905_v30 = vpop.xlane.xlu0 %5904  ;;  %v6071_v55 = vsel %vm1474_vm3, %v14233_v18, 0.0  ;;  %v14239_v46 = vpop.eup %11500 }
 0x90f   : > { %11510 = vpow2.f32 %v5997_v21  ;;  %v5939_v26 = vsub.f32 %v14016_v60, %v5905_v30  ;;  %6075 = vadd.xlane.f32.xlu1 %v6074_v58  ;;  %6072 = vadd.xlane.f32.xlu0 %v6071_v55  ;;  %v6080_v17 = vsel %vm1474_vm3, %v14239_v46, 0.0  ;;  %v15557_v58 = vld [vmem:[#allocation8_spill] sm:$0xff] }
 0x910   : > { %11512 = vpow2.f32 %v6003_v9  ;;  %v15556_v9 = vld [vmem:[#allocation9_spill] sm:$0xff] }
 0x911   : > { %v14242_v36 = vpop.eup %11502  ;;  %v6001_v31 = vmul.f32 1.442695, %v5939_v26 }
 0x912   : > { %v6077_v56 = vsel %vm1474_vm3, %v14242_v36, 0.0  ;;  %v14248_v47 = vpop.eup %11504  ;;  %v14288_v11 = vpop.permute.xlu0 %6792 }
 0x913   : > { %11514 = vpow2.f32 %v6001_v31  ;;  %6081 = vadd.xlane.f32.xlu0 %v6080_v17  ;;  %6078 = vadd.xlane.f32.xlu1 %v6077_v56  ;;  %v6086_v60 = vsel %vm1474_vm3, %v14248_v47, 0.0  ;;  %v15558_v17 = vld [vmem:[#allocation13_spill] sm:$0xff] }
 0x914   : > { %v6010_v48 = vpop.xlane.xlu1 %6009 }
 0x915   : > { %v14250_v42 = vpop.eup %11506  ;;  %11516 = vrcp.f32 %v6010_v48 }
 0x916   : > { %v6083_v23 = vsel %vm1474_vm3, %v14250_v42, 0.0  ;;  %v14256_v43 = vpop.eup %11508 }
 0x917   : > { %6087 = vadd.xlane.f32.xlu1 %v6086_v60  ;;  %6084 = vadd.xlane.f32.xlu0 %v6083_v23  ;;  %v6092_v7 = vsel %vm1474_vm3, %v14256_v43, 0.0 }
 0x918   : > { %v6016_v1 = vpop.xlane.xlu1 %6015 }
 0x919   : > { %v14258_v16 = vpop.eup %11510 }
 0x91a   : > { %v6089_v6 = vsel %vm1474_vm3, %v14258_v16, 0.0  ;;  %v14264_v33 = vpop.eup %11512 }
 0x91b   : > { %6093 = vadd.xlane.f32.xlu0 %v6092_v7  ;;  %6090 = vadd.xlane.f32.xlu1 %v6089_v6  ;;  %v6098_v22 = vsel %vm1474_vm3, %v14264_v33, 0.0 }
 0x91c   : > { %v6022_v21 = vpop.xlane.xlu1 %6021 }
 0x91d   : > { %v14266_v12 = vpop.eup %11514 }
 0x91e   : > { %v6095_v2 = vsel %vm1474_vm3, %v14266_v12, 0.0 }
 0x91f   : > { %6099 = vadd.xlane.f32.xlu1 %v6098_v22  ;;  %6096 = vadd.xlane.f32.xlu0 %v6095_v2  ;;  %v11517_v55 = vpop.eup %11516  ;;  %v15559_v22 = vld [vmem:[#allocation12_spill] sm:$0xff] }
 0x920   : > { %v6028_v26 = vpop.xlane.xlu1 %6027  ;;  %v6134_v60 = vmul.f32 %v11517_v55, %v14023_v8  ;;  %v15560_v8 = vld [vmem:[#allocation47_spill] sm:$0xff] }
 0x930   : > { %6839 = vrot.lane.b32.xlu1 %v15366_v24, %s11725_s9 }
 0x934   : > { %7200 = vrot.lane.b32.xlu1 %v11846_v32, %s11726_s18 }
 0x935   : > { %6886 = vrot.lane.b32.xlu0 %v11915_v38, %s11725_s9 }
 0x938   : > { %7251 = vrot.lane.b32.xlu1 %v15482_v57, %s11726_s18 }
 0x939   : > { %7198 = vrot.lane.b32.xlu0 %v11846_v32, %s11727_s19 }
 0x93c   : > { %7302 = vrot.lane.b32.xlu1 %v11866_v52, %s11726_s18 }
 0x93d   : > { %7249 = vrot.lane.b32.xlu0 %v15482_v57, %s11727_s19 }
 0x940   : > { %7353 = vrot.lane.b32.xlu1 %v15484_v10, %s11726_s18 }
 0x941   : > { %7300 = vrot.lane.b32.xlu0 %v11866_v52, %s11727_s19 }
 0x943   : > { %v6007_v3 = vpop.xlane.xlu0 %6006 }
 0x944   : > { %11518 = vrcp.f32 %v6007_v3  ;;  %7404 = vrot.lane.b32.xlu1 %v15556_v9, %s11726_s18 }
 0x945   : > { %7351 = vrot.lane.b32.xlu0 %v15484_v10, %s11727_s19  ;;  %11520 = vrcp.f32 %v6016_v1 }
 0x947   : > { %v6013_v30 = vpop.xlane.xlu0 %6012 }
 0x948   : > { %11522 = vrcp.f32 %v6013_v30  ;;  %7455 = vrot.lane.b32.xlu1 %v15557_v58, %s11726_s18 }
 0x949   : > { %7402 = vrot.lane.b32.xlu0 %v15556_v9, %s11727_s19  ;;  %11524 = vrcp.f32 %v6022_v21 }
 0x94c   : > { %v6019_v31 = vpop.xlane.xlu0 %6018  ;;  %7506 = vrot.lane.b32.xlu1 %v15558_v17, %s11726_s18 }
 0x94d   : > { %11526 = vrcp.f32 %v6019_v31  ;;  %7453 = vrot.lane.b32.xlu0 %v15557_v58, %s11727_s19 }
 0x94e   : > { %v11519_v56 = vpop.eup %11518  ;;  %11528 = vrcp.f32 %v6028_v26  ;;  %v15561_v26 = vld [vmem:[#allocation4_spill] sm:$0xff] }
 0x94f   : > { %v6133_v23 = vmul.f32 %v11519_v56, %v14062_v0  ;;  %v11521_v7 = vpop.eup %11520 }
 0x950   : > { %v6025_v6 = vpop.xlane.xlu0 %6024  ;;  %7557 = vrot.lane.b32.xlu1 %v15559_v22, %s11726_s18  ;;  %v6136_v3 = vmul.f32 %v11521_v7, %v14027_v54 }
 0x951   : > { %v6165_v2 = vpack.c.bf16 %v6134_v60, %v6133_v23  ;;  %11530 = vrcp.f32 %v6025_v6  ;;  %v6034_v48 = vpop.xlane.xlu1 %6033  ;;  %7504 = vrot.lane.b32.xlu0 %v15558_v17, %s11727_s19  ;;  %v15562_v60 = vld [vmem:[#allocation49_spill] sm:$0xff]  ;;  %v15563_v6 = vld [vmem:[#allocation3_spill] sm:$0xff] }
 0x952   : > { %v11523_v1 = vpop.eup %11522  ;;  %11532 = vrcp.f32 %v6034_v48 }
 0x953   : > { %v6135_v21 = vmul.f32 %v11523_v1, %v14072_v40  ;;  %10700 = vmatmul.mubr.msk.bf16.vlgmr.msra.gmra.mrb[160].mxu0 %vm1474_vm3, %v6165_v2  ;;  %v11525_v30 = vpop.eup %11524 }
 0x954   : > { %10710 = vmatpush3.bf16.msra.mxu0 %v15560_v8  ;;  %v6031_v0 = vpop.xlane.xlu0 %6030  ;;  %7555 = vrot.lane.b32.xlu1 %v15559_v22, %s11727_s19  ;;  %v6138_v40 = vmul.f32 %v11525_v30, %v14031_v44 }
 0x955   : > { %11534 = vrcp.f32 %v6031_v0  ;;  %v6040_v55 = vpop.xlane.xlu1 %6039  ;;  %7608 = vrot.lane.b32.xlu0 %v15561_v26, %s11726_s18  ;;  %v6166_v31 = vpack.c.bf16 %v6136_v3, %v6135_v21  ;;  %10711 = vmatprep.mubr.msk.bf16.mxu0 %vm11717_vm1, %v15364_v34  ;;  %v15564_v3 = vld [vmem:[#allocation48_spill] sm:$0xff]  ;;  %v15565_v21 = vld [vmem:[#allocation7_spill] sm:$0xff] }
 0x956   : > { %10721 = vmatprep.subr.bf16.mxu0 %v15364_v34  ;;  %11536 = vrcp.f32 %v6040_v55  ;;  %v15566_v55 = vld [vmem:[#allocation51_spill] sm:$0xff] }
 0x957   : > { %v11527_v54 = vpop.eup %11526  ;;  %10706 = vmatmul.mubr.msk.bf16.vlgmr.msra.gmra.mrb[224].mxu1 %vm1474_vm3, %v6166_v31  ;;  %v15567_v31 = vld [vmem:[#allocation6_spill] sm:$0xff] }
 0x958   : > { %v6137_v56 = vmul.f32 %v11527_v54, %v14082_v51  ;;  %10716 = vmatpush3.bf16.msra.mxu1 %v15562_v60  ;;  %v6037_v23 = vpop.xlane.xlu0 %6036  ;;  %7606 = vrot.lane.b32.xlu1 %v15561_v26, %s11727_s19  ;;  %v11529_v7 = vpop.eup %11528  ;;  %v15569_v60 = vld [vmem:[#allocation11_spill] sm:$0xff] }
 0x959   : > { %11538 = vrcp.f32 %v6037_v23  ;;  %7659 = vrot.lane.b32.xlu0 %v15563_v6, %s11726_s18  ;;  %10717 = vmatprep.mubr.msk.bf16.mxu1 %vm11717_vm1, %v15364_v34  ;;  %v6140_v51 = vmul.f32 %v11529_v7, %v14035_v15 }
 0x95a   : > { %v6167_v2 = vpack.c.bf16 %v6138_v40, %v6137_v56  ;;  %10727 = vmatprep.subr.bf16.mxu1 %v15364_v34  ;;  %v15568_v56 = vld [vmem:[#allocation50_spill] sm:$0xff] }
 0x95b   : > { %v11531_v44 = vpop.eup %11530 }
 0x95c   : > { %v6139_v48 = vmul.f32 %v11531_v44, %v14096_v20  ;;  %10712 = vmatmul.mubr.msk.bf16.vlgmr.msra.gmra.mrb[164].mxu0 %vm1474_vm3, %v6167_v2  ;;  %7657 = vrot.lane.b32.xlu1 %v15563_v6, %s11727_s19  ;;  %v11533_v1 = vpop.eup %11532 }
 0x95d   : > { %10722 = vmatpush3.bf16.msra.mxu0 %v15564_v3  ;;  %7710 = vrot.lane.b32.xlu0 %v15565_v21, %s11726_s18  ;;  %v6142_v20 = vmul.f32 %v11533_v1, %v14100_v59 }
 0x95e   : > { %v6168_v8 = vpack.c.bf16 %v6140_v51, %v6139_v48  ;;  %10723 = vmatprep.mubr.msk.bf16.mxu0 %vm11717_vm1, %v15364_v34  ;;  %10733 = vmatprep.subr.bf16.mxu0 %v15364_v34 }
 0x95f   : > { %v11535_v15 = vpop.eup %11534 }
 0x960   : > { %v6141_v0 = vmul.f32 %v11535_v15, %v14104_v27  ;;  %10718 = vmatmul.mubr.msk.bf16.vlgmr.msra.gmra.mrb[228].mxu1 %vm1474_vm3, %v6168_v8  ;;  %7708 = vrot.lane.b32.xlu1 %v15565_v21, %s11727_s19  ;;  %v11537_v30 = vpop.eup %11536 }
 0x961   : > { %10728 = vmatpush3.bf16.msra.mxu1 %v15566_v55  ;;  %7761 = vrot.lane.b32.xlu0 %v15567_v31, %s11726_s18  ;;  %v6144_v27 = vmul.f32 %v11537_v30, %v14112_v49  ;;  %v15570_v49 = vld [vmem:[#allocation53_spill] sm:$0xff] }
 0x962   : > { %v6169_v54 = vpack.c.bf16 %v6142_v20, %v6141_v0  ;;  %10729 = vmatprep.mubr.msk.bf16.mxu1 %vm11717_vm1, %v15364_v34  ;;  %10739 = vmatprep.subr.bf16.mxu1 %v15364_v34 }
 0x963   : > { %v11539_v59 = vpop.eup %11538 }
 0x964   : > { %v6143_v40 = vmul.f32 %v11539_v59, %v14120_v45  ;;  %10724 = vmatmul.mubr.msk.bf16.vlgmr.msra.gmra.mrb[168].mxu0 %vm1474_vm3, %v6169_v54  ;;  %7759 = vrot.lane.b32.xlu1 %v15567_v31, %s11727_s19 }
 0x965   : > { %10734 = vmatpush3.bf16.msra.mxu0 %v15568_v56  ;;  %7812 = vrot.lane.b32.xlu0 %v15569_v60, %s11726_s18 }
 0x966   : > { %v6170_v23 = vpack.c.bf16 %v6144_v27, %v6143_v40  ;;  %10735 = vmatprep.mubr.msk.bf16.mxu0 %vm11717_vm1, %v15364_v34  ;;  %10745 = vmatprep.subr.bf16.mxu0 %v15364_v34 }
 0x968   : > { %10730 = vmatmul.mubr.msk.bf16.vlgmr.msra.gmra.mrb[232].mxu1 %vm1474_vm3, %v6170_v23  ;;  %7810 = vrot.lane.b32.xlu1 %v15569_v60, %s11727_s19 }
 0x969   : > { %10740 = vmatpush3.bf16.msra.mxu1 %v15570_v49  ;;  %7863 = vrot.lane.b32.xlu0 %v15504_v5, %s11726_s18 }
 0x96a   : > { %10741 = vmatprep.mubr.msk.bf16.mxu1 %vm11717_vm1, %v15364_v34  ;;  %10751 = vmatprep.subr.bf16.mxu1 %v15364_v34 }
 0x96c   : > { %7861 = vrot.lane.b32.xlu1 %v15504_v5, %s11727_s19 }
 0x96d   : > { %7914 = vrot.lane.b32.xlu0 %v15366_v24, %s11726_s18 }
 0x970   : > { %7912 = vrot.lane.b32.xlu1 %v15366_v24, %s11727_s19 }
 0x971   : > { %7965 = vrot.lane.b32.xlu0 %v11915_v38, %s11726_s18 }
 0x974   : > { %8429 = vrot.lane.b32.xlu1 %v15482_v57, %s11728_s20  ;;  %v6046_v57 = vpop.xlane.xlu1 %6045 }
 0x975   : > { %7963 = vrot.lane.b32.xlu0 %v11915_v38, %s11727_s19  ;;  %11540 = vrcp.f32 %v6046_v57 }
 0x978   : > { %8523 = vrot.lane.b32.xlu1 %v15484_v10, %s11728_s20 }
 0x979   : > { %8382 = vrot.lane.b32.xlu0 %v11846_v32, %s11728_s20  ;;  %v6052_v32 = vpop.xlane.xlu1 %6051 }
 0x97c   : > { %8617 = vrot.lane.b32.xlu1 %v15557_v58, %s11728_s20 }
 0x97d   : > { %8476 = vrot.lane.b32.xlu0 %v11866_v52, %s11728_s20 }
 0x980   : > { %8711 = vrot.lane.b32.xlu1 %v15559_v22, %s11728_s20 }
 0x981   : > { %8570 = vrot.lane.b32.xlu0 %v15556_v9, %s11728_s20  ;;  %v11541_v9 = vpop.eup %11540 }
 0x982   : > { %v6146_v7 = vmul.f32 %v11541_v9, %v14124_v62 }
 0x984   : > { %8805 = vrot.lane.b32.xlu1 %v15563_v6, %s11728_s20 }
 0x985   : > { %8664 = vrot.lane.b32.xlu0 %v15558_v17, %s11728_s20 }
 0x988   : > { %v6043_v10 = vpop.xlane.xlu0 %6042 }
 0x989   : > { %11542 = vrcp.f32 %v6043_v10  ;;  %8758 = vrot.lane.b32.xlu0 %v15561_v26, %s11728_s20 }
 0x98a   : > { %11544 = vrcp.f32 %v6052_v32 }
 0x98c   : > { %v6049_v52 = vpop.xlane.xlu0 %6048 }
 0x98d   : > { %11546 = vrcp.f32 %v6049_v52 }
 0x990   : > { %v6055_v45 = vpop.xlane.xlu1 %6054  ;;  %v6058_v58 = vpop.xlane.xlu0 %6057 }
 0x991   : > { %11548 = vrcp.f32 %v6055_v45 }
 0x992   : > { %11550 = vrcp.f32 %v6058_v58 }
 0x993   : > { %v11543_v22 = vpop.eup %11542 }
 0x994   : > { %v6145_v17 = vmul.f32 %v11543_v22, %v14189_v13  ;;  %v6064_v6 = vpop.xlane.xlu1 %6063  ;;  %v6061_v2 = vpop.xlane.xlu0 %6060 }
 0x995   : > { %v11545_v44 = vpop.eup %11544  ;;  %11552 = vrcp.f32 %v6064_v6 }
 0x996   : > { %11554 = vrcp.f32 %v6061_v2  ;;  %v6171_v51 = vpack.c.bf16 %v6146_v7, %v6145_v17  ;;  %v6148_v48 = vmul.f32 %v11545_v44, %v14134_v25 }
 0x997   : > { %v11547_v26 = vpop.eup %11546 }
 0x998   : > { %v6147_v1 = vmul.f32 %v11547_v26, %v14195_v61  ;;  %v6067_v3 = vpop.xlane.xlu1 %6066  ;;  %10736 = vmatmul.mubr.msk.bf16.vlgmr.msra.gmra.mrb[172].mxu0 %vm1474_vm3, %v6171_v51  ;;  %v6070_v8 = vpop.xlane.xlu0 %6069 }
 0x999   : > { %11556 = vrcp.f32 %v6067_v3  ;;  %10746 = vmatpush3.bf16.msra.mxu0 %v14060_v39  ;;  %10747 = vmatprep.mubr.msk.bf16.mxu0 %vm11717_vm1, %v15364_v34 }
 0x99a   : > { %11558 = vrcp.f32 %v6070_v8  ;;  %v6172_v62 = vpack.c.bf16 %v6148_v48, %v6147_v1  ;;  %10757 = vmatprep.subr.bf16.mxu0 %v15364_v34 }
 0x99b   : > { %v11549_v13 = vpop.eup %11548 }
 0x99c   : > { %v11551_v15 = vpop.eup %11550  ;;  %v6149_v25 = vmul.f32 %v11549_v13, %v14203_v14  ;;  %v6076_v20 = vpop.xlane.xlu1 %6075  ;;  %10742 = vmatmul.mubr.msk.bf16.vlgmr.msra.gmra.mrb[236].mxu1 %vm1474_vm3, %v6172_v62 }
 0x99d   : > { %v6073_v61 = vpop.xlane.xlu0 %6072  ;;  %v6150_v0 = vmul.f32 %v11551_v15, %v14200_v37  ;;  %11560 = vrcp.f32 %v6076_v20  ;;  %10752 = vmatpush3.bf16.msra.mxu1 %v14049_v50  ;;  %10753 = vmatprep.mubr.msk.bf16.mxu1 %vm11717_vm1, %v15364_v34 }
 0x99e   : > { %11562 = vrcp.f32 %v6073_v61  ;;  %10763 = vmatprep.subr.bf16.mxu1 %v15364_v34 }
 0x99f   : > { %v11553_v39 = vpop.eup %11552  ;;  %v6173_v30 = vpack.c.bf16 %v6150_v0, %v6149_v25 }
 0x9a0   : > { %v11555_v55 = vpop.eup %11554  ;;  %v6152_v14 = vmul.f32 %v11553_v39, %v14210_v53  ;;  %v6079_v54 = vpop.xlane.xlu1 %6078 }
 0x9a1   : > { %v6082_v59 = vpop.xlane.xlu0 %6081  ;;  %v6151_v27 = vmul.f32 %v11555_v55, %v14213_v28  ;;  %11564 = vrcp.f32 %v6079_v54  ;;  %10748 = vmatmul.mubr.msk.bf16.vlgmr.msra.gmra.mrb[176].mxu0 %vm1474_vm3, %v6173_v30 }
 0x9a2   : > { %10758 = vmatpush3.bf16.msra.mxu0 %v14057_v41  ;;  %11566 = vrcp.f32 %v6082_v59  ;;  %10759 = vmatprep.mubr.msk.bf16.mxu0 %vm11717_vm1, %v15364_v34 }
 0x9a3   : > { %v11557_v50 = vpop.eup %11556  ;;  %v6174_v37 = vpack.c.bf16 %v6152_v14, %v6151_v27  ;;  %10769 = vmatprep.subr.bf16.mxu0 %v15364_v34 }
 0x9a4   : > { %v11559_v40 = vpop.eup %11558  ;;  %v6153_v53 = vmul.f32 %v11557_v50, %v14223_v63  ;;  %v6088_v56 = vpop.xlane.xlu1 %6087 }
 0x9a5   : > { %v6085_v23 = vpop.xlane.xlu0 %6084  ;;  %v6154_v28 = vmul.f32 %v11559_v40, %v14220_v19  ;;  %11568 = vrcp.f32 %v6088_v56  ;;  %10754 = vmatmul.mubr.msk.bf16.vlgmr.msra.gmra.mrb[240].mxu1 %vm1474_vm3, %v6174_v37 }
 0x9a6   : > { %10764 = vmatpush3.bf16.msra.mxu1 %v14162_v35  ;;  %11570 = vrcp.f32 %v6085_v23  ;;  %10765 = vmatprep.mubr.msk.bf16.mxu1 %vm11717_vm1, %v15364_v34 }
 0x9a7   : > { %v11561_v41 = vpop.eup %11560  ;;  %v6175_v49 = vpack.c.bf16 %v6154_v28, %v6153_v53  ;;  %10775 = vmatprep.subr.bf16.mxu1 %v15364_v34 }
 0x9a8   : > { %v11563_v57 = vpop.eup %11562  ;;  %v6156_v63 = vmul.f32 %v11561_v41, %v14230_v4  ;;  %v6091_v32 = vpop.xlane.xlu1 %6090 }
 0x9a9   : > { %v6094_v10 = vpop.xlane.xlu0 %6093  ;;  %v6155_v19 = vmul.f32 %v11563_v57, %v14233_v18  ;;  %11572 = vrcp.f32 %v6091_v32  ;;  %10760 = vmatmul.mubr.msk.bf16.vlgmr.msra.gmra.mrb[180].mxu0 %vm1474_vm3, %v6175_v49 }
 0x9aa   : > { %10770 = vmatpush3.bf16.msra.mxu0 %v14278_v29  ;;  %11574 = vrcp.f32 %v6094_v10  ;;  %10771 = vmatprep.mubr.msk.bf16.mxu0 %vm11717_vm1, %v15364_v34 }
 0x9ab   : > { %v11565_v35 = vpop.eup %11564  ;;  %v6176_v52 = vpack.c.bf16 %v6156_v63, %v6155_v19  ;;  %10781 = vmatprep.subr.bf16.mxu0 %v15364_v34 }
 0x9ac   : > { %v11567_v45 = vpop.eup %11566  ;;  %v6157_v4 = vmul.f32 %v11565_v35, %v14242_v36  ;;  %v6100_v58 = vpop.xlane.xlu1 %6099 }
 0x9ad   : > { %v6097_v9 = vpop.xlane.xlu0 %6096  ;;  %v6158_v18 = vmul.f32 %v11567_v45, %v14239_v46  ;;  %11576 = vrcp.f32 %v6100_v58  ;;  %10766 = vmatmul.mubr.msk.bf16.vlgmr.msra.gmra.mrb[244].mxu1 %vm1474_vm3, %v6176_v52  ;;  %v9700_v46 = vld [vmem:[%s15251_s6 + $0x8] sm:$0xf] }
 0x9ae   : > { %10776 = vmatpush3.bf16.msra.mxu1 %v14288_v11  ;;  %11578 = vrcp.f32 %v6097_v9  ;;  %10777 = vmatprep.mubr.msk.bf16.mxu1 %vm11717_vm1, %v15364_v34  ;;  %v7000_v1 = vsel %vm4617_vm4, %v9700_v46, 0 }
 0x9af   : > { %v11569_v29 = vpop.eup %11568  ;;  %v6177_v22 = vpack.c.bf16 %v6158_v18, %v6157_v4  ;;  %10787 = vmatprep.subr.bf16.mxu1 %v15364_v34 }
 0x9b0   : > { %v11571_v7 = vpop.eup %11570  ;;  %v6160_v36 = vmul.f32 %v11569_v29, %v14248_v47  ;;  %v6840_v17 = vpop.permute.xlu1 %6839 }
 0x9b1   : > { %v6159_v6 = vmul.f32 %v11571_v7, %v14250_v42  ;;  %10772 = vmatmul.mubr.msk.bf16.vlgmr.msra.gmra.mrb[184].mxu0 %vm1474_vm3, %v6177_v22  ;;  %v6887_v26 = vpop.permute.xlu0 %6886 }
 0x9b2   : > { %10782 = vmatpush3.bf16.msra.mxu0 %v6840_v17  ;;  %10783 = vmatprep.mubr.msk.bf16.mxu0 %vm11717_vm1, %v15364_v34 }
 0x9b3   : > { %v11573_v11 = vpop.eup %11572  ;;  %v6178_v2 = vpack.c.bf16 %v6160_v36, %v6159_v6  ;;  %11155 = vmatprep.subr.msk.bf16.mxu0 %vm4617_vm4, %v9700_v46 }
 0x9b4   : > { %v11575_v44 = vpop.eup %11574  ;;  %v6161_v47 = vmul.f32 %v11573_v11, %v14258_v16 }
 0x9b5   : > { %v6162_v51 = vmul.f32 %v11575_v44, %v14256_v43  ;;  %10778 = vmatmul.mubr.msk.bf16.vlgmr.msra.gmra.mrb[248].mxu1 %vm1474_vm3, %v6178_v2  ;;  %v7201_v43 = vpop.permute.xlu1 %7200  ;;  %v7199_v15 = vpop.permute.xlu0 %7198 }
 0x9b6   : > { %10788 = vmatpush3.bf16.msra.mxu1 %v6887_v26  ;;  %10789 = vmatprep.mubr.msk.bf16.mxu1 %vm11717_vm1, %v15364_v34  ;;  %v7206_v13 = vsel %vm676_vm2, %v7201_v43, 0 }
 0x9b7   : > { %v11577_v42 = vpop.eup %11576  ;;  %v6179_v48 = vpack.c.bf16 %v6162_v51, %v6161_v47  ;;  %10827 = vmatprep.subr.bf16.mxu1 %v15364_v34 }
 0x9b8   : > { %v11579_v3 = vpop.eup %11578  ;;  %v6164_v8 = vmul.f32 %v11577_v42, %v14264_v33 }
 0x9b9   : > { %v6163_v16 = vmul.f32 %v11579_v3, %v14266_v12  ;;  %10784 = vmatmul.mubr.msk.bf16.vlgmr.msra.gmra.mrb[188].mxu0 %vm1474_vm3, %v6179_v48  ;;  %v7252_v33 = vpop.permute.xlu1 %7251  ;;  %v7250_v12 = vpop.permute.xlu0 %7249 }
 0x9ba   : > { %10794 = vmatpush3.bf16.msra.mxu0 %v7000_v1  ;;  %v7257_v25 = vsel %vm676_vm2, %v7252_v33, 0 }
 0x9bb   : > { %v6180_v62 = vpack.c.bf16 %v6164_v8, %v6163_v16  ;;  %10875 = vmatprep.subr.bf16.mxu0 %v15364_v34 }
 0x9bd   : > { %10790 = vmatmul.mubr.msk.bf16.vlgmr.msra.gmra.mrb[252].mxu1 %vm1474_vm3, %v6180_v62  ;;  %v7303_v20 = vpop.permute.xlu1 %7302  ;;  %v7301_v61 = vpop.permute.xlu0 %7300 }
 0x9be   : > { %10829 = vmatprep.mubr.msk.bf16.mxu1 %vm11717_vm1, %v15364_v34  ;;  %v7308_v0 = vsel %vm676_vm2, %v7303_v20, 0 }
 0x9bf   : > { %10828 = vmatpush3.bf16.xpose.msra.mxu1 %v7206_v13 }
 0x9c0   : > { %10833 = vmatprep.subr.bf16.mxu1 %v15364_v34 }
 0x9c1   : > { %v7354_v39 = vpop.permute.xlu1 %7353  ;;  %v7352_v30 = vpop.permute.xlu0 %7351 }
 0x9c2   : > { %v7359_v55 = vsel %vm676_vm2, %v7354_v39, 0 }
 0x9c5   : > { %v7405_v14 = vpop.permute.xlu1 %7404  ;;  %v7403_v54 = vpop.permute.xlu0 %7402 }
 0x9c6   : > { %10830 = vmatmul.mubr.msk.bf16.vlgmr.msra.gmra.mrb[0].mxu1 %vm676_vm2, %v7199_v15  ;;  %v7410_v50 = vsel %vm676_vm2, %v7405_v14, 0 }
 0x9c7   : > { %10834 = vmatpush3.bf16.xpose.msra.mxu1 %v7257_v25  ;;  %10835 = vmatprep.mubr.msk.bf16.mxu1 %vm11717_vm1, %v15364_v34 }
 0x9c8   : > { %10839 = vmatprep.subr.bf16.mxu1 %v15364_v34 }
 0x9c9   : > { %v7456_v59 = vpop.permute.xlu1 %7455  ;;  %v7454_v27 = vpop.permute.xlu0 %7453 }
 0x9ca   : > { %v7461_v53 = vsel %vm676_vm2, %v7456_v59, 0 }
 0x9cd   : > { %v7507_v37 = vpop.permute.xlu1 %7506  ;;  %v7505_v40 = vpop.permute.xlu0 %7504 }
 0x9ce   : > { %10836 = vmatmul.mubr.msk.bf16.vlgmr.msra.gmra.mrb[4].mxu1 %vm676_vm2, %v7250_v12  ;;  %v7512_v28 = vsel %vm676_vm2, %v7507_v37, 0 }
 0x9cf   : > { %10840 = vmatpush3.bf16.xpose.msra.mxu1 %v7308_v0  ;;  %10841 = vmatprep.mubr.msk.bf16.mxu1 %vm11717_vm1, %v15364_v34 }
 0x9d0   : > { %10845 = vmatprep.subr.bf16.mxu1 %v15364_v34 }
 0x9d1   : > { %v7558_v56 = vpop.permute.xlu1 %7557  ;;  %v14500_v23 = vpop.permute.xlu0 %7608 }
 0x9d2   : > { %v7563_v32 = vsel %vm676_vm2, %v7558_v56, 0  ;;  %v7614_v16 = vsel %vm676_vm2, %v14500_v23, 0 }
 0x9d5   : > { %v7556_v41 = vpop.permute.xlu1 %7555  ;;  %v7660_v49 = vpop.permute.xlu0 %7659 }
 0x9d6   : > { %10842 = vmatmul.mubr.msk.bf16.vlgmr.msra.gmra.mrb[8].mxu1 %vm676_vm2, %v7301_v61  ;;  %v7665_v35 = vsel %vm676_vm2, %v7660_v49, 0 }
 0x9d7   : > { %10846 = vmatpush3.bf16.xpose.msra.mxu1 %v7359_v55  ;;  %10847 = vmatprep.mubr.msk.bf16.mxu1 %vm11717_vm1, %v15364_v34 }
 0x9d8   : > { %10851 = vmatprep.subr.bf16.mxu1 %v15364_v34 }
 0x9d9   : > { %v14507_v57 = vpop.permute.xlu1 %7606  ;;  %v14509_v63 = vpop.permute.xlu0 %7710 }
 0x9dd   : > { %v7658_v10 = vpop.permute.xlu1 %7657  ;;  %v7762_v19 = vpop.permute.xlu0 %7761 }
 0x9de   : > { %10848 = vmatmul.mubr.msk.bf16.vlgmr.msra.gmra.mrb[12].mxu1 %vm676_vm2, %v7352_v30  ;;  %v7767_v4 = vsel %vm676_vm2, %v7762_v19, 0 }
 0x9df   : > { %10852 = vmatpush3.bf16.xpose.msra.mxu1 %v7410_v50  ;;  %10853 = vmatprep.mubr.msk.bf16.mxu1 %vm11717_vm1, %v15364_v34 }
 0x9e0   : > { %10857 = vmatprep.subr.bf16.mxu1 %v15364_v34 }
 0x9e1   : > { %v14520_v52 = vpop.permute.xlu1 %7708  ;;  %v14523_v45 = vpop.permute.xlu0 %7812 }
 0x9e5   : > { %v7760_v58 = vpop.permute.xlu1 %7759  ;;  %v7864_v9 = vpop.permute.xlu0 %7863 }
 0x9e6   : > { %10854 = vmatmul.mubr.msk.bf16.vlgmr.msra.gmra.mrb[16].mxu1 %vm676_vm2, %v7403_v54  ;;  %v7869_v22 = vsel %vm676_vm2, %v7864_v9, 0 }
 0x9e7   : > { %10858 = vmatpush3.bf16.xpose.msra.mxu1 %v7461_v53  ;;  %10859 = vmatprep.mubr.msk.bf16.mxu1 %vm11717_vm1, %v15364_v34 }
 0x9e8   : > { %10863 = vmatprep.subr.bf16.mxu1 %v15364_v34 }
 0x9e9   : > { %v14530_v18 = vpop.permute.xlu1 %7810  ;;  %v14532_v29 = vpop.permute.xlu0 %7914 }
 0x9ed   : > { %v7862_v7 = vpop.permute.xlu1 %7861  ;;  %v7966_v36 = vpop.permute.xlu0 %7965 }
 0x9ee   : > { %10860 = vmatmul.mubr.msk.bf16.vlgmr.msra.gmra.mrb[20].mxu1 %vm676_vm2, %v7454_v27  ;;  %v7971_v17 = vsel %vm676_vm2, %v7966_v36, 0 }
 0x9ef   : > { %10864 = vmatpush3.bf16.xpose.msra.mxu1 %v7512_v28  ;;  %10865 = vmatprep.mubr.msk.bf16.mxu1 %vm11717_vm1, %v15364_v34 }
 0x9f0   : > { %10869 = vmatprep.subr.bf16.mxu1 %v15364_v34 }
 0x9f1   : > { %v14543_v46 = vpop.permute.xlu1 %7912  ;;  %v7964_v6 = vpop.permute.xlu0 %7963 }
 0x9f5   : > { %v8430_v11 = vpop.permute.xlu1 %8429 }
 0x9f6   : > { %10866 = vmatmul.mubr.msk.bf16.vlgmr.msra.gmra.mrb[24].mxu1 %vm676_vm2, %v7505_v40 }
 0x9f7   : > { %10870 = vmatpush3.bf16.xpose.msra.mxu1 %v7563_v32  ;;  %10871 = vmatprep.mubr.msk.bf16.mxu1 %vm11717_vm1, %v15364_v34 }
 0x9f8   : > { %10881 = vmatprep.subr.bf16.mxu1 %v15364_v34 }
 0x9fe   : > { %10872 = vmatmul.mubr.msk.bf16.vlgmr.msra.gmra.mrb[28].mxu1 %vm676_vm2, %v7556_v41 }
 0x9ff   : > { %10882 = vmatpush3.bf16.xpose.msra.mxu1 %v7665_v35  ;;  %10883 = vmatprep.mubr.msk.bf16.mxu1 %vm11717_vm1, %v15364_v34 }
 0xa00   : > { %10893 = vmatprep.subr.bf16.mxu1 %v15364_v34 }
 0xa06   : > { %10884 = vmatmul.mubr.msk.bf16.vlgmr.msra.gmra.mrb[32].mxu1 %vm676_vm2, %v7658_v10 }
 0xa07   : > { %10894 = vmatpush3.bf16.xpose.msra.mxu1 %v7767_v4  ;;  %10895 = vmatprep.mubr.msk.bf16.mxu1 %vm11717_vm1, %v15364_v34 }
 0xa08   : > { %10905 = vmatprep.subr.bf16.mxu1 %v15364_v34 }
 0xa0e   : > { %10896 = vmatmul.mubr.msk.bf16.vlgmr.msra.gmra.mrb[36].mxu1 %vm676_vm2, %v7760_v58 }
 0xa0f   : > { %10906 = vmatpush3.bf16.xpose.msra.mxu1 %v7869_v22  ;;  %10907 = vmatprep.mubr.msk.bf16.mxu1 %vm11717_vm1, %v15364_v34 }
 0xa10   : > { %10917 = vmatprep.subr.bf16.mxu1 %v15364_v34 }
 0xa16   : > { %10908 = vmatmul.mubr.msk.bf16.vlgmr.msra.gmra.mrb[40].mxu1 %vm676_vm2, %v7862_v7 }
 0xa17   : > { %10918 = vmatpush3.bf16.xpose.msra.mxu1 %v7971_v17  ;;  %10919 = vmatprep.mubr.msk.bf16.mxu1 %vm11717_vm1, %v15364_v34 }
 0xa18   : > { %10929 = vmatprep.subr.bf16.mxu1 %v15364_v34 }
 0xa1e   : > { %10920 = vmatmul.mubr.msk.bf16.vlgmr.msra.gmra.mrb[44].mxu1 %vm676_vm2, %v7964_v6 }
 0xa1f   : > { %10930 = vmatpush3.bf16.msra.mxu1 %v8430_v11  ;;  %10931 = vmatprep.mubr.msk.bf16.mxu1 %vm11717_vm1, %v15364_v34 }
 0xa20   : > { %10941 = vmatprep.subr.bf16.mxu1 %v15364_v34 }
 0xa26   : > { %v6221_v2 = vpop.f32.mrb[160].mxu0 }
 0xa27   : > { %v10701_v44 = vpop.f32.mrb[161].mxu0 }
 0xa28   : > { %v6224_v47 = vpop.f32.mrb[162].mxu0 }
 0xa29   : > { %v6933_v51 = vpack.c.bf16 %v6224_v47, %v6221_v2  ;;  %v10702_v26 = vpop.f32.mrb[163].mxu0 }
 0xa2a   : > { %v6268_v42 = vpop.f32.mrb[224].mxu1 }
 0xa2b   : > { %v10707_v48 = vpop.f32.mrb[225].mxu1  ;;  %10795 = vmatprep.mubr.msk.bf16.mxu0 %vm676_vm2, %v6933_v51 }
 0xa2c   : > { %v6271_v1 = vpop.f32.mrb[226].mxu1 }
 0xa2d   : > { %v6934_v3 = vpack.c.bf16 %v6271_v1, %v6268_v42  ;;  %v10708_v8 = vpop.f32.mrb[227].mxu1 }
 0xa2f   : > { %v6315_v43 = vpop.f32.mrb[164].mxu0  ;;  %10796 = vmatmul.mubr.msk.bf16.vlgmr.msra.gmra.mrb[128].mxu0 %vm676_vm2, %v6934_v3 }
 0xa30   : > { %v10713_v62 = vpop.f32.mrb[165].mxu0  ;;  %10876 = vmatpush3.bf16.xpose.msra.mxu0 %v7614_v16 }
 0xa31   : > { %v6318_v13 = vpop.f32.mrb[166].mxu0  ;;  %10887 = vmatprep.subr.bf16.mxu0 %v15364_v34 }
 0xa32   : > { %v6935_v15 = vpack.c.bf16 %v6318_v13, %v6315_v43  ;;  %v10714_v33 = vpop.f32.mrb[167].mxu0 }
 0xa33   : > { %v6362_v12 = vpop.f32.mrb[228].mxu1 }
 0xa34   : > { %v10719_v25 = vpop.f32.mrb[229].mxu1  ;;  %10799 = vmatprep.mubr.msk.bf16.mxu0 %vm676_vm2, %v6935_v15 }
 0xa35   : > { %v6365_v20 = vpop.f32.mrb[230].mxu1 }
 0xa36   : > { %v6936_v61 = vpack.c.bf16 %v6365_v20, %v6362_v12  ;;  %v10720_v0 = vpop.f32.mrb[231].mxu1 }
 0xa37   : > { %v6409_v39 = vpop.f32.mrb[168].mxu0 }
 0xa38   : > { %v10725_v30 = vpop.f32.mrb[169].mxu0  ;;  %10800 = vmatmul.mubr.msk.bf16.gmra.mrb[132].mxu0 %vm676_vm2, %v6936_v61 }
 0xa39   : > { %v6412_v55 = vpop.f32.mrb[170].mxu0 }
 0xa3a   : > { %v6937_v14 = vpack.c.bf16 %v6412_v55, %v6409_v39  ;;  %v10726_v54 = vpop.f32.mrb[171].mxu0 }
 0xa3b   : > { %v6456_v59 = vpop.f32.mrb[232].mxu1 }
 0xa3c   : > { %v10731_v27 = vpop.f32.mrb[233].mxu1  ;;  %10803 = vmatprep.mubr.msk.bf16.mxu0 %vm676_vm2, %v6937_v14 }
 0xa3d   : > { %v6459_v50 = vpop.f32.mrb[234].mxu1 }
 0xa3e   : > { %v6938_v37 = vpack.c.bf16 %v6459_v50, %v6456_v59  ;;  %v10732_v40 = vpop.f32.mrb[235].mxu1 }
 0xa40   : > { %10804 = vmatmul.mubr.msk.bf16.gmra.mrb[136].mxu0 %vm676_vm2, %v6938_v37 }
 0xa6b   : > { %v6503_v53 = vpop.f32.mrb[172].mxu0 }
 0xa6c   : > { %v10737_v56 = vpop.f32.mrb[173].mxu0 }
 0xa6d   : > { %v6506_v23 = vpop.f32.mrb[174].mxu0 }
 0xa6e   : > { %v6939_v28 = vpack.c.bf16 %v6506_v23, %v6503_v53  ;;  %v10738_v41 = vpop.f32.mrb[175].mxu0  ;;  %v14574_v53 = vld [vmem:[%s15249_s4 + $0x30] sm:$0xff]  ;;  %v14579_v23 = vld [vmem:[%s15249_s4 + $0x38] sm:$0xff] }
 0xa6f   : > { %v6550_v49 = vpop.f32.mrb[236].mxu1 }
 0xa70   : > { %v10743_v32 = vpop.f32.mrb[237].mxu1  ;;  %10807 = vmatprep.mubr.msk.bf16.mxu0 %vm676_vm2, %v6939_v28 }
 0xa71   : > { %v6553_v10 = vpop.f32.mrb[238].mxu1 }
 0xa72   : > { %v6940_v19 = vpack.c.bf16 %v6553_v10, %v6550_v49  ;;  %v10744_v35 = vpop.f32.mrb[239].mxu1 }
 0xa73   : > { %v7716_v35 = vsel %vm676_vm2, %v14509_v63, 0 }
 0xa74   : > { %v6597_v4 = vpop.f32.mrb[176].mxu0  ;;  %10808 = vmatmul.mubr.msk.bf16.gmra.mrb[140].mxu0 %vm676_vm2, %v6940_v19 }
 0xa75   : > { %v10749_v58 = vpop.f32.mrb[177].mxu0 }
 0xa76   : > { %v6600_v9 = vpop.f32.mrb[178].mxu0 }
 0xa77   : > { %v6941_v22 = vpack.c.bf16 %v6600_v9, %v6597_v4  ;;  %v10750_v7 = vpop.f32.mrb[179].mxu0 }
 0xa78   : > { %v6644_v36 = vpop.f32.mrb[240].mxu1 }
 0xa79   : > { %v10755_v17 = vpop.f32.mrb[241].mxu1  ;;  %10811 = vmatprep.mubr.msk.bf16.mxu0 %vm676_vm2, %v6941_v22 }
 0xa7a   : > { %v6647_v6 = vpop.f32.mrb[242].mxu1  ;;  %v7818_v17 = vsel %vm676_vm2, %v14523_v45, 0 }
 0xa7b   : > { %v6942_v11 = vpack.c.bf16 %v6647_v6, %v6644_v36  ;;  %v10756_v2 = vpop.f32.mrb[243].mxu1 }
 0xa7c   : > { %v6691_v44 = vpop.f32.mrb[180].mxu0 }
 0xa7d   : > { %v10761_v47 = vpop.f32.mrb[181].mxu0  ;;  %10812 = vmatmul.mubr.msk.bf16.gmra.mrb[144].mxu0 %vm676_vm2, %v6942_v11 }
 0xa7e   : > { %v6694_v51 = vpop.f32.mrb[182].mxu0 }
 0xa7f   : > { %v6943_v26 = vpack.c.bf16 %v6694_v51, %v6691_v44  ;;  %v10762_v42 = vpop.f32.mrb[183].mxu0 }
 0xa80   : > { %v6738_v48 = vpop.f32.mrb[244].mxu1 }
 0xa81   : > { %v10767_v1 = vpop.f32.mrb[245].mxu1  ;;  %10815 = vmatprep.mubr.msk.bf16.mxu0 %vm676_vm2, %v6943_v26  ;;  %v7920_v26 = vsel %vm676_vm2, %v14532_v29, 0 }
 0xa82   : > { %v6741_v3 = vpop.f32.mrb[246].mxu1 }
 0xa83   : > { %v6944_v8 = vpack.c.bf16 %v6741_v3, %v6738_v48  ;;  %v10768_v16 = vpop.f32.mrb[247].mxu1 }
 0xa84   : > { %v6785_v43 = vpop.f32.mrb[184].mxu0 }
 0xa85   : > { %v10773_v62 = vpop.f32.mrb[185].mxu0  ;;  %10816 = vmatmul.mubr.msk.bf16.gmra.mrb[148].mxu0 %vm676_vm2, %v6944_v8 }
 0xa86   : > { %v6788_v13 = vpop.f32.mrb[186].mxu0 }
 0xa87   : > { %v6945_v15 = vpack.c.bf16 %v6788_v13, %v6785_v43  ;;  %v10774_v33 = vpop.f32.mrb[187].mxu0  ;;  %v8383_v43 = vpop.permute.xlu0 %8382 }
 0xa88   : > { %v6832_v12 = vpop.f32.mrb[248].mxu1 }
 0xa89   : > { %v10779_v25 = vpop.f32.mrb[249].mxu1  ;;  %10819 = vmatprep.mubr.msk.bf16.mxu0 %vm676_vm2, %v6945_v15 }
 0xa8a   : > { %v6835_v20 = vpop.f32.mrb[250].mxu1 }
 0xa8b   : > { %v6946_v61 = vpack.c.bf16 %v6835_v20, %v6832_v12  ;;  %v10780_v0 = vpop.f32.mrb[251].mxu1 }
 0xa8c   : > { %v6879_v39 = vpop.f32.mrb[188].mxu0 }
 0xa8d   : > { %v10785_v30 = vpop.f32.mrb[189].mxu0  ;;  %10820 = vmatmul.mubr.msk.bf16.gmra.mrb[152].mxu0 %vm676_vm2, %v6946_v61 }
 0xa8e   : > { %v6882_v55 = vpop.f32.mrb[190].mxu0 }
 0xa8f   : > { %v6947_v14 = vpack.c.bf16 %v6882_v55, %v6879_v39  ;;  %v10786_v54 = vpop.f32.mrb[191].mxu0 }
 0xa90   : > { %v6926_v59 = vpop.f32.mrb[252].mxu1 }
 0xa91   : > { %v10791_v27 = vpop.f32.mrb[253].mxu1  ;;  %10823 = vmatprep.mubr.msk.bf16.mxu0 %vm676_vm2, %v6947_v14 }
 0xa92   : > { %v6929_v50 = vpop.f32.mrb[254].mxu1 }
 0xa93   : > { %v6948_v37 = vpack.c.bf16 %v6929_v50, %v6926_v59  ;;  %v10792_v40 = vpop.f32.mrb[255].mxu1 }
 0xa95   : > { %10824 = vmatmul.mubr.msk.bf16.gmra.mrb[156].mxu0 %vm676_vm2, %v6948_v37 }
 0xa96   : > { %10877 = vmatprep.mubr.msk.bf16.mxu0 %vm11717_vm1, %v15364_v34 }
 0xa99   : > { %v7242_v56 = vpop.f32.mrb[0].mxu1 }
 0xa9a   : > { %v14582_v28 = vadd.f32 %v14574_v53, %v7242_v56  ;;  %v10831_v41 = vpop.f32.mrb[1].mxu1 }
 0xa9b   : > { %v7245_v49 = vpop.f32.mrb[2].mxu1 }
 0xa9c   : > { %v14585_v32 = vadd.f32 %v14579_v23, %v7245_v49  ;;  %v10832_v10 = vpop.f32.mrb[3].mxu1  ;;  %v8014_v19 = vsel %vm1474_vm3, %v14582_v28, -inf }
 0xa9d   : > { %8015 = vmax.xlane.f32.xlu1 %v8014_v19  ;;  %10878 = vmatmul.mubr.msk.bf16.vlgmr.msra.gmra.mrb[192].mxu0 %vm676_vm2, %v14507_v57 }
 0xa9e   : > { %10888 = vmatpush3.bf16.xpose.msra.mxu0 %v7716_v35  ;;  %v8017_v4 = vsel %vm1474_vm3, %v14585_v32, -inf  ;;  %10889 = vmatprep.mubr.msk.bf16.mxu0 %vm11717_vm1, %v15364_v34 }
 0xa9f   : > { %8018 = vmax.xlane.f32.xlu0 %v8017_v4  ;;  %10899 = vmatprep.subr.bf16.mxu0 %v15364_v34 }
 0xaa1   : > { %v7293_v58 = vpop.f32.mrb[4].mxu1 }
 0xaa2   : > { %v14599_v9 = vadd.f32 %v14574_v53, %v7293_v58  ;;  %v10837_v22 = vpop.f32.mrb[5].mxu1 }
 0xaa3   : > { %v7296_v63 = vpop.f32.mrb[6].mxu1 }
 0xaa4   : > { %v14602_v7 = vadd.f32 %v14579_v23, %v7296_v63  ;;  %v10838_v57 = vpop.f32.mrb[7].mxu1  ;;  %v8020_v36 = vsel %vm1474_vm3, %v14599_v9, -inf }
 0xaa5   : > { %8021 = vmax.xlane.f32.xlu0 %v8020_v36  ;;  %10890 = vmatmul.mubr.msk.bf16.vlgmr.msra.gmra.mrb[196].mxu0 %vm676_vm2, %v14520_v52 }
 0xaa6   : > { %10900 = vmatpush3.bf16.xpose.msra.mxu0 %v7818_v17  ;;  %v8023_v6 = vsel %vm1474_vm3, %v14602_v7, -inf  ;;  %10901 = vmatprep.mubr.msk.bf16.mxu0 %vm11717_vm1, %v15364_v34 }
 0xaa7   : > { %8024 = vmax.xlane.f32.xlu1 %v8023_v6  ;;  %10911 = vmatprep.subr.bf16.mxu0 %v15364_v34 }
 0xaa9   : > { %v7344_v11 = vpop.f32.mrb[8].mxu1 }
 0xaaa   : > { %v14616_v2 = vadd.f32 %v14574_v53, %v7344_v11  ;;  %v10843_v44 = vpop.f32.mrb[9].mxu1 }
 0xaab   : > { %v7347_v45 = vpop.f32.mrb[10].mxu1 }
 0xaac   : > { %v14619_v47 = vadd.f32 %v14579_v23, %v7347_v45  ;;  %v10844_v52 = vpop.f32.mrb[11].mxu1  ;;  %v8026_v51 = vsel %vm1474_vm3, %v14616_v2, -inf }
 0xaad   : > { %8027 = vmax.xlane.f32.xlu0 %v8026_v51  ;;  %10902 = vmatmul.mubr.msk.bf16.vlgmr.msra.gmra.mrb[200].mxu0 %vm676_vm2, %v14530_v18 }
 0xaae   : > { %10912 = vmatpush3.bf16.xpose.msra.mxu0 %v7920_v26  ;;  %v8029_v42 = vsel %vm1474_vm3, %v14619_v47, -inf  ;;  %10913 = vmatprep.mubr.msk.bf16.mxu0 %vm11717_vm1, %v15364_v34 }
 0xaaf   : > { %8030 = vmax.xlane.f32.xlu1 %v8029_v42  ;;  %10923 = vmatprep.subr.bf16.mxu0 %v15364_v34 }
 0xab1   : > { %v7395_v48 = vpop.f32.mrb[12].mxu1 }
 0xab2   : > { %v14633_v1 = vadd.f32 %v14574_v53, %v7395_v48  ;;  %v10849_v3 = vpop.f32.mrb[13].mxu1 }
 0xab3   : > { %v7398_v29 = vpop.f32.mrb[14].mxu1 }
 0xab4   : > { %v14636_v8 = vadd.f32 %v14579_v23, %v7398_v29  ;;  %v10850_v18 = vpop.f32.mrb[15].mxu1  ;;  %v8032_v16 = vsel %vm1474_vm3, %v14633_v1, -inf }
 0xab5   : > { %8033 = vmax.xlane.f32.xlu0 %v8032_v16  ;;  %10914 = vmatmul.mubr.msk.bf16.vlgmr.msra.gmra.mrb[204].mxu0 %vm676_vm2, %v14543_v46 }
 0xab6   : > { %10924 = vmatpush3.bf16.msra.mxu0 %v8383_v43  ;;  %v8035_v62 = vsel %vm1474_vm3, %v14636_v8, -inf  ;;  %10925 = vmatprep.mubr.msk.bf16.mxu0 %vm11717_vm1, %v15364_v34 }
 0xab7   : > { %8036 = vmax.xlane.f32.xlu1 %v8035_v62  ;;  %10935 = vmatprep.subr.bf16.mxu0 %v15364_v34 }
 0xab9   : > { %v7446_v13 = vpop.f32.mrb[16].mxu1 }
 0xaba   : > { %v14648_v15 = vadd.f32 %v14574_v53, %v7446_v13  ;;  %v10855_v33 = vpop.f32.mrb[17].mxu1 }
 0xabb   : > { %v7449_v12 = vpop.f32.mrb[18].mxu1 }
 0xabc   : > { %v14651_v25 = vadd.f32 %v14579_v23, %v7449_v12  ;;  %v10856_v46 = vpop.f32.mrb[19].mxu1  ;;  %v8038_v20 = vsel %vm1474_vm3, %v14648_v15, -inf }
 0xabd   : > { %8039 = vmax.xlane.f32.xlu0 %v8038_v20 }
 0xabe   : > { %v8041_v61 = vsel %vm1474_vm3, %v14651_v25, -inf }
 0xabf   : > { %8042 = vmax.xlane.f32.xlu1 %v8041_v61 }
 0xac1   : > { %v7497_v0 = vpop.f32.mrb[20].mxu1 }
 0xac2   : > { %v14658_v39 = vadd.f32 %v14574_v53, %v7497_v0  ;;  %v10861_v30 = vpop.f32.mrb[21].mxu1 }
 0xac3   : > { %v7500_v55 = vpop.f32.mrb[22].mxu1 }
 0xac4   : > { %v14661_v14 = vadd.f32 %v14579_v23, %v7500_v55  ;;  %v10862_v54 = vpop.f32.mrb[23].mxu1  ;;  %v8044_v59 = vsel %vm1474_vm3, %v14658_v39, -inf }
 0xac5   : > { %8045 = vmax.xlane.f32.xlu0 %v8044_v59 }
 0xac6   : > { %v8047_v27 = vsel %vm1474_vm3, %v14661_v14, -inf }
 0xac7   : > { %8048 = vmax.xlane.f32.xlu1 %v8047_v27 }
 0xac9   : > { %v7548_v50 = vpop.f32.mrb[24].mxu1 }
 0xaca   : > { %v14668_v37 = vadd.f32 %v14574_v53, %v7548_v50  ;;  %v10867_v40 = vpop.f32.mrb[25].mxu1 }
 0xacb   : > { %v7551_v56 = vpop.f32.mrb[26].mxu1 }
 0xacc   : > { %v14671_v41 = vadd.f32 %v14579_v23, %v7551_v56  ;;  %v10868_v49 = vpop.f32.mrb[27].mxu1  ;;  %v8050_v10 = vsel %vm1474_vm3, %v14668_v37, -inf }
 0xacd   : > { %8051 = vmax.xlane.f32.xlu0 %v8050_v10 }
 0xace   : > { %v8053_v19 = vsel %vm1474_vm3, %v14671_v41, -inf }
 0xacf   : > { %8054 = vmax.xlane.f32.xlu1 %v8053_v19  ;;  %v14727_v19 = vpop.permute.xlu1 %8523 }
 0xad1   : > { %v7599_v35 = vpop.f32.mrb[28].mxu1 }
 0xad2   : > { %v14678_v4 = vadd.f32 %v14574_v53, %v7599_v35  ;;  %v10873_v58 = vpop.f32.mrb[29].mxu1  ;;  %v14729_v35 = vpop.permute.xlu0 %8476 }
 0xad3   : > { %v7602_v22 = vpop.f32.mrb[30].mxu1  ;;  %v14731_v58 = vpop.permute.xlu1 %8617 }
 0xad4   : > { %v14681_v63 = vadd.f32 %v14579_v23, %v7602_v22  ;;  %v10874_v57 = vpop.f32.mrb[31].mxu1  ;;  %v8056_v36 = vsel %vm1474_vm3, %v14678_v4, -inf }
 0xad5   : > { %8057 = vmax.xlane.f32.xlu0 %v8056_v36 }
 0xad6   : > { %v8059_v17 = vsel %vm1474_vm3, %v14681_v63, -inf  ;;  %v14733_v22 = vpop.permute.xlu0 %8570 }
 0xad7   : > { %8060 = vmax.xlane.f32.xlu1 %v8059_v17  ;;  %v14735_v57 = vpop.permute.xlu1 %8711 }
 0xad9   : > { %v7701_v6 = vpop.f32.mrb[32].mxu1 }
 0xada   : > { %v14688_v11 = vadd.f32 %v14574_v53, %v7701_v6  ;;  %v10885_v44 = vpop.f32.mrb[33].mxu1  ;;  %v14737_v36 = vpop.permute.xlu0 %8664 }
 0xadb   : > { %v7704_v45 = vpop.f32.mrb[34].mxu1  ;;  %v14739_v17 = vpop.permute.xlu1 %8805 }
 0xadc   : > { %v14691_v52 = vadd.f32 %v14579_v23, %v7704_v45  ;;  %v10886_v51 = vpop.f32.mrb[35].mxu1  ;;  %v8068_v26 = vsel %vm1474_vm3, %v14688_v11, -inf }
 0xadd   : > { %8069 = vmax.xlane.f32.xlu0 %v8068_v26 }
 0xade   : > { %v8071_v42 = vsel %vm1474_vm3, %v14691_v52, -inf  ;;  %v14741_v6 = vpop.permute.xlu0 %8758 }
 0xadf   : > { %8072 = vmax.xlane.f32.xlu1 %v8071_v42 }
 0xae1   : > { %v7803_v48 = vpop.f32.mrb[36].mxu1 }
 0xae2   : > { %v14698_v3 = vadd.f32 %v14574_v53, %v7803_v48  ;;  %v10897_v29 = vpop.f32.mrb[37].mxu1 }
 0xae3   : > { %v7806_v18 = vpop.f32.mrb[38].mxu1 }
 0xae4   : > { %v14701_v16 = vadd.f32 %v14579_v23, %v7806_v18  ;;  %v10898_v43 = vpop.f32.mrb[39].mxu1  ;;  %v8080_v62 = vsel %vm1474_vm3, %v14698_v3, -inf }
 0xae5   : > { %8081 = vmax.xlane.f32.xlu0 %v8080_v62 }
 0xae6   : > { %v8083_v13 = vsel %vm1474_vm3, %v14701_v16, -inf }
 0xae7   : > { %8084 = vmax.xlane.f32.xlu1 %v8083_v13 }
 0xae9   : > { %v7905_v33 = vpop.f32.mrb[40].mxu1 }
 0xaea   : > { %v14708_v12 = vadd.f32 %v14574_v53, %v7905_v33  ;;  %v10909_v46 = vpop.f32.mrb[41].mxu1 }
 0xaeb   : > { %v7908_v20 = vpop.f32.mrb[42].mxu1 }
 0xaec   : > { %v14711_v61 = vadd.f32 %v14579_v23, %v7908_v20  ;;  %v10910_v0 = vpop.f32.mrb[43].mxu1  ;;  %v8092_v30 = vsel %vm1474_vm3, %v14708_v12, -inf }
 0xaed   : > { %8093 = vmax.xlane.f32.xlu0 %v8092_v30 }
 0xaee   : > { %v8095_v55 = vsel %vm1474_vm3, %v14711_v61, -inf }
 0xaef   : > { %8096 = vmax.xlane.f32.xlu1 %v8095_v55 }
 0xaf1   : > { %v8007_v54 = vpop.f32.mrb[44].mxu1 }
 0xaf2   : > { %v14718_v59 = vadd.f32 %v14574_v53, %v8007_v54  ;;  %v10921_v27 = vpop.f32.mrb[45].mxu1 }
 0xaf3   : > { %v8010_v50 = vpop.f32.mrb[46].mxu1 }
 0xaf4   : > { %v14721_v40 = vadd.f32 %v14579_v23, %v8010_v50  ;;  %v10922_v56 = vpop.f32.mrb[47].mxu1  ;;  %v8104_v49 = vsel %vm1474_vm3, %v14718_v59, -inf }
 0xaf5   : > { %8105 = vmax.xlane.f32.xlu0 %v8104_v49 }
 0xaf6   : > { %v8107_v10 = vsel %vm1474_vm3, %v14721_v40, -inf }
 0xaf7   : > { %8108 = vmax.xlane.f32.xlu1 %v8107_v10 }
 0xb2a   : > { %v8016_v44 = vpop.xlane.xlu1 %8015 }
 0xb2b   : > { %v8110_v45 = vsub.f32 %v14582_v28, %v8016_v44 }
 0xb2c   : > { %v8019_v51 = vpop.xlane.xlu0 %8018 }
 0xb2d   : > { %v8142_v26 = vmul.f32 1.442695, %v8110_v45  ;;  %v8111_v42 = vsub.f32 %v14585_v32, %v8019_v51 }
 0xb2f   : > { %11580 = vpow2.f32 %v8142_v26  ;;  %v8144_v48 = vmul.f32 1.442695, %v8111_v42 }
 0xb31   : > { %11582 = vpow2.f32 %v8144_v48 }
 0xb32   : > { %v8022_v29 = vpop.xlane.xlu0 %8021 }
 0xb33   : > { %v8112_v18 = vsub.f32 %v14599_v9, %v8022_v29 }
 0xb34   : > { %v8025_v43 = vpop.xlane.xlu1 %8024 }
 0xb35   : > { %v8146_v62 = vmul.f32 1.442695, %v8112_v18  ;;  %v8113_v13 = vsub.f32 %v14602_v7, %v8025_v43 }
 0xb37   : > { %11584 = vpow2.f32 %v8146_v62  ;;  %v8148_v33 = vmul.f32 1.442695, %v8113_v13 }
 0xb39   : > { %v14747_v46 = vpop.eup %11580  ;;  %11586 = vpow2.f32 %v8148_v33 }
 0xb3a   : > { %v8028_v28 = vpop.xlane.xlu0 %8027  ;;  %v8206_v20 = vsel %vm1474_vm3, %v14747_v46, 0.0 }
 0xb3b   : > { %v14751_v32 = vpop.eup %11582  ;;  %v8114_v0 = vsub.f32 %v14616_v2, %v8028_v28  ;;  %8207 = vadd.xlane.f32.xlu0 %v8206_v20 }
 0xb3c   : > { %v8031_v30 = vpop.xlane.xlu1 %8030  ;;  %v8209_v9 = vsel %vm1474_vm3, %v14751_v32, 0.0 }
 0xb3d   : > { %v8150_v55 = vmul.f32 1.442695, %v8114_v0  ;;  %v8115_v7 = vsub.f32 %v14619_v47, %v8031_v30  ;;  %8210 = vadd.xlane.f32.xlu1 %v8209_v9 }
 0xb3f   : > { %11588 = vpow2.f32 %v8150_v55  ;;  %v8152_v54 = vmul.f32 1.442695, %v8115_v7 }
 0xb41   : > { %v14757_v27 = vpop.eup %11584  ;;  %11590 = vpow2.f32 %v8152_v54 }
 0xb42   : > { %v8034_v50 = vpop.xlane.xlu0 %8033  ;;  %v8212_v56 = vsel %vm1474_vm3, %v14757_v27, 0.0 }
 0xb43   : > { %v14761_v49 = vpop.eup %11586  ;;  %v8116_v2 = vsub.f32 %v14633_v1, %v8034_v50  ;;  %8213 = vadd.xlane.f32.xlu0 %v8212_v56 }
 0xb44   : > { %v8037_v10 = vpop.xlane.xlu1 %8036  ;;  %v8215_v44 = vsel %vm1474_vm3, %v14761_v49, 0.0 }
 0xb45   : > { %v8154_v47 = vmul.f32 1.442695, %v8116_v2  ;;  %v8117_v45 = vsub.f32 %v14636_v8, %v8037_v10  ;;  %8216 = vadd.xlane.f32.xlu1 %v8215_v44 }
 0xb47   : > { %11592 = vpow2.f32 %v8154_v47  ;;  %v8156_v51 = vmul.f32 1.442695, %v8117_v45 }
 0xb49   : > { %v14767_v26 = vpop.eup %11588  ;;  %11594 = vpow2.f32 %v8156_v51 }
 0xb4a   : > { %v8040_v42 = vpop.xlane.xlu0 %8039  ;;  %v8218_v48 = vsel %vm1474_vm3, %v14767_v26, 0.0 }
 0xb4b   : > { %v14771_v29 = vpop.eup %11590  ;;  %v8118_v1 = vsub.f32 %v14648_v15, %v8040_v42  ;;  %8219 = vadd.xlane.f32.xlu0 %v8218_v48 }
 0xb4c   : > { %v8043_v18 = vpop.xlane.xlu1 %8042  ;;  %v8221_v43 = vsel %vm1474_vm3, %v14771_v29, 0.0 }
 0xb4d   : > { %v8158_v8 = vmul.f32 1.442695, %v8118_v1  ;;  %v8119_v62 = vsub.f32 %v14651_v25, %v8043_v18  ;;  %8222 = vadd.xlane.f32.xlu1 %v8221_v43 }
 0xb4f   : > { %11596 = vpow2.f32 %v8158_v8  ;;  %v8160_v13 = vmul.f32 1.442695, %v8119_v62 }
 0xb51   : > { %v14777_v33 = vpop.eup %11592  ;;  %11598 = vpow2.f32 %v8160_v13 }
 0xb52   : > { %v8046_v28 = vpop.xlane.xlu0 %8045  ;;  %v8224_v20 = vsel %vm1474_vm3, %v14777_v33, 0.0 }
 0xb53   : > { %v14781_v0 = vpop.eup %11594  ;;  %v8120_v15 = vsub.f32 %v14658_v39, %v8046_v28  ;;  %8225 = vadd.xlane.f32.xlu0 %v8224_v20 }
 0xb54   : > { %v8049_v30 = vpop.xlane.xlu1 %8048  ;;  %v8227_v9 = vsel %vm1474_vm3, %v14781_v0, 0.0 }
 0xb55   : > { %v8162_v25 = vmul.f32 1.442695, %v8120_v15  ;;  %v8121_v55 = vsub.f32 %v14661_v14, %v8049_v30  ;;  %8228 = vadd.xlane.f32.xlu1 %v8227_v9 }
 0xb57   : > { %11600 = vpow2.f32 %v8162_v25  ;;  %v8164_v7 = vmul.f32 1.442695, %v8121_v55 }
 0xb59   : > { %v14787_v54 = vpop.eup %11596  ;;  %11602 = vpow2.f32 %v8164_v7 }
 0xb5a   : > { %v8052_v50 = vpop.xlane.xlu0 %8051  ;;  %v8230_v56 = vsel %vm1474_vm3, %v14787_v54, 0.0 }
 0xb5b   : > { %v14791_v2 = vpop.eup %11598  ;;  %v8122_v39 = vsub.f32 %v14668_v37, %v8052_v50  ;;  %8231 = vadd.xlane.f32.xlu0 %v8230_v56 }
 0xb5c   : > { %v8055_v10 = vpop.xlane.xlu1 %8054  ;;  %v8233_v44 = vsel %vm1474_vm3, %v14791_v2, 0.0 }
 0xb5d   : > { %v8166_v14 = vmul.f32 1.442695, %v8122_v39  ;;  %v8123_v47 = vsub.f32 %v14671_v41, %v8055_v10  ;;  %8234 = vadd.xlane.f32.xlu1 %v8233_v44 }
 0xb5f   : > { %11604 = vpow2.f32 %v8166_v14  ;;  %v8168_v45 = vmul.f32 1.442695, %v8123_v47 }
 0xb61   : > { %v14797_v51 = vpop.eup %11600  ;;  %11606 = vpow2.f32 %v8168_v45 }
 0xb62   : > { %v8058_v42 = vpop.xlane.xlu0 %8057  ;;  %v8236_v48 = vsel %vm1474_vm3, %v14797_v51, 0.0 }
 0xb63   : > { %v14801_v1 = vpop.eup %11602  ;;  %v8124_v37 = vsub.f32 %v14678_v4, %v8058_v42  ;;  %8237 = vadd.xlane.f32.xlu0 %v8236_v48 }
 0xb64   : > { %v8061_v18 = vpop.xlane.xlu1 %8060  ;;  %v8239_v43 = vsel %vm1474_vm3, %v14801_v1, 0.0 }
 0xb65   : > { %v8170_v41 = vmul.f32 1.442695, %v8124_v37  ;;  %v8125_v8 = vsub.f32 %v14681_v63, %v8061_v18  ;;  %8240 = vadd.xlane.f32.xlu1 %v8239_v43 }
 0xb67   : > { %11608 = vpow2.f32 %v8170_v41  ;;  %v8172_v62 = vmul.f32 1.442695, %v8125_v8 }
 0xb69   : > { %v14807_v13 = vpop.eup %11604  ;;  %11610 = vpow2.f32 %v8172_v62 }
 0xb6a   : > { %v8070_v28 = vpop.xlane.xlu0 %8069  ;;  %v8242_v20 = vsel %vm1474_vm3, %v14807_v13, 0.0 }
 0xb6b   : > { %v14811_v15 = vpop.eup %11606  ;;  %v8128_v4 = vsub.f32 %v14688_v11, %v8070_v28  ;;  %8243 = vadd.xlane.f32.xlu0 %v8242_v20 }
 0xb6c   : > { %v8073_v30 = vpop.xlane.xlu1 %8072  ;;  %v8245_v9 = vsel %vm1474_vm3, %v14811_v15, 0.0 }
 0xb6d   : > { %v8178_v63 = vmul.f32 1.442695, %v8128_v4  ;;  %v8129_v25 = vsub.f32 %v14691_v52, %v8073_v30  ;;  %8246 = vadd.xlane.f32.xlu1 %v8245_v9 }
 0xb6f   : > { %11612 = vpow2.f32 %v8178_v63  ;;  %v8180_v55 = vmul.f32 1.442695, %v8129_v25 }
 0xb70   : > { %v7650_v7 = vpop.f32.mrb[192].mxu0 }
 0xb71   : > { %v14817_v50 = vpop.eup %11608  ;;  %11614 = vpow2.f32 %v8180_v55  ;;  %v10879_v56 = vpop.f32.mrb[193].mxu0  ;;  %v14820_v39 = vadd.f32 %v14574_v53, %v7650_v7 }
 0xb72   : > { %v8082_v11 = vpop.xlane.xlu0 %8081  ;;  %v7653_v10 = vpop.f32.mrb[194].mxu0  ;;  %v8248_v44 = vsel %vm1474_vm3, %v14817_v50, 0.0 }
 0xb73   : > { %v14824_v14 = vpop.eup %11610  ;;  %v8132_v52 = vsub.f32 %v14698_v3, %v8082_v11  ;;  %8249 = vadd.xlane.f32.xlu0 %v8248_v44  ;;  %v10880_v47 = vpop.f32.mrb[195].mxu0  ;;  %v14828_v45 = vadd.f32 %v14579_v23, %v7653_v10  ;;  %v8062_v43 = vsel %vm1474_vm3, %v14820_v39, -inf }
 0xb74   : > { %v8085_v42 = vpop.xlane.xlu1 %8084  ;;  %v8251_v48 = vsel %vm1474_vm3, %v14824_v14, 0.0 }
 0xb75   : > { %v8186_v37 = vmul.f32 1.442695, %v8132_v52  ;;  %v8133_v18 = vsub.f32 %v14701_v16, %v8085_v42  ;;  %8252 = vadd.xlane.f32.xlu1 %v8251_v48  ;;  %v8065_v8 = vsel %vm1474_vm3, %v14828_v45, -inf }
 0xb77   : > { %11616 = vpow2.f32 %v8186_v37  ;;  %v8188_v41 = vmul.f32 1.442695, %v8133_v18  ;;  %8063 = vmax.xlane.f32.xlu0 %v8062_v43 }
 0xb78   : > { %v7752_v3 = vpop.f32.mrb[196].mxu0 }
 0xb79   : > { %v14837_v62 = vpop.eup %11612  ;;  %11618 = vpow2.f32 %v8188_v41  ;;  %8066 = vmax.xlane.f32.xlu1 %v8065_v8  ;;  %v10891_v28 = vpop.f32.mrb[197].mxu0  ;;  %v14840_v20 = vadd.f32 %v14574_v53, %v7752_v3 }
 0xb7a   : > { %v8094_v16 = vpop.xlane.xlu0 %8093  ;;  %v7755_v4 = vpop.f32.mrb[198].mxu0  ;;  %v8260_v30 = vsel %vm1474_vm3, %v14837_v62, 0.0 }
 0xb7b   : > { %v14844_v9 = vpop.eup %11614  ;;  %v8136_v63 = vsub.f32 %v14708_v12, %v8094_v16  ;;  %8261 = vadd.xlane.f32.xlu0 %v8260_v30  ;;  %v10892_v25 = vpop.f32.mrb[199].mxu0  ;;  %v14848_v55 = vadd.f32 %v14579_v23, %v7755_v4  ;;  %v8074_v44 = vsel %vm1474_vm3, %v14840_v20, -inf }
 0xb7c   : > { %v8097_v7 = vpop.xlane.xlu1 %8096  ;;  %v8263_v56 = vsel %vm1474_vm3, %v14844_v9, 0.0 }
 0xb7d   : > { %v8194_v11 = vmul.f32 1.442695, %v8136_v63  ;;  %v8137_v10 = vsub.f32 %v14711_v61, %v8097_v7  ;;  %8264 = vadd.xlane.f32.xlu1 %v8263_v56  ;;  %v8077_v47 = vsel %vm1474_vm3, %v14848_v55, -inf }
 0xb7f   : > { %11620 = vpow2.f32 %v8194_v11  ;;  %v8196_v52 = vmul.f32 1.442695, %v8137_v10  ;;  %8075 = vmax.xlane.f32.xlu0 %v8074_v44 }
 0xb80   : > { %v7854_v12 = vpop.f32.mrb[200].mxu0 }
 0xb81   : > { %v14857_v42 = vpop.eup %11616  ;;  %11622 = vpow2.f32 %v8196_v52  ;;  %8078 = vmax.xlane.f32.xlu1 %v8077_v47  ;;  %v10903_v48 = vpop.f32.mrb[201].mxu0  ;;  %v14860_v37 = vadd.f32 %v14574_v53, %v7854_v12 }
 0xb82   : > { %v7857_v61 = vpop.f32.mrb[202].mxu0  ;;  %v8272_v18 = vsel %vm1474_vm3, %v14857_v42, 0.0 }
 0xb83   : > { %v14864_v43 = vpop.eup %11618  ;;  %8273 = vadd.xlane.f32.xlu0 %v8272_v18  ;;  %v10904_v41 = vpop.f32.mrb[203].mxu0  ;;  %v14867_v3 = vadd.f32 %v14579_v23, %v7857_v61  ;;  %v8086_v28 = vsel %vm1474_vm3, %v14860_v37, -inf }
 0xb84   : > { %v8275_v8 = vsel %vm1474_vm3, %v14864_v43, 0.0  ;;  %v8109_v47 = vpop.xlane.xlu1 %8108 }
 0xb85   : > { %8276 = vadd.xlane.f32.xlu1 %v8275_v8  ;;  %v8089_v4 = vsel %vm1474_vm3, %v14867_v3, -inf  ;;  %v8141_v61 = vsub.f32 %v14721_v40, %v8109_v47 }
 0xb87   : > { %8087 = vmax.xlane.f32.xlu0 %v8086_v28  ;;  %v8204_v41 = vmul.f32 1.442695, %v8141_v61 }
 0xb88   : > { %v7956_v16 = vpop.f32.mrb[204].mxu0 }
 0xb89   : > { %v14875_v30 = vpop.eup %11620  ;;  %8090 = vmax.xlane.f32.xlu1 %v8089_v4  ;;  %v10915_v63 = vpop.f32.mrb[205].mxu0  ;;  %v14878_v25 = vadd.f32 %v14574_v53, %v7956_v16 }
 0xb8a   : > { %v7959_v7 = vpop.f32.mrb[206].mxu0  ;;  %v8284_v56 = vsel %vm1474_vm3, %v14875_v30, 0.0 }
 0xb8b   : > { %v14882_v11 = vpop.eup %11622  ;;  %8285 = vadd.xlane.f32.xlu0 %v8284_v56  ;;  %v10916_v10 = vpop.f32.mrb[207].mxu0  ;;  %v14885_v44 = vadd.f32 %v14579_v23, %v7959_v7  ;;  %v8098_v12 = vsel %vm1474_vm3, %v14878_v25, -inf }
 0xb8c   : > { %v8287_v52 = vsel %vm1474_vm3, %v14882_v11, 0.0  ;;  %v8106_v23 = vpop.xlane.xlu0 %8105 }
 0xb8d   : > { %8288 = vadd.xlane.f32.xlu1 %v8287_v52  ;;  %v8101_v53 = vsel %vm1474_vm3, %v14885_v44, -inf  ;;  %v8140_v48 = vsub.f32 %v14718_v59, %v8106_v23 }
 0xb8f   : > { %8099 = vmax.xlane.f32.xlu0 %v8098_v12  ;;  %v8202_v18 = vmul.f32 1.442695, %v8140_v48 }
 0xb91   : > { %8102 = vmax.xlane.f32.xlu1 %v8101_v53  ;;  %11624 = vpow2.f32 %v8202_v18 }
 0xb92   : > { %11626 = vpow2.f32 %v8204_v41 }
 0xb9b   : > { %v14899_v8 = vpop.eup %11624 }
 0xb9c   : > { %v14901_v28 = vpop.eup %11626 }
 0xba2   : > { %8852 = vrot.lane.b32.xlu1 %v15565_v21, %s11728_s20  ;;  %v8296_v21 = vsel %vm1474_vm3, %v14899_v8, 0.0 }
 0xba5   : > { %8899 = vrot.lane.b32.xlu0 %v15567_v31, %s11728_s20  ;;  %v8299_v31 = vsel %vm1474_vm3, %v14901_v28, 0.0 }
 0xbc4   : > { %8297 = vadd.xlane.f32.xlu0 %v8296_v21 }
 0xbc6   : > { %8300 = vadd.xlane.f32.xlu1 %v8299_v31 }
 0xbc8   : > { %v8208_v16 = vpop.xlane.xlu0 %8207 }
 0xbc9   : > { %11628 = vrcp.f32 %v8208_v16 }
 0xbca   : > { %v8211_v59 = vpop.xlane.xlu1 %8210 }
 0xbcb   : > { %11630 = vrcp.f32 %v8211_v59 }
 0xbd0   : > { %v8214_v40 = vpop.xlane.xlu0 %8213 }
 0xbd1   : > { %11632 = vrcp.f32 %v8214_v40 }
 0xbd2   : > { %v8217_v4 = vpop.xlane.xlu1 %8216 }
 0xbd3   : > { %v11629_v63 = vpop.eup %11628  ;;  %11634 = vrcp.f32 %v8217_v4 }
 0xbd4   : > { %v8334_v56 = vmul.f32 %v11629_v63, %v14747_v46 }
 0xbd5   : > { %v11631_v7 = vpop.eup %11630 }
 0xbd6   : > { %v8335_v10 = vmul.f32 %v11631_v7, %v14751_v32 }
 0xbd8   : > { %v8220_v52 = vpop.xlane.xlu0 %8219  ;;  %v8366_v12 = vpack.c.bf16 %v8335_v10, %v8334_v56 }
 0xbd9   : > { %11636 = vrcp.f32 %v8220_v52 }
 0xbda   : > { %v8223_v53 = vpop.xlane.xlu1 %8222  ;;  %10926 = vmatmul.mubr.msk.bf16.vlgmr.msra.gmra.mrb[208].mxu0 %vm1474_vm3, %v8366_v12 }
 0xbdb   : > { %v11633_v23 = vpop.eup %11632  ;;  %11638 = vrcp.f32 %v8223_v53  ;;  %10936 = vmatpush3.bf16.msra.mxu0 %v14729_v35  ;;  %10937 = vmatprep.mubr.msk.bf16.mxu0 %vm11717_vm1, %v15364_v34 }
 0xbdc   : > { %10947 = vmatprep.subr.bf16.mxu0 %v15364_v34  ;;  %v8336_v46 = vmul.f32 %v11633_v23, %v14757_v27 }
 0xbdd   : > { %v11635_v47 = vpop.eup %11634 }
 0xbde   : > { %v8337_v32 = vmul.f32 %v11635_v47, %v14761_v49 }
 0xbe0   : > { %v8367_v48 = vpack.c.bf16 %v8337_v32, %v8336_v46  ;;  %v8226_v61 = vpop.xlane.xlu0 %8225 }
 0xbe1   : > { %11640 = vrcp.f32 %v8226_v61 }
 0xbe2   : > { %v8229_v18 = vpop.xlane.xlu1 %8228  ;;  %10932 = vmatmul.mubr.msk.bf16.vlgmr.msra.gmra.mrb[48].mxu1 %vm1474_vm3, %v8367_v48 }
 0xbe3   : > { %v11637_v41 = vpop.eup %11636  ;;  %11642 = vrcp.f32 %v8229_v18  ;;  %10942 = vmatpush3.bf16.msra.mxu1 %v14727_v19  ;;  %10943 = vmatprep.mubr.msk.bf16.mxu1 %vm11717_vm1, %v15364_v34 }
 0xbe4   : > { %10953 = vmatprep.subr.bf16.mxu1 %v15364_v34  ;;  %v8338_v27 = vmul.f32 %v11637_v41, %v14767_v26 }
 0xbe5   : > { %v11639_v35 = vpop.eup %11638 }
 0xbe6   : > { %v8339_v49 = vmul.f32 %v11639_v35, %v14771_v29 }
 0xbe8   : > { %v8232_v21 = vpop.xlane.xlu0 %8231  ;;  %v8368_v31 = vpack.c.bf16 %v8339_v49, %v8338_v27 }
 0xbe9   : > { %11644 = vrcp.f32 %v8232_v21 }
 0xbea   : > { %v8235_v16 = vpop.xlane.xlu1 %8234  ;;  %10938 = vmatmul.mubr.msk.bf16.vlgmr.msra.gmra.mrb[212].mxu0 %vm1474_vm3, %v8368_v31 }
 0xbeb   : > { %v11641_v59 = vpop.eup %11640  ;;  %11646 = vrcp.f32 %v8235_v16  ;;  %10948 = vmatpush3.bf16.msra.mxu0 %v14733_v22  ;;  %10949 = vmatprep.mubr.msk.bf16.mxu0 %vm11717_vm1, %v15364_v34 }
 0xbec   : > { %10959 = vmatprep.subr.bf16.mxu0 %v15364_v34  ;;  %v8340_v26 = vmul.f32 %v11641_v59, %v14777_v33 }
 0xbed   : > { %v11643_v19 = vpop.eup %11642 }
 0xbee   : > { %v8341_v29 = vmul.f32 %v11643_v19, %v14781_v0 }
 0xbf0   : > { %v8369_v40 = vpack.c.bf16 %v8341_v29, %v8340_v26  ;;  %v8238_v4 = vpop.xlane.xlu0 %8237 }
 0xbf1   : > { %11648 = vrcp.f32 %v8238_v4 }
 0xbf2   : > { %v8241_v63 = vpop.xlane.xlu1 %8240  ;;  %10944 = vmatmul.mubr.msk.bf16.vlgmr.msra.gmra.mrb[52].mxu1 %vm1474_vm3, %v8369_v40 }
 0xbf3   : > { %v11645_v7 = vpop.eup %11644  ;;  %11650 = vrcp.f32 %v8241_v63  ;;  %10954 = vmatpush3.bf16.msra.mxu1 %v14731_v58  ;;  %10955 = vmatprep.mubr.msk.bf16.mxu1 %vm11717_vm1, %v15364_v34 }
 0xbf4   : > { %10965 = vmatprep.subr.bf16.mxu1 %v15364_v34  ;;  %v8342_v33 = vmul.f32 %v11645_v7, %v14787_v54 }
 0xbf5   : > { %v11647_v22 = vpop.eup %11646 }
 0xbf6   : > { %v8343_v0 = vmul.f32 %v11647_v22, %v14791_v2 }
 0xbf8   : > { %v8244_v56 = vpop.xlane.xlu0 %8243  ;;  %v8370_v10 = vpack.c.bf16 %v8343_v0, %v8342_v33 }
 0xbf9   : > { %11652 = vrcp.f32 %v8244_v56 }
 0xbfa   : > { %v8247_v52 = vpop.xlane.xlu1 %8246  ;;  %10950 = vmatmul.mubr.msk.bf16.vlgmr.msra.gmra.mrb[216].mxu0 %vm1474_vm3, %v8370_v10 }
 0xbfb   : > { %v11649_v12 = vpop.eup %11648  ;;  %11654 = vrcp.f32 %v8247_v52  ;;  %10960 = vmatpush3.bf16.msra.mxu0 %v14737_v36  ;;  %10961 = vmatprep.mubr.msk.bf16.mxu0 %vm11717_vm1, %v15364_v34 }
 0xbfc   : > { %10971 = vmatprep.subr.bf16.mxu0 %v15364_v34  ;;  %v8344_v54 = vmul.f32 %v11649_v12, %v14797_v51 }
 0xbfd   : > { %v11651_v58 = vpop.eup %11650 }
 0xbfe   : > { %v8345_v2 = vmul.f32 %v11651_v58, %v14801_v1 }
 0xc00   : > { %v8371_v53 = vpack.c.bf16 %v8345_v2, %v8344_v54  ;;  %v8250_v23 = vpop.xlane.xlu0 %8249 }
 0xc01   : > { %11656 = vrcp.f32 %v8250_v23 }
 0xc02   : > { %v8253_v47 = vpop.xlane.xlu1 %8252  ;;  %10956 = vmatmul.mubr.msk.bf16.vlgmr.msra.gmra.mrb[56].mxu1 %vm1474_vm3, %v8371_v53 }
 0xc03   : > { %v11653_v46 = vpop.eup %11652  ;;  %11658 = vrcp.f32 %v8253_v47  ;;  %10966 = vmatpush3.bf16.msra.mxu1 %v14735_v57  ;;  %10967 = vmatprep.mubr.msk.bf16.mxu1 %vm11717_vm1, %v15364_v34 }
 0xc04   : > { %v8064_v36 = vpop.xlane.xlu0 %8063  ;;  %10977 = vmatprep.subr.bf16.mxu1 %v15364_v34  ;;  %v8346_v1 = vmul.f32 %v11653_v46, %v14807_v13 }
 0xc05   : > { %v11655_v32 = vpop.eup %11654  ;;  %v8126_v51 = vsub.f32 %v14820_v39, %v8064_v36 }
 0xc06   : > { %v8347_v48 = vmul.f32 %v11655_v32, %v14811_v15  ;;  %v8067_v61 = vpop.xlane.xlu1 %8066 }
 0xc07   : > { %v8174_v18 = vmul.f32 1.442695, %v8126_v51  ;;  %v8127_v41 = vsub.f32 %v14828_v45, %v8067_v61 }
 0xc08   : > { %v8262_v35 = vpop.xlane.xlu0 %8261  ;;  %v8372_v27 = vpack.c.bf16 %v8347_v48, %v8346_v1 }
 0xc09   : > { %11660 = vpow2.f32 %v8174_v18  ;;  %v8176_v57 = vmul.f32 1.442695, %v8127_v41 }
 0xc0a   : > { %11662 = vrcp.f32 %v8262_v35  ;;  %v8265_v49 = vpop.xlane.xlu1 %8264  ;;  %10962 = vmatmul.mubr.msk.bf16.vlgmr.msra.gmra.mrb[220].mxu0 %vm1474_vm3, %v8372_v27 }
 0xc0b   : > { %v11657_v21 = vpop.eup %11656  ;;  %11664 = vpow2.f32 %v8176_v57  ;;  %10972 = vmatpush3.bf16.msra.mxu0 %v14741_v6  ;;  %10973 = vmatprep.mubr.msk.bf16.mxu0 %vm11717_vm1, %v15364_v34 }
 0xc0c   : > { %11666 = vrcp.f32 %v8265_v49  ;;  %v8076_v13 = vpop.xlane.xlu0 %8075  ;;  %10983 = vmatprep.subr.bf16.mxu0 %v15364_v34  ;;  %v8348_v39 = vmul.f32 %v11657_v21, %v14817_v50 }
 0xc0d   : > { %v11659_v15 = vpop.eup %11658  ;;  %v8130_v36 = vsub.f32 %v14840_v20, %v8076_v13 }
 0xc0e   : > { %v8349_v45 = vmul.f32 %v11659_v15, %v14824_v14  ;;  %v8079_v31 = vpop.xlane.xlu1 %8078 }
 0xc0f   : > { %v8131_v16 = vsub.f32 %v14848_v55, %v8079_v31  ;;  %v8182_v32 = vmul.f32 1.442695, %v8130_v36 }
 0xc10   : > { %v8373_v59 = vpack.c.bf16 %v8349_v45, %v8348_v39  ;;  %v8274_v19 = vpop.xlane.xlu0 %8273 }
 0xc11   : > { %v8184_v26 = vmul.f32 1.442695, %v8131_v16  ;;  %11668 = vrcp.f32 %v8274_v19 }
 0xc12   : > { %v8277_v6 = vpop.xlane.xlu1 %8276  ;;  %10968 = vmatmul.mubr.msk.bf16.vlgmr.msra.gmra.mrb[60].mxu1 %vm1474_vm3, %v8373_v59 }
 0xc13   : > { %v14962_v29 = vpop.eup %11660  ;;  %11670 = vpow2.f32 %v8184_v26  ;;  %10978 = vmatpush3.bf16.msra.mxu1 %v14739_v17  ;;  %10979 = vmatprep.mubr.msk.bf16.mxu1 %vm11717_vm1, %v15364_v34 }
 0xc14   : > { %v11663_v50 = vpop.eup %11662  ;;  %11672 = vrcp.f32 %v8277_v6  ;;  %v8088_v14 = vpop.xlane.xlu0 %8087  ;;  %v8254_v55 = vsel %vm1474_vm3, %v14962_v29, 0.0  ;;  %10989 = vmatprep.subr.bf16.mxu1 %v15364_v34 }
 0xc15   : > { %v14970_v40 = vpop.eup %11664  ;;  %8255 = vadd.xlane.f32.xlu1 %v8254_v55  ;;  %v8352_v17 = vmul.f32 %v11663_v50, %v14837_v62  ;;  %v8134_v51 = vsub.f32 %v14860_v37, %v8088_v14 }
 0xc16   : > { %v11667_v4 = vpop.eup %11666  ;;  %v8091_v63 = vpop.xlane.xlu1 %8090  ;;  %v8257_v7 = vsel %vm1474_vm3, %v14970_v40, 0.0 }
 0xc17   : > { %v8353_v22 = vmul.f32 %v11667_v4, %v14844_v9  ;;  %8258 = vadd.xlane.f32.xlu0 %v8257_v7  ;;  %v8190_v1 = vmul.f32 1.442695, %v8134_v51  ;;  %v8135_v61 = vsub.f32 %v14867_v3, %v8091_v63 }
 0xc18   : > { %v8286_v33 = vpop.xlane.xlu0 %8285 }
 0xc19   : > { %v8375_v0 = vpack.c.bf16 %v8353_v22, %v8352_v17  ;;  %11674 = vrcp.f32 %v8286_v33  ;;  %v8192_v18 = vmul.f32 1.442695, %v8135_v61 }
 0xc1a   : > { %v8289_v56 = vpop.xlane.xlu1 %8288 }
 0xc1b   : > { %10980 = vmatmul.mubr.msk.bf16.vlgmr.msra.gmra.mrb[64].mxu1 %vm1474_vm3, %v8375_v0  ;;  %v11669_v10 = vpop.eup %11668  ;;  %11676 = vrcp.f32 %v8289_v56 }
 0xc1c   : > { %v8100_v52 = vpop.xlane.xlu0 %8099  ;;  %10991 = vmatprep.mubr.msk.bf16.mxu1 %vm11717_vm1, %v15364_v34  ;;  %v8356_v54 = vmul.f32 %v11669_v10, %v14857_v42  ;;  %11678 = vpow2.f32 %v8182_v32 }
 0xc1d   : > { %v14979_v12 = vpop.eup %11670  ;;  %v8138_v48 = vsub.f32 %v14878_v25, %v8100_v52  ;;  %11680 = vpow2.f32 %v8190_v1 }
 0xc1e   : > { %v11673_v58 = vpop.eup %11672  ;;  %v8269_v62 = vsel %vm1474_vm3, %v14979_v12, 0.0 }
 0xc1f   : > { %v8357_v9 = vmul.f32 %v11673_v58, %v14864_v43  ;;  %8270 = vadd.xlane.f32.xlu0 %v8269_v62 }
 0xc20   : > { %v8900_v2 = vpop.permute.xlu0 %8899 }
 0xc21   : > { %10990 = vmatpush3.bf16.msra.mxu1 %v8900_v2  ;;  %v8377_v53 = vpack.c.bf16 %v8357_v9, %v8356_v54 }
 0xc22   : > { %11001 = vmatprep.subr.bf16.mxu1 %v15364_v34 }
 0xc23   : > { %v11675_v23 = vpop.eup %11674 }
 0xc24   : > { %10992 = vmatmul.mubr.msk.bf16.vlgmr.msra.gmra.mrb[68].mxu1 %vm1474_vm3, %v8377_v53  ;;  %v8360_v43 = vmul.f32 %v11675_v23, %v14875_v30  ;;  %v8198_v30 = vmul.f32 1.442695, %v8138_v48 }
 0xc25   : > { %11003 = vmatprep.mubr.msk.bf16.mxu1 %vm11717_vm1, %v15364_v34  ;;  %v11677_v47 = vpop.eup %11676 }
 0xc26   : > { %8946 = vrot.lane.b32.xlu1 %v15569_v60, %s11728_s20  ;;  %v8361_v46 = vmul.f32 %v11677_v47, %v14882_v11  ;;  %v8103_v60 = vpop.xlane.xlu1 %8102  ;;  %11682 = vpow2.f32 %v8198_v30  ;;  %v15000_v20 = vpop.eup %11678 }
 0xc27   : > { %v8139_v11 = vsub.f32 %v14885_v44, %v8103_v60  ;;  %11684 = vpow2.f32 %v8192_v18  ;;  %v8266_v37 = vsel %vm1474_vm3, %v15000_v20, 0.0  ;;  %v15004_v41 = vpop.eup %11680 }
 0xc28   : > { %v8379_v42 = vpack.c.bf16 %v8361_v46, %v8360_v43  ;;  %v8278_v3 = vsel %vm1474_vm3, %v15004_v41, 0.0 }
 0xc2a   : > { %v8853_v21 = vpop.permute.xlu1 %8852 }
 0xc30   : > { %v15008_v25 = vpop.eup %11682 }
 0xc31   : > { %v15010_v35 = vpop.eup %11684  ;;  %v8290_v44 = vsel %vm1474_vm3, %v15008_v25, 0.0 }
 0xc32   : > { %v8281_v27 = vsel %vm1474_vm3, %v15010_v35, 0.0 }
 0xc35   : > { %8993 = vrot.lane.b32.xlu0 %v15504_v5, %s11728_s20  ;;  %v8200_v5 = vmul.f32 1.442695, %v8139_v11 }
 0xc37   : > { %11686 = vpow2.f32 %v8200_v5 }
 0xc41   : > { %v15016_v57 = vpop.eup %11686 }
 0xc42   : > { %v8293_v49 = vsel %vm1474_vm3, %v15016_v57, 0.0 }
 0xc4a   : > { %8267 = vadd.xlane.f32.xlu1 %v8266_v37 }
 0xc4e   : > { %8279 = vadd.xlane.f32.xlu1 %v8278_v3 }
 0xc51   : > { %v8298_v15 = vpop.xlane.xlu0 %8297 }
 0xc52   : > { %8291 = vadd.xlane.f32.xlu1 %v8290_v44 }
 0xc53   : > { %v8301_v13 = vpop.xlane.xlu1 %8300 }
 0xc54   : > { %8282 = vadd.xlane.f32.xlu0 %v8281_v27 }
 0xc58   : > { %8294 = vadd.xlane.f32.xlu0 %v8293_v49 }
 0xc63   : > { %9040 = vrot.lane.b32.xlu1 %v15366_v24, %s11728_s20 }
 0xc6e   : > { %9087 = vrot.lane.b32.xlu0 %v11915_v38, %s11728_s20 }
 0xca2   : > { %v8256_v39 = vpop.xlane.xlu1 %8255 }
 0xca3   : > { %11688 = vrcp.f32 %v8256_v39 }
 0xca4   : > { %v8259_v45 = vpop.xlane.xlu0 %8258 }
 0xca5   : > { %11690 = vrcp.f32 %v8259_v45 }
 0xca6   : > { %v8947_v46 = vpop.permute.xlu1 %8946 }
 0xcac   : > { %v8271_v31 = vpop.xlane.xlu0 %8270 }
 0xcad   : > { %v11689_v16 = vpop.eup %11688  ;;  %v15024_v59 = vpop.f32.mrb[208].mxu0  ;;  %11692 = vrcp.f32 %v8271_v31 }
 0xcae   : > { %v10927_v19 = vpop.f32.mrb[209].mxu0  ;;  %v8350_v24 = vmul.f32 %v11689_v16, %v14962_v29 }
 0xcaf   : > { %v11691_v26 = vpop.eup %11690  ;;  %v15026_v6 = vpop.f32.mrb[210].mxu0 }
 0xcb0   : > { %v8351_v50 = vmul.f32 %v11691_v26, %v14970_v40  ;;  %v9134_v38 = vpack.c.bf16 %v15026_v6, %v15024_v59  ;;  %v10928_v14 = vpop.f32.mrb[211].mxu0  ;;  %v8994_v55 = vpop.permute.xlu0 %8993 }
 0xcb1   : > { %11002 = vmatpush3.bf16.msra.mxu1 %v8994_v55 }
 0xcb2   : > { %v8374_v4 = vpack.c.bf16 %v8351_v50, %v8350_v24  ;;  %11013 = vmatprep.subr.bf16.mxu1 %v15364_v34 }
 0xcb4   : > { %10974 = vmatmul.mubr.msk.bf16.vlgmr.msra.gmra.mrb[224].mxu0 %vm1474_vm3, %v8374_v4  ;;  %11004 = vmatmul.mubr.msk.bf16.vlgmr.msra.gmra.mrb[72].mxu1 %vm1474_vm3, %v8379_v42 }
 0xcb5   : > { %10984 = vmatpush3.bf16.msra.mxu0 %v8853_v21  ;;  %v15035_v63 = vpop.f32.mrb[48].mxu1  ;;  %10985 = vmatprep.mubr.msk.bf16.mxu0 %vm11717_vm1, %v15364_v34 }
 0xcb6   : > { %v10933_v29 = vpop.f32.mrb[49].mxu1  ;;  %10995 = vmatprep.subr.bf16.mxu0 %v15364_v34  ;;  %11015 = vmatprep.mubr.msk.bf16.mxu1 %vm11717_vm1, %v15364_v34 }
 0xcb7   : > { %v15042_v40 = vpop.f32.mrb[50].mxu1  ;;  %v11693_v11 = vpop.eup %11692 }
 0xcb8   : > { %v9135_v7 = vpack.c.bf16 %v15042_v40, %v15035_v63  ;;  %v10934_v17 = vpop.f32.mrb[51].mxu1  ;;  %v8355_v27 = vmul.f32 %v11693_v11, %v14979_v12 }
 0xcbd   : > { %v15046_v22 = vpop.f32.mrb[212].mxu0 }
 0xcbe   : > { %v10939_v33 = vpop.f32.mrb[213].mxu0 }
 0xcbf   : > { %v15048_v0 = vpop.f32.mrb[214].mxu0 }
 0xcc0   : > { %v9136_v56 = vpack.c.bf16 %v15048_v0, %v15046_v22  ;;  %v10940_v10 = vpop.f32.mrb[215].mxu0 }
 0xcc5   : > { %v15052_v52 = vpop.f32.mrb[52].mxu1 }
 0xcc6   : > { %v10945_v58 = vpop.f32.mrb[53].mxu1 }
 0xcc7   : > { %v15054_v62 = vpop.f32.mrb[54].mxu1 }
 0xcc8   : > { %v9137_v9 = vpack.c.bf16 %v15054_v62, %v15052_v52  ;;  %v10946_v54 = vpop.f32.mrb[55].mxu1 }
 0xccd   : > { %v15058_v2 = vpop.f32.mrb[216].mxu0 }
 0xcce   : > { %v10951_v53 = vpop.f32.mrb[217].mxu0 }
 0xccf   : > { %v15060_v23 = vpop.f32.mrb[218].mxu0 }
 0xcd0   : > { %v9138_v47 = vpack.c.bf16 %v15060_v23, %v15058_v2  ;;  %v10952_v43 = vpop.f32.mrb[219].mxu0 }
 0xcd5   : > { %v15064_v42 = vpop.f32.mrb[56].mxu1 }
 0xcd6   : > { %v10957_v36 = vpop.f32.mrb[57].mxu1 }
 0xcd7   : > { %v15066_v32 = vpop.f32.mrb[58].mxu1  ;;  %v8268_v51 = vpop.xlane.xlu1 %8267 }
 0xcd8   : > { %v9139_v1 = vpack.c.bf16 %v15066_v32, %v15064_v42  ;;  %11694 = vrcp.f32 %v8268_v51  ;;  %v10958_v48 = vpop.f32.mrb[59].mxu1 }
 0xcd9   : > { %11696 = vrcp.f32 %v8301_v13 }
 0xcda   : > { %11698 = vrcp.f32 %v8298_v15 }
 0xcdb   : > { %v8280_v61 = vpop.xlane.xlu1 %8279 }
 0xcdc   : > { %11700 = vrcp.f32 %v8280_v61 }
 0xcdd   : > { %v15070_v60 = vpop.f32.mrb[220].mxu0 }
 0xcde   : > { %v10963_v30 = vpop.f32.mrb[221].mxu0 }
 0xcdf   : > { %v15072_v18 = vpop.f32.mrb[222].mxu0  ;;  %v8292_v13 = vpop.xlane.xlu1 %8291 }
 0xce0   : > { %v9140_v5 = vpack.c.bf16 %v15072_v18, %v15070_v60  ;;  %v10964_v37 = vpop.f32.mrb[223].mxu0 }
 0xce1   : > { %v8283_v3 = vpop.xlane.xlu0 %8282 }
 0xce2   : > { %v11695_v44 = vpop.eup %11694  ;;  %11702 = vrcp.f32 %v8283_v3 }
 0xce3   : > { %v8354_v49 = vmul.f32 %v11695_v44, %v15000_v20  ;;  %v11697_v21 = vpop.eup %11696  ;;  %v9041_v53 = vpop.permute.xlu1 %9040 }
 0xce4   : > { %v11699_v31 = vpop.eup %11698  ;;  %v8365_v19 = vmul.f32 %v11697_v21, %v14901_v28 }
 0xce5   : > { %v8751_v15 = vpop.f32.mrb[60].mxu1  ;;  %v8295_v39 = vpop.xlane.xlu0 %8294  ;;  %v8376_v45 = vpack.c.bf16 %v8355_v27, %v8354_v49  ;;  %v8364_v12 = vmul.f32 %v11699_v31, %v14899_v8  ;;  %v9751_v8 = vld [vmem:[%s15251_s6 + $0xc] sm:$0xf] }
 0xce6   : > { %11704 = vrcp.f32 %v8295_v39  ;;  %v10969_v16 = vpop.f32.mrb[61].mxu1  ;;  %v11701_v14 = vpop.eup %11700  ;;  %v9201_v61 = vsel %vm4617_vm4, %v9751_v8, 0  ;;  %v15139_v39 = vld [vmem:[%s15252_s7] ss:$0 sm:$0xff] }
 0xce7   : > { %v8754_v26 = vpop.f32.mrb[62].mxu1  ;;  %10986 = vmatmul.mubr.msk.bf16.vlgmr.msra.gmra.mrb[228].mxu0 %vm1474_vm3, %v8376_v45  ;;  %11706 = vrcp.f32 %v8292_v13  ;;  %v8381_v55 = vpack.c.bf16 %v8365_v19, %v8364_v12  ;;  %v8358_v28 = vmul.f32 %v11701_v14, %v15004_v41 }
 0xce8   : > { %v9141_v24 = vpack.c.bf16 %v8754_v26, %v8751_v15  ;;  %10996 = vmatpush3.bf16.msra.mxu0 %v8947_v46  ;;  %v10970_v50 = vpop.f32.mrb[63].mxu1  ;;  %10997 = vmatprep.mubr.msk.bf16.mxu0 %vm11717_vm1, %v15364_v34 }
 0xce9   : > { %v9088_v20 = vpop.permute.xlu0 %9087  ;;  %11007 = vmatprep.subr.bf16.mxu0 %v15364_v34 }
 0xcea   : > { %11014 = vmatpush3.bf16.msra.mxu1 %v9088_v20 }
 0xcec   : > { %v11703_v4 = vpop.eup %11702 }
 0xced   : > { %v8359_v29 = vmul.f32 %v11703_v4, %v15010_v35  ;;  %11016 = vmatmul.mubr.msk.bf16.vlgmr.msra.gmra.mrb[76].mxu1 %vm1474_vm3, %v8381_v55 }
 0xcee   : > { %v8845_v17 = vpop.f32.mrb[64].mxu1 }
 0xcef   : > { %v10981_v33 = vpop.f32.mrb[65].mxu1  ;;  %v8378_v10 = vpack.c.bf16 %v8359_v29, %v8358_v28 }
 0xcf0   : > { %v11705_v58 = vpop.eup %11704  ;;  %v8848_v54 = vpop.f32.mrb[66].mxu1 }
 0xcf1   : > { %v9143_v43 = vpack.c.bf16 %v8848_v54, %v8845_v17  ;;  %v10982_v46 = vpop.f32.mrb[67].mxu1  ;;  %10998 = vmatmul.mubr.msk.bf16.vlgmr.msra.gmra.mrb[232].mxu0 %vm1474_vm3, %v8378_v10  ;;  %v11707_v36 = vpop.eup %11706  ;;  %v8363_v41 = vmul.f32 %v11705_v58, %v15016_v57 }
 0xcf2   : > { %11008 = vmatpush3.bf16.msra.mxu0 %v9041_v53  ;;  %11009 = vmatprep.mubr.msk.bf16.mxu0 %vm11717_vm1, %v15364_v34  ;;  %v8362_v35 = vmul.f32 %v11707_v36, %v15008_v25 }
 0xcf3   : > { %11156 = vmatprep.subr.msk.bf16.mxu0 %vm4617_vm4, %v9751_v8 }
 0xcf4   : > { %v8380_v48 = vpack.c.bf16 %v8363_v41, %v8362_v35 }
 0xcf7   : > { %v8939_v51 = vpop.f32.mrb[68].mxu1 }
 0xcf8   : > { %v10993_v30 = vpop.f32.mrb[69].mxu1 }
 0xcf9   : > { %v8942_v11 = vpop.f32.mrb[70].mxu1  ;;  %11010 = vmatmul.mubr.msk.bf16.vlgmr.msra.gmra.mrb[236].mxu0 %vm1474_vm3, %v8380_v48 }
 0xcfa   : > { %v9145_v37 = vpack.c.bf16 %v8942_v11, %v8939_v51  ;;  %v10994_v3 = vpop.f32.mrb[71].mxu1  ;;  %11021 = vmatprep.mubr.msk.bf16.mxu0 %vm676_vm2, %v9134_v38  ;;  %11020 = vmatpush3.bf16.msra.mxu0 %v9201_v61 }
 0xd01   : > { %11022 = vmatmul.mubr.msk.bf16.vlgmr.msra.gmra.mrb[128].mxu0 %vm676_vm2, %v9135_v7 }
 0xd02   : > { %11025 = vmatprep.mubr.msk.bf16.mxu0 %vm676_vm2, %v9136_v56 }
 0xd09   : > { %11026 = vmatmul.mubr.msk.bf16.gmra.mrb[132].mxu0 %vm676_vm2, %v9137_v9 }
 0xd0a   : > { %11029 = vmatprep.mubr.msk.bf16.mxu0 %vm676_vm2, %v9138_v47 }
 0xd11   : > { %11030 = vmatmul.mubr.msk.bf16.gmra.mrb[136].mxu0 %vm676_vm2, %v9139_v1 }
 0xd12   : > { %11033 = vmatprep.mubr.msk.bf16.mxu0 %vm676_vm2, %v9140_v5 }
 0xd19   : > { %11034 = vmatmul.mubr.msk.bf16.gmra.mrb[140].mxu0 %vm676_vm2, %v9141_v24 }
 0xd87   : > { %v8798_v34 = vpop.f32.mrb[224].mxu0  ;;  %v9033_v25 = vpop.f32.mrb[72].mxu1 }
 0xd88   : > { %v10975_v57 = vpop.f32.mrb[225].mxu0  ;;  %v11005_v59 = vpop.f32.mrb[73].mxu1 }
 0xd89   : > { %v8801_v6 = vpop.f32.mrb[226].mxu0  ;;  %v9036_v38 = vpop.f32.mrb[74].mxu1 }
 0xd8a   : > { %v9142_v63 = vpack.c.bf16 %v8801_v6, %v8798_v34  ;;  %v9147_v40 = vpack.c.bf16 %v9036_v38, %v9033_v25  ;;  %v10976_v7 = vpop.f32.mrb[227].mxu0  ;;  %v11006_v22 = vpop.f32.mrb[75].mxu1 }
 0xd8c   : > { %11037 = vmatprep.mubr.msk.bf16.mxu0 %vm676_vm2, %v9142_v63 }
 0xd8d   : > { %11038 = vmatmul.mubr.msk.bf16.gmra.mrb[144].mxu0 %vm676_vm2, %v9143_v43 }
 0xdba   : > { %v8892_v0 = vpop.f32.mrb[228].mxu0 }
 0xdbb   : > { %v10987_v56 = vpop.f32.mrb[229].mxu0 }
 0xdbc   : > { %v8895_v52 = vpop.f32.mrb[230].mxu0 }
 0xdbd   : > { %v9144_v62 = vpack.c.bf16 %v8895_v52, %v8892_v0  ;;  %v10988_v9 = vpop.f32.mrb[231].mxu0 }
 0xdbf   : > { %11041 = vmatprep.mubr.msk.bf16.mxu0 %vm676_vm2, %v9144_v62 }
 0xdc0   : > { %v9127_v2 = vpop.f32.mrb[76].mxu1  ;;  %11042 = vmatmul.mubr.msk.bf16.gmra.mrb[148].mxu0 %vm676_vm2, %v9145_v37 }
 0xdc1   : > { %v11017_v23 = vpop.f32.mrb[77].mxu1 }
 0xdc2   : > { %v9130_v47 = vpop.f32.mrb[78].mxu1 }
 0xdc3   : > { %v9149_v42 = vpack.c.bf16 %v9130_v47, %v9127_v2  ;;  %v11018_v32 = vpop.f32.mrb[79].mxu1 }
 0xdc4   : > { %v8986_v1 = vpop.f32.mrb[232].mxu0 }
 0xdc5   : > { %v10999_v60 = vpop.f32.mrb[233].mxu0 }
 0xdc6   : > { %v8989_v18 = vpop.f32.mrb[234].mxu0 }
 0xdc7   : > { %v9146_v5 = vpack.c.bf16 %v8989_v18, %v8986_v1  ;;  %v11000_v44 = vpop.f32.mrb[235].mxu0 }
 0xdc9   : > { %11045 = vmatprep.mubr.msk.bf16.mxu0 %vm676_vm2, %v9146_v5 }
 0xdca   : > { %11046 = vmatmul.mubr.msk.bf16.gmra.mrb[152].mxu0 %vm676_vm2, %v9147_v40 }
 0xdcc   : > { %v9080_v27 = vpop.f32.mrb[236].mxu0 }
 0xdcd   : > { %v11011_v49 = vpop.f32.mrb[237].mxu0 }
 0xdce   : > { %v9083_v21 = vpop.f32.mrb[238].mxu0 }
 0xdcf   : > { %v9148_v13 = vpack.c.bf16 %v9083_v21, %v9080_v27  ;;  %v11012_v15 = vpop.f32.mrb[239].mxu0 }
 0xdd1   : > { %11049 = vmatprep.mubr.msk.bf16.mxu0 %vm676_vm2, %v9148_v13 }
 0xdd2   : > { %11050 = vmatmul.mubr.msk.bf16.gmra.mrb[156].mxu0 %vm676_vm2, %v9149_v42 }
 0xdd4   : > { %v11023_v45 = vpop.f32.mrb[128].mxu0 }
 0xdd5   : > { %v9405_v31 = vadd.f32 %v11023_v45, %v15139_v39  ;;  %v9237_v16 = vpop.f32.mrb[129].mxu0 }
 0xdd6   : > { %v9403_v19 = vadd.f32 %v15139_v39, %v9237_v16  ;;  %v11024_v26 = vpop.f32.mrb[130].mxu0 }
 0xdd7   : > { %9437 = vst.msk [vmem:[%s15144_s12 + $0x10] sm:$0xff] %vm445_vm0, %v9405_v31  ;;  %v9406_v24 = vadd.f32 %v11024_v26, %v15139_v39  ;;  %v9240_v50 = vpop.f32.mrb[131].mxu0 }
 0xdd8   : > { %9435 = vst.msk [vmem:[%s15144_s12] sm:$0xff] %vm445_vm0, %v9403_v19  ;;  %v9404_v12 = vadd.f32 %v15139_v39, %v9240_v50 }
 0xdd9   : > { %9438 = vst.msk [vmem:[%s15144_s12 + $0x18] sm:$0xff] %vm445_vm0, %v9406_v24 }
 0xdda   : > { %9436 = vst.msk [vmem:[%s15144_s12 + $0x8] sm:$0xff] %vm445_vm0, %v9404_v12 }
 0xddc   : > { %v11027_v20 = vpop.f32.mrb[132].mxu0 }
 0xddd   : > { %v9409_v14 = vadd.f32 %v11027_v20, %v15139_v39  ;;  %v9253_v55 = vpop.f32.mrb[133].mxu0 }
 0xdde   : > { %v9407_v4 = vadd.f32 %v15139_v39, %v9253_v55  ;;  %v11028_v28 = vpop.f32.mrb[134].mxu0 }
 0xddf   : > { %9441 = vst.msk [vmem:[%s15144_s12 + $0x30] sm:$0xff] %vm445_vm0, %v9409_v14  ;;  %v9410_v29 = vadd.f32 %v11028_v28, %v15139_v39  ;;  %v9256_v17 = vpop.f32.mrb[135].mxu0 }
 0xde0   : > { %9439 = vst.msk [vmem:[%s15144_s12 + $0x20] sm:$0xff] %vm445_vm0, %v9407_v4  ;;  %v9408_v33 = vadd.f32 %v15139_v39, %v9256_v17 }
 0xde1   : > { %9442 = vst.msk [vmem:[%s15144_s12 + $0x38] sm:$0xff] %vm445_vm0, %v9410_v29 }
 0xde2   : > { %9440 = vst.msk [vmem:[%s15144_s12 + $0x28] sm:$0xff] %vm445_vm0, %v9408_v33 }
 0xde4   : > { %v11031_v10 = vpop.f32.mrb[136].mxu0 }
 0xde5   : > { %v9413_v58 = vadd.f32 %v11031_v10, %v15139_v39  ;;  %v9269_v54 = vpop.f32.mrb[137].mxu0 }
 0xde6   : > { %v9411_v8 = vadd.f32 %v15139_v39, %v9269_v54  ;;  %v11032_v53 = vpop.f32.mrb[138].mxu0 }
 0xde7   : > { %9445 = vst.msk [vmem:[%s15144_s12 + $0x50] sm:$0xff] %vm445_vm0, %v9413_v58  ;;  %v9414_v43 = vadd.f32 %v11032_v53, %v15139_v39  ;;  %v9272_v46 = vpop.f32.mrb[139].mxu0 }
 0xde8   : > { %9443 = vst.msk [vmem:[%s15144_s12 + $0x40] sm:$0xff] %vm445_vm0, %v9411_v8  ;;  %v9412_v36 = vadd.f32 %v15139_v39, %v9272_v46 }
 0xde9   : > { %9446 = vst.msk [vmem:[%s15144_s12 + $0x58] sm:$0xff] %vm445_vm0, %v9414_v43 }
 0xdea   : > { %9444 = vst.msk [vmem:[%s15144_s12 + $0x48] sm:$0xff] %vm445_vm0, %v9412_v36 }
 0xdec   : > { %v11035_v41 = vpop.f32.mrb[140].mxu0 }
 0xded   : > { %v9417_v35 = vadd.f32 %v11035_v41, %v15139_v39  ;;  %v9285_v51 = vpop.f32.mrb[141].mxu0 }
 0xdee   : > { %v9415_v48 = vadd.f32 %v15139_v39, %v9285_v51  ;;  %v11036_v61 = vpop.f32.mrb[142].mxu0 }
 0xdef   : > { %9449 = vst.msk [vmem:[%s15144_s12 + $0x70] sm:$0xff] %vm445_vm0, %v9417_v35  ;;  %v9418_v30 = vadd.f32 %v11036_v61, %v15139_v39  ;;  %v9288_v11 = vpop.f32.mrb[143].mxu0 }
 0xdf0   : > { %9447 = vst.msk [vmem:[%s15144_s12 + $0x60] sm:$0xff] %vm445_vm0, %v9415_v48  ;;  %v9416_v37 = vadd.f32 %v15139_v39, %v9288_v11 }
 0xdf1   : > { %9450 = vst.msk [vmem:[%s15144_s12 + $0x78] sm:$0xff] %vm445_vm0, %v9418_v30 }
 0xdf2   : > { %9448 = vst.msk [vmem:[%s15144_s12 + $0x68] sm:$0xff] %vm445_vm0, %v9416_v37 }
 0xe60   : > { %v11039_v3 = vpop.f32.mrb[144].mxu0 }
 0xe61   : > { %v9421_v34 = vadd.f32 %v11039_v3, %v15139_v39  ;;  %v9301_v25 = vpop.f32.mrb[145].mxu0 }
 0xe62   : > { %v9419_v57 = vadd.f32 %v15139_v39, %v9301_v25  ;;  %v11040_v59 = vpop.f32.mrb[146].mxu0 }
 0xe63   : > { %9453 = vst.msk [vmem:[%s15144_s12 + $0x90] sm:$0xff] %vm445_vm0, %v9421_v34  ;;  %v9422_v6 = vadd.f32 %v11040_v59, %v15139_v39  ;;  %v9304_v38 = vpop.f32.mrb[147].mxu0 }
 0xe64   : > { %9451 = vst.msk [vmem:[%s15144_s12 + $0x80] sm:$0xff] %vm445_vm0, %v9419_v57  ;;  %v9420_v63 = vadd.f32 %v15139_v39, %v9304_v38 }
 0xe65   : > { %9454 = vst.msk [vmem:[%s15144_s12 + $0x98] sm:$0xff] %vm445_vm0, %v9422_v6 }
 0xe66   : > { %9452 = vst.msk [vmem:[%s15144_s12 + $0x88] sm:$0xff] %vm445_vm0, %v9420_v63 }
 0xe93   : > { %v11043_v40 = vpop.f32.mrb[148].mxu0 }
 0xe94   : > { %v9425_v7 = vadd.f32 %v11043_v40, %v15139_v39  ;;  %v9317_v22 = vpop.f32.mrb[149].mxu0 }
 0xe95   : > { %v9423_v0 = vadd.f32 %v15139_v39, %v9317_v22  ;;  %v11044_v56 = vpop.f32.mrb[150].mxu0 }
 0xe96   : > { %9457 = vst.msk [vmem:[%s15144_s12 + $0xb0] sm:$0xff] %vm445_vm0, %v9425_v7  ;;  %v9426_v52 = vadd.f32 %v11044_v56, %v15139_v39  ;;  %v9320_v62 = vpop.f32.mrb[151].mxu0 }
 0xe97   : > { %9455 = vst.msk [vmem:[%s15144_s12 + $0xa0] sm:$0xff] %vm445_vm0, %v9423_v0  ;;  %v9424_v9 = vadd.f32 %v15139_v39, %v9320_v62 }
 0xe98   : > { %9458 = vst.msk [vmem:[%s15144_s12 + $0xb8] sm:$0xff] %vm445_vm0, %v9426_v52 }
 0xe99   : > { %9456 = vst.msk [vmem:[%s15144_s12 + $0xa8] sm:$0xff] %vm445_vm0, %v9424_v9 }
 0xe9d   : > { %v11047_v2 = vpop.f32.mrb[152].mxu0 }
 0xe9e   : > { %v9429_v23 = vadd.f32 %v11047_v2, %v15139_v39  ;;  %v9333_v47 = vpop.f32.mrb[153].mxu0 }
 0xe9f   : > { %v9427_v42 = vadd.f32 %v15139_v39, %v9333_v47  ;;  %v11048_v32 = vpop.f32.mrb[154].mxu0 }
 0xea0   : > { %9461 = vst.msk [vmem:[%s15144_s12 + $0xd0] sm:$0xff] %vm445_vm0, %v9429_v23  ;;  %v9430_v1 = vadd.f32 %v11048_v32, %v15139_v39  ;;  %v9336_v60 = vpop.f32.mrb[155].mxu0 }
 0xea1   : > { %9459 = vst.msk [vmem:[%s15144_s12 + $0xc0] sm:$0xff] %vm445_vm0, %v9427_v42  ;;  %v9428_v18 = vadd.f32 %v15139_v39, %v9336_v60 }
 0xea2   : > { %9462 = vst.msk [vmem:[%s15144_s12 + $0xd8] sm:$0xff] %vm445_vm0, %v9430_v1 }
 0xea3   : > { %9460 = vst.msk [vmem:[%s15144_s12 + $0xc8] sm:$0xff] %vm445_vm0, %v9428_v18 }
 0xea5   : > { %v11051_v5 = vpop.f32.mrb[156].mxu0 }
 0xea6   : > { %v9433_v44 = vadd.f32 %v11051_v5, %v15139_v39  ;;  %v9349_v27 = vpop.f32.mrb[157].mxu0 }
 0xea7   : > { %v9431_v49 = vadd.f32 %v15139_v39, %v9349_v27  ;;  %v11052_v21 = vpop.f32.mrb[158].mxu0 }
 0xea8   : > { %9465 = vst.msk [vmem:[%s15144_s12 + $0xf0] sm:$0xff] %vm445_vm0, %v9433_v44  ;;  %v9434_v13 = vadd.f32 %v11052_v21, %v15139_v39  ;;  %v9352_v15 = vpop.f32.mrb[159].mxu0 }
 0xea9   : > { %9463 = vst.msk [vmem:[%s15144_s12 + $0xe0] sm:$0xff] %vm445_vm0, %v9431_v49  ;;  %v9432_v45 = vadd.f32 %v15139_v39, %v9352_v15 }
 0xeaa   : > { %9466 = vst.msk [vmem:[%s15144_s12 + $0xf8] sm:$0xff] %vm445_vm0, %v9434_v13 }
 0xeab   : > { %9464 = vst.msk [vmem:[%s15144_s12 + $0xe8] sm:$0xff] %vm445_vm0, %v9432_v45 }
 0xeac PF: > { %s18_s26 = sadd.s32 1, %s11714_s26  }
 0xead   : > { %p15_p4 = scmp.ge.s32.totalorder %s18_s26, 4  }
 0xeaf   :  { %17 = sbr.rel (!%p15_p4) target bundleno = 1 (0x1), region = 88 }

</bundles_post_ra>
